<compile_context>
chip_gen: v5e
topology: v5e:2x2
jax: 0.10.0
libtpu: 0.0.40
codegen_flags: <defaults>
</compile_context>

<pallas_src>
import functools

import jax
import jax.numpy as jnp
import numpy as np
from jax.experimental import pallas as pl
from jax.experimental.pallas import tpu as pltpu


def _round_up(v, m):
    return ((v + m - 1) // m) * m


# --------------------------------------------------------------------------- #
# Fused Pallas kernel:
#   conv1 -> ReLU -> pool1   (even/odd im2col, 2 matmuls, in-register max)
#   conv2 -> ReLU            (single im2col matmul)
#   pool2 + flatten          (merged strided gathers into the feature slab)
#   fc1 -> ReLU -> fc2 -> ReLU -> fc3
# --------------------------------------------------------------------------- #
def _lenet_fused_kernel(x_ref, w1_ref, b1_ref, w2_ref, b2_ref,
                        wf1_ref, bf1_ref, wf2_ref, bf2_ref, wf3_ref, bf3_ref,
                        out_ref,
                        cols1e, cols1o, p1s, cols2, y2s, flat):
    bn = out_ref.shape[0]                    # samples in this batch block
    _, cin = x_ref.shape                     # (bn*l0, Cin)
    c1 = w1_ref.shape[1]                     # 6
    c2 = w2_ref.shape[1]                     # 16
    k1 = w1_ref.shape[0] // cin              # 5
    k2 = w2_ref.shape[0] // c1               # 5
    mh = cols1e.shape[0]                     # bn*l1 - 8 pooled-1 rows computed
    n1 = p1s.shape[0]                        # bn*l1
    l1 = n1 // bn                            # padded per-sample pooled-1 steps
    r2 = cols2.shape[0]                      # bn*l1 - 8 conv2 rows kept
    p2v = flat.shape[1] // c2                # valid pooled-2 steps (= 25)

    # ---- conv1 + ReLU + pool1 fused -----------------------------------------
    # Pooled row m = max(conv1[2m], conv1[2m+1]); build the two tap matrices
    # with stride-2 reads of the input, run two MXU matmuls, max in-register.
    for k in range(k1):
        cols1e[:, k * cin:(k + 1) * cin] = x_ref[pl.ds(k, mh, stride=2), :]
        cols1o[:, k * cin:(k + 1) * cin] = x_ref[pl.ds(k + 1, mh, stride=2), :]
    ye = jnp.dot(cols1e[...], w1_ref[...], preferred_element_type=jnp.float32)
    yo = jnp.dot(cols1o[...], w1_ref[...], preferred_element_type=jnp.float32)
    p1s[mh:n1, :] = jnp.zeros((n1 - mh, c1), jnp.float32)   # keep tail finite
    p1s[0:mh, :] = jnp.maximum(jnp.maximum(ye, yo) + b1_ref[...], 0.0)

    # ---- conv2 + ReLU: im2col, single MXU matmul -----------------------------
    for k in range(k2):
        cols2[:, k * c1:(k + 1) * c1] = p1s[k:k + r2, :]
    y2 = jnp.dot(cols2[...], w2_ref[...], preferred_element_type=jnp.float32)
    y2s[r2:n1, :] = jnp.zeros((n1 - r2, c2), jnp.float32)   # keep tail finite
    y2s[0:r2, :] = jnp.maximum(y2 + b2_ref[...], 0.0)

    # ---- pool2 merged with flatten -------------------------------------------
    # flat[:, q*C2:(q+1)*C2] = max over the pool window, gathered per sample
    # via stride-l1 row reads (rows b*l1 + 2q and b*l1 + 2q + 1).
    for q in range(p2v):
        flat[:, q * c2:(q + 1) * c2] = jnp.maximum(
            y2s[pl.ds(2 * q, bn, stride=l1), :],
            y2s[pl.ds(2 * q + 1, bn, stride=l1), :])

    # ---- MLP (all widths padded to 128 lanes -> lane-dense stores) -----------
    h = jnp.dot(flat[...], wf1_ref[...], preferred_element_type=jnp.float32)
    h = jnp.maximum(h + bf1_ref[...], 0.0)
    h = jnp.dot(h, wf2_ref[...], preferred_element_type=jnp.float32)
    h = jnp.maximum(h + bf2_ref[...], 0.0)
    out_ref[...] = (jnp.dot(h, wf3_ref[...], preferred_element_type=jnp.float32)
                    + bf3_ref[...])


# --------------------------------------------------------------------------- #
# VMEM footprint estimate (f32, (8,128)-padded tiles), used to clamp bn.
# Includes double-buffered I/O + weights and the large matmul-result temps.
# --------------------------------------------------------------------------- #
def _vmem_bytes(bn, l0, l1, cin, c1, c2, feat_dim, d1p, d2p, ncp, k1, k2):
    def tile(r, c):
        return _round_up(max(r, 1), 8) * _round_up(c, 128) * 4

    scratch = (2 * tile(bn * l1 - 8, k1 * cin)      # cols1 even / odd
               + tile(bn * l1, c1)                  # p1s
               + tile(bn * l1 - 8, k2 * c1)         # cols2
               + tile(bn * l1, c2)                  # y2s
               + tile(bn, feat_dim))                # flat features
    temps = (2 * tile(bn * l1, c1)                  # ye / yo matmul results
             + tile(bn * l1, c2)                    # y2 matmul result
             + tile(bn, d1p) + tile(bn, d2p))       # MLP intermediates
    io = 2 * tile(bn * l0, cin) + 2 * tile(bn, ncp)
    weights = 2 * (tile(k1 * cin, c1) + tile(1, c1) + tile(k2 * c1, c2)
                   + tile(1, c2) + tile(feat_dim, d1p) + tile(1, d1p)
                   + tile(d1p, d2p) + tile(1, d2p) + tile(d2p, ncp)
                   + tile(1, ncp))
    return scratch + temps + io + weights


# --------------------------------------------------------------------------- #
# Wrapper: layout / padding / weight re-packing + pallas_call
# --------------------------------------------------------------------------- #
@functools.partial(jax.jit, static_argnames=("num_classes", "block_n"))
def lenet_forward(x, params, num_classes, *, block_n=64):
    """x: (N, C, L) float32 -- the 3-D time-series input of the PyTorch model."""
    # TODO(synk): the channel == 1 branch of the PyTorch module uses padding=2;
    # only the channel != 1 (padding=0) path is implemented here.
    n, c_in, length = x.shape
    c1 = params["conv1_w"].shape[0]                 # 6
    c2 = params["conv2_w"].shape[0]                 # 16
    k1 = params["conv1_w"].shape[2]                 # 5
    k2 = params["conv2_w"].shape[2]                 # 5

    t1 = length - k1 + 1                            # conv1 valid length (108)
    p1 = (t1 - 2) // 2 + 1                          # pool1 length (54)
    t2 = p1 - k2 + 1                                # conv2 valid length (50)
    p2 = (t2 - 2) // 2 + 1                          # pool2 length (25)
    feat_dim = c2 * p2                              # 400
    assert params["fc1_w"].shape[1] == feat_dim, "seq length incompatible with fc_1"

    # Padded per-sample lengths.  l0 = 2*l1, l1 multiple of 8, and l1-8 >= p1
    # so every valid pooled row lies in the 8-aligned computed region while
    # garbage boundary rows only feed garbage rows downstream.
    l1 = _round_up(p1 + 8, 8)                       # 64 for length=112
    l0 = 2 * l1                                     # 128
    assert l0 >= length and l1 % 8 == 0
    assert l1 - 8 >= p1 and l1 - 8 >= t2 and l1 // 2 >= p2

    d1 = params["fc1_w"].shape[0]                   # 120
    d2 = params["fc2_w"].shape[0]                   # 84
    d1p = _round_up(d1, 128)                        # 128
    d2p = _round_up(d2, 128)                        # 128
    ncp = _round_up(num_classes, 128)               # 128

    # ---- batch block: as large as the VMEM budget allows; prefer >= 2 grid
    #      steps so both v7x TensorCores get work on the "parallel" axis.
    vmem_budget = 40 * 1024 * 1024                  # safe on v5e/v6e/v7x
    bn = min(_round_up(block_n, 8), _round_up(n, 8))
    while bn > 8 and _vmem_bytes(bn, l0, l1, c_in, c1, c2, feat_dim,
                                 d1p, d2p, ncp, k1, k2) > vmem_budget:
        bn -= 8
    if bn > 8 and _round_up(n, bn) // bn < 2:
        bn = max(8, _round_up(pl.cdiv(n, 2), 8))
    n_pad = _round_up(n, bn)
    vmem_limit = int(min(56 * 1024 * 1024,
                         max(32 * 1024 * 1024,
                             _vmem_bytes(bn, l0, l1, c_in, c1, c2, feat_dim,
                                         d1p, d2p, ncp, k1, k2) + (8 << 20))))

    # ---- input: (N, C, L) -> zero-padded flat (Npad*l0, Cin) ----------------
    x_tc = jnp.transpose(x, (0, 2, 1)).astype(jnp.float32)        # (N, L, Cin)
    x_tc = jnp.pad(x_tc, ((0, n_pad - n), (0, l0 - length), (0, 0)))
    x_flat = x_tc.reshape(n_pad * l0, c_in)

    # ---- conv weights as im2col matrices: row index = k*Cin + cin -----------
    w1f = jnp.transpose(params["conv1_w"][:, :, :, 0], (2, 1, 0)).reshape(k1 * c_in, c1)
    b1 = params["conv1_b"].reshape(1, c1)
    w2f = jnp.transpose(params["conv2_w"][:, :, :, 0], (2, 1, 0)).reshape(k2 * c1, c2)
    b2 = params["conv2_b"].reshape(1, c2)

    # ---- MLP weights: absorb the channel-major flatten + pad widths to 128 --
    # kernel flatten is time-major (q*C2 + c); PyTorch flatten is channel-major
    # (c*P2 + q) -> permute fc1_w's input dimension accordingly.
    wf1 = params["fc1_w"].reshape(d1, c2, p2)                     # [o, c, q]
    wf1 = jnp.transpose(wf1, (2, 1, 0)).reshape(feat_dim, d1)     # [(q,c), o]
    wf1 = jnp.pad(wf1, ((0, 0), (0, d1p - d1)))
    bf1 = jnp.pad(params["fc1_b"], (0, d1p - d1)).reshape(1, d1p)
    wf2 = jnp.pad(params["fc2_w"].T, ((0, d1p - d1), (0, d2p - d2)))
    bf2 = jnp.pad(params["fc2_b"], (0, d2p - d2)).reshape(1, d2p)
    wf3 = jnp.pad(params["fc3_w"].T, ((0, d2p - d2), (0, ncp - num_classes)))
    bf3 = jnp.pad(params["fc3_b"], (0, ncp - num_classes)).reshape(1, ncp)

    grid = (n_pad // bn,)
    const = lambda i: (0, 0)

    out = pl.pallas_call(
        _lenet_fused_kernel,
        out_shape=jax.ShapeDtypeStruct((n_pad, ncp), jnp.float32),
        grid_spec=pltpu.PrefetchScalarGridSpec(
            num_scalar_prefetch=0,
            grid=grid,
            in_specs=[
                pl.BlockSpec((bn * l0, c_in), lambda i: (i, 0)),   # x (flat)
                pl.BlockSpec((k1 * c_in, c1), const),              # w1 (im2col)
                pl.BlockSpec((1, c1), const),                      # b1
                pl.BlockSpec((k2 * c1, c2), const),                # w2 (im2col)
                pl.BlockSpec((1, c2), const),                      # b2
                pl.BlockSpec((feat_dim, d1p), const),              # fc1 w
                pl.BlockSpec((1, d1p), const),                     # fc1 b
                pl.BlockSpec((d1p, d2p), const),                   # fc2 w
                pl.BlockSpec((1, d2p), const),                     # fc2 b
                pl.BlockSpec((d2p, ncp), const),                   # fc3 w
                pl.BlockSpec((1, ncp), const),                     # fc3 b
            ],
            out_specs=pl.BlockSpec((bn, ncp), lambda i: (i, 0)),
            scratch_shapes=[
                pltpu.VMEM((bn * l1 - 8, k1 * c_in), jnp.float32),  # cols1 even
                pltpu.VMEM((bn * l1 - 8, k1 * c_in), jnp.float32),  # cols1 odd
                pltpu.VMEM((bn * l1, c1), jnp.float32),             # p1s (pooled1)
                pltpu.VMEM((bn * l1 - 8, k2 * c1), jnp.float32),    # cols2
                pltpu.VMEM((bn * l1, c2), jnp.float32),             # y2s (conv2)
                pltpu.VMEM((bn, feat_dim), jnp.float32),            # flat feats
            ],
        ),
        compiler_params=pltpu.CompilerParams(
            dimension_semantics=("parallel",),
            vmem_limit_bytes=vmem_limit),
    )(x_flat, w1f, b1, w2f, b2, wf1, bf1, wf2, bf2, wf3, bf3)

    return out[:n, :num_classes]


# --------------------------------------------------------------------------- #
# Deterministic synthetic parameters (PyTorch-shaped) + pure-JAX reference
# --------------------------------------------------------------------------- #
def init_params(key, channel, num_classes):
    ks = jax.random.split(key, 10)
    w = lambda k, shape, s: s * jax.random.normal(k, shape, jnp.float32)
    return {
        "conv1_w": w(ks[0], (6, channel, 5, 1), 0.2),
        "conv1_b": w(ks[1], (6,), 0.1),
        "conv2_w": w(ks[2], (16, 6, 5, 1), 0.2),
        "conv2_b": w(ks[3], (16,), 0.1),
        "fc1_w": w(ks[4], (120, 16 * 5 * 5), 0.05),
        "fc1_b": w(ks[5], (120,), 0.05),
        "fc2_w": w(ks[6], (84, 120), 0.1),
        "fc2_b": w(ks[7], (84,), 0.05),
        "fc3_w": w(ks[8], (num_classes, 84), 0.1),
        "fc3_b": w(ks[9], (num_classes,), 0.05),
    }


def reference_forward(x, params):
    """Pure-JAX (XLA) reference matching the PyTorch forward exactly."""
    hp = jax.lax.Precision.HIGHEST
    x4 = x[..., None]                                           # (N, C, L, 1)
    dn = ("NCHW", "OIHW", "NCHW")
    y = jax.lax.conv_general_dilated(x4, params["conv1_w"], (1, 1), "VALID",
                                     dimension_numbers=dn, precision=hp)
    y = jax.nn.relu(y + params["conv1_b"][None, :, None, None])
    y = jax.lax.reduce_window(y, -jnp.inf, jax.lax.max,
                              (1, 1, 2, 1), (1, 1, 2, 2), "VALID")
    y = jax.lax.conv_general_dilated(y, params["conv2_w"], (1, 1), "VALID",
                                     dimension_numbers=dn, precision=hp)
    y = jax.nn.relu(y + params["conv2_b"][None, :, None, None])
    y = jax.lax.reduce_window(y, -jnp.inf, jax.lax.max,
                              (1, 1, 2, 1), (1, 1, 2, 2), "VALID")
    y = y.reshape(y.shape[0], -1)
    y = jax.nn.relu(jnp.dot(y, params["fc1_w"].T, precision=hp) + params["fc1_b"])
    y = jax.nn.relu(jnp.dot(y, params["fc2_w"].T, precision=hp) + params["fc2_b"])
    return jnp.dot(y, params["fc3_w"].T, precision=hp) + params["fc3_b"]


# --------------------------------------------------------------------------- #
if __name__ == "__main__":
    key = jax.random.PRNGKey(0)
    k_x, k_p = jax.random.split(key)

    # L = 112 is a sequence length for which the feature stack flattens to
    # exactly 16*5*5 = 400 features, as fc_1 of the PyTorch module requires.
    channel, seq_len, num_classes = 4, 112, 10
    params = init_params(k_p, channel, num_classes)

    # Two small configs: batch=2 (single small block) and batch=24 (multi-step
    # "parallel" grid with a multi-sample block, exercising the strided
    # gathers across sample boundaries).
    for batch in (2, 24):
        x = jax.random.normal(jax.random.fold_in(k_x, batch),
                              (batch, channel, seq_len), jnp.float32)
        out = jax.block_until_ready(lenet_forward(x, params, num_classes))
        ref = jax.block_until_ready(reference_forward(x, params))
        assert out.shape == (batch, num_classes)
        if not np.allclose(np.asarray(out), np.asarray(ref), rtol=2e-3, atol=2e-3):
            diff = np.max(np.abs(np.asarray(out) - np.asarray(ref)))
            raise AssertionError(f"batch={batch}: Pallas mismatch, max abs diff = {diff}")
    print("KERNEL_OK")
</pallas_src>

<mosaic_0001>
module attributes {stable_mosaic.version = 11 : i64} {
  func.func @_lenet_fused_kernel(%arg0: i32, %arg1: memref<1024x4xf32, #tpu.memory_space<vmem>>, %arg2: memref<20x6xf32, #tpu.memory_space<vmem>>, %arg3: memref<1x6xf32, #tpu.memory_space<vmem>>, %arg4: memref<30x16xf32, #tpu.memory_space<vmem>>, %arg5: memref<1x16xf32, #tpu.memory_space<vmem>>, %arg6: memref<400x128xf32, #tpu.memory_space<vmem>>, %arg7: memref<1x128xf32, #tpu.memory_space<vmem>>, %arg8: memref<128x128xf32, #tpu.memory_space<vmem>>, %arg9: memref<1x128xf32, #tpu.memory_space<vmem>>, %arg10: memref<128x128xf32, #tpu.memory_space<vmem>>, %arg11: memref<1x128xf32, #tpu.memory_space<vmem>>, %arg12: memref<8x128xf32, #tpu.memory_space<vmem>>, %arg13: memref<504x20xf32, #tpu.memory_space<vmem>>, %arg14: memref<504x20xf32, #tpu.memory_space<vmem>>, %arg15: memref<512x6xf32, #tpu.memory_space<vmem>>, %arg16: memref<504x30xf32, #tpu.memory_space<vmem>>, %arg17: memref<512x16xf32, #tpu.memory_space<vmem>>, %arg18: memref<8x400xf32, #tpu.memory_space<vmem>>) attributes {dimension_semantics = [#tpu.dimension_semantics<parallel>], iteration_bounds = array<i64: 1>, scalar_prefetch = 0 : i64, scratch_operands = 6 : i64, tpu.core_type = #tpu.core_type<tc>, window_params = [{transform_indices = @transform_0, window_bounds = array<i64: 1024, 4>}, {pipeline_mode = #tpu.pipeline_mode<synchronous>, transform_indices = @transform_1, window_bounds = array<i64: 20, 6>}, {pipeline_mode = #tpu.pipeline_mode<synchronous>, transform_indices = @transform_2, window_bounds = array<i64: 1, 6>}, {pipeline_mode = #tpu.pipeline_mode<synchronous>, transform_indices = @transform_3, window_bounds = array<i64: 30, 16>}, {pipeline_mode = #tpu.pipeline_mode<synchronous>, transform_indices = @transform_4, window_bounds = array<i64: 1, 16>}, {pipeline_mode = #tpu.pipeline_mode<synchronous>, transform_indices = @transform_5, window_bounds = array<i64: 400, 128>}, {pipeline_mode = #tpu.pipeline_mode<synchronous>, transform_indices = @transform_6, window_bounds = array<i64: 1, 128>}, {pipeline_mode = #tpu.pipeline_mode<synchronous>, transform_indices = @transform_7, window_bounds = array<i64: 128, 128>}, {pipeline_mode = #tpu.pipeline_mode<synchronous>, transform_indices = @transform_8, window_bounds = array<i64: 1, 128>}, {pipeline_mode = #tpu.pipeline_mode<synchronous>, transform_indices = @transform_9, window_bounds = array<i64: 128, 128>}, {pipeline_mode = #tpu.pipeline_mode<synchronous>, transform_indices = @transform_10, window_bounds = array<i64: 1, 128>}, {transform_indices = @transform_11, window_bounds = array<i64: 8, 128>}]} {
    %c0 = arith.constant 0 : index
    %c0_0 = arith.constant 0 : index
    %0 = tpu.strided_load %arg1[%c0, %c0_0] {strides = array<i32: 2, 1>} : memref<1024x4xf32, #tpu.memory_space<vmem>>, vector<504x4xf32>
    %c0_1 = arith.constant 0 : index
    %c0_2 = arith.constant 0 : index
    %1 = vector.load %arg13[%c0_1, %c0_2] : memref<504x20xf32, #tpu.memory_space<vmem>>, vector<504x4xf32>
    tpu.vector_store %arg13[%c0_1, %c0_2], %0 {strides = array<i32>} : memref<504x20xf32, #tpu.memory_space<vmem>>, vector<504x4xf32>,
    %c1 = arith.constant 1 : index
    %c0_3 = arith.constant 0 : index
    %2 = tpu.strided_load %arg1[%c1, %c0_3] {strides = array<i32: 2, 1>} : memref<1024x4xf32, #tpu.memory_space<vmem>>, vector<504x4xf32>
    %c0_4 = arith.constant 0 : index
    %c0_5 = arith.constant 0 : index
    %3 = vector.load %arg14[%c0_4, %c0_5] : memref<504x20xf32, #tpu.memory_space<vmem>>, vector<504x4xf32>
    tpu.vector_store %arg14[%c0_4, %c0_5], %2 {strides = array<i32>} : memref<504x20xf32, #tpu.memory_space<vmem>>, vector<504x4xf32>,
    %c1_6 = arith.constant 1 : index
    %c0_7 = arith.constant 0 : index
    %4 = tpu.strided_load %arg1[%c1_6, %c0_7] {strides = array<i32: 2, 1>} : memref<1024x4xf32, #tpu.memory_space<vmem>>, vector<504x4xf32>
    %c0_8 = arith.constant 0 : index
    %c4 = arith.constant 4 : index
    %5 = vector.load %arg13[%c0_8, %c4] : memref<504x20xf32, #tpu.memory_space<vmem>>, vector<504x4xf32>
    tpu.vector_store %arg13[%c0_8, %c4], %4 {strides = array<i32>} : memref<504x20xf32, #tpu.memory_space<vmem>>, vector<504x4xf32>,
    %c2 = arith.constant 2 : index
    %c0_9 = arith.constant 0 : index
    %6 = tpu.strided_load %arg1[%c2, %c0_9] {strides = array<i32: 2, 1>} : memref<1024x4xf32, #tpu.memory_space<vmem>>, vector<504x4xf32>
    %c0_10 = arith.constant 0 : index
    %c4_11 = arith.constant 4 : index
    %7 = vector.load %arg14[%c0_10, %c4_11] : memref<504x20xf32, #tpu.memory_space<vmem>>, vector<504x4xf32>
    tpu.vector_store %arg14[%c0_10, %c4_11], %6 {strides = array<i32>} : memref<504x20xf32, #tpu.memory_space<vmem>>, vector<504x4xf32>,
    %c2_12 = arith.constant 2 : index
    %c0_13 = arith.constant 0 : index
    %8 = tpu.strided_load %arg1[%c2_12, %c0_13] {strides = array<i32: 2, 1>} : memref<1024x4xf32, #tpu.memory_space<vmem>>, vector<504x4xf32>
    %c0_14 = arith.constant 0 : index
    %c8 = arith.constant 8 : index
    %9 = vector.load %arg13[%c0_14, %c8] : memref<504x20xf32, #tpu.memory_space<vmem>>, vector<504x4xf32>
    tpu.vector_store %arg13[%c0_14, %c8], %8 {strides = array<i32>} : memref<504x20xf32, #tpu.memory_space<vmem>>, vector<504x4xf32>,
    %c3 = arith.constant 3 : index
    %c0_15 = arith.constant 0 : index
    %10 = tpu.strided_load %arg1[%c3, %c0_15] {strides = array<i32: 2, 1>} : memref<1024x4xf32, #tpu.memory_space<vmem>>, vector<504x4xf32>
    %c0_16 = arith.constant 0 : index
    %c8_17 = arith.constant 8 : index
    %11 = vector.load %arg14[%c0_16, %c8_17] : memref<504x20xf32, #tpu.memory_space<vmem>>, vector<504x4xf32>
    tpu.vector_store %arg14[%c0_16, %c8_17], %10 {strides = array<i32>} : memref<504x20xf32, #tpu.memory_space<vmem>>, vector<504x4xf32>,
    %c3_18 = arith.constant 3 : index
    %c0_19 = arith.constant 0 : index
    %12 = tpu.strided_load %arg1[%c3_18, %c0_19] {strides = array<i32: 2, 1>} : memref<1024x4xf32, #tpu.memory_space<vmem>>, vector<504x4xf32>
    %c0_20 = arith.constant 0 : index
    %c12 = arith.constant 12 : index
    %13 = vector.load %arg13[%c0_20, %c12] : memref<504x20xf32, #tpu.memory_space<vmem>>, vector<504x4xf32>
    tpu.vector_store %arg13[%c0_20, %c12], %12 {strides = array<i32>} : memref<504x20xf32, #tpu.memory_space<vmem>>, vector<504x4xf32>,
    %c4_21 = arith.constant 4 : index
    %c0_22 = arith.constant 0 : index
    %14 = tpu.strided_load %arg1[%c4_21, %c0_22] {strides = array<i32: 2, 1>} : memref<1024x4xf32, #tpu.memory_space<vmem>>, vector<504x4xf32>
    %c0_23 = arith.constant 0 : index
    %c12_24 = arith.constant 12 : index
    %15 = vector.load %arg14[%c0_23, %c12_24] : memref<504x20xf32, #tpu.memory_space<vmem>>, vector<504x4xf32>
    tpu.vector_store %arg14[%c0_23, %c12_24], %14 {strides = array<i32>} : memref<504x20xf32, #tpu.memory_space<vmem>>, vector<504x4xf32>,
    %c4_25 = arith.constant 4 : index
    %c0_26 = arith.constant 0 : index
    %16 = tpu.strided_load %arg1[%c4_25, %c0_26] {strides = array<i32: 2, 1>} : memref<1024x4xf32, #tpu.memory_space<vmem>>, vector<504x4xf32>
    %c0_27 = arith.constant 0 : index
    %c16 = arith.constant 16 : index
    %17 = vector.load %arg13[%c0_27, %c16] : memref<504x20xf32, #tpu.memory_space<vmem>>, vector<504x4xf32>
    tpu.vector_store %arg13[%c0_27, %c16], %16 {strides = array<i32>} : memref<504x20xf32, #tpu.memory_space<vmem>>, vector<504x4xf32>,
    %c5 = arith.constant 5 : index
    %c0_28 = arith.constant 0 : index
    %18 = tpu.strided_load %arg1[%c5, %c0_28] {strides = array<i32: 2, 1>} : memref<1024x4xf32, #tpu.memory_space<vmem>>, vector<504x4xf32>
    %c0_29 = arith.constant 0 : index
    %c16_30 = arith.constant 16 : index
    %19 = vector.load %arg14[%c0_29, %c16_30] : memref<504x20xf32, #tpu.memory_space<vmem>>, vector<504x4xf32>
    tpu.vector_store %arg14[%c0_29, %c16_30], %18 {strides = array<i32>} : memref<504x20xf32, #tpu.memory_space<vmem>>, vector<504x4xf32>,
    %c0_31 = arith.constant 0 : index
    %c0_32 = arith.constant 0 : index
    %20 = vector.load %arg13[%c0_31, %c0_32] : memref<504x20xf32, #tpu.memory_space<vmem>>, vector<504x20xf32>
    %c0_33 = arith.constant 0 : index
    %c0_34 = arith.constant 0 : index
    %21 = vector.load %arg2[%c0_33, %c0_34] : memref<20x6xf32, #tpu.memory_space<vmem>>, vector<20x6xf32>
    %cst = arith.constant dense<0.000000e+00> : vector<504x6xf32>
    %22 = tpu.matmul %20, %21, %cst {dimension_numbers = #tpu.dot_dimension_numbers<[1], [0], [0], [1], [0, 0, 1, 1], [], []>} : vector<504x20xf32>, vector<20x6xf32>, vector<504x6xf32> -> vector<504x6xf32>
    %c0_35 = arith.constant 0 : index
    %c0_36 = arith.constant 0 : index
    %23 = vector.load %arg14[%c0_35, %c0_36] : memref<504x20xf32, #tpu.memory_space<vmem>>, vector<504x20xf32>
    %c0_37 = arith.constant 0 : index
    %c0_38 = arith.constant 0 : index
    %24 = vector.load %arg2[%c0_37, %c0_38] : memref<20x6xf32, #tpu.memory_space<vmem>>, vector<20x6xf32>
    %cst_39 = arith.constant dense<0.000000e+00> : vector<504x6xf32>
    %25 = tpu.matmul %23, %24, %cst_39 {dimension_numbers = #tpu.dot_dimension_numbers<[1], [0], [0], [1], [0, 0, 1, 1], [], []>} : vector<504x20xf32>, vector<20x6xf32>, vector<504x6xf32> -> vector<504x6xf32>
    %cst_40 = arith.constant 0.000000e+00 : f32
    %26 = vector.broadcast %cst_40 : f32 to vector<8x6xf32>
    %c504 = arith.constant 504 : index
    %c0_41 = arith.constant 0 : index
    %27 = vector.load %arg15[%c504, %c0_41] : memref<512x6xf32, #tpu.memory_space<vmem>>, vector<8x6xf32>
    tpu.vector_store %arg15[%c504, %c0_41], %26 {strides = array<i32>} : memref<512x6xf32, #tpu.memory_space<vmem>>, vector<8x6xf32>,
    %28 = arith.maximumf %22, %25 : vector<504x6xf32>
    %c0_42 = arith.constant 0 : index
    %c0_43 = arith.constant 0 : index
    %29 = vector.load %arg3[%c0_42, %c0_43] : memref<1x6xf32, #tpu.memory_space<vmem>>, vector<1x6xf32>
    %30 = vector.broadcast %29 : vector<1x6xf32> to vector<504x6xf32>
    %31 = arith.addf %28, %30 : vector<504x6xf32>
    %cst_44 = arith.constant 0.000000e+00 : f32
    %32 = vector.broadcast %cst_44 : f32 to vector<504x6xf32>
    %33 = arith.maximumf %31, %32 : vector<504x6xf32>
    %c0_45 = arith.constant 0 : index
    %c0_46 = arith.constant 0 : index
    %34 = vector.load %arg15[%c0_45, %c0_46] : memref<512x6xf32, #tpu.memory_space<vmem>>, vector<504x6xf32>
    tpu.vector_store %arg15[%c0_45, %c0_46], %33 {strides = array<i32>} : memref<512x6xf32, #tpu.memory_space<vmem>>, vector<504x6xf32>,
    %c0_47 = arith.constant 0 : index
    %c0_48 = arith.constant 0 : index
    %35 = vector.load %arg15[%c0_47, %c0_48] : memref<512x6xf32, #tpu.memory_space<vmem>>, vector<504x6xf32>
    %c0_49 = arith.constant 0 : index
    %c0_50 = arith.constant 0 : index
    %36 = vector.load %arg16[%c0_49, %c0_50] : memref<504x30xf32, #tpu.memory_space<vmem>>, vector<504x6xf32>
    tpu.vector_store %arg16[%c0_49, %c0_50], %35 {strides = array<i32>} : memref<504x30xf32, #tpu.memory_space<vmem>>, vector<504x6xf32>,
    %c1_51 = arith.constant 1 : index
    %c0_52 = arith.constant 0 : index
    %37 = vector.load %arg15[%c1_51, %c0_52] : memref<512x6xf32, #tpu.memory_space<vmem>>, vector<504x6xf32>
    %c0_53 = arith.constant 0 : index
    %c6 = arith.constant 6 : index
    %38 = vector.load %arg16[%c0_53, %c6] : memref<504x30xf32, #tpu.memory_space<vmem>>, vector<504x6xf32>
    tpu.vector_store %arg16[%c0_53, %c6], %37 {strides = array<i32>} : memref<504x30xf32, #tpu.memory_space<vmem>>, vector<504x6xf32>,
    %c2_54 = arith.constant 2 : index
    %c0_55 = arith.constant 0 : index
    %39 = vector.load %arg15[%c2_54, %c0_55] : memref<512x6xf32, #tpu.memory_space<vmem>>, vector<504x6xf32>
    %c0_56 = arith.constant 0 : index
    %c12_57 = arith.constant 12 : index
    %40 = vector.load %arg16[%c0_56, %c12_57] : memref<504x30xf32, #tpu.memory_space<vmem>>, vector<504x6xf32>
    tpu.vector_store %arg16[%c0_56, %c12_57], %39 {strides = array<i32>} : memref<504x30xf32, #tpu.memory_space<vmem>>, vector<504x6xf32>,
    %c3_58 = arith.constant 3 : index
    %c0_59 = arith.constant 0 : index
    %41 = vector.load %arg15[%c3_58, %c0_59] : memref<512x6xf32, #tpu.memory_space<vmem>>, vector<504x6xf32>
    %c0_60 = arith.constant 0 : index
    %c18 = arith.constant 18 : index
    %42 = vector.load %arg16[%c0_60, %c18] : memref<504x30xf32, #tpu.memory_space<vmem>>, vector<504x6xf32>
    tpu.vector_store %arg16[%c0_60, %c18], %41 {strides = array<i32>} : memref<504x30xf32, #tpu.memory_space<vmem>>, vector<504x6xf32>,
    %c4_61 = arith.constant 4 : index
    %c0_62 = arith.constant 0 : index
    %43 = vector.load %arg15[%c4_61, %c0_62] : memref<512x6xf32, #tpu.memory_space<vmem>>, vector<504x6xf32>
    %c0_63 = arith.constant 0 : index
    %c24 = arith.constant 24 : index
    %44 = vector.load %arg16[%c0_63, %c24] : memref<504x30xf32, #tpu.memory_space<vmem>>, vector<504x6xf32>
    tpu.vector_store %arg16[%c0_63, %c24], %43 {strides = array<i32>} : memref<504x30xf32, #tpu.memory_space<vmem>>, vector<504x6xf32>,
    %c0_64 = arith.constant 0 : index
    %c0_65 = arith.constant 0 : index
    %45 = vector.load %arg16[%c0_64, %c0_65] : memref<504x30xf32, #tpu.memory_space<vmem>>, vector<504x30xf32>
    %c0_66 = arith.constant 0 : index
    %c0_67 = arith.constant 0 : index
    %46 = vector.load %arg4[%c0_66, %c0_67] : memref<30x16xf32, #tpu.memory_space<vmem>>, vector<30x16xf32>
    %cst_68 = arith.constant dense<0.000000e+00> : vector<504x16xf32>
    %47 = tpu.matmul %45, %46, %cst_68 {dimension_numbers = #tpu.dot_dimension_numbers<[1], [0], [0], [1], [0, 0, 1, 1], [], []>} : vector<504x30xf32>, vector<30x16xf32>, vector<504x16xf32> -> vector<504x16xf32>
    %cst_69 = arith.constant 0.000000e+00 : f32
    %48 = vector.broadcast %cst_69 : f32 to vector<8x16xf32>
    %c504_70 = arith.constant 504 : index
    %c0_71 = arith.constant 0 : index
    %49 = vector.load %arg17[%c504_70, %c0_71] : memref<512x16xf32, #tpu.memory_space<vmem>>, vector<8x16xf32>
    tpu.vector_store %arg17[%c504_70, %c0_71], %48 {strides = array<i32>} : memref<512x16xf32, #tpu.memory_space<vmem>>, vector<8x16xf32>,
    %c0_72 = arith.constant 0 : index
    %c0_73 = arith.constant 0 : index
    %50 = vector.load %arg5[%c0_72, %c0_73] : memref<1x16xf32, #tpu.memory_space<vmem>>, vector<1x16xf32>
    %51 = vector.broadcast %50 : vector<1x16xf32> to vector<504x16xf32>
    %52 = arith.addf %47, %51 : vector<504x16xf32>
    %cst_74 = arith.constant 0.000000e+00 : f32
    %53 = vector.broadcast %cst_74 : f32 to vector<504x16xf32>
    %54 = arith.maximumf %52, %53 : vector<504x16xf32>
    %c0_75 = arith.constant 0 : index
    %c0_76 = arith.constant 0 : index
    %55 = vector.load %arg17[%c0_75, %c0_76] : memref<512x16xf32, #tpu.memory_space<vmem>>, vector<504x16xf32>
    tpu.vector_store %arg17[%c0_75, %c0_76], %54 {strides = array<i32>} : memref<512x16xf32, #tpu.memory_space<vmem>>, vector<504x16xf32>,
    %c0_77 = arith.constant 0 : index
    %c0_78 = arith.constant 0 : index
    %56 = tpu.strided_load %arg17[%c0_77, %c0_78] {strides = array<i32: 64, 1>} : memref<512x16xf32, #tpu.memory_space<vmem>>, vector<8x16xf32>
    %c1_79 = arith.constant 1 : index
    %c0_80 = arith.constant 0 : index
    %57 = tpu.strided_load %arg17[%c1_79, %c0_80] {strides = array<i32: 64, 1>} : memref<512x16xf32, #tpu.memory_space<vmem>>, vector<8x16xf32>
    %58 = arith.maximumf %56, %57 : vector<8x16xf32>
    %c0_81 = arith.constant 0 : index
    %c0_82 = arith.constant 0 : index
    %59 = vector.load %arg18[%c0_81, %c0_82] : memref<8x400xf32, #tpu.memory_space<vmem>>, vector<8x16xf32>
    tpu.vector_store %arg18[%c0_81, %c0_82], %58 {strides = array<i32>} : memref<8x400xf32, #tpu.memory_space<vmem>>, vector<8x16xf32>,
    %c2_83 = arith.constant 2 : index
    %c0_84 = arith.constant 0 : index
    %60 = tpu.strided_load %arg17[%c2_83, %c0_84] {strides = array<i32: 64, 1>} : memref<512x16xf32, #tpu.memory_space<vmem>>, vector<8x16xf32>
    %c3_85 = arith.constant 3 : index
    %c0_86 = arith.constant 0 : index
    %61 = tpu.strided_load %arg17[%c3_85, %c0_86] {strides = array<i32: 64, 1>} : memref<512x16xf32, #tpu.memory_space<vmem>>, vector<8x16xf32>
    %62 = arith.maximumf %60, %61 : vector<8x16xf32>
    %c0_87 = arith.constant 0 : index
    %c16_88 = arith.constant 16 : index
    %63 = vector.load %arg18[%c0_87, %c16_88] : memref<8x400xf32, #tpu.memory_space<vmem>>, vector<8x16xf32>
    tpu.vector_store %arg18[%c0_87, %c16_88], %62 {strides = array<i32>} : memref<8x400xf32, #tpu.memory_space<vmem>>, vector<8x16xf32>,
    %c4_89 = arith.constant 4 : index
    %c0_90 = arith.constant 0 : index
    %64 = tpu.strided_load %arg17[%c4_89, %c0_90] {strides = array<i32: 64, 1>} : memref<512x16xf32, #tpu.memory_space<vmem>>, vector<8x16xf32>
    %c5_91 = arith.constant 5 : index
    %c0_92 = arith.constant 0 : index
    %65 = tpu.strided_load %arg17[%c5_91, %c0_92] {strides = array<i32: 64, 1>} : memref<512x16xf32, #tpu.memory_space<vmem>>, vector<8x16xf32>
    %66 = arith.maximumf %64, %65 : vector<8x16xf32>
    %c0_93 = arith.constant 0 : index
    %c32 = arith.constant 32 : index
    %67 = vector.load %arg18[%c0_93, %c32] : memref<8x400xf32, #tpu.memory_space<vmem>>, vector<8x16xf32>
    tpu.vector_store %arg18[%c0_93, %c32], %66 {strides = array<i32>} : memref<8x400xf32, #tpu.memory_space<vmem>>, vector<8x16xf32>,
    %c6_94 = arith.constant 6 : index
    %c0_95 = arith.constant 0 : index
    %68 = tpu.strided_load %arg17[%c6_94, %c0_95] {strides = array<i32: 64, 1>} : memref<512x16xf32, #tpu.memory_space<vmem>>, vector<8x16xf32>
    %c7 = arith.constant 7 : index
    %c0_96 = arith.constant 0 : index
    %69 = tpu.strided_load %arg17[%c7, %c0_96] {strides = array<i32: 64, 1>} : memref<512x16xf32, #tpu.memory_space<vmem>>, vector<8x16xf32>
    %70 = arith.maximumf %68, %69 : vector<8x16xf32>
    %c0_97 = arith.constant 0 : index
    %c48 = arith.constant 48 : index
    %71 = vector.load %arg18[%c0_97, %c48] : memref<8x400xf32, #tpu.memory_space<vmem>>, vector<8x16xf32>
    tpu.vector_store %arg18[%c0_97, %c48], %70 {strides = array<i32>} : memref<8x400xf32, #tpu.memory_space<vmem>>, vector<8x16xf32>,
    %c8_98 = arith.constant 8 : index
    %c0_99 = arith.constant 0 : index
    %72 = tpu.strided_load %arg17[%c8_98, %c0_99] {strides = array<i32: 64, 1>} : memref<512x16xf32, #tpu.memory_space<vmem>>, vector<8x16xf32>
    %c9 = arith.constant 9 : index
    %c0_100 = arith.constant 0 : index
    %73 = tpu.strided_load %arg17[%c9, %c0_100] {strides = array<i32: 64, 1>} : memref<512x16xf32, #tpu.memory_space<vmem>>, vector<8x16xf32>
    %74 = arith.maximumf %72, %73 : vector<8x16xf32>
    %c0_101 = arith.constant 0 : index
    %c64 = arith.constant 64 : index
    %75 = vector.load %arg18[%c0_101, %c64] : memref<8x400xf32, #tpu.memory_space<vmem>>, vector<8x16xf32>
    tpu.vector_store %arg18[%c0_101, %c64], %74 {strides = array<i32>} : memref<8x400xf32, #tpu.memory_space<vmem>>, vector<8x16xf32>,
    %c10 = arith.constant 10 : index
    %c0_102 = arith.constant 0 : index
    %76 = tpu.strided_load %arg17[%c10, %c0_102] {strides = array<i32: 64, 1>} : memref<512x16xf32, #tpu.memory_space<vmem>>, vector<8x16xf32>
    %c11 = arith.constant 11 : index
    %c0_103 = arith.constant 0 : index
    %77 = tpu.strided_load %arg17[%c11, %c0_103] {strides = array<i32: 64, 1>} : memref<512x16xf32, #tpu.memory_space<vmem>>, vector<8x16xf32>
    %78 = arith.maximumf %76, %77 : vector<8x16xf32>
    %c0_104 = arith.constant 0 : index
    %c80 = arith.constant 80 : index
    %79 = vector.load %arg18[%c0_104, %c80] : memref<8x400xf32, #tpu.memory_space<vmem>>, vector<8x16xf32>
    tpu.vector_store %arg18[%c0_104, %c80], %78 {strides = array<i32>} : memref<8x400xf32, #tpu.memory_space<vmem>>, vector<8x16xf32>,
    %c12_105 = arith.constant 12 : index
    %c0_106 = arith.constant 0 : index
    %80 = tpu.strided_load %arg17[%c12_105, %c0_106] {strides = array<i32: 64, 1>} : memref<512x16xf32, #tpu.memory_space<vmem>>, vector<8x16xf32>
    %c13 = arith.constant 13 : index
    %c0_107 = arith.constant 0 : index
    %81 = tpu.strided_load %arg17[%c13, %c0_107] {strides = array<i32: 64, 1>} : memref<512x16xf32, #tpu.memory_space<vmem>>, vector<8x16xf32>
    %82 = arith.maximumf %80, %81 : vector<8x16xf32>
    %c0_108 = arith.constant 0 : index
    %c96 = arith.constant 96 : index
    %83 = vector.load %arg18[%c0_108, %c96] : memref<8x400xf32, #tpu.memory_space<vmem>>, vector<8x16xf32>
    tpu.vector_store %arg18[%c0_108, %c96], %82 {strides = array<i32>} : memref<8x400xf32, #tpu.memory_space<vmem>>, vector<8x16xf32>,
    %c14 = arith.constant 14 : index
    %c0_109 = arith.constant 0 : index
    %84 = tpu.strided_load %arg17[%c14, %c0_109] {strides = array<i32: 64, 1>} : memref<512x16xf32, #tpu.memory_space<vmem>>, vector<8x16xf32>
    %c15 = arith.constant 15 : index
    %c0_110 = arith.constant 0 : index
    %85 = tpu.strided_load %arg17[%c15, %c0_110] {strides = array<i32: 64, 1>} : memref<512x16xf32, #tpu.memory_space<vmem>>, vector<8x16xf32>
    %86 = arith.maximumf %84, %85 : vector<8x16xf32>
    %c0_111 = arith.constant 0 : index
    %c112 = arith.constant 112 : index
    %87 = vector.load %arg18[%c0_111, %c112] : memref<8x400xf32, #tpu.memory_space<vmem>>, vector<8x16xf32>
    tpu.vector_store %arg18[%c0_111, %c112], %86 {strides = array<i32>} : memref<8x400xf32, #tpu.memory_space<vmem>>, vector<8x16xf32>,
    %c16_112 = arith.constant 16 : index
    %c0_113 = arith.constant 0 : index
    %88 = tpu.strided_load %arg17[%c16_112, %c0_113] {strides = array<i32: 64, 1>} : memref<512x16xf32, #tpu.memory_space<vmem>>, vector<8x16xf32>
    %c17 = arith.constant 17 : index
    %c0_114 = arith.constant 0 : index
    %89 = tpu.strided_load %arg17[%c17, %c0_114] {strides = array<i32: 64, 1>} : memref<512x16xf32, #tpu.memory_space<vmem>>, vector<8x16xf32>
    %90 = arith.maximumf %88, %89 : vector<8x16xf32>
    %c0_115 = arith.constant 0 : index
    %c128 = arith.constant 128 : index
    %91 = vector.load %arg18[%c0_115, %c128] : memref<8x400xf32, #tpu.memory_space<vmem>>, vector<8x16xf32>
    tpu.vector_store %arg18[%c0_115, %c128], %90 {strides = array<i32>} : memref<8x400xf32, #tpu.memory_space<vmem>>, vector<8x16xf32>,
    %c18_116 = arith.constant 18 : index
    %c0_117 = arith.constant 0 : index
    %92 = tpu.strided_load %arg17[%c18_116, %c0_117] {strides = array<i32: 64, 1>} : memref<512x16xf32, #tpu.memory_space<vmem>>, vector<8x16xf32>
    %c19 = arith.constant 19 : index
    %c0_118 = arith.constant 0 : index
    %93 = tpu.strided_load %arg17[%c19, %c0_118] {strides = array<i32: 64, 1>} : memref<512x16xf32, #tpu.memory_space<vmem>>, vector<8x16xf32>
    %94 = arith.maximumf %92, %93 : vector<8x16xf32>
    %c0_119 = arith.constant 0 : index
    %c144 = arith.constant 144 : index
    %95 = vector.load %arg18[%c0_119, %c144] : memref<8x400xf32, #tpu.memory_space<vmem>>, vector<8x16xf32>
    tpu.vector_store %arg18[%c0_119, %c144], %94 {strides = array<i32>} : memref<8x400xf32, #tpu.memory_space<vmem>>, vector<8x16xf32>,
    %c20 = arith.constant 20 : index
    %c0_120 = arith.constant 0 : index
    %96 = tpu.strided_load %arg17[%c20, %c0_120] {strides = array<i32: 64, 1>} : memref<512x16xf32, #tpu.memory_space<vmem>>, vector<8x16xf32>
    %c21 = arith.constant 21 : index
    %c0_121 = arith.constant 0 : index
    %97 = tpu.strided_load %arg17[%c21, %c0_121] {strides = array<i32: 64, 1>} : memref<512x16xf32, #tpu.memory_space<vmem>>, vector<8x16xf32>
    %98 = arith.maximumf %96, %97 : vector<8x16xf32>
    %c0_122 = arith.constant 0 : index
    %c160 = arith.constant 160 : index
    %99 = vector.load %arg18[%c0_122, %c160] : memref<8x400xf32, #tpu.memory_space<vmem>>, vector<8x16xf32>
    tpu.vector_store %arg18[%c0_122, %c160], %98 {strides = array<i32>} : memref<8x400xf32, #tpu.memory_space<vmem>>, vector<8x16xf32>,
    %c22 = arith.constant 22 : index
    %c0_123 = arith.constant 0 : index
    %100 = tpu.strided_load %arg17[%c22, %c0_123] {strides = array<i32: 64, 1>} : memref<512x16xf32, #tpu.memory_space<vmem>>, vector<8x16xf32>
    %c23 = arith.constant 23 : index
    %c0_124 = arith.constant 0 : index
    %101 = tpu.strided_load %arg17[%c23, %c0_124] {strides = array<i32: 64, 1>} : memref<512x16xf32, #tpu.memory_space<vmem>>, vector<8x16xf32>
    %102 = arith.maximumf %100, %101 : vector<8x16xf32>
    %c0_125 = arith.constant 0 : index
    %c176 = arith.constant 176 : index
    %103 = vector.load %arg18[%c0_125, %c176] : memref<8x400xf32, #tpu.memory_space<vmem>>, vector<8x16xf32>
    tpu.vector_store %arg18[%c0_125, %c176], %102 {strides = array<i32>} : memref<8x400xf32, #tpu.memory_space<vmem>>, vector<8x16xf32>,
    %c24_126 = arith.constant 24 : index
    %c0_127 = arith.constant 0 : index
    %104 = tpu.strided_load %arg17[%c24_126, %c0_127] {strides = array<i32: 64, 1>} : memref<512x16xf32, #tpu.memory_space<vmem>>, vector<8x16xf32>
    %c25 = arith.constant 25 : index
    %c0_128 = arith.constant 0 : index
    %105 = tpu.strided_load %arg17[%c25, %c0_128] {strides = array<i32: 64, 1>} : memref<512x16xf32, #tpu.memory_space<vmem>>, vector<8x16xf32>
    %106 = arith.maximumf %104, %105 : vector<8x16xf32>
    %c0_129 = arith.constant 0 : index
    %c192 = arith.constant 192 : index
    %107 = vector.load %arg18[%c0_129, %c192] : memref<8x400xf32, #tpu.memory_space<vmem>>, vector<8x16xf32>
    tpu.vector_store %arg18[%c0_129, %c192], %106 {strides = array<i32>} : memref<8x400xf32, #tpu.memory_space<vmem>>, vector<8x16xf32>,
    %c26 = arith.constant 26 : index
    %c0_130 = arith.constant 0 : index
    %108 = tpu.strided_load %arg17[%c26, %c0_130] {strides = array<i32: 64, 1>} : memref<512x16xf32, #tpu.memory_space<vmem>>, vector<8x16xf32>
    %c27 = arith.constant 27 : index
    %c0_131 = arith.constant 0 : index
    %109 = tpu.strided_load %arg17[%c27, %c0_131] {strides = array<i32: 64, 1>} : memref<512x16xf32, #tpu.memory_space<vmem>>, vector<8x16xf32>
    %110 = arith.maximumf %108, %109 : vector<8x16xf32>
    %c0_132 = arith.constant 0 : index
    %c208 = arith.constant 208 : index
    %111 = vector.load %arg18[%c0_132, %c208] : memref<8x400xf32, #tpu.memory_space<vmem>>, vector<8x16xf32>
    tpu.vector_store %arg18[%c0_132, %c208], %110 {strides = array<i32>} : memref<8x400xf32, #tpu.memory_space<vmem>>, vector<8x16xf32>,
    %c28 = arith.constant 28 : index
    %c0_133 = arith.constant 0 : index
    %112 = tpu.strided_load %arg17[%c28, %c0_133] {strides = array<i32: 64, 1>} : memref<512x16xf32, #tpu.memory_space<vmem>>, vector<8x16xf32>
    %c29 = arith.constant 29 : index
    %c0_134 = arith.constant 0 : index
    %113 = tpu.strided_load %arg17[%c29, %c0_134] {strides = array<i32: 64, 1>} : memref<512x16xf32, #tpu.memory_space<vmem>>, vector<8x16xf32>
    %114 = arith.maximumf %112, %113 : vector<8x16xf32>
    %c0_135 = arith.constant 0 : index
    %c224 = arith.constant 224 : index
    %115 = vector.load %arg18[%c0_135, %c224] : memref<8x400xf32, #tpu.memory_space<vmem>>, vector<8x16xf32>
    tpu.vector_store %arg18[%c0_135, %c224], %114 {strides = array<i32>} : memref<8x400xf32, #tpu.memory_space<vmem>>, vector<8x16xf32>,
    %c30 = arith.constant 30 : index
    %c0_136 = arith.constant 0 : index
    %116 = tpu.strided_load %arg17[%c30, %c0_136] {strides = array<i32: 64, 1>} : memref<512x16xf32, #tpu.memory_space<vmem>>, vector<8x16xf32>
    %c31 = arith.constant 31 : index
    %c0_137 = arith.constant 0 : index
    %117 = tpu.strided_load %arg17[%c31, %c0_137] {strides = array<i32: 64, 1>} : memref<512x16xf32, #tpu.memory_space<vmem>>, vector<8x16xf32>
    %118 = arith.maximumf %116, %117 : vector<8x16xf32>
    %c0_138 = arith.constant 0 : index
    %c240 = arith.constant 240 : index
    %119 = vector.load %arg18[%c0_138, %c240] : memref<8x400xf32, #tpu.memory_space<vmem>>, vector<8x16xf32>
    tpu.vector_store %arg18[%c0_138, %c240], %118 {strides = array<i32>} : memref<8x400xf32, #tpu.memory_space<vmem>>, vector<8x16xf32>,
    %c32_139 = arith.constant 32 : index
    %c0_140 = arith.constant 0 : index
    %120 = tpu.strided_load %arg17[%c32_139, %c0_140] {strides = array<i32: 64, 1>} : memref<512x16xf32, #tpu.memory_space<vmem>>, vector<8x16xf32>
    %c33 = arith.constant 33 : index
    %c0_141 = arith.constant 0 : index
    %121 = tpu.strided_load %arg17[%c33, %c0_141] {strides = array<i32: 64, 1>} : memref<512x16xf32, #tpu.memory_space<vmem>>, vector<8x16xf32>
    %122 = arith.maximumf %120, %121 : vector<8x16xf32>
    %c0_142 = arith.constant 0 : index
    %c256 = arith.constant 256 : index
    %123 = vector.load %arg18[%c0_142, %c256] : memref<8x400xf32, #tpu.memory_space<vmem>>, vector<8x16xf32>
    tpu.vector_store %arg18[%c0_142, %c256], %122 {strides = array<i32>} : memref<8x400xf32, #tpu.memory_space<vmem>>, vector<8x16xf32>,
    %c34 = arith.constant 34 : index
    %c0_143 = arith.constant 0 : index
    %124 = tpu.strided_load %arg17[%c34, %c0_143] {strides = array<i32: 64, 1>} : memref<512x16xf32, #tpu.memory_space<vmem>>, vector<8x16xf32>
    %c35 = arith.constant 35 : index
    %c0_144 = arith.constant 0 : index
    %125 = tpu.strided_load %arg17[%c35, %c0_144] {strides = array<i32: 64, 1>} : memref<512x16xf32, #tpu.memory_space<vmem>>, vector<8x16xf32>
    %126 = arith.maximumf %124, %125 : vector<8x16xf32>
    %c0_145 = arith.constant 0 : index
    %c272 = arith.constant 272 : index
    %127 = vector.load %arg18[%c0_145, %c272] : memref<8x400xf32, #tpu.memory_space<vmem>>, vector<8x16xf32>
    tpu.vector_store %arg18[%c0_145, %c272], %126 {strides = array<i32>} : memref<8x400xf32, #tpu.memory_space<vmem>>, vector<8x16xf32>,
    %c36 = arith.constant 36 : index
    %c0_146 = arith.constant 0 : index
    %128 = tpu.strided_load %arg17[%c36, %c0_146] {strides = array<i32: 64, 1>} : memref<512x16xf32, #tpu.memory_space<vmem>>, vector<8x16xf32>
    %c37 = arith.constant 37 : index
    %c0_147 = arith.constant 0 : index
    %129 = tpu.strided_load %arg17[%c37, %c0_147] {strides = array<i32: 64, 1>} : memref<512x16xf32, #tpu.memory_space<vmem>>, vector<8x16xf32>
    %130 = arith.maximumf %128, %129 : vector<8x16xf32>
    %c0_148 = arith.constant 0 : index
    %c288 = arith.constant 288 : index
    %131 = vector.load %arg18[%c0_148, %c288] : memref<8x400xf32, #tpu.memory_space<vmem>>, vector<8x16xf32>
    tpu.vector_store %arg18[%c0_148, %c288], %130 {strides = array<i32>} : memref<8x400xf32, #tpu.memory_space<vmem>>, vector<8x16xf32>,
    %c38 = arith.constant 38 : index
    %c0_149 = arith.constant 0 : index
    %132 = tpu.strided_load %arg17[%c38, %c0_149] {strides = array<i32: 64, 1>} : memref<512x16xf32, #tpu.memory_space<vmem>>, vector<8x16xf32>
    %c39 = arith.constant 39 : index
    %c0_150 = arith.constant 0 : index
    %133 = tpu.strided_load %arg17[%c39, %c0_150] {strides = array<i32: 64, 1>} : memref<512x16xf32, #tpu.memory_space<vmem>>, vector<8x16xf32>
    %134 = arith.maximumf %132, %133 : vector<8x16xf32>
    %c0_151 = arith.constant 0 : index
    %c304 = arith.constant 304 : index
    %135 = vector.load %arg18[%c0_151, %c304] : memref<8x400xf32, #tpu.memory_space<vmem>>, vector<8x16xf32>
    tpu.vector_store %arg18[%c0_151, %c304], %134 {strides = array<i32>} : memref<8x400xf32, #tpu.memory_space<vmem>>, vector<8x16xf32>,
    %c40 = arith.constant 40 : index
    %c0_152 = arith.constant 0 : index
    %136 = tpu.strided_load %arg17[%c40, %c0_152] {strides = array<i32: 64, 1>} : memref<512x16xf32, #tpu.memory_space<vmem>>, vector<8x16xf32>
    %c41 = arith.constant 41 : index
    %c0_153 = arith.constant 0 : index
    %137 = tpu.strided_load %arg17[%c41, %c0_153] {strides = array<i32: 64, 1>} : memref<512x16xf32, #tpu.memory_space<vmem>>, vector<8x16xf32>
    %138 = arith.maximumf %136, %137 : vector<8x16xf32>
    %c0_154 = arith.constant 0 : index
    %c320 = arith.constant 320 : index
    %139 = vector.load %arg18[%c0_154, %c320] : memref<8x400xf32, #tpu.memory_space<vmem>>, vector<8x16xf32>
    tpu.vector_store %arg18[%c0_154, %c320], %138 {strides = array<i32>} : memref<8x400xf32, #tpu.memory_space<vmem>>, vector<8x16xf32>,
    %c42 = arith.constant 42 : index
    %c0_155 = arith.constant 0 : index
    %140 = tpu.strided_load %arg17[%c42, %c0_155] {strides = array<i32: 64, 1>} : memref<512x16xf32, #tpu.memory_space<vmem>>, vector<8x16xf32>
    %c43 = arith.constant 43 : index
    %c0_156 = arith.constant 0 : index
    %141 = tpu.strided_load %arg17[%c43, %c0_156] {strides = array<i32: 64, 1>} : memref<512x16xf32, #tpu.memory_space<vmem>>, vector<8x16xf32>
    %142 = arith.maximumf %140, %141 : vector<8x16xf32>
    %c0_157 = arith.constant 0 : index
    %c336 = arith.constant 336 : index
    %143 = vector.load %arg18[%c0_157, %c336] : memref<8x400xf32, #tpu.memory_space<vmem>>, vector<8x16xf32>
    tpu.vector_store %arg18[%c0_157, %c336], %142 {strides = array<i32>} : memref<8x400xf32, #tpu.memory_space<vmem>>, vector<8x16xf32>,
    %c44 = arith.constant 44 : index
    %c0_158 = arith.constant 0 : index
    %144 = tpu.strided_load %arg17[%c44, %c0_158] {strides = array<i32: 64, 1>} : memref<512x16xf32, #tpu.memory_space<vmem>>, vector<8x16xf32>
    %c45 = arith.constant 45 : index
    %c0_159 = arith.constant 0 : index
    %145 = tpu.strided_load %arg17[%c45, %c0_159] {strides = array<i32: 64, 1>} : memref<512x16xf32, #tpu.memory_space<vmem>>, vector<8x16xf32>
    %146 = arith.maximumf %144, %145 : vector<8x16xf32>
    %c0_160 = arith.constant 0 : index
    %c352 = arith.constant 352 : index
    %147 = vector.load %arg18[%c0_160, %c352] : memref<8x400xf32, #tpu.memory_space<vmem>>, vector<8x16xf32>
    tpu.vector_store %arg18[%c0_160, %c352], %146 {strides = array<i32>} : memref<8x400xf32, #tpu.memory_space<vmem>>, vector<8x16xf32>,
    %c46 = arith.constant 46 : index
    %c0_161 = arith.constant 0 : index
    %148 = tpu.strided_load %arg17[%c46, %c0_161] {strides = array<i32: 64, 1>} : memref<512x16xf32, #tpu.memory_space<vmem>>, vector<8x16xf32>
    %c47 = arith.constant 47 : index
    %c0_162 = arith.constant 0 : index
    %149 = tpu.strided_load %arg17[%c47, %c0_162] {strides = array<i32: 64, 1>} : memref<512x16xf32, #tpu.memory_space<vmem>>, vector<8x16xf32>
    %150 = arith.maximumf %148, %149 : vector<8x16xf32>
    %c0_163 = arith.constant 0 : index
    %c368 = arith.constant 368 : index
    %151 = vector.load %arg18[%c0_163, %c368] : memref<8x400xf32, #tpu.memory_space<vmem>>, vector<8x16xf32>
    tpu.vector_store %arg18[%c0_163, %c368], %150 {strides = array<i32>} : memref<8x400xf32, #tpu.memory_space<vmem>>, vector<8x16xf32>,
    %c48_164 = arith.constant 48 : index
    %c0_165 = arith.constant 0 : index
    %152 = tpu.strided_load %arg17[%c48_164, %c0_165] {strides = array<i32: 64, 1>} : memref<512x16xf32, #tpu.memory_space<vmem>>, vector<8x16xf32>
    %c49 = arith.constant 49 : index
    %c0_166 = arith.constant 0 : index
    %153 = tpu.strided_load %arg17[%c49, %c0_166] {strides = array<i32: 64, 1>} : memref<512x16xf32, #tpu.memory_space<vmem>>, vector<8x16xf32>
    %154 = arith.maximumf %152, %153 : vector<8x16xf32>
    %c0_167 = arith.constant 0 : index
    %c384 = arith.constant 384 : index
    %155 = vector.load %arg18[%c0_167, %c384] : memref<8x400xf32, #tpu.memory_space<vmem>>, vector<8x16xf32>
    tpu.vector_store %arg18[%c0_167, %c384], %154 {strides = array<i32>} : memref<8x400xf32, #tpu.memory_space<vmem>>, vector<8x16xf32>,
    %c0_168 = arith.constant 0 : index
    %c0_169 = arith.constant 0 : index
    %156 = vector.load %arg18[%c0_168, %c0_169] : memref<8x400xf32, #tpu.memory_space<vmem>>, vector<8x400xf32>
    %c0_170 = arith.constant 0 : index
    %c0_171 = arith.constant 0 : index
    %157 = vector.load %arg6[%c0_170, %c0_171] : memref<400x128xf32, #tpu.memory_space<vmem>>, vector<400x128xf32>
    %cst_172 = arith.constant dense<0.000000e+00> : vector<8x128xf32>
    %158 = tpu.matmul %156, %157, %cst_172 {dimension_numbers = #tpu.dot_dimension_numbers<[1], [0], [0], [1], [0, 0, 1, 1], [], []>} : vector<8x400xf32>, vector<400x128xf32>, vector<8x128xf32> -> vector<8x128xf32>
    %c0_173 = arith.constant 0 : index
    %c0_174 = arith.constant 0 : index
    %159 = vector.load %arg7[%c0_173, %c0_174] : memref<1x128xf32, #tpu.memory_space<vmem>>, vector<1x128xf32>
    %160 = vector.broadcast %159 : vector<1x128xf32> to vector<8x128xf32>
    %161 = arith.addf %158, %160 : vector<8x128xf32>
    %cst_175 = arith.constant 0.000000e+00 : f32
    %162 = vector.broadcast %cst_175 : f32 to vector<8x128xf32>
    %163 = arith.maximumf %161, %162 : vector<8x128xf32>
    %c0_176 = arith.constant 0 : index
    %c0_177 = arith.constant 0 : index
    %164 = vector.load %arg8[%c0_176, %c0_177] : memref<128x128xf32, #tpu.memory_space<vmem>>, vector<128x128xf32>
    %cst_178 = arith.constant dense<0.000000e+00> : vector<8x128xf32>
    %165 = tpu.matmul %163, %164, %cst_178 {dimension_numbers = #tpu.dot_dimension_numbers<[1], [0], [0], [1], [0, 0, 1, 1], [], []>} : vector<8x128xf32>, vector<128x128xf32>, vector<8x128xf32> -> vector<8x128xf32>
    %c0_179 = arith.constant 0 : index
    %c0_180 = arith.constant 0 : index
    %166 = vector.load %arg9[%c0_179, %c0_180] : memref<1x128xf32, #tpu.memory_space<vmem>>, vector<1x128xf32>
    %167 = vector.broadcast %166 : vector<1x128xf32> to vector<8x128xf32>
    %168 = arith.addf %165, %167 : vector<8x128xf32>
    %cst_181 = arith.constant 0.000000e+00 : f32
    %169 = vector.broadcast %cst_181 : f32 to vector<8x128xf32>
    %170 = arith.maximumf %168, %169 : vector<8x128xf32>
    %c0_182 = arith.constant 0 : index
    %c0_183 = arith.constant 0 : index
    %171 = vector.load %arg10[%c0_182, %c0_183] : memref<128x128xf32, #tpu.memory_space<vmem>>, vector<128x128xf32>
    %cst_184 = arith.constant dense<0.000000e+00> : vector<8x128xf32>
    %172 = tpu.matmul %170, %171, %cst_184 {dimension_numbers = #tpu.dot_dimension_numbers<[1], [0], [0], [1], [0, 0, 1, 1], [], []>} : vector<8x128xf32>, vector<128x128xf32>, vector<8x128xf32> -> vector<8x128xf32>
    %c0_185 = arith.constant 0 : index
    %c0_186 = arith.constant 0 : index
    %173 = vector.load %arg11[%c0_185, %c0_186] : memref<1x128xf32, #tpu.memory_space<vmem>>, vector<1x128xf32>
    %174 = vector.broadcast %173 : vector<1x128xf32> to vector<8x128xf32>
    %175 = arith.addf %172, %174 : vector<8x128xf32>
    %c0_187 = arith.constant 0 : index
    %c0_188 = arith.constant 0 : index
    %176 = vector.load %arg12[%c0_187, %c0_188] : memref<8x128xf32, #tpu.memory_space<vmem>>, vector<8x128xf32>
    tpu.vector_store %arg12[%c0_187, %c0_188], %175 {strides = array<i32>} : memref<8x128xf32, #tpu.memory_space<vmem>>, vector<8x128xf32>,
    return
  }
  func.func @transform_0(%arg0: i32) -> (i32, i32) {
    %c0_i32 = arith.constant 0 : i32
    %c0_i32_0 = arith.constant 0 : i32
    return %arg0, %c0_i32 : i32, i32
  }
  func.func @transform_1(%arg0: i32) -> (i32, i32) {
    %c0_i32 = arith.constant 0 : i32
    %c0_i32_0 = arith.constant 0 : i32
    %c0_i32_1 = arith.constant 0 : i32
    return %c0_i32, %c0_i32_0 : i32, i32
  }
  func.func @transform_2(%arg0: i32) -> (i32, i32) {
    %c0_i32 = arith.constant 0 : i32
    %c0_i32_0 = arith.constant 0 : i32
    %c0_i32_1 = arith.constant 0 : i32
    return %c0_i32, %c0_i32_0 : i32, i32
  }
  func.func @transform_3(%arg0: i32) -> (i32, i32) {
    %c0_i32 = arith.constant 0 : i32
    %c0_i32_0 = arith.constant 0 : i32
    %c0_i32_1 = arith.constant 0 : i32
    return %c0_i32, %c0_i32_0 : i32, i32
  }
  func.func @transform_4(%arg0: i32) -> (i32, i32) {
    %c0_i32 = arith.constant 0 : i32
    %c0_i32_0 = arith.constant 0 : i32
    %c0_i32_1 = arith.constant 0 : i32
    return %c0_i32, %c0_i32_0 : i32, i32
  }
  func.func @transform_5(%arg0: i32) -> (i32, i32) {
    %c0_i32 = arith.constant 0 : i32
    %c0_i32_0 = arith.constant 0 : i32
    %c0_i32_1 = arith.constant 0 : i32
    return %c0_i32, %c0_i32_0 : i32, i32
  }
  func.func @transform_6(%arg0: i32) -> (i32, i32) {
    %c0_i32 = arith.constant 0 : i32
    %c0_i32_0 = arith.constant 0 : i32
    %c0_i32_1 = arith.constant 0 : i32
    return %c0_i32, %c0_i32_0 : i32, i32
  }
  func.func @transform_7(%arg0: i32) -> (i32, i32) {
    %c0_i32 = arith.constant 0 : i32
    %c0_i32_0 = arith.constant 0 : i32
    %c0_i32_1 = arith.constant 0 : i32
    return %c0_i32, %c0_i32_0 : i32, i32
  }
  func.func @transform_8(%arg0: i32) -> (i32, i32) {
    %c0_i32 = arith.constant 0 : i32
    %c0_i32_0 = arith.constant 0 : i32
    %c0_i32_1 = arith.constant 0 : i32
    return %c0_i32, %c0_i32_0 : i32, i32
  }
  func.func @transform_9(%arg0: i32) -> (i32, i32) {
    %c0_i32 = arith.constant 0 : i32
    %c0_i32_0 = arith.constant 0 : i32
    %c0_i32_1 = arith.constant 0 : i32
    return %c0_i32, %c0_i32_0 : i32, i32
  }
  func.func @transform_10(%arg0: i32) -> (i32, i32) {
    %c0_i32 = arith.constant 0 : i32
    %c0_i32_0 = arith.constant 0 : i32
    %c0_i32_1 = arith.constant 0 : i32
    return %c0_i32, %c0_i32_0 : i32, i32
  }
  func.func @transform_11(%arg0: i32) -> (i32, i32) {
    %c0_i32 = arith.constant 0 : i32
    %c0_i32_0 = arith.constant 0 : i32
    return %arg0, %c0_i32 : i32, i32
  }
}

</mosaic_0001>

<bundles_post_ra>
// kernel: lenet_forward.1
= control target key start
LH: loop header
LB: loop body
LE: loop exit
PB: predicated region body
PF: predicated region fallthrough
CT: control target
= control target key end

     0   :  { %s9146_s21 = smov 4   ;;  %vm163_vm0 = vcmask 31744   ;;  %vm731_vm1 = vcmask 64544   ;;  %s9147_s12 = smov 8   ;;  %vm1551_vm2 = vcmask 97344   ;;  %vm2371_vm3 = vcmask 130144   ;;  %s14273_s0 = inlined_call_operand.vmem [shape: f32[1024,4], index: 0, kind: input, shape index: {}]   ;;  %s14274_s1 = inlined_call_operand.vmem [shape: f32[20,6], index: 1, kind: input, shape index: {}]   ;;  %s14275_s2 = inlined_call_operand.vmem [shape: f32[1,6], index: 2, kind: input, shape index: {}]   ;;  %s14276_s3 = inlined_call_operand.vmem [shape: f32[30,16], index: 3, kind: input, shape index: {}]   ;;  %s14277_s4 = inlined_call_operand.vmem [shape: f32[1,16], index: 4, kind: input, shape index: {}]   ;;  %s14278_s5 = inlined_call_operand.vmem [shape: f32[400,128], index: 5, kind: input, shape index: {}]   ;;  %s14279_s6 = inlined_call_operand.vmem [shape: f32[1,128], index: 6, kind: input, shape index: {}]   ;;  %s14280_s8 = inlined_call_operand.vmem [shape: f32[1,128], index: 8, kind: input, shape index: {}]   ;;  %s14281_s7 = inlined_call_operand.vmem [shape: f32[128,128], index: 7, kind: input, shape index: {}]   ;;  %s14282_s9 = inlined_call_operand.vmem [shape: f32[128,128], index: 9, kind: input, shape index: {}]   ;;  %s14283_s10 = inlined_call_operand.vmem [shape: f32[1,128], index: 10, kind: input, shape index: {}]   ;;  %s14284_s11 = inlined_call_operand.vmem [shape: f32[8,128], index: 11, kind: output, shape index: {}]  }
   0x1   :  { %v8412_v0 = vld [vmem:[%s14273_s0 + $0x1] ss:$2 sm:$0xff]  ;;  %v8413_v3 = vld [vmem:[%s14273_s0 + $0x11] ss:$2 sm:$0xff]  ;;  %v38_v33 = vld [vmem:[%s14273_s0] ss:$2 sm:$0xff] }
   0x2   :  { %v8414_v1 = vld [vmem:[%s14273_s0 + $0x21] ss:$2 sm:$0xff]  ;;  %542 = vrot.lane.b32.xlu0 %v8412_v0, %s9146_s21  ;;  %v8415_v4 = vld [vmem:[%s14273_s0 + $0x31] ss:$2 sm:$0xff]  ;;  %164 = vst.msk [vmem:[#allocation2] sm:$0xff] %vm163_vm0, %v38_v33  ;;  %s9149_s17 = smov 16  }
   0x3   :  { %546 = vrot.lane.b32.xlu1 %v8414_v1, %s9146_s21  ;;  %v8416_v2 = vld [vmem:[%s14273_s0 + $0x41] ss:$2 sm:$0xff]  ;;  %v8417_v5 = vld [vmem:[%s14273_s0 + $0x51] ss:$2 sm:$0xff]  ;;  %v8290_v37 = vld [vmem:[%s14273_s0 + $0x40] ss:$2 sm:$0xff] }
   0x4   :  { %550 = vrot.lane.b32.xlu2 %v8416_v2, %s9146_s21  ;;  %v8418_v6 = vld [vmem:[%s14273_s0 + $0x61] ss:$2 sm:$0xff]  ;;  %v8419_v7 = vld [vmem:[%s14273_s0 + $0x71] ss:$2 sm:$0xff]  ;;  %v8288_v38 = vld [vmem:[%s14273_s0 + $0x20] ss:$2 sm:$0xff] }
   0x5   :  { %v8420_v8 = vld [vmem:[%s14273_s0 + $0x81] ss:$2 sm:$0xff]  ;;  %v8421_v9 = vld [vmem:[%s14273_s0 + $0x91] ss:$2 sm:$0xff]  ;;  %168 = vst.msk [vmem:[#allocation2 + $0x20] sm:$0xff] %vm163_vm0, %v8290_v37  ;;  %vm3191_vm4 = vcmask 162944  }
   0x6   :  { %v8422_v10 = vld [vmem:[%s14273_s0 + $0xa1] ss:$2 sm:$0xff]  ;;  %v8423_v11 = vld [vmem:[%s14273_s0 + $0xb1] ss:$2 sm:$0xff]  ;;  %v8287_v39 = vld [vmem:[%s14273_s0 + $0x10] ss:$2 sm:$0xff] }
   0x7   :  { %v8424_v12 = vld [vmem:[%s14273_s0 + $0xc1] ss:$2 sm:$0xff]  ;;  %v8425_v13 = vld [vmem:[%s14273_s0 + $0xd1] ss:$2 sm:$0xff]  ;;  %166 = vst.msk [vmem:[#allocation2 + $0x10] sm:$0xff] %vm163_vm0, %v8288_v38  ;;  %vm3952_vm5 = vcmask 1043456  }
   0x8   :  { %v8426_v14 = vld [vmem:[%s14273_s0 + $0xe1] ss:$2 sm:$0xff]  ;;  %v8427_v15 = vld [vmem:[%s14273_s0 + $0xf1] ss:$2 sm:$0xff]  ;;  %165 = vst.msk [vmem:[#allocation2 + $0x8] sm:$0xff] %vm163_vm0, %v8287_v39  ;;  %vm3762_vm6 = vcmask 162816  }
   0x9   :  { %v8428_v16 = vld [vmem:[%s14273_s0 + $0x101] ss:$2 sm:$0xff]  ;;  %v8429_v17 = vld [vmem:[%s14273_s0 + $0x111] ss:$2 sm:$0xff]  ;;  %v8291_v44 = vld [vmem:[%s14273_s0 + $0x50] ss:$2 sm:$0xff] }
   0xa   :  { %544 = vrot.lane.b32.xlu0 %v8413_v3, %s9146_s21  ;;  %v8430_v18 = vld [vmem:[%s14273_s0 + $0x121] ss:$2 sm:$0xff]  ;;  %v8431_v19 = vld [vmem:[%s14273_s0 + $0x131] ss:$2 sm:$0xff]  ;;  %v8289_v45 = vld [vmem:[%s14273_s0 + $0x30] ss:$2 sm:$0xff] }
   0xb   :  { %548 = vrot.lane.b32.xlu1 %v8415_v4, %s9146_s21  ;;  %v8432_v20 = vld [vmem:[%s14273_s0 + $0x141] ss:$2 sm:$0xff]  ;;  %v8433_v21 = vld [vmem:[%s14273_s0 + $0x151] ss:$2 sm:$0xff]  ;;  %169 = vst.msk [vmem:[#allocation2 + $0x28] sm:$0xff] %vm163_vm0, %v8291_v44  ;;  %vm4620_vm7 = vcmask 48128  }
   0xc   :  { %552 = vrot.lane.b32.xlu2 %v8417_v5, %s9146_s21  ;;  %v8434_v22 = vld [vmem:[%s14273_s0 + $0x161] ss:$2 sm:$0xff]  ;;  %v8435_v23 = vld [vmem:[%s14273_s0 + $0x171] ss:$2 sm:$0xff]  ;;  %v8292_v46 = vld [vmem:[%s14273_s0 + $0x60] ss:$2 sm:$0xff] }
   0xd   :  { %v8436_v24 = vld [vmem:[%s14273_s0 + $0x181] ss:$2 sm:$0xff]  ;;  %v8437_v25 = vld [vmem:[%s14273_s0 + $0x191] ss:$2 sm:$0xff]  ;;  %167 = vst.msk [vmem:[#allocation2 + $0x18] sm:$0xff] %vm163_vm0, %v8289_v45  ;;  %s9150_s14 = smov 18  }
   0xe   :  { %v8438_v26 = vld [vmem:[%s14273_s0 + $0x1a1] ss:$2 sm:$0xff]  ;;  %v8439_v27 = vld [vmem:[%s14273_s0 + $0x1b1] ss:$2 sm:$0xff]  ;;  %170 = vst.msk [vmem:[#allocation2 + $0x30] sm:$0xff] %vm163_vm0, %v8292_v46  ;;  %s9151_s15 = smov 6  }
   0xf   :  { %v8440_v28 = vld [vmem:[%s14273_s0 + $0x1c1] ss:$2 sm:$0xff]  ;;  %v8441_v29 = vld [vmem:[%s14273_s0 + $0x1d1] ss:$2 sm:$0xff]  ;;  %v8294_v51 = vld [vmem:[%s14273_s0 + $0x80] ss:$2 sm:$0xff] }
  0x10   :  { %v8442_v30 = vld [vmem:[%s14273_s0 + $0x1e1] ss:$2 sm:$0xff]  ;;  %v8443_v31 = vld [vmem:[%s14273_s0 + $0x1f1] ss:$2 sm:$0xff]  ;;  %v8293_v52 = vld [vmem:[%s14273_s0 + $0x70] ss:$2 sm:$0xff] }
  0x11   :  { %v8444_v32 = vld [vmem:[%s14273_s0 + $0x201] ss:$2 sm:$0xff]  ;;  %v8445_v34 = vld [vmem:[%s14273_s0 + $0x211] ss:$2 sm:$0xff]  ;;  %172 = vst.msk [vmem:[#allocation2 + $0x40] sm:$0xff] %vm163_vm0, %v8294_v51  ;;  %s9152_s20 = smov 24  }
  0x12   :  { %554 = vrot.lane.b32.xlu0 %v8418_v6, %s9146_s21  ;;  %v8446_v35 = vld [vmem:[%s14273_s0 + $0x221] ss:$2 sm:$0xff]  ;;  %v8447_v36 = vld [vmem:[%s14273_s0 + $0x231] ss:$2 sm:$0xff]  ;;  %v8295_v53 = vld [vmem:[%s14273_s0 + $0x90] ss:$2 sm:$0xff] }
  0x13   :  { %556 = vrot.lane.b32.xlu1 %v8419_v7, %s9146_s21  ;;  %v8448_v41 = vld [vmem:[%s14273_s0 + $0x241] ss:$2 sm:$0xff]  ;;  %v8449_v42 = vld [vmem:[%s14273_s0 + $0x251] ss:$2 sm:$0xff]  ;;  %171 = vst.msk [vmem:[#allocation2 + $0x38] sm:$0xff] %vm163_vm0, %v8293_v52  ;;  %vm6783_vm8 = vcmask 1045504  }
  0x14   :  { %558 = vrot.lane.b32.xlu2 %v8420_v8, %s9146_s21  ;;  %v8450_v43 = vld [vmem:[%s14273_s0 + $0x261] ss:$2 sm:$0xff]  ;;  %v8451_v48 = vld [vmem:[%s14273_s0 + $0x271] ss:$2 sm:$0xff]  ;;  %173 = vst.msk [vmem:[#allocation2 + $0x48] sm:$0xff] %vm163_vm0, %v8295_v53  ;;  %vm5319_vm9 = vcmask 97328  }
  0x15   :  { %v8452_v49 = vld [vmem:[%s14273_s0 + $0x281] ss:$2 sm:$0xff]  ;;  %v8453_v50 = vld [vmem:[%s14273_s0 + $0x291] ss:$2 sm:$0xff]  ;;  %v8297_v58 = vld [vmem:[%s14273_s0 + $0xb0] ss:$2 sm:$0xff] }
  0x16   :  { %v8454_v55 = vld [vmem:[%s14273_s0 + $0x2a1] ss:$2 sm:$0xff]  ;;  %v8455_v56 = vld [vmem:[%s14273_s0 + $0x2b1] ss:$2 sm:$0xff]  ;;  %v8296_v59 = vld [vmem:[%s14273_s0 + $0xa0] ss:$2 sm:$0xff] }
  0x17   :  { %v8456_v57 = vld [vmem:[%s14273_s0 + $0x2c1] ss:$2 sm:$0xff]  ;;  %175 = vst.msk [vmem:[#allocation2 + $0x58] sm:$0xff] %vm163_vm0, %v8297_v58  ;;  %v8298_v62 = vld [vmem:[%s14273_s0 + $0xc0] ss:$2 sm:$0xff]  ;;  %vm5698_vm10 = vcmask 146528  }
  0x18   :  { %174 = vst.msk [vmem:[#allocation2 + $0x50] sm:$0xff] %vm163_vm0, %v8296_v59  ;;  %v8457_v0 = vld [vmem:[%s14273_s0 + $0x2d1] ss:$2 sm:$0xff]  ;;  %v8458_v1 = vld [vmem:[%s14273_s0 + $0x2e1] ss:$2 sm:$0xff]  ;;  %vm6077_vm11 = vcmask 195728  }
  0x19   :  { %176 = vst.msk [vmem:[#allocation2 + $0x60] sm:$0xff] %vm163_vm0, %v8298_v62  ;;  %v8459_v2 = vld [vmem:[%s14273_s0 + $0x2f1] ss:$2 sm:$0xff]  ;;  %v8300_v3 = vld [vmem:[%s14273_s0 + $0xe0] ss:$2 sm:$0xff]  ;;  %vm6456_vm12 = vcmask 244928  }
  0x1a   :  { %560 = vrot.lane.b32.xlu0 %v8421_v9, %s9146_s21  ;;  %v8299_v4 = vld [vmem:[%s14273_s0 + $0xd0] ss:$2 sm:$0xff]  ;;  %178 = vst.msk [vmem:[#allocation2 + $0x70] sm:$0xff] %vm163_vm0, %v8300_v3  ;;  %v8460_v9 = vld [vmem:[%s14273_s0 + $0x301] ss:$2 sm:$0xff]  ;;  %vm6593_vm13 = vcmask 244736  }
  0x1b   :  { %562 = vrot.lane.b32.xlu1 %v8422_v10, %s9146_s21  ;;  %177 = vst.msk [vmem:[#allocation2 + $0x68] sm:$0xff] %vm163_vm0, %v8299_v4  ;;  %v8301_v7 = vld [vmem:[%s14273_s0 + $0xf0] ss:$2 sm:$0xff]  ;;  %v8461_v10 = vld [vmem:[%s14273_s0 + $0x311] ss:$2 sm:$0xff]  ;;  %vm6587_vm14 = vcmask 130048  }
  0x1c   :  { %564 = vrot.lane.b32.xlu2 %v8423_v11, %s9146_s21  ;;  %179 = vst.msk [vmem:[#allocation2 + $0x78] sm:$0xff] %vm163_vm0, %v8301_v7  ;;  %v8462_v11 = vld [vmem:[%s14273_s0 + $0x321] ss:$2 sm:$0xff]  ;;  %v8471_v38 = vld [vmem:[%s14273_s0 + $0x3b1] ss:$2 sm:$0xff]  ;;  %s9158_s25 = smov 64  }
  0x1d   :  { %v8470_v37 = vld [vmem:[%s14273_s0 + $0x3a1] ss:$2 sm:$0xff]  ;;  %v8312_v39 = vld [vmem:[%s14273_s0 + $0x1a0] ss:$2 sm:$0xff]  ;;  %v8473_v46 = vld [vmem:[%s14273_s0 + $0x3d1] ss:$2 sm:$0xff] }
  0x1e   :  { %190 = vst.msk [vmem:[#allocation2 + $0xd0] sm:$0xff] %vm163_vm0, %v8312_v39  ;;  %v8472_v45 = vld [vmem:[%s14273_s0 + $0x3c1] ss:$2 sm:$0xff]  ;;  %v8316_v52 = vld [vmem:[%s14273_s0 + $0x1e0] ss:$2 sm:$0xff]  ;;  %vm7189_vm15 = vcmask 261248  }
  0x1f   :  { %194 = vst.msk [vmem:[#allocation2 + $0xf0] sm:$0xff] %vm163_vm0, %v8316_v52  ;;  %v8317_v58 = vld [vmem:[%s14273_s0 + $0x1f0] ss:$2 sm:$0xff]  ;;  %v8320_v3 = vld [vmem:[%s14273_s0 + $0x220] ss:$2 sm:$0xff] }
  0x20   :  { %195 = vst.msk [vmem:[#allocation2 + $0xf8] sm:$0xff] %vm163_vm0, %v8317_v58  ;;  %v8332_v39 = vld [vmem:[%s14273_s0 + $0x2e0] ss:$2 sm:$0xff] }
  0x21   :  { %198 = vst.msk [vmem:[#allocation2 + $0x110] sm:$0xff] %vm163_vm0, %v8320_v3 }
  0x22   :  { %566 = vrot.lane.b32.xlu0 %v8424_v12, %s9146_s21  ;;  %v8303_v12 = vld [vmem:[%s14273_s0 + $0x110] ss:$2 sm:$0xff]  ;;  %210 = vst.msk [vmem:[#allocation2 + $0x170] sm:$0xff] %vm163_vm0, %v8332_v39 }
  0x23   :  { %568 = vrot.lane.b32.xlu1 %v8425_v13, %s9146_s21  ;;  %v8302_v13 = vld [vmem:[%s14273_s0 + $0x100] ss:$2 sm:$0xff]  ;;  %181 = vst.msk [vmem:[#allocation2 + $0x88] sm:$0xff] %vm163_vm0, %v8303_v12  ;;  %v8323_v12 = vld [vmem:[%s14273_s0 + $0x250] ss:$2 sm:$0xff] }
  0x24   :  { %570 = vrot.lane.b32.xlu2 %v8426_v14, %s9146_s21  ;;  %180 = vst.msk [vmem:[#allocation2 + $0x80] sm:$0xff] %vm163_vm0, %v8302_v13 }
  0x25   :  { %201 = vst.msk [vmem:[#allocation2 + $0x128] sm:$0xff] %vm163_vm0, %v8323_v12 }
  0x2a   :  { %572 = vrot.lane.b32.xlu0 %v8427_v15, %s9146_s21 }
  0x2b   :  { %574 = vrot.lane.b32.xlu1 %v8428_v16, %s9146_s21  ;;  %v8304_v16 = vld [vmem:[%s14273_s0 + $0x120] ss:$2 sm:$0xff] }
  0x2c   :  { %576 = vrot.lane.b32.xlu2 %v8429_v17, %s9146_s21  ;;  %182 = vst.msk [vmem:[#allocation2 + $0x90] sm:$0xff] %vm163_vm0, %v8304_v16 }
  0x32   :  { %578 = vrot.lane.b32.xlu0 %v8430_v18, %s9146_s21  ;;  %v8463_v18 = vld [vmem:[%s14273_s0 + $0x331] ss:$2 sm:$0xff] }
  0x33   :  { %580 = vrot.lane.b32.xlu1 %v8431_v19, %s9146_s21  ;;  %v8464_v19 = vld [vmem:[%s14273_s0 + $0x341] ss:$2 sm:$0xff] }
  0x34   :  { %582 = vrot.lane.b32.xlu2 %v8432_v20, %s9146_s21  ;;  %v8465_v20 = vld [vmem:[%s14273_s0 + $0x351] ss:$2 sm:$0xff] }
  0x3a   :  { %584 = vrot.lane.b32.xlu0 %v8433_v21, %s9146_s21  ;;  %v8306_v21 = vld [vmem:[%s14273_s0 + $0x140] ss:$2 sm:$0xff] }
  0x3b   :  { %586 = vrot.lane.b32.xlu1 %v8434_v22, %s9146_s21  ;;  %v8305_v22 = vld [vmem:[%s14273_s0 + $0x130] ss:$2 sm:$0xff]  ;;  %184 = vst.msk [vmem:[#allocation2 + $0xa0] sm:$0xff] %vm163_vm0, %v8306_v21  ;;  %v8326_v21 = vld [vmem:[%s14273_s0 + $0x280] ss:$2 sm:$0xff] }
  0x3c   :  { %588 = vrot.lane.b32.xlu2 %v8435_v23, %s9146_s21  ;;  %183 = vst.msk [vmem:[#allocation2 + $0x98] sm:$0xff] %vm163_vm0, %v8305_v22 }
  0x3d   :  { %204 = vst.msk [vmem:[#allocation2 + $0x140] sm:$0xff] %vm163_vm0, %v8326_v21 }
  0x42   :  { %590 = vrot.lane.b32.xlu0 %v8436_v24, %s9146_s21 }
  0x43   :  { %592 = vrot.lane.b32.xlu1 %v8437_v25, %s9146_s21  ;;  %v8307_v25 = vld [vmem:[%s14273_s0 + $0x150] ss:$2 sm:$0xff] }
  0x44   :  { %594 = vrot.lane.b32.xlu2 %v8438_v26, %s9146_s21  ;;  %185 = vst.msk [vmem:[#allocation2 + $0xa8] sm:$0xff] %vm163_vm0, %v8307_v25 }
  0x4a   :  { %596 = vrot.lane.b32.xlu0 %v8439_v27, %s9146_s21  ;;  %v8466_v27 = vld [vmem:[%s14273_s0 + $0x361] ss:$2 sm:$0xff] }
  0x4b   :  { %598 = vrot.lane.b32.xlu1 %v8440_v28, %s9146_s21  ;;  %v8467_v28 = vld [vmem:[%s14273_s0 + $0x371] ss:$2 sm:$0xff] }
  0x4c   :  { %600 = vrot.lane.b32.xlu2 %v8441_v29, %s9146_s21  ;;  %v8468_v29 = vld [vmem:[%s14273_s0 + $0x381] ss:$2 sm:$0xff] }
  0x52   :  { %602 = vrot.lane.b32.xlu0 %v8442_v30, %s9146_s21  ;;  %v8309_v30 = vld [vmem:[%s14273_s0 + $0x170] ss:$2 sm:$0xff] }
  0x53   :  { %604 = vrot.lane.b32.xlu1 %v8443_v31, %s9146_s21  ;;  %v8308_v31 = vld [vmem:[%s14273_s0 + $0x160] ss:$2 sm:$0xff]  ;;  %187 = vst.msk [vmem:[#allocation2 + $0xb8] sm:$0xff] %vm163_vm0, %v8309_v30  ;;  %v8329_v30 = vld [vmem:[%s14273_s0 + $0x2b0] ss:$2 sm:$0xff] }
  0x54   :  { %606 = vrot.lane.b32.xlu2 %v8444_v32, %s9146_s21  ;;  %186 = vst.msk [vmem:[#allocation2 + $0xb0] sm:$0xff] %vm163_vm0, %v8308_v31 }
  0x55   :  { %207 = vst.msk [vmem:[#allocation2 + $0x158] sm:$0xff] %vm163_vm0, %v8329_v30 }
  0x5a   :  { %608 = vrot.lane.b32.xlu0 %v8445_v34, %s9146_s21  ;;  %v8310_v34 = vld [vmem:[%s14273_s0 + $0x180] ss:$2 sm:$0xff] }
  0x5b   :  { %610 = vrot.lane.b32.xlu1 %v8446_v35, %s9146_s21  ;;  %188 = vst.msk [vmem:[#allocation2 + $0xc0] sm:$0xff] %vm163_vm0, %v8310_v34 }
  0x5c   :  { %612 = vrot.lane.b32.xlu2 %v8447_v36, %s9146_s21  ;;  %v8469_v36 = vld [vmem:[%s14273_s0 + $0x391] ss:$2 sm:$0xff] }
  0x5e   :  { %v551_v40 = vpop.permute.xlu2 %550 }
  0x5f   :  { %736 = vst.msk [vmem:[#allocation2 + $0x20] sm:$0xff] %vm731_vm1, %v551_v40  ;;  %v8311_v40 = vld [vmem:[%s14273_s0 + $0x190] ss:$2 sm:$0xff] }
  0x60   :  { %189 = vst.msk [vmem:[#allocation2 + $0xc8] sm:$0xff] %vm163_vm0, %v8311_v40 }
  0x62   :  { %614 = vrot.lane.b32.xlu0 %v8448_v41, %s9146_s21 }
  0x63   :  { %616 = vrot.lane.b32.xlu1 %v8449_v42, %s9146_s21 }
  0x64   :  { %618 = vrot.lane.b32.xlu2 %v8450_v43, %s9146_s21  ;;  %v8313_v43 = vld [vmem:[%s14273_s0 + $0x1b0] ss:$2 sm:$0xff] }
  0x65   :  { %191 = vst.msk [vmem:[#allocation2 + $0xd8] sm:$0xff] %vm163_vm0, %v8313_v43 }
  0x66   :  { %v553_v47 = vpop.permute.xlu2 %552 }
  0x67   :  { %737 = vst.msk [vmem:[#allocation2 + $0x28] sm:$0xff] %vm731_vm1, %v553_v47  ;;  %v8474_v47 = vld [vmem:[%s14273_s0 + $0x3e1] ss:$2 sm:$0xff] }
  0x6a   :  { %620 = vrot.lane.b32.xlu0 %v8451_v48, %s9146_s21  ;;  %v8315_v48 = vld [vmem:[%s14273_s0 + $0x1d0] ss:$2 sm:$0xff] }
  0x6b   :  { %622 = vrot.lane.b32.xlu1 %v8452_v49, %s9146_s21  ;;  %v8314_v49 = vld [vmem:[%s14273_s0 + $0x1c0] ss:$2 sm:$0xff]  ;;  %193 = vst.msk [vmem:[#allocation2 + $0xe8] sm:$0xff] %vm163_vm0, %v8315_v48  ;;  %v8335_v48 = vld [vmem:[%s14273_s0 + $0x310] ss:$2 sm:$0xff] }
  0x6c   :  { %624 = vrot.lane.b32.xlu2 %v8453_v50, %s9146_s21  ;;  %192 = vst.msk [vmem:[#allocation2 + $0xe0] sm:$0xff] %vm163_vm0, %v8314_v49 }
  0x6d   :  { %213 = vst.msk [vmem:[#allocation2 + $0x188] sm:$0xff] %vm163_vm0, %v8335_v48 }
  0x6e   :  { %v559_v54 = vpop.permute.xlu2 %558 }
  0x6f   :  { %740 = vst.msk [vmem:[#allocation2 + $0x40] sm:$0xff] %vm731_vm1, %v559_v54  ;;  %v8475_v54 = vld [vmem:[%s14273_s0 + $0x2] ss:$2 sm:$0xff] }
  0x72   :  { %626 = vrot.lane.b32.xlu0 %v8454_v55, %s9146_s21  ;;  %v8476_v55 = vld [vmem:[%s14273_s0 + $0x12] ss:$2 sm:$0xff] }
  0x73   :  { %628 = vrot.lane.b32.xlu1 %v8455_v56, %s9146_s21  ;;  %v8477_v56 = vld [vmem:[%s14273_s0 + $0x22] ss:$2 sm:$0xff] }
  0x74   :  { %v543_v60 = vpop.permute.xlu0 %542  ;;  %630 = vrot.lane.b32.xlu2 %v8456_v57, %s9146_s21  ;;  %v8318_v57 = vld [vmem:[%s14273_s0 + $0x200] ss:$2 sm:$0xff] }
  0x75   :  { %v547_v61 = vpop.permute.xlu1 %546  ;;  %732 = vst.msk [vmem:[#allocation2] sm:$0xff] %vm731_vm1, %v543_v60 }
  0x76   :  { %734 = vst.msk [vmem:[#allocation2 + $0x10] sm:$0xff] %vm731_vm1, %v547_v61  ;;  %v565_v63 = vpop.permute.xlu2 %564  ;;  %v8319_v61 = vld [vmem:[%s14273_s0 + $0x210] ss:$2 sm:$0xff] }
  0x77   :  { %743 = vst.msk [vmem:[#allocation2 + $0x58] sm:$0xff] %vm731_vm1, %v565_v63  ;;  %v8478_v63 = vld [vmem:[%s14273_s0 + $0x32] ss:$2 sm:$0xff] }
  0x78   :  { %196 = vst.msk [vmem:[#allocation2 + $0x100] sm:$0xff] %vm163_vm0, %v8318_v57  ;;  %v8338_v57 = vld [vmem:[%s14273_s0 + $0x340] ss:$2 sm:$0xff] }
  0x79   :  { %197 = vst.msk [vmem:[#allocation2 + $0x108] sm:$0xff] %vm163_vm0, %v8319_v61 }
  0x7a   :  { %632 = vrot.lane.b32.xlu0 %v8457_v0, %s9146_s21  ;;  %v8479_v0 = vld [vmem:[%s14273_s0 + $0x42] ss:$2 sm:$0xff]  ;;  %216 = vst.msk [vmem:[#allocation2 + $0x1a0] sm:$0xff] %vm163_vm0, %v8338_v57 }
  0x7b   :  { %634 = vrot.lane.b32.xlu1 %v8458_v1, %s9146_s21  ;;  %v8480_v1 = vld [vmem:[%s14273_s0 + $0x52] ss:$2 sm:$0xff] }
  0x7c   :  { %v545_v5 = vpop.permute.xlu0 %544  ;;  %636 = vrot.lane.b32.xlu2 %v8459_v2, %s9146_s21  ;;  %v8321_v2 = vld [vmem:[%s14273_s0 + $0x230] ss:$2 sm:$0xff] }
  0x7d   :  { %v549_v6 = vpop.permute.xlu1 %548  ;;  %733 = vst.msk [vmem:[#allocation2 + $0x8] sm:$0xff] %vm731_vm1, %v545_v5 }
  0x7e   :  { %735 = vst.msk [vmem:[#allocation2 + $0x18] sm:$0xff] %vm731_vm1, %v549_v6  ;;  %v571_v8 = vpop.permute.xlu2 %570  ;;  %v8322_v6 = vld [vmem:[%s14273_s0 + $0x240] ss:$2 sm:$0xff] }
  0x7f   :  { %746 = vst.msk [vmem:[#allocation2 + $0x70] sm:$0xff] %vm731_vm1, %v571_v8  ;;  %v8481_v8 = vld [vmem:[%s14273_s0 + $0x62] ss:$2 sm:$0xff] }
  0x80   :  { %199 = vst.msk [vmem:[#allocation2 + $0x118] sm:$0xff] %vm163_vm0, %v8321_v2  ;;  %v8341_v2 = vld [vmem:[%s14273_s0 + $0x370] ss:$2 sm:$0xff] }
  0x81   :  { %200 = vst.msk [vmem:[#allocation2 + $0x120] sm:$0xff] %vm163_vm0, %v8322_v6 }
  0x82   :  { %638 = vrot.lane.b32.xlu0 %v8460_v9, %s9146_s21  ;;  %v8482_v9 = vld [vmem:[%s14273_s0 + $0x72] ss:$2 sm:$0xff]  ;;  %219 = vst.msk [vmem:[#allocation2 + $0x1b8] sm:$0xff] %vm163_vm0, %v8341_v2 }
  0x83   :  { %640 = vrot.lane.b32.xlu1 %v8461_v10, %s9146_s21  ;;  %v8483_v10 = vld [vmem:[%s14273_s0 + $0x82] ss:$2 sm:$0xff] }
  0x84   :  { %v555_v14 = vpop.permute.xlu0 %554  ;;  %642 = vrot.lane.b32.xlu2 %v8462_v11, %s9146_s21  ;;  %v8324_v11 = vld [vmem:[%s14273_s0 + $0x260] ss:$2 sm:$0xff] }
  0x85   :  { %v557_v15 = vpop.permute.xlu1 %556  ;;  %738 = vst.msk [vmem:[#allocation2 + $0x30] sm:$0xff] %vm731_vm1, %v555_v14 }
  0x86   :  { %739 = vst.msk [vmem:[#allocation2 + $0x38] sm:$0xff] %vm731_vm1, %v557_v15  ;;  %v577_v17 = vpop.permute.xlu2 %576  ;;  %v8325_v15 = vld [vmem:[%s14273_s0 + $0x270] ss:$2 sm:$0xff] }
  0x87   :  { %749 = vst.msk [vmem:[#allocation2 + $0x88] sm:$0xff] %vm731_vm1, %v577_v17  ;;  %v8484_v17 = vld [vmem:[%s14273_s0 + $0x92] ss:$2 sm:$0xff] }
  0x88   :  { %202 = vst.msk [vmem:[#allocation2 + $0x130] sm:$0xff] %vm163_vm0, %v8324_v11  ;;  %v8344_v11 = vld [vmem:[%s14273_s0 + $0x3a0] ss:$2 sm:$0xff] }
  0x89   :  { %203 = vst.msk [vmem:[#allocation2 + $0x138] sm:$0xff] %vm163_vm0, %v8325_v15 }
  0x8a   :  { %644 = vrot.lane.b32.xlu0 %v8463_v18, %s9146_s21  ;;  %v8485_v18 = vld [vmem:[%s14273_s0 + $0xa2] ss:$2 sm:$0xff]  ;;  %222 = vst.msk [vmem:[#allocation2 + $0x1d0] sm:$0xff] %vm163_vm0, %v8344_v11 }
  0x8b   :  { %646 = vrot.lane.b32.xlu1 %v8464_v19, %s9146_s21  ;;  %v8486_v19 = vld [vmem:[%s14273_s0 + $0xb2] ss:$2 sm:$0xff] }
  0x8c   :  { %v561_v23 = vpop.permute.xlu0 %560  ;;  %648 = vrot.lane.b32.xlu2 %v8465_v20, %s9146_s21  ;;  %v8327_v20 = vld [vmem:[%s14273_s0 + $0x290] ss:$2 sm:$0xff] }
  0x8d   :  { %v563_v24 = vpop.permute.xlu1 %562  ;;  %741 = vst.msk [vmem:[#allocation2 + $0x48] sm:$0xff] %vm731_vm1, %v561_v23 }
  0x8e   :  { %742 = vst.msk [vmem:[#allocation2 + $0x50] sm:$0xff] %vm731_vm1, %v563_v24  ;;  %v583_v26 = vpop.permute.xlu2 %582  ;;  %v8328_v24 = vld [vmem:[%s14273_s0 + $0x2a0] ss:$2 sm:$0xff] }
  0x8f   :  { %752 = vst.msk [vmem:[#allocation2 + $0xa0] sm:$0xff] %vm731_vm1, %v583_v26  ;;  %v8487_v26 = vld [vmem:[%s14273_s0 + $0xc2] ss:$2 sm:$0xff] }
  0x90   :  { %205 = vst.msk [vmem:[#allocation2 + $0x148] sm:$0xff] %vm163_vm0, %v8327_v20  ;;  %v8347_v20 = vld [vmem:[%s14273_s0 + $0x3d0] ss:$2 sm:$0xff] }
  0x91   :  { %206 = vst.msk [vmem:[#allocation2 + $0x150] sm:$0xff] %vm163_vm0, %v8328_v24 }
  0x92   :  { %650 = vrot.lane.b32.xlu0 %v8466_v27, %s9146_s21  ;;  %v8488_v27 = vld [vmem:[%s14273_s0 + $0xd2] ss:$2 sm:$0xff]  ;;  %225 = vst.msk [vmem:[#allocation2 + $0x1e8] sm:$0xff] %vm163_vm0, %v8347_v20 }
  0x93   :  { %652 = vrot.lane.b32.xlu1 %v8467_v28, %s9146_s21  ;;  %v8489_v28 = vld [vmem:[%s14273_s0 + $0xe2] ss:$2 sm:$0xff] }
  0x94   :  { %v567_v32 = vpop.permute.xlu0 %566  ;;  %654 = vrot.lane.b32.xlu2 %v8468_v29, %s9146_s21  ;;  %v8330_v29 = vld [vmem:[%s14273_s0 + $0x2c0] ss:$2 sm:$0xff] }
  0x95   :  { %v569_v33 = vpop.permute.xlu1 %568  ;;  %744 = vst.msk [vmem:[#allocation2 + $0x60] sm:$0xff] %vm731_vm1, %v567_v32 }
  0x96   :  { %745 = vst.msk [vmem:[#allocation2 + $0x68] sm:$0xff] %vm731_vm1, %v569_v33  ;;  %v589_v35 = vpop.permute.xlu2 %588  ;;  %v8331_v33 = vld [vmem:[%s14273_s0 + $0x2d0] ss:$2 sm:$0xff] }
  0x97   :  { %755 = vst.msk [vmem:[#allocation2 + $0xb8] sm:$0xff] %vm731_vm1, %v589_v35  ;;  %v8490_v35 = vld [vmem:[%s14273_s0 + $0xf2] ss:$2 sm:$0xff] }
  0x98   :  { %208 = vst.msk [vmem:[#allocation2 + $0x160] sm:$0xff] %vm163_vm0, %v8330_v29  ;;  %v8350_v29 = vld [vmem:[%s14273_s0 + $0x11] ss:$2 sm:$0xff] }
  0x99   :  { %209 = vst.msk [vmem:[#allocation2 + $0x168] sm:$0xff] %vm163_vm0, %v8331_v33 }
  0x9a   :  { %656 = vrot.lane.b32.xlu0 %v8469_v36, %s9146_s21  ;;  %v8491_v36 = vld [vmem:[%s14273_s0 + $0x102] ss:$2 sm:$0xff]  ;;  %354 = vst.msk [vmem:[#allocation3 + $0x8] sm:$0xff] %vm163_vm0, %v8350_v29 }
  0x9b   :  { %658 = vrot.lane.b32.xlu1 %v8470_v37, %s9146_s21  ;;  %v8492_v37 = vld [vmem:[%s14273_s0 + $0x112] ss:$2 sm:$0xff] }
  0x9c   :  { %v573_v41 = vpop.permute.xlu0 %572  ;;  %660 = vrot.lane.b32.xlu2 %v8471_v38, %s9146_s21  ;;  %v8333_v38 = vld [vmem:[%s14273_s0 + $0x2f0] ss:$2 sm:$0xff] }
  0x9d   :  { %v575_v42 = vpop.permute.xlu1 %574  ;;  %747 = vst.msk [vmem:[#allocation2 + $0x78] sm:$0xff] %vm731_vm1, %v573_v41 }
  0x9e   :  { %748 = vst.msk [vmem:[#allocation2 + $0x80] sm:$0xff] %vm731_vm1, %v575_v42  ;;  %v595_v44 = vpop.permute.xlu2 %594  ;;  %v8334_v42 = vld [vmem:[%s14273_s0 + $0x300] ss:$2 sm:$0xff] }
  0x9f   :  { %758 = vst.msk [vmem:[#allocation2 + $0xd0] sm:$0xff] %vm731_vm1, %v595_v44  ;;  %v8493_v44 = vld [vmem:[%s14273_s0 + $0x122] ss:$2 sm:$0xff] }
  0xa0   :  { %211 = vst.msk [vmem:[#allocation2 + $0x178] sm:$0xff] %vm163_vm0, %v8333_v38  ;;  %v8353_v38 = vld [vmem:[%s14273_s0 + $0x41] ss:$2 sm:$0xff] }
  0xa1   :  { %212 = vst.msk [vmem:[#allocation2 + $0x180] sm:$0xff] %vm163_vm0, %v8334_v42 }
  0xa2   :  { %662 = vrot.lane.b32.xlu0 %v8472_v45, %s9146_s21  ;;  %v8494_v45 = vld [vmem:[%s14273_s0 + $0x132] ss:$2 sm:$0xff]  ;;  %357 = vst.msk [vmem:[#allocation3 + $0x20] sm:$0xff] %vm163_vm0, %v8353_v38 }
  0xa3   :  { %664 = vrot.lane.b32.xlu1 %v8473_v46, %s9146_s21  ;;  %v8495_v46 = vld [vmem:[%s14273_s0 + $0x142] ss:$2 sm:$0xff] }
  0xa4   :  { %v579_v50 = vpop.permute.xlu0 %578  ;;  %666 = vrot.lane.b32.xlu2 %v8474_v47, %s9146_s21  ;;  %v8336_v47 = vld [vmem:[%s14273_s0 + $0x320] ss:$2 sm:$0xff] }
  0xa5   :  { %v581_v51 = vpop.permute.xlu1 %580  ;;  %750 = vst.msk [vmem:[#allocation2 + $0x90] sm:$0xff] %vm731_vm1, %v579_v50 }
  0xa6   :  { %751 = vst.msk [vmem:[#allocation2 + $0x98] sm:$0xff] %vm731_vm1, %v581_v51  ;;  %v601_v53 = vpop.permute.xlu2 %600  ;;  %v8337_v51 = vld [vmem:[%s14273_s0 + $0x330] ss:$2 sm:$0xff] }
  0xa7   :  { %761 = vst.msk [vmem:[#allocation2 + $0xe8] sm:$0xff] %vm731_vm1, %v601_v53  ;;  %v8496_v53 = vld [vmem:[%s14273_s0 + $0x152] ss:$2 sm:$0xff] }
  0xa8   :  { %214 = vst.msk [vmem:[#allocation2 + $0x190] sm:$0xff] %vm163_vm0, %v8336_v47  ;;  %v8356_v47 = vld [vmem:[%s14273_s0 + $0x71] ss:$2 sm:$0xff] }
  0xa9   :  { %215 = vst.msk [vmem:[#allocation2 + $0x198] sm:$0xff] %vm163_vm0, %v8337_v51 }
  0xaa   :  { %984 = vrot.lane.b32.xlu0 %v8475_v54, %s9146_s21  ;;  %v8497_v54 = vld [vmem:[%s14273_s0 + $0x162] ss:$2 sm:$0xff]  ;;  %360 = vst.msk [vmem:[#allocation3 + $0x38] sm:$0xff] %vm163_vm0, %v8356_v47 }
  0xab   :  { %986 = vrot.lane.b32.xlu1 %v8476_v55, %s9146_s21  ;;  %v8498_v55 = vld [vmem:[%s14273_s0 + $0x172] ss:$2 sm:$0xff] }
  0xac   :  { %v585_v59 = vpop.permute.xlu0 %584  ;;  %988 = vrot.lane.b32.xlu2 %v8477_v56, %s9146_s21  ;;  %v8339_v56 = vld [vmem:[%s14273_s0 + $0x350] ss:$2 sm:$0xff] }
  0xad   :  { %v587_v60 = vpop.permute.xlu1 %586  ;;  %753 = vst.msk [vmem:[#allocation2 + $0xa8] sm:$0xff] %vm731_vm1, %v585_v59 }
  0xae   :  { %754 = vst.msk [vmem:[#allocation2 + $0xb0] sm:$0xff] %vm731_vm1, %v587_v60  ;;  %v607_v62 = vpop.permute.xlu2 %606  ;;  %v8340_v60 = vld [vmem:[%s14273_s0 + $0x360] ss:$2 sm:$0xff] }
  0xaf   :  { %764 = vst.msk [vmem:[#allocation2 + $0x100] sm:$0xff] %vm731_vm1, %v607_v62  ;;  %v8499_v62 = vld [vmem:[%s14273_s0 + $0x182] ss:$2 sm:$0xff] }
  0xb0   :  { %217 = vst.msk [vmem:[#allocation2 + $0x1a8] sm:$0xff] %vm163_vm0, %v8339_v56  ;;  %v8359_v56 = vld [vmem:[%s14273_s0 + $0xa1] ss:$2 sm:$0xff] }
  0xb1   :  { %218 = vst.msk [vmem:[#allocation2 + $0x1b0] sm:$0xff] %vm163_vm0, %v8340_v60 }
  0xb2   :  { %990 = vrot.lane.b32.xlu0 %v8478_v63, %s9146_s21  ;;  %v8500_v63 = vld [vmem:[%s14273_s0 + $0x192] ss:$2 sm:$0xff]  ;;  %363 = vst.msk [vmem:[#allocation3 + $0x50] sm:$0xff] %vm163_vm0, %v8359_v56 }
  0xb3   :  { %992 = vrot.lane.b32.xlu1 %v8479_v0, %s9146_s21  ;;  %v8501_v0 = vld [vmem:[%s14273_s0 + $0x1a2] ss:$2 sm:$0xff] }
  0xb4   :  { %v591_v4 = vpop.permute.xlu0 %590  ;;  %994 = vrot.lane.b32.xlu2 %v8480_v1, %s9146_s21  ;;  %v8342_v1 = vld [vmem:[%s14273_s0 + $0x380] ss:$2 sm:$0xff] }
  0xb5   :  { %v593_v5 = vpop.permute.xlu1 %592  ;;  %756 = vst.msk [vmem:[#allocation2 + $0xc0] sm:$0xff] %vm731_vm1, %v591_v4 }
  0xb6   :  { %757 = vst.msk [vmem:[#allocation2 + $0xc8] sm:$0xff] %vm731_vm1, %v593_v5  ;;  %v613_v7 = vpop.permute.xlu2 %612  ;;  %v8343_v5 = vld [vmem:[%s14273_s0 + $0x390] ss:$2 sm:$0xff] }
  0xb7   :  { %767 = vst.msk [vmem:[#allocation2 + $0x118] sm:$0xff] %vm731_vm1, %v613_v7  ;;  %v8502_v7 = vld [vmem:[%s14273_s0 + $0x1b2] ss:$2 sm:$0xff] }
  0xb8   :  { %220 = vst.msk [vmem:[#allocation2 + $0x1c0] sm:$0xff] %vm163_vm0, %v8342_v1  ;;  %v8362_v1 = vld [vmem:[%s14273_s0 + $0xd1] ss:$2 sm:$0xff] }
  0xb9   :  { %221 = vst.msk [vmem:[#allocation2 + $0x1c8] sm:$0xff] %vm163_vm0, %v8343_v5 }
  0xba   :  { %996 = vrot.lane.b32.xlu0 %v8481_v8, %s9146_s21  ;;  %v8503_v8 = vld [vmem:[%s14273_s0 + $0x1c2] ss:$2 sm:$0xff]  ;;  %366 = vst.msk [vmem:[#allocation3 + $0x68] sm:$0xff] %vm163_vm0, %v8362_v1 }
  0xbb   :  { %998 = vrot.lane.b32.xlu1 %v8482_v9, %s9146_s21  ;;  %v8504_v9 = vld [vmem:[%s14273_s0 + $0x1d2] ss:$2 sm:$0xff] }
  0xbc   :  { %v597_v13 = vpop.permute.xlu0 %596  ;;  %1000 = vrot.lane.b32.xlu2 %v8483_v10, %s9146_s21  ;;  %v8345_v10 = vld [vmem:[%s14273_s0 + $0x3b0] ss:$2 sm:$0xff] }
  0xbd   :  { %v599_v14 = vpop.permute.xlu1 %598  ;;  %759 = vst.msk [vmem:[#allocation2 + $0xd8] sm:$0xff] %vm731_vm1, %v597_v13 }
  0xbe   :  { %760 = vst.msk [vmem:[#allocation2 + $0xe0] sm:$0xff] %vm731_vm1, %v599_v14  ;;  %v619_v16 = vpop.permute.xlu2 %618  ;;  %v8346_v14 = vld [vmem:[%s14273_s0 + $0x3c0] ss:$2 sm:$0xff] }
  0xbf   :  { %770 = vst.msk [vmem:[#allocation2 + $0x130] sm:$0xff] %vm731_vm1, %v619_v16  ;;  %v8505_v16 = vld [vmem:[%s14273_s0 + $0x1e2] ss:$2 sm:$0xff] }
  0xc0   :  { %223 = vst.msk [vmem:[#allocation2 + $0x1d8] sm:$0xff] %vm163_vm0, %v8345_v10  ;;  %v8365_v10 = vld [vmem:[%s14273_s0 + $0x101] ss:$2 sm:$0xff] }
  0xc1   :  { %224 = vst.msk [vmem:[#allocation2 + $0x1e0] sm:$0xff] %vm163_vm0, %v8346_v14 }
  0xc2   :  { %1002 = vrot.lane.b32.xlu0 %v8484_v17, %s9146_s21  ;;  %v8506_v17 = vld [vmem:[%s14273_s0 + $0x1f2] ss:$2 sm:$0xff]  ;;  %369 = vst.msk [vmem:[#allocation3 + $0x80] sm:$0xff] %vm163_vm0, %v8365_v10 }
  0xc3   :  { %1004 = vrot.lane.b32.xlu1 %v8485_v18, %s9146_s21  ;;  %v8507_v18 = vld [vmem:[%s14273_s0 + $0x202] ss:$2 sm:$0xff] }
  0xc4   :  { %v603_v22 = vpop.permute.xlu0 %602  ;;  %1006 = vrot.lane.b32.xlu2 %v8486_v19, %s9146_s21  ;;  %v8348_v19 = vld [vmem:[%s14273_s0 + $0x3e0] ss:$2 sm:$0xff] }
  0xc5   :  { %v605_v23 = vpop.permute.xlu1 %604  ;;  %762 = vst.msk [vmem:[#allocation2 + $0xf0] sm:$0xff] %vm731_vm1, %v603_v22 }
  0xc6   :  { %763 = vst.msk [vmem:[#allocation2 + $0xf8] sm:$0xff] %vm731_vm1, %v605_v23  ;;  %v625_v25 = vpop.permute.xlu2 %624  ;;  %v8349_v23 = vld [vmem:[%s14273_s0 + $0x1] ss:$2 sm:$0xff] }
  0xc7   :  { %773 = vst.msk [vmem:[#allocation2 + $0x148] sm:$0xff] %vm731_vm1, %v625_v25  ;;  %v8508_v25 = vld [vmem:[%s14273_s0 + $0x212] ss:$2 sm:$0xff] }
  0xc8   :  { %226 = vst.msk [vmem:[#allocation2 + $0x1f0] sm:$0xff] %vm163_vm0, %v8348_v19  ;;  %v8368_v19 = vld [vmem:[%s14273_s0 + $0x131] ss:$2 sm:$0xff] }
  0xc9   :  { %353 = vst.msk [vmem:[#allocation3] sm:$0xff] %vm163_vm0, %v8349_v23 }
  0xca   :  { %1008 = vrot.lane.b32.xlu0 %v8487_v26, %s9146_s21  ;;  %v8509_v26 = vld [vmem:[%s14273_s0 + $0x222] ss:$2 sm:$0xff]  ;;  %372 = vst.msk [vmem:[#allocation3 + $0x98] sm:$0xff] %vm163_vm0, %v8368_v19 }
  0xcb   :  { %1010 = vrot.lane.b32.xlu1 %v8488_v27, %s9146_s21  ;;  %v8510_v27 = vld [vmem:[%s14273_s0 + $0x232] ss:$2 sm:$0xff] }
  0xcc   :  { %v609_v31 = vpop.permute.xlu0 %608  ;;  %1012 = vrot.lane.b32.xlu2 %v8489_v28, %s9146_s21  ;;  %v8351_v28 = vld [vmem:[%s14273_s0 + $0x21] ss:$2 sm:$0xff] }
  0xcd   :  { %v611_v32 = vpop.permute.xlu1 %610  ;;  %765 = vst.msk [vmem:[#allocation2 + $0x108] sm:$0xff] %vm731_vm1, %v609_v31 }
  0xce   :  { %766 = vst.msk [vmem:[#allocation2 + $0x110] sm:$0xff] %vm731_vm1, %v611_v32  ;;  %v631_v34 = vpop.permute.xlu2 %630  ;;  %v8352_v32 = vld [vmem:[%s14273_s0 + $0x31] ss:$2 sm:$0xff] }
  0xcf   :  { %776 = vst.msk [vmem:[#allocation2 + $0x160] sm:$0xff] %vm731_vm1, %v631_v34  ;;  %v8511_v34 = vld [vmem:[%s14273_s0 + $0x242] ss:$2 sm:$0xff] }
  0xd0   :  { %355 = vst.msk [vmem:[#allocation3 + $0x10] sm:$0xff] %vm163_vm0, %v8351_v28  ;;  %v8371_v28 = vld [vmem:[%s14273_s0 + $0x161] ss:$2 sm:$0xff] }
  0xd1   :  { %356 = vst.msk [vmem:[#allocation3 + $0x18] sm:$0xff] %vm163_vm0, %v8352_v32 }
  0xd2   :  { %1014 = vrot.lane.b32.xlu0 %v8490_v35, %s9146_s21  ;;  %v8512_v35 = vld [vmem:[%s14273_s0 + $0x252] ss:$2 sm:$0xff]  ;;  %375 = vst.msk [vmem:[#allocation3 + $0xb0] sm:$0xff] %vm163_vm0, %v8371_v28 }
  0xd3   :  { %1016 = vrot.lane.b32.xlu1 %v8491_v36, %s9146_s21  ;;  %v8513_v36 = vld [vmem:[%s14273_s0 + $0x262] ss:$2 sm:$0xff] }
  0xd4   :  { %v615_v40 = vpop.permute.xlu0 %614  ;;  %1018 = vrot.lane.b32.xlu2 %v8492_v37, %s9146_s21  ;;  %v8354_v37 = vld [vmem:[%s14273_s0 + $0x51] ss:$2 sm:$0xff] }
  0xd5   :  { %v617_v41 = vpop.permute.xlu1 %616  ;;  %768 = vst.msk [vmem:[#allocation2 + $0x120] sm:$0xff] %vm731_vm1, %v615_v40 }
  0xd6   :  { %769 = vst.msk [vmem:[#allocation2 + $0x128] sm:$0xff] %vm731_vm1, %v617_v41  ;;  %v637_v43 = vpop.permute.xlu2 %636  ;;  %v8355_v41 = vld [vmem:[%s14273_s0 + $0x61] ss:$2 sm:$0xff] }
  0xd7   :  { %779 = vst.msk [vmem:[#allocation2 + $0x178] sm:$0xff] %vm731_vm1, %v637_v43  ;;  %v8514_v43 = vld [vmem:[%s14273_s0 + $0x272] ss:$2 sm:$0xff] }
  0xd8   :  { %358 = vst.msk [vmem:[#allocation3 + $0x28] sm:$0xff] %vm163_vm0, %v8354_v37  ;;  %v8374_v37 = vld [vmem:[%s14273_s0 + $0x191] ss:$2 sm:$0xff] }
  0xd9   :  { %359 = vst.msk [vmem:[#allocation3 + $0x30] sm:$0xff] %vm163_vm0, %v8355_v41 }
  0xda   :  { %1020 = vrot.lane.b32.xlu0 %v8493_v44, %s9146_s21  ;;  %v8515_v44 = vld [vmem:[%s14273_s0 + $0x282] ss:$2 sm:$0xff]  ;;  %378 = vst.msk [vmem:[#allocation3 + $0xc8] sm:$0xff] %vm163_vm0, %v8374_v37 }
  0xdb   :  { %1022 = vrot.lane.b32.xlu1 %v8494_v45, %s9146_s21  ;;  %v8516_v45 = vld [vmem:[%s14273_s0 + $0x292] ss:$2 sm:$0xff] }
  0xdc   :  { %v621_v49 = vpop.permute.xlu0 %620  ;;  %1024 = vrot.lane.b32.xlu2 %v8495_v46, %s9146_s21  ;;  %v8357_v46 = vld [vmem:[%s14273_s0 + $0x81] ss:$2 sm:$0xff] }
  0xdd   :  { %v623_v50 = vpop.permute.xlu1 %622  ;;  %771 = vst.msk [vmem:[#allocation2 + $0x138] sm:$0xff] %vm731_vm1, %v621_v49 }
  0xde   :  { %772 = vst.msk [vmem:[#allocation2 + $0x140] sm:$0xff] %vm731_vm1, %v623_v50  ;;  %v643_v52 = vpop.permute.xlu2 %642  ;;  %v8358_v50 = vld [vmem:[%s14273_s0 + $0x91] ss:$2 sm:$0xff] }
  0xdf   :  { %782 = vst.msk [vmem:[#allocation2 + $0x190] sm:$0xff] %vm731_vm1, %v643_v52  ;;  %v8517_v52 = vld [vmem:[%s14273_s0 + $0x2a2] ss:$2 sm:$0xff] }
  0xe0   :  { %361 = vst.msk [vmem:[#allocation3 + $0x40] sm:$0xff] %vm163_vm0, %v8357_v46  ;;  %v8377_v46 = vld [vmem:[%s14273_s0 + $0x1c1] ss:$2 sm:$0xff] }
  0xe1   :  { %362 = vst.msk [vmem:[#allocation3 + $0x48] sm:$0xff] %vm163_vm0, %v8358_v50 }
  0xe2   :  { %1026 = vrot.lane.b32.xlu0 %v8496_v53, %s9146_s21  ;;  %v8518_v53 = vld [vmem:[%s14273_s0 + $0x2b2] ss:$2 sm:$0xff]  ;;  %381 = vst.msk [vmem:[#allocation3 + $0xe0] sm:$0xff] %vm163_vm0, %v8377_v46 }
  0xe3   :  { %1028 = vrot.lane.b32.xlu1 %v8497_v54, %s9146_s21  ;;  %v8519_v54 = vld [vmem:[%s14273_s0 + $0x2c2] ss:$2 sm:$0xff] }
  0xe4   :  { %v627_v58 = vpop.permute.xlu0 %626  ;;  %1030 = vrot.lane.b32.xlu2 %v8498_v55, %s9146_s21  ;;  %v8360_v55 = vld [vmem:[%s14273_s0 + $0xb1] ss:$2 sm:$0xff] }
  0xe5   :  { %v629_v59 = vpop.permute.xlu1 %628  ;;  %774 = vst.msk [vmem:[#allocation2 + $0x150] sm:$0xff] %vm731_vm1, %v627_v58 }
  0xe6   :  { %775 = vst.msk [vmem:[#allocation2 + $0x158] sm:$0xff] %vm731_vm1, %v629_v59  ;;  %v649_v61 = vpop.permute.xlu2 %648  ;;  %v8361_v59 = vld [vmem:[%s14273_s0 + $0xc1] ss:$2 sm:$0xff] }
  0xe7   :  { %785 = vst.msk [vmem:[#allocation2 + $0x1a8] sm:$0xff] %vm731_vm1, %v649_v61  ;;  %v8520_v61 = vld [vmem:[%s14273_s0 + $0x2d2] ss:$2 sm:$0xff] }
  0xe8   :  { %364 = vst.msk [vmem:[#allocation3 + $0x58] sm:$0xff] %vm163_vm0, %v8360_v55  ;;  %v8380_v55 = vld [vmem:[%s14273_s0 + $0x1f1] ss:$2 sm:$0xff] }
  0xe9   :  { %365 = vst.msk [vmem:[#allocation3 + $0x60] sm:$0xff] %vm163_vm0, %v8361_v59 }
  0xea   :  { %1032 = vrot.lane.b32.xlu0 %v8499_v62, %s9146_s21  ;;  %v8521_v62 = vld [vmem:[%s14273_s0 + $0x2e2] ss:$2 sm:$0xff]  ;;  %384 = vst.msk [vmem:[#allocation3 + $0xf8] sm:$0xff] %vm163_vm0, %v8380_v55 }
  0xeb   :  { %1034 = vrot.lane.b32.xlu1 %v8500_v63, %s9146_s21  ;;  %v8522_v63 = vld [vmem:[%s14273_s0 + $0x2f2] ss:$2 sm:$0xff] }
  0xec   :  { %v633_v3 = vpop.permute.xlu0 %632  ;;  %1036 = vrot.lane.b32.xlu2 %v8501_v0, %s9146_s21  ;;  %v8363_v0 = vld [vmem:[%s14273_s0 + $0xe1] ss:$2 sm:$0xff] }
  0xed   :  { %v635_v4 = vpop.permute.xlu1 %634  ;;  %777 = vst.msk [vmem:[#allocation2 + $0x168] sm:$0xff] %vm731_vm1, %v633_v3 }
  0xee   :  { %778 = vst.msk [vmem:[#allocation2 + $0x170] sm:$0xff] %vm731_vm1, %v635_v4  ;;  %v655_v6 = vpop.permute.xlu2 %654  ;;  %v8364_v4 = vld [vmem:[%s14273_s0 + $0xf1] ss:$2 sm:$0xff] }
  0xef   :  { %788 = vst.msk [vmem:[#allocation2 + $0x1c0] sm:$0xff] %vm731_vm1, %v655_v6  ;;  %v8523_v6 = vld [vmem:[%s14273_s0 + $0x302] ss:$2 sm:$0xff] }
  0xf0   :  { %367 = vst.msk [vmem:[#allocation3 + $0x70] sm:$0xff] %vm163_vm0, %v8363_v0  ;;  %v8383_v0 = vld [vmem:[%s14273_s0 + $0x221] ss:$2 sm:$0xff] }
  0xf1   :  { %368 = vst.msk [vmem:[#allocation3 + $0x78] sm:$0xff] %vm163_vm0, %v8364_v4 }
  0xf2   :  { %1038 = vrot.lane.b32.xlu0 %v8502_v7, %s9146_s21  ;;  %v8524_v7 = vld [vmem:[%s14273_s0 + $0x312] ss:$2 sm:$0xff]  ;;  %387 = vst.msk [vmem:[#allocation3 + $0x110] sm:$0xff] %vm163_vm0, %v8383_v0 }
  0xf3   :  { %1040 = vrot.lane.b32.xlu1 %v8503_v8, %s9146_s21  ;;  %v8525_v8 = vld [vmem:[%s14273_s0 + $0x322] ss:$2 sm:$0xff] }
  0xf4   :  { %v639_v12 = vpop.permute.xlu0 %638  ;;  %1042 = vrot.lane.b32.xlu2 %v8504_v9, %s9146_s21  ;;  %v8366_v9 = vld [vmem:[%s14273_s0 + $0x111] ss:$2 sm:$0xff] }
  0xf5   :  { %v641_v13 = vpop.permute.xlu1 %640  ;;  %780 = vst.msk [vmem:[#allocation2 + $0x180] sm:$0xff] %vm731_vm1, %v639_v12 }
  0xf6   :  { %781 = vst.msk [vmem:[#allocation2 + $0x188] sm:$0xff] %vm731_vm1, %v641_v13  ;;  %v661_v15 = vpop.permute.xlu2 %660  ;;  %v8367_v13 = vld [vmem:[%s14273_s0 + $0x121] ss:$2 sm:$0xff] }
  0xf7   :  { %791 = vst.msk [vmem:[#allocation2 + $0x1d8] sm:$0xff] %vm731_vm1, %v661_v15  ;;  %v8526_v15 = vld [vmem:[%s14273_s0 + $0x332] ss:$2 sm:$0xff] }
  0xf8   :  { %370 = vst.msk [vmem:[#allocation3 + $0x88] sm:$0xff] %vm163_vm0, %v8366_v9  ;;  %v8386_v9 = vld [vmem:[%s14273_s0 + $0x251] ss:$2 sm:$0xff] }
  0xf9   :  { %371 = vst.msk [vmem:[#allocation3 + $0x90] sm:$0xff] %vm163_vm0, %v8367_v13 }
  0xfa   :  { %1044 = vrot.lane.b32.xlu0 %v8505_v16, %s9146_s21  ;;  %v8527_v16 = vld [vmem:[%s14273_s0 + $0x342] ss:$2 sm:$0xff]  ;;  %390 = vst.msk [vmem:[#allocation3 + $0x128] sm:$0xff] %vm163_vm0, %v8386_v9 }
  0xfb   :  { %1046 = vrot.lane.b32.xlu1 %v8506_v17, %s9146_s21  ;;  %v8528_v17 = vld [vmem:[%s14273_s0 + $0x352] ss:$2 sm:$0xff] }
  0xfc   :  { %v645_v21 = vpop.permute.xlu0 %644  ;;  %1048 = vrot.lane.b32.xlu2 %v8507_v18, %s9146_s21  ;;  %v8369_v18 = vld [vmem:[%s14273_s0 + $0x141] ss:$2 sm:$0xff] }
  0xfd   :  { %v647_v22 = vpop.permute.xlu1 %646  ;;  %783 = vst.msk [vmem:[#allocation2 + $0x198] sm:$0xff] %vm731_vm1, %v645_v21 }
  0xfe   :  { %784 = vst.msk [vmem:[#allocation2 + $0x1a0] sm:$0xff] %vm731_vm1, %v647_v22  ;;  %v667_v24 = vpop.permute.xlu2 %666  ;;  %v8370_v22 = vld [vmem:[%s14273_s0 + $0x151] ss:$2 sm:$0xff] }
  0xff   :  { %794 = vst.msk [vmem:[#allocation2 + $0x1f0] sm:$0xff] %vm731_vm1, %v667_v24  ;;  %v8529_v24 = vld [vmem:[%s14273_s0 + $0x362] ss:$2 sm:$0xff] }
 0x100   :  { %373 = vst.msk [vmem:[#allocation3 + $0xa0] sm:$0xff] %vm163_vm0, %v8369_v18  ;;  %v8389_v18 = vld [vmem:[%s14273_s0 + $0x281] ss:$2 sm:$0xff] }
 0x101   :  { %374 = vst.msk [vmem:[#allocation3 + $0xa8] sm:$0xff] %vm163_vm0, %v8370_v22 }
 0x102   :  { %1050 = vrot.lane.b32.xlu0 %v8508_v25, %s9146_s21  ;;  %v8530_v25 = vld [vmem:[%s14273_s0 + $0x372] ss:$2 sm:$0xff]  ;;  %393 = vst.msk [vmem:[#allocation3 + $0x140] sm:$0xff] %vm163_vm0, %v8389_v18 }
 0x103   :  { %1052 = vrot.lane.b32.xlu1 %v8509_v26, %s9146_s21  ;;  %v8531_v26 = vld [vmem:[%s14273_s0 + $0x382] ss:$2 sm:$0xff] }
 0x104   :  { %v651_v30 = vpop.permute.xlu0 %650  ;;  %1054 = vrot.lane.b32.xlu2 %v8510_v27, %s9146_s21  ;;  %v8372_v27 = vld [vmem:[%s14273_s0 + $0x171] ss:$2 sm:$0xff] }
 0x105   :  { %v653_v31 = vpop.permute.xlu1 %652  ;;  %786 = vst.msk [vmem:[#allocation2 + $0x1b0] sm:$0xff] %vm731_vm1, %v651_v30 }
 0x106   :  { %787 = vst.msk [vmem:[#allocation2 + $0x1b8] sm:$0xff] %vm731_vm1, %v653_v31  ;;  %v989_v33 = vpop.permute.xlu2 %988  ;;  %v8373_v31 = vld [vmem:[%s14273_s0 + $0x181] ss:$2 sm:$0xff] }
 0x107   :  { %1175 = vst.msk [vmem:[#allocation3 + $0x10] sm:$0xff] %vm731_vm1, %v989_v33  ;;  %v8532_v33 = vld [vmem:[%s14273_s0 + $0x392] ss:$2 sm:$0xff] }
 0x108   :  { %376 = vst.msk [vmem:[#allocation3 + $0xb8] sm:$0xff] %vm163_vm0, %v8372_v27  ;;  %v8392_v27 = vld [vmem:[%s14273_s0 + $0x2b1] ss:$2 sm:$0xff] }
 0x109   :  { %377 = vst.msk [vmem:[#allocation3 + $0xc0] sm:$0xff] %vm163_vm0, %v8373_v31 }
 0x10a   :  { %1056 = vrot.lane.b32.xlu0 %v8511_v34, %s9146_s21  ;;  %v8533_v34 = vld [vmem:[%s14273_s0 + $0x3a2] ss:$2 sm:$0xff]  ;;  %396 = vst.msk [vmem:[#allocation3 + $0x158] sm:$0xff] %vm163_vm0, %v8392_v27 }
 0x10b   :  { %1058 = vrot.lane.b32.xlu1 %v8512_v35, %s9146_s21  ;;  %v8534_v35 = vld [vmem:[%s14273_s0 + $0x3b2] ss:$2 sm:$0xff]  ;;  %v8574_v27 = vld [vmem:[%s14273_s0 + $0x242] ss:$2 sm:$0xff] }
 0x10c   :  { %v657_v39 = vpop.permute.xlu0 %656  ;;  %1060 = vrot.lane.b32.xlu2 %v8513_v36, %s9146_s21  ;;  %v8375_v36 = vld [vmem:[%s14273_s0 + $0x1a1] ss:$2 sm:$0xff] }
 0x10d   :  { %v659_v40 = vpop.permute.xlu1 %658  ;;  %789 = vst.msk [vmem:[#allocation2 + $0x1c8] sm:$0xff] %vm731_vm1, %v657_v39 }
 0x10e   :  { %790 = vst.msk [vmem:[#allocation2 + $0x1d0] sm:$0xff] %vm731_vm1, %v659_v40  ;;  %v995_v42 = vpop.permute.xlu2 %994  ;;  %v8376_v40 = vld [vmem:[%s14273_s0 + $0x1b1] ss:$2 sm:$0xff] }
 0x10f   :  { %1178 = vst.msk [vmem:[#allocation3 + $0x28] sm:$0xff] %vm731_vm1, %v995_v42  ;;  %v8535_v42 = vld [vmem:[%s14273_s0 + $0x3c2] ss:$2 sm:$0xff] }
 0x110   :  { %379 = vst.msk [vmem:[#allocation3 + $0xd0] sm:$0xff] %vm163_vm0, %v8375_v36  ;;  %v8395_v36 = vld [vmem:[%s14273_s0 + $0x2e1] ss:$2 sm:$0xff] }
 0x111   :  { %380 = vst.msk [vmem:[#allocation3 + $0xd8] sm:$0xff] %vm163_vm0, %v8376_v40 }
 0x112   :  { %1062 = vrot.lane.b32.xlu0 %v8514_v43, %s9146_s21  ;;  %v8536_v43 = vld [vmem:[%s14273_s0 + $0x3d2] ss:$2 sm:$0xff]  ;;  %399 = vst.msk [vmem:[#allocation3 + $0x170] sm:$0xff] %vm163_vm0, %v8395_v36 }
 0x113   :  { %1064 = vrot.lane.b32.xlu1 %v8515_v44, %s9146_s21  ;;  %v8537_v44 = vld [vmem:[%s14273_s0 + $0x3e2] ss:$2 sm:$0xff] }
 0x114   :  { %v663_v48 = vpop.permute.xlu0 %662  ;;  %1066 = vrot.lane.b32.xlu2 %v8516_v45, %s9146_s21  ;;  %v8378_v45 = vld [vmem:[%s14273_s0 + $0x1d1] ss:$2 sm:$0xff] }
 0x115   :  { %v665_v49 = vpop.permute.xlu1 %664  ;;  %792 = vst.msk [vmem:[#allocation2 + $0x1e0] sm:$0xff] %vm731_vm1, %v663_v48 }
 0x116   :  { %793 = vst.msk [vmem:[#allocation2 + $0x1e8] sm:$0xff] %vm731_vm1, %v665_v49  ;;  %v1001_v51 = vpop.permute.xlu2 %1000  ;;  %v8379_v49 = vld [vmem:[%s14273_s0 + $0x1e1] ss:$2 sm:$0xff] }
 0x117   :  { %1181 = vst.msk [vmem:[#allocation3 + $0x40] sm:$0xff] %vm731_vm1, %v1001_v51  ;;  %v8538_v51 = vld [vmem:[%s14273_s0 + $0x2] ss:$2 sm:$0xff] }
 0x118   :  { %382 = vst.msk [vmem:[#allocation3 + $0xe8] sm:$0xff] %vm163_vm0, %v8378_v45  ;;  %v8398_v45 = vld [vmem:[%s14273_s0 + $0x311] ss:$2 sm:$0xff] }
 0x119   :  { %383 = vst.msk [vmem:[#allocation3 + $0xf0] sm:$0xff] %vm163_vm0, %v8379_v49 }
 0x11a   :  { %1068 = vrot.lane.b32.xlu0 %v8517_v52, %s9146_s21  ;;  %v8539_v52 = vld [vmem:[%s14273_s0 + $0x12] ss:$2 sm:$0xff]  ;;  %402 = vst.msk [vmem:[#allocation3 + $0x188] sm:$0xff] %vm163_vm0, %v8398_v45 }
 0x11b   :  { %1070 = vrot.lane.b32.xlu1 %v8518_v53, %s9146_s21  ;;  %v8540_v53 = vld [vmem:[%s14273_s0 + $0x22] ss:$2 sm:$0xff]  ;;  %v8583_v45 = vld [vmem:[%s14273_s0 + $0x2d2] ss:$2 sm:$0xff] }
 0x11c   :  { %v985_v57 = vpop.permute.xlu0 %984  ;;  %1072 = vrot.lane.b32.xlu2 %v8519_v54, %s9146_s21  ;;  %v8381_v54 = vld [vmem:[%s14273_s0 + $0x201] ss:$2 sm:$0xff] }
 0x11d   :  { %v987_v58 = vpop.permute.xlu1 %986  ;;  %1173 = vst.msk [vmem:[#allocation3] sm:$0xff] %vm731_vm1, %v985_v57 }
 0x11e   :  { %1174 = vst.msk [vmem:[#allocation3 + $0x8] sm:$0xff] %vm731_vm1, %v987_v58  ;;  %v1007_v60 = vpop.permute.xlu2 %1006  ;;  %v8382_v58 = vld [vmem:[%s14273_s0 + $0x211] ss:$2 sm:$0xff] }
 0x11f   :  { %1184 = vst.msk [vmem:[#allocation3 + $0x58] sm:$0xff] %vm731_vm1, %v1007_v60  ;;  %v8541_v60 = vld [vmem:[%s14273_s0 + $0x32] ss:$2 sm:$0xff] }
 0x120   :  { %385 = vst.msk [vmem:[#allocation3 + $0x100] sm:$0xff] %vm163_vm0, %v8381_v54  ;;  %v8401_v54 = vld [vmem:[%s14273_s0 + $0x341] ss:$2 sm:$0xff] }
 0x121   :  { %386 = vst.msk [vmem:[#allocation3 + $0x108] sm:$0xff] %vm163_vm0, %v8382_v58 }
 0x122   :  { %1074 = vrot.lane.b32.xlu0 %v8520_v61, %s9146_s21  ;;  %v8542_v61 = vld [vmem:[%s14273_s0 + $0x42] ss:$2 sm:$0xff]  ;;  %405 = vst.msk [vmem:[#allocation3 + $0x1a0] sm:$0xff] %vm163_vm0, %v8401_v54 }
 0x123   :  { %1076 = vrot.lane.b32.xlu1 %v8521_v62, %s9146_s21  ;;  %v8543_v62 = vld [vmem:[%s14273_s0 + $0x52] ss:$2 sm:$0xff] }
 0x124   :  { %v991_v2 = vpop.permute.xlu0 %990  ;;  %1078 = vrot.lane.b32.xlu2 %v8522_v63, %s9146_s21  ;;  %v8384_v63 = vld [vmem:[%s14273_s0 + $0x231] ss:$2 sm:$0xff] }
 0x125   :  { %v993_v3 = vpop.permute.xlu1 %992  ;;  %1176 = vst.msk [vmem:[#allocation3 + $0x18] sm:$0xff] %vm731_vm1, %v991_v2 }
 0x126   :  { %1177 = vst.msk [vmem:[#allocation3 + $0x20] sm:$0xff] %vm731_vm1, %v993_v3  ;;  %v1013_v5 = vpop.permute.xlu2 %1012  ;;  %v8385_v3 = vld [vmem:[%s14273_s0 + $0x241] ss:$2 sm:$0xff] }
 0x127   :  { %1187 = vst.msk [vmem:[#allocation3 + $0x70] sm:$0xff] %vm731_vm1, %v1013_v5  ;;  %v8544_v5 = vld [vmem:[%s14273_s0 + $0x62] ss:$2 sm:$0xff] }
 0x128   :  { %388 = vst.msk [vmem:[#allocation3 + $0x118] sm:$0xff] %vm163_vm0, %v8384_v63  ;;  %v8404_v63 = vld [vmem:[%s14273_s0 + $0x371] ss:$2 sm:$0xff] }
 0x129   :  { %389 = vst.msk [vmem:[#allocation3 + $0x120] sm:$0xff] %vm163_vm0, %v8385_v3 }
 0x12a   :  { %1080 = vrot.lane.b32.xlu0 %v8523_v6, %s9146_s21  ;;  %v8545_v6 = vld [vmem:[%s14273_s0 + $0x72] ss:$2 sm:$0xff]  ;;  %408 = vst.msk [vmem:[#allocation3 + $0x1b8] sm:$0xff] %vm163_vm0, %v8404_v63  ;;  %v8592_v63 = vld [vmem:[%s14273_s0 + $0x362] ss:$2 sm:$0xff] }
 0x12b   :  { %1082 = vrot.lane.b32.xlu1 %v8524_v7, %s9146_s21  ;;  %v8546_v7 = vld [vmem:[%s14273_s0 + $0x82] ss:$2 sm:$0xff] }
 0x12c   :  { %v997_v11 = vpop.permute.xlu0 %996  ;;  %1084 = vrot.lane.b32.xlu2 %v8525_v8, %s9146_s21  ;;  %v8387_v8 = vld [vmem:[%s14273_s0 + $0x261] ss:$2 sm:$0xff] }
 0x12d   :  { %v999_v12 = vpop.permute.xlu1 %998  ;;  %1179 = vst.msk [vmem:[#allocation3 + $0x30] sm:$0xff] %vm731_vm1, %v997_v11 }
 0x12e   :  { %1180 = vst.msk [vmem:[#allocation3 + $0x38] sm:$0xff] %vm731_vm1, %v999_v12  ;;  %v1019_v14 = vpop.permute.xlu2 %1018  ;;  %v8388_v12 = vld [vmem:[%s14273_s0 + $0x271] ss:$2 sm:$0xff] }
 0x12f   :  { %1190 = vst.msk [vmem:[#allocation3 + $0x88] sm:$0xff] %vm731_vm1, %v1019_v14  ;;  %v8547_v14 = vld [vmem:[%s14273_s0 + $0x92] ss:$2 sm:$0xff] }
 0x130   :  { %391 = vst.msk [vmem:[#allocation3 + $0x130] sm:$0xff] %vm163_vm0, %v8387_v8  ;;  %v8407_v8 = vld [vmem:[%s14273_s0 + $0x3a1] ss:$2 sm:$0xff] }
 0x131   :  { %392 = vst.msk [vmem:[#allocation3 + $0x138] sm:$0xff] %vm163_vm0, %v8388_v12 }
 0x132   :  { %1086 = vrot.lane.b32.xlu0 %v8526_v15, %s9146_s21  ;;  %v8548_v15 = vld [vmem:[%s14273_s0 + $0xa2] ss:$2 sm:$0xff]  ;;  %411 = vst.msk [vmem:[#allocation3 + $0x1d0] sm:$0xff] %vm163_vm0, %v8407_v8 }
 0x133   :  { %1088 = vrot.lane.b32.xlu1 %v8527_v16, %s9146_s21  ;;  %v8549_v16 = vld [vmem:[%s14273_s0 + $0xb2] ss:$2 sm:$0xff] }
 0x134   :  { %v1003_v20 = vpop.permute.xlu0 %1002  ;;  %1090 = vrot.lane.b32.xlu2 %v8528_v17, %s9146_s21  ;;  %v8390_v17 = vld [vmem:[%s14273_s0 + $0x291] ss:$2 sm:$0xff] }
 0x135   :  { %v1005_v21 = vpop.permute.xlu1 %1004  ;;  %1182 = vst.msk [vmem:[#allocation3 + $0x48] sm:$0xff] %vm731_vm1, %v1003_v20 }
 0x136   :  { %1183 = vst.msk [vmem:[#allocation3 + $0x50] sm:$0xff] %vm731_vm1, %v1005_v21  ;;  %v1025_v23 = vpop.permute.xlu2 %1024  ;;  %v8391_v21 = vld [vmem:[%s14273_s0 + $0x2a1] ss:$2 sm:$0xff] }
 0x137   :  { %1193 = vst.msk [vmem:[#allocation3 + $0xa0] sm:$0xff] %vm731_vm1, %v1025_v23  ;;  %v8550_v23 = vld [vmem:[%s14273_s0 + $0xc2] ss:$2 sm:$0xff] }
 0x138   :  { %394 = vst.msk [vmem:[#allocation3 + $0x148] sm:$0xff] %vm163_vm0, %v8390_v17  ;;  %v8410_v17 = vld [vmem:[%s14273_s0 + $0x3d1] ss:$2 sm:$0xff] }
 0x139   :  { %395 = vst.msk [vmem:[#allocation3 + $0x150] sm:$0xff] %vm163_vm0, %v8391_v21  ;;  %v8571_v21 = vld [vmem:[%s14273_s0 + $0x212] ss:$2 sm:$0xff] }
 0x13a   :  { %1092 = vrot.lane.b32.xlu0 %v8529_v24, %s9146_s21  ;;  %v8551_v24 = vld [vmem:[%s14273_s0 + $0xd2] ss:$2 sm:$0xff]  ;;  %414 = vst.msk [vmem:[#allocation3 + $0x1e8] sm:$0xff] %vm163_vm0, %v8410_v17  ;;  %v8601_v17 = vld [vmem:[%s14273_s0 + $0x3] ss:$2 sm:$0xff] }
 0x13b   :  { %1094 = vrot.lane.b32.xlu1 %v8530_v25, %s9146_s21  ;;  %v8552_v25 = vld [vmem:[%s14273_s0 + $0xe2] ss:$2 sm:$0xff] }
 0x13c   :  { %v1009_v29 = vpop.permute.xlu0 %1008  ;;  %1096 = vrot.lane.b32.xlu2 %v8531_v26, %s9146_s21  ;;  %v8393_v26 = vld [vmem:[%s14273_s0 + $0x2c1] ss:$2 sm:$0xff] }
 0x13d   :  { %v1011_v30 = vpop.permute.xlu1 %1010  ;;  %1185 = vst.msk [vmem:[#allocation3 + $0x60] sm:$0xff] %vm731_vm1, %v1009_v29 }
 0x13e   :  { %1186 = vst.msk [vmem:[#allocation3 + $0x68] sm:$0xff] %vm731_vm1, %v1011_v30  ;;  %v1031_v32 = vpop.permute.xlu2 %1030  ;;  %v8394_v30 = vld [vmem:[%s14273_s0 + $0x2d1] ss:$2 sm:$0xff] }
 0x13f   :  { %1196 = vst.msk [vmem:[#allocation3 + $0xb8] sm:$0xff] %vm731_vm1, %v1031_v32  ;;  %v8553_v32 = vld [vmem:[%s14273_s0 + $0xf2] ss:$2 sm:$0xff] }
 0x140   :  { %397 = vst.msk [vmem:[#allocation3 + $0x160] sm:$0xff] %vm163_vm0, %v8393_v26 }
 0x141   :  { %398 = vst.msk [vmem:[#allocation3 + $0x168] sm:$0xff] %vm163_vm0, %v8394_v30 }
 0x142   :  { %1098 = vrot.lane.b32.xlu0 %v8532_v33, %s9146_s21  ;;  %v8554_v33 = vld [vmem:[%s14273_s0 + $0x102] ss:$2 sm:$0xff] }
 0x143   :  { %1100 = vrot.lane.b32.xlu1 %v8533_v34, %s9146_s21  ;;  %v8555_v34 = vld [vmem:[%s14273_s0 + $0x112] ss:$2 sm:$0xff] }
 0x144   :  { %v1015_v38 = vpop.permute.xlu0 %1014  ;;  %1102 = vrot.lane.b32.xlu2 %v8534_v35, %s9146_s21  ;;  %v8396_v35 = vld [vmem:[%s14273_s0 + $0x2f1] ss:$2 sm:$0xff] }
 0x145   :  { %v1017_v39 = vpop.permute.xlu1 %1016  ;;  %1188 = vst.msk [vmem:[#allocation3 + $0x78] sm:$0xff] %vm731_vm1, %v1015_v38 }
 0x146   :  { %1189 = vst.msk [vmem:[#allocation3 + $0x80] sm:$0xff] %vm731_vm1, %v1017_v39  ;;  %v1037_v41 = vpop.permute.xlu2 %1036  ;;  %v8397_v39 = vld [vmem:[%s14273_s0 + $0x301] ss:$2 sm:$0xff] }
 0x147   :  { %1199 = vst.msk [vmem:[#allocation3 + $0xd0] sm:$0xff] %vm731_vm1, %v1037_v41  ;;  %v8556_v41 = vld [vmem:[%s14273_s0 + $0x122] ss:$2 sm:$0xff] }
 0x148   :  { %400 = vst.msk [vmem:[#allocation3 + $0x178] sm:$0xff] %vm163_vm0, %v8396_v35  ;;  %v8579_v35 = vld [vmem:[%s14273_s0 + $0x292] ss:$2 sm:$0xff] }
 0x149   :  { %401 = vst.msk [vmem:[#allocation3 + $0x180] sm:$0xff] %vm163_vm0, %v8397_v39  ;;  %v8580_v39 = vld [vmem:[%s14273_s0 + $0x2a2] ss:$2 sm:$0xff] }
 0x14a   :  { %1104 = vrot.lane.b32.xlu0 %v8535_v42, %s9146_s21  ;;  %v8557_v42 = vld [vmem:[%s14273_s0 + $0x132] ss:$2 sm:$0xff] }
 0x14b   :  { %1106 = vrot.lane.b32.xlu1 %v8536_v43, %s9146_s21  ;;  %v8558_v43 = vld [vmem:[%s14273_s0 + $0x142] ss:$2 sm:$0xff] }
 0x14c   :  { %v1021_v47 = vpop.permute.xlu0 %1020  ;;  %1108 = vrot.lane.b32.xlu2 %v8537_v44, %s9146_s21  ;;  %v8399_v44 = vld [vmem:[%s14273_s0 + $0x321] ss:$2 sm:$0xff] }
 0x14d   :  { %v1023_v48 = vpop.permute.xlu1 %1022  ;;  %1191 = vst.msk [vmem:[#allocation3 + $0x90] sm:$0xff] %vm731_vm1, %v1021_v47 }
 0x14e   :  { %1192 = vst.msk [vmem:[#allocation3 + $0x98] sm:$0xff] %vm731_vm1, %v1023_v48  ;;  %v1043_v50 = vpop.permute.xlu2 %1042  ;;  %v8400_v48 = vld [vmem:[%s14273_s0 + $0x331] ss:$2 sm:$0xff] }
 0x14f   :  { %1202 = vst.msk [vmem:[#allocation3 + $0xe8] sm:$0xff] %vm731_vm1, %v1043_v50  ;;  %v8559_v50 = vld [vmem:[%s14273_s0 + $0x152] ss:$2 sm:$0xff] }
 0x150   :  { %403 = vst.msk [vmem:[#allocation3 + $0x190] sm:$0xff] %vm163_vm0, %v8399_v44 }
 0x151   :  { %404 = vst.msk [vmem:[#allocation3 + $0x198] sm:$0xff] %vm163_vm0, %v8400_v48 }
 0x152   :  { %1362 = vrot.lane.b32.xlu0 %v8538_v51, %s9147_s12  ;;  %v8560_v51 = vld [vmem:[%s14273_s0 + $0x162] ss:$2 sm:$0xff] }
 0x153   :  { %1364 = vrot.lane.b32.xlu1 %v8539_v52, %s9147_s12  ;;  %v8561_v52 = vld [vmem:[%s14273_s0 + $0x172] ss:$2 sm:$0xff] }
 0x154   :  { %v1027_v56 = vpop.permute.xlu0 %1026  ;;  %1366 = vrot.lane.b32.xlu2 %v8540_v53, %s9147_s12  ;;  %v8402_v53 = vld [vmem:[%s14273_s0 + $0x351] ss:$2 sm:$0xff] }
 0x155   :  { %v1029_v57 = vpop.permute.xlu1 %1028  ;;  %1194 = vst.msk [vmem:[#allocation3 + $0xa8] sm:$0xff] %vm731_vm1, %v1027_v56 }
 0x156   :  { %1195 = vst.msk [vmem:[#allocation3 + $0xb0] sm:$0xff] %vm731_vm1, %v1029_v57  ;;  %v1049_v59 = vpop.permute.xlu2 %1048  ;;  %v8403_v57 = vld [vmem:[%s14273_s0 + $0x361] ss:$2 sm:$0xff] }
 0x157   :  { %1205 = vst.msk [vmem:[#allocation3 + $0x100] sm:$0xff] %vm731_vm1, %v1049_v59  ;;  %v8562_v59 = vld [vmem:[%s14273_s0 + $0x182] ss:$2 sm:$0xff] }
 0x158   :  { %406 = vst.msk [vmem:[#allocation3 + $0x1a8] sm:$0xff] %vm163_vm0, %v8402_v53  ;;  %v8588_v53 = vld [vmem:[%s14273_s0 + $0x322] ss:$2 sm:$0xff] }
 0x159   :  { %407 = vst.msk [vmem:[#allocation3 + $0x1b0] sm:$0xff] %vm163_vm0, %v8403_v57  ;;  %v8589_v57 = vld [vmem:[%s14273_s0 + $0x332] ss:$2 sm:$0xff] }
 0x15a   :  { %1368 = vrot.lane.b32.xlu0 %v8541_v60, %s9147_s12  ;;  %v8563_v60 = vld [vmem:[%s14273_s0 + $0x192] ss:$2 sm:$0xff] }
 0x15b   :  { %1370 = vrot.lane.b32.xlu1 %v8542_v61, %s9147_s12  ;;  %v8564_v61 = vld [vmem:[%s14273_s0 + $0x1a2] ss:$2 sm:$0xff] }
 0x15c   :  { %v1033_v1 = vpop.permute.xlu0 %1032  ;;  %1372 = vrot.lane.b32.xlu2 %v8543_v62, %s9147_s12  ;;  %v8405_v62 = vld [vmem:[%s14273_s0 + $0x381] ss:$2 sm:$0xff] }
 0x15d   :  { %v1035_v2 = vpop.permute.xlu1 %1034  ;;  %1197 = vst.msk [vmem:[#allocation3 + $0xc0] sm:$0xff] %vm731_vm1, %v1033_v1 }
 0x15e   :  { %1198 = vst.msk [vmem:[#allocation3 + $0xc8] sm:$0xff] %vm731_vm1, %v1035_v2  ;;  %v1055_v4 = vpop.permute.xlu2 %1054  ;;  %v8406_v2 = vld [vmem:[%s14273_s0 + $0x391] ss:$2 sm:$0xff] }
 0x15f   :  { %1208 = vst.msk [vmem:[#allocation3 + $0x118] sm:$0xff] %vm731_vm1, %v1055_v4  ;;  %v8565_v4 = vld [vmem:[%s14273_s0 + $0x1b2] ss:$2 sm:$0xff] }
 0x160   :  { %409 = vst.msk [vmem:[#allocation3 + $0x1c0] sm:$0xff] %vm163_vm0, %v8405_v62 }
 0x161   :  { %410 = vst.msk [vmem:[#allocation3 + $0x1c8] sm:$0xff] %vm163_vm0, %v8406_v2 }
 0x162   :  { %1374 = vrot.lane.b32.xlu0 %v8544_v5, %s9147_s12  ;;  %v8566_v5 = vld [vmem:[%s14273_s0 + $0x1c2] ss:$2 sm:$0xff] }
 0x163   :  { %1376 = vrot.lane.b32.xlu1 %v8545_v6, %s9147_s12  ;;  %v8567_v6 = vld [vmem:[%s14273_s0 + $0x1d2] ss:$2 sm:$0xff] }
 0x164   :  { %v1039_v10 = vpop.permute.xlu0 %1038  ;;  %1378 = vrot.lane.b32.xlu2 %v8546_v7, %s9147_s12  ;;  %v8408_v7 = vld [vmem:[%s14273_s0 + $0x3b1] ss:$2 sm:$0xff] }
 0x165   :  { %v1041_v11 = vpop.permute.xlu1 %1040  ;;  %1200 = vst.msk [vmem:[#allocation3 + $0xd8] sm:$0xff] %vm731_vm1, %v1039_v10 }
 0x166   :  { %1201 = vst.msk [vmem:[#allocation3 + $0xe0] sm:$0xff] %vm731_vm1, %v1041_v11  ;;  %v1061_v13 = vpop.permute.xlu2 %1060  ;;  %v8409_v11 = vld [vmem:[%s14273_s0 + $0x3c1] ss:$2 sm:$0xff] }
 0x167   :  { %1211 = vst.msk [vmem:[#allocation3 + $0x130] sm:$0xff] %vm731_vm1, %v1061_v13  ;;  %v8568_v13 = vld [vmem:[%s14273_s0 + $0x1e2] ss:$2 sm:$0xff] }
 0x168   :  { %412 = vst.msk [vmem:[#allocation3 + $0x1d8] sm:$0xff] %vm163_vm0, %v8408_v7  ;;  %v8597_v7 = vld [vmem:[%s14273_s0 + $0x3b2] ss:$2 sm:$0xff] }
 0x169   :  { %413 = vst.msk [vmem:[#allocation3 + $0x1e0] sm:$0xff] %vm163_vm0, %v8409_v11  ;;  %v8598_v11 = vld [vmem:[%s14273_s0 + $0x3c2] ss:$2 sm:$0xff] }
 0x16a   :  { %1380 = vrot.lane.b32.xlu0 %v8547_v14, %s9147_s12  ;;  %v8569_v14 = vld [vmem:[%s14273_s0 + $0x1f2] ss:$2 sm:$0xff] }
 0x16b   :  { %1382 = vrot.lane.b32.xlu1 %v8548_v15, %s9147_s12  ;;  %v8570_v15 = vld [vmem:[%s14273_s0 + $0x202] ss:$2 sm:$0xff] }
 0x16c   :  { %v1045_v19 = vpop.permute.xlu0 %1044  ;;  %1384 = vrot.lane.b32.xlu2 %v8549_v16, %s9147_s12  ;;  %v8411_v16 = vld [vmem:[%s14273_s0 + $0x3e1] ss:$2 sm:$0xff] }
 0x16d   :  { %v1047_v20 = vpop.permute.xlu1 %1046  ;;  %1203 = vst.msk [vmem:[#allocation3 + $0xf0] sm:$0xff] %vm731_vm1, %v1045_v19 }
 0x16e   :  { %1204 = vst.msk [vmem:[#allocation3 + $0xf8] sm:$0xff] %vm731_vm1, %v1047_v20  ;;  %v1067_v22 = vpop.permute.xlu2 %1066 }
 0x16f   :  { %1214 = vst.msk [vmem:[#allocation3 + $0x148] sm:$0xff] %vm731_vm1, %v1067_v22  ;;  %v8572_v22 = vld [vmem:[%s14273_s0 + $0x222] ss:$2 sm:$0xff] }
 0x170   :  { %415 = vst.msk [vmem:[#allocation3 + $0x1f0] sm:$0xff] %vm163_vm0, %v8411_v16  ;;  %vm7228_vm0 = vcmask 392448  }
 0x172   :  { %1386 = vrot.lane.b32.xlu0 %v8550_v23, %s9147_s12  ;;  %v8573_v23 = vld [vmem:[%s14273_s0 + $0x232] ss:$2 sm:$0xff] }
 0x173   :  { %1388 = vrot.lane.b32.xlu1 %v8551_v24, %s9147_s12 }
 0x174   :  { %v1051_v28 = vpop.permute.xlu0 %1050  ;;  %1390 = vrot.lane.b32.xlu2 %v8552_v25, %s9147_s12 }
 0x175   :  { %v1053_v29 = vpop.permute.xlu1 %1052  ;;  %1206 = vst.msk [vmem:[#allocation3 + $0x108] sm:$0xff] %vm731_vm1, %v1051_v28  ;;  %v8575_v28 = vld [vmem:[%s14273_s0 + $0x252] ss:$2 sm:$0xff] }
 0x176   :  { %1207 = vst.msk [vmem:[#allocation3 + $0x110] sm:$0xff] %vm731_vm1, %v1053_v29  ;;  %v1073_v31 = vpop.permute.xlu2 %1072  ;;  %v8576_v29 = vld [vmem:[%s14273_s0 + $0x262] ss:$2 sm:$0xff] }
 0x177   :  { %1217 = vst.msk [vmem:[#allocation3 + $0x160] sm:$0xff] %vm731_vm1, %v1073_v31 }
 0x17a   :  { %1392 = vrot.lane.b32.xlu0 %v8553_v32, %s9147_s12 }
 0x17b   :  { %1394 = vrot.lane.b32.xlu1 %v8554_v33, %s9147_s12  ;;  %v8577_v33 = vld [vmem:[%s14273_s0 + $0x272] ss:$2 sm:$0xff] }
 0x17c   :  { %v1057_v37 = vpop.permute.xlu0 %1056  ;;  %1396 = vrot.lane.b32.xlu2 %v8555_v34, %s9147_s12  ;;  %v8578_v34 = vld [vmem:[%s14273_s0 + $0x282] ss:$2 sm:$0xff] }
 0x17d   :  { %v1059_v38 = vpop.permute.xlu1 %1058  ;;  %1209 = vst.msk [vmem:[#allocation3 + $0x120] sm:$0xff] %vm731_vm1, %v1057_v37 }
 0x17e   :  { %1210 = vst.msk [vmem:[#allocation3 + $0x128] sm:$0xff] %vm731_vm1, %v1059_v38  ;;  %v1079_v40 = vpop.permute.xlu2 %1078 }
 0x17f   :  { %1220 = vst.msk [vmem:[#allocation3 + $0x178] sm:$0xff] %vm731_vm1, %v1079_v40  ;;  %v8581_v40 = vld [vmem:[%s14273_s0 + $0x2b2] ss:$2 sm:$0xff] }
 0x182   :  { %1398 = vrot.lane.b32.xlu0 %v8556_v41, %s9147_s12  ;;  %v8582_v41 = vld [vmem:[%s14273_s0 + $0x2c2] ss:$2 sm:$0xff] }
 0x183   :  { %1400 = vrot.lane.b32.xlu1 %v8557_v42, %s9147_s12 }
 0x184   :  { %v1063_v46 = vpop.permute.xlu0 %1062  ;;  %1402 = vrot.lane.b32.xlu2 %v8558_v43, %s9147_s12 }
 0x185   :  { %v1065_v47 = vpop.permute.xlu1 %1064  ;;  %1212 = vst.msk [vmem:[#allocation3 + $0x138] sm:$0xff] %vm731_vm1, %v1063_v46  ;;  %v8584_v46 = vld [vmem:[%s14273_s0 + $0x2e2] ss:$2 sm:$0xff] }
 0x186   :  { %1213 = vst.msk [vmem:[#allocation3 + $0x140] sm:$0xff] %vm731_vm1, %v1065_v47  ;;  %v1085_v49 = vpop.permute.xlu2 %1084  ;;  %v8585_v47 = vld [vmem:[%s14273_s0 + $0x2f2] ss:$2 sm:$0xff] }
 0x187   :  { %1223 = vst.msk [vmem:[#allocation3 + $0x190] sm:$0xff] %vm731_vm1, %v1085_v49 }
 0x18a   :  { %1404 = vrot.lane.b32.xlu0 %v8559_v50, %s9147_s12 }
 0x18b   :  { %1406 = vrot.lane.b32.xlu1 %v8560_v51, %s9147_s12  ;;  %v8586_v51 = vld [vmem:[%s14273_s0 + $0x302] ss:$2 sm:$0xff] }
 0x18c   :  { %v1069_v55 = vpop.permute.xlu0 %1068  ;;  %1408 = vrot.lane.b32.xlu2 %v8561_v52, %s9147_s12  ;;  %v8587_v52 = vld [vmem:[%s14273_s0 + $0x312] ss:$2 sm:$0xff] }
 0x18d   :  { %v1071_v56 = vpop.permute.xlu1 %1070  ;;  %1215 = vst.msk [vmem:[#allocation3 + $0x150] sm:$0xff] %vm731_vm1, %v1069_v55 }
 0x18e   :  { %1216 = vst.msk [vmem:[#allocation3 + $0x158] sm:$0xff] %vm731_vm1, %v1071_v56  ;;  %v1091_v58 = vpop.permute.xlu2 %1090 }
 0x18f   :  { %1226 = vst.msk [vmem:[#allocation3 + $0x1a8] sm:$0xff] %vm731_vm1, %v1091_v58  ;;  %v8590_v58 = vld [vmem:[%s14273_s0 + $0x342] ss:$2 sm:$0xff] }
 0x192   :  { %1410 = vrot.lane.b32.xlu0 %v8562_v59, %s9147_s12  ;;  %v8591_v59 = vld [vmem:[%s14273_s0 + $0x352] ss:$2 sm:$0xff] }
 0x193   :  { %1412 = vrot.lane.b32.xlu1 %v8563_v60, %s9147_s12 }
 0x194   :  { %v1075_v0 = vpop.permute.xlu0 %1074  ;;  %1414 = vrot.lane.b32.xlu2 %v8564_v61, %s9147_s12 }
 0x195   :  { %v1077_v1 = vpop.permute.xlu1 %1076  ;;  %1218 = vst.msk [vmem:[#allocation3 + $0x168] sm:$0xff] %vm731_vm1, %v1075_v0  ;;  %v8593_v0 = vld [vmem:[%s14273_s0 + $0x372] ss:$2 sm:$0xff] }
 0x196   :  { %1219 = vst.msk [vmem:[#allocation3 + $0x170] sm:$0xff] %vm731_vm1, %v1077_v1  ;;  %v1097_v3 = vpop.permute.xlu2 %1096  ;;  %v8594_v1 = vld [vmem:[%s14273_s0 + $0x382] ss:$2 sm:$0xff] }
 0x197   :  { %1229 = vst.msk [vmem:[#allocation3 + $0x1c0] sm:$0xff] %vm731_vm1, %v1097_v3 }
 0x19a   :  { %1416 = vrot.lane.b32.xlu0 %v8565_v4, %s9147_s12 }
 0x19b   :  { %1418 = vrot.lane.b32.xlu1 %v8566_v5, %s9147_s12  ;;  %v8595_v5 = vld [vmem:[%s14273_s0 + $0x392] ss:$2 sm:$0xff] }
 0x19c   :  { %v1081_v9 = vpop.permute.xlu0 %1080  ;;  %1420 = vrot.lane.b32.xlu2 %v8567_v6, %s9147_s12  ;;  %v8596_v6 = vld [vmem:[%s14273_s0 + $0x3a2] ss:$2 sm:$0xff] }
 0x19d   :  { %v1083_v10 = vpop.permute.xlu1 %1082  ;;  %1221 = vst.msk [vmem:[#allocation3 + $0x180] sm:$0xff] %vm731_vm1, %v1081_v9 }
 0x19e   :  { %1222 = vst.msk [vmem:[#allocation3 + $0x188] sm:$0xff] %vm731_vm1, %v1083_v10  ;;  %v1103_v12 = vpop.permute.xlu2 %1102 }
 0x19f   :  { %1232 = vst.msk [vmem:[#allocation3 + $0x1d8] sm:$0xff] %vm731_vm1, %v1103_v12  ;;  %v8599_v12 = vld [vmem:[%s14273_s0 + $0x3d2] ss:$2 sm:$0xff] }
 0x1a2   :  { %1422 = vrot.lane.b32.xlu0 %v8568_v13, %s9147_s12  ;;  %v8600_v13 = vld [vmem:[%s14273_s0 + $0x3e2] ss:$2 sm:$0xff] }
 0x1a3   :  { %1424 = vrot.lane.b32.xlu1 %v8569_v14, %s9147_s12 }
 0x1a4   :  { %v1087_v18 = vpop.permute.xlu0 %1086  ;;  %1426 = vrot.lane.b32.xlu2 %v8570_v15, %s9147_s12 }
 0x1a5   :  { %v1089_v19 = vpop.permute.xlu1 %1088  ;;  %1224 = vst.msk [vmem:[#allocation3 + $0x198] sm:$0xff] %vm731_vm1, %v1087_v18  ;;  %v8602_v18 = vld [vmem:[%s14273_s0 + $0x13] ss:$2 sm:$0xff] }
 0x1a6   :  { %1225 = vst.msk [vmem:[#allocation3 + $0x1a0] sm:$0xff] %vm731_vm1, %v1089_v19  ;;  %v1109_v20 = vpop.permute.xlu2 %1108  ;;  %v8603_v19 = vld [vmem:[%s14273_s0 + $0x23] ss:$2 sm:$0xff] }
 0x1a7   :  { %1235 = vst.msk [vmem:[#allocation3 + $0x1f0] sm:$0xff] %vm731_vm1, %v1109_v20 }
 0x1aa   :  { %1428 = vrot.lane.b32.xlu0 %v8571_v21, %s9147_s12 }
 0x1ab   :  { %1430 = vrot.lane.b32.xlu1 %v8572_v22, %s9147_s12 }
 0x1ac   :  { %v1093_v24 = vpop.permute.xlu0 %1092  ;;  %1432 = vrot.lane.b32.xlu2 %v8573_v23, %s9147_s12  ;;  %v8604_v23 = vld [vmem:[%s14273_s0 + $0x33] ss:$2 sm:$0xff] }
 0x1ad   :  { %v1095_v25 = vpop.permute.xlu1 %1094  ;;  %1227 = vst.msk [vmem:[#allocation3 + $0x1b0] sm:$0xff] %vm731_vm1, %v1093_v24  ;;  %v8605_v24 = vld [vmem:[%s14273_s0 + $0x43] ss:$2 sm:$0xff] }
 0x1ae   :  { %1228 = vst.msk [vmem:[#allocation3 + $0x1b8] sm:$0xff] %vm731_vm1, %v1095_v25  ;;  %v1367_v26 = vpop.permute.xlu2 %1366  ;;  %v8606_v25 = vld [vmem:[%s14273_s0 + $0x53] ss:$2 sm:$0xff] }
 0x1af   :  { %1554 = vst.msk [vmem:[#allocation2 + $0x10] sm:$0xff] %vm1551_vm2, %v1367_v26 }
 0x1b2   :  { %1434 = vrot.lane.b32.xlu0 %v8574_v27, %s9147_s12 }
 0x1b3   :  { %1436 = vrot.lane.b32.xlu1 %v8575_v28, %s9147_s12 }
 0x1b4   :  { %v1099_v30 = vpop.permute.xlu0 %1098  ;;  %1438 = vrot.lane.b32.xlu2 %v8576_v29, %s9147_s12  ;;  %v8607_v29 = vld [vmem:[%s14273_s0 + $0x63] ss:$2 sm:$0xff] }
 0x1b5   :  { %v1101_v31 = vpop.permute.xlu1 %1100  ;;  %1230 = vst.msk [vmem:[#allocation3 + $0x1c8] sm:$0xff] %vm731_vm1, %v1099_v30  ;;  %v8608_v30 = vld [vmem:[%s14273_s0 + $0x73] ss:$2 sm:$0xff] }
 0x1b6   :  { %1231 = vst.msk [vmem:[#allocation3 + $0x1d0] sm:$0xff] %vm731_vm1, %v1101_v31  ;;  %v1373_v32 = vpop.permute.xlu2 %1372  ;;  %v8609_v31 = vld [vmem:[%s14273_s0 + $0x83] ss:$2 sm:$0xff] }
 0x1b7   :  { %1557 = vst.msk [vmem:[#allocation2 + $0x28] sm:$0xff] %vm1551_vm2, %v1373_v32 }
 0x1ba   :  { %1440 = vrot.lane.b32.xlu0 %v8577_v33, %s9147_s12 }
 0x1bb   :  { %1442 = vrot.lane.b32.xlu1 %v8578_v34, %s9147_s12 }
 0x1bc   :  { %v1105_v36 = vpop.permute.xlu0 %1104  ;;  %1444 = vrot.lane.b32.xlu2 %v8579_v35, %s9147_s12  ;;  %v8610_v35 = vld [vmem:[%s14273_s0 + $0x93] ss:$2 sm:$0xff] }
 0x1bd   :  { %v1107_v37 = vpop.permute.xlu1 %1106  ;;  %1233 = vst.msk [vmem:[#allocation3 + $0x1e0] sm:$0xff] %vm731_vm1, %v1105_v36  ;;  %v8611_v36 = vld [vmem:[%s14273_s0 + $0xa3] ss:$2 sm:$0xff] }
 0x1be   :  { %1234 = vst.msk [vmem:[#allocation3 + $0x1e8] sm:$0xff] %vm731_vm1, %v1107_v37  ;;  %v1379_v38 = vpop.permute.xlu2 %1378  ;;  %v8612_v37 = vld [vmem:[%s14273_s0 + $0xb3] ss:$2 sm:$0xff]  ;;  %vm7267_vm1 = vcmask 523648  }
 0x1bf   :  { %1560 = vst.msk [vmem:[#allocation2 + $0x40] sm:$0xff] %vm1551_vm2, %v1379_v38 }
 0x1c2   :  { %1446 = vrot.lane.b32.xlu0 %v8580_v39, %s9147_s12 }
 0x1c3   :  { %1448 = vrot.lane.b32.xlu1 %v8581_v40, %s9147_s12 }
 0x1c4   :  { %v1363_v42 = vpop.permute.xlu0 %1362  ;;  %1450 = vrot.lane.b32.xlu2 %v8582_v41, %s9147_s12  ;;  %v8613_v41 = vld [vmem:[%s14273_s0 + $0xc3] ss:$2 sm:$0xff] }
 0x1c5   :  { %v1365_v43 = vpop.permute.xlu1 %1364  ;;  %1552 = vst.msk [vmem:[#allocation2] sm:$0xff] %vm1551_vm2, %v1363_v42  ;;  %v8614_v42 = vld [vmem:[%s14273_s0 + $0xd3] ss:$2 sm:$0xff] }
 0x1c6   :  { %1553 = vst.msk [vmem:[#allocation2 + $0x8] sm:$0xff] %vm1551_vm2, %v1365_v43  ;;  %v1385_v44 = vpop.permute.xlu2 %1384  ;;  %v8615_v43 = vld [vmem:[%s14273_s0 + $0xe3] ss:$2 sm:$0xff] }
 0x1c7   :  { %1563 = vst.msk [vmem:[#allocation2 + $0x58] sm:$0xff] %vm1551_vm2, %v1385_v44 }
 0x1ca   :  { %1452 = vrot.lane.b32.xlu0 %v8583_v45, %s9147_s12 }
 0x1cb   :  { %1454 = vrot.lane.b32.xlu1 %v8584_v46, %s9147_s12 }
 0x1cc   :  { %v1369_v48 = vpop.permute.xlu0 %1368  ;;  %1456 = vrot.lane.b32.xlu2 %v8585_v47, %s9147_s12  ;;  %v8616_v47 = vld [vmem:[%s14273_s0 + $0xf3] ss:$2 sm:$0xff] }
 0x1cd   :  { %v1371_v49 = vpop.permute.xlu1 %1370  ;;  %1555 = vst.msk [vmem:[#allocation2 + $0x18] sm:$0xff] %vm1551_vm2, %v1369_v48  ;;  %v8617_v48 = vld [vmem:[%s14273_s0 + $0x103] ss:$2 sm:$0xff] }
 0x1ce   :  { %1556 = vst.msk [vmem:[#allocation2 + $0x20] sm:$0xff] %vm1551_vm2, %v1371_v49  ;;  %v1391_v50 = vpop.permute.xlu2 %1390  ;;  %v8618_v49 = vld [vmem:[%s14273_s0 + $0x113] ss:$2 sm:$0xff] }
 0x1cf   :  { %1566 = vst.msk [vmem:[#allocation2 + $0x70] sm:$0xff] %vm1551_vm2, %v1391_v50 }
 0x1d2   :  { %1458 = vrot.lane.b32.xlu0 %v8586_v51, %s9147_s12 }
 0x1d3   :  { %1460 = vrot.lane.b32.xlu1 %v8587_v52, %s9147_s12 }
 0x1d4   :  { %v1375_v54 = vpop.permute.xlu0 %1374  ;;  %1462 = vrot.lane.b32.xlu2 %v8588_v53, %s9147_s12  ;;  %v8619_v53 = vld [vmem:[%s14273_s0 + $0x123] ss:$2 sm:$0xff] }
 0x1d5   :  { %v1377_v55 = vpop.permute.xlu1 %1376  ;;  %1558 = vst.msk [vmem:[#allocation2 + $0x30] sm:$0xff] %vm1551_vm2, %v1375_v54  ;;  %v8620_v54 = vld [vmem:[%s14273_s0 + $0x133] ss:$2 sm:$0xff] }
 0x1d6   :  { %1559 = vst.msk [vmem:[#allocation2 + $0x38] sm:$0xff] %vm1551_vm2, %v1377_v55  ;;  %v1397_v56 = vpop.permute.xlu2 %1396  ;;  %v8621_v55 = vld [vmem:[%s14273_s0 + $0x143] ss:$2 sm:$0xff] }
 0x1d7   :  { %1569 = vst.msk [vmem:[#allocation2 + $0x88] sm:$0xff] %vm1551_vm2, %v1397_v56 }
 0x1da   :  { %1464 = vrot.lane.b32.xlu0 %v8589_v57, %s9147_s12 }
 0x1db   :  { %1466 = vrot.lane.b32.xlu1 %v8590_v58, %s9147_s12 }
 0x1dc   :  { %v1381_v60 = vpop.permute.xlu0 %1380  ;;  %1468 = vrot.lane.b32.xlu2 %v8591_v59, %s9147_s12  ;;  %v8622_v59 = vld [vmem:[%s14273_s0 + $0x153] ss:$2 sm:$0xff] }
 0x1dd   :  { %v1383_v61 = vpop.permute.xlu1 %1382  ;;  %1561 = vst.msk [vmem:[#allocation2 + $0x48] sm:$0xff] %vm1551_vm2, %v1381_v60  ;;  %v8623_v60 = vld [vmem:[%s14273_s0 + $0x163] ss:$2 sm:$0xff] }
 0x1de   :  { %1562 = vst.msk [vmem:[#allocation2 + $0x50] sm:$0xff] %vm1551_vm2, %v1383_v61  ;;  %v1403_v62 = vpop.permute.xlu2 %1402  ;;  %v8624_v61 = vld [vmem:[%s14273_s0 + $0x173] ss:$2 sm:$0xff] }
 0x1df   :  { %1572 = vst.msk [vmem:[#allocation2 + $0xa0] sm:$0xff] %vm1551_vm2, %v1403_v62 }
 0x1e2   :  { %1470 = vrot.lane.b32.xlu0 %v8592_v63, %s9147_s12 }
 0x1e3   :  { %1472 = vrot.lane.b32.xlu1 %v8593_v0, %s9147_s12 }
 0x1e4   :  { %v1387_v2 = vpop.permute.xlu0 %1386  ;;  %1474 = vrot.lane.b32.xlu2 %v8594_v1, %s9147_s12  ;;  %v8625_v1 = vld [vmem:[%s14273_s0 + $0x183] ss:$2 sm:$0xff] }
 0x1e5   :  { %v1389_v3 = vpop.permute.xlu1 %1388  ;;  %1564 = vst.msk [vmem:[#allocation2 + $0x60] sm:$0xff] %vm1551_vm2, %v1387_v2  ;;  %v8626_v2 = vld [vmem:[%s14273_s0 + $0x193] ss:$2 sm:$0xff] }
 0x1e6   :  { %1565 = vst.msk [vmem:[#allocation2 + $0x68] sm:$0xff] %vm1551_vm2, %v1389_v3  ;;  %v1409_v4 = vpop.permute.xlu2 %1408  ;;  %v8627_v3 = vld [vmem:[%s14273_s0 + $0x1a3] ss:$2 sm:$0xff] }
 0x1e7   :  { %1575 = vst.msk [vmem:[#allocation2 + $0xb8] sm:$0xff] %vm1551_vm2, %v1409_v4 }
 0x1ea   :  { %1476 = vrot.lane.b32.xlu0 %v8595_v5, %s9147_s12 }
 0x1eb   :  { %1478 = vrot.lane.b32.xlu1 %v8596_v6, %s9147_s12 }
 0x1ec   :  { %v1393_v8 = vpop.permute.xlu0 %1392  ;;  %1480 = vrot.lane.b32.xlu2 %v8597_v7, %s9147_s12  ;;  %v8628_v7 = vld [vmem:[%s14273_s0 + $0x1b3] ss:$2 sm:$0xff] }
 0x1ed   :  { %v1395_v9 = vpop.permute.xlu1 %1394  ;;  %1567 = vst.msk [vmem:[#allocation2 + $0x78] sm:$0xff] %vm1551_vm2, %v1393_v8  ;;  %v8629_v8 = vld [vmem:[%s14273_s0 + $0x1c3] ss:$2 sm:$0xff] }
 0x1ee   :  { %1568 = vst.msk [vmem:[#allocation2 + $0x80] sm:$0xff] %vm1551_vm2, %v1395_v9  ;;  %v1415_v10 = vpop.permute.xlu2 %1414  ;;  %v8630_v9 = vld [vmem:[%s14273_s0 + $0x1d3] ss:$2 sm:$0xff] }
 0x1ef   :  { %1578 = vst.msk [vmem:[#allocation2 + $0xd0] sm:$0xff] %vm1551_vm2, %v1415_v10 }
 0x1f2   :  { %1482 = vrot.lane.b32.xlu0 %v8598_v11, %s9147_s12 }
 0x1f3   :  { %1484 = vrot.lane.b32.xlu1 %v8599_v12, %s9147_s12 }
 0x1f4   :  { %v1399_v14 = vpop.permute.xlu0 %1398  ;;  %1486 = vrot.lane.b32.xlu2 %v8600_v13, %s9147_s12  ;;  %v8631_v13 = vld [vmem:[%s14273_s0 + $0x1e3] ss:$2 sm:$0xff] }
 0x1f5   :  { %v1401_v15 = vpop.permute.xlu1 %1400  ;;  %1570 = vst.msk [vmem:[#allocation2 + $0x90] sm:$0xff] %vm1551_vm2, %v1399_v14  ;;  %v8632_v14 = vld [vmem:[%s14273_s0 + $0x1f3] ss:$2 sm:$0xff] }
 0x1f6   :  { %1571 = vst.msk [vmem:[#allocation2 + $0x98] sm:$0xff] %vm1551_vm2, %v1401_v15  ;;  %v1421_v16 = vpop.permute.xlu2 %1420  ;;  %v8633_v15 = vld [vmem:[%s14273_s0 + $0x203] ss:$2 sm:$0xff] }
 0x1f7   :  { %1581 = vst.msk [vmem:[#allocation2 + $0xe8] sm:$0xff] %vm1551_vm2, %v1421_v16 }
 0x1fa   :  { %1804 = vrot.lane.b32.xlu0 %v8601_v17, %s9147_s12 }
 0x1fb   :  { %1806 = vrot.lane.b32.xlu1 %v8602_v18, %s9147_s12 }
 0x1fc   :  { %v1405_v20 = vpop.permute.xlu0 %1404  ;;  %1808 = vrot.lane.b32.xlu2 %v8603_v19, %s9147_s12  ;;  %v8634_v19 = vld [vmem:[%s14273_s0 + $0x213] ss:$2 sm:$0xff] }
 0x1fd   :  { %v1407_v21 = vpop.permute.xlu1 %1406  ;;  %1573 = vst.msk [vmem:[#allocation2 + $0xa8] sm:$0xff] %vm1551_vm2, %v1405_v20  ;;  %v8635_v20 = vld [vmem:[%s14273_s0 + $0x223] ss:$2 sm:$0xff] }
 0x1fe   :  { %1574 = vst.msk [vmem:[#allocation2 + $0xb0] sm:$0xff] %vm1551_vm2, %v1407_v21  ;;  %v1427_v22 = vpop.permute.xlu2 %1426  ;;  %v8636_v21 = vld [vmem:[%s14273_s0 + $0x233] ss:$2 sm:$0xff] }
 0x1ff   :  { %1584 = vst.msk [vmem:[#allocation2 + $0x100] sm:$0xff] %vm1551_vm2, %v1427_v22 }
 0x202   :  { %1810 = vrot.lane.b32.xlu0 %v8604_v23, %s9147_s12 }
 0x203   :  { %1812 = vrot.lane.b32.xlu1 %v8605_v24, %s9147_s12 }
 0x204   :  { %v1411_v26 = vpop.permute.xlu0 %1410  ;;  %1814 = vrot.lane.b32.xlu2 %v8606_v25, %s9147_s12  ;;  %v8637_v25 = vld [vmem:[%s14273_s0 + $0x243] ss:$2 sm:$0xff] }
 0x205   :  { %v1413_v27 = vpop.permute.xlu1 %1412  ;;  %1576 = vst.msk [vmem:[#allocation2 + $0xc0] sm:$0xff] %vm1551_vm2, %v1411_v26  ;;  %v8638_v26 = vld [vmem:[%s14273_s0 + $0x253] ss:$2 sm:$0xff] }
 0x206   :  { %1577 = vst.msk [vmem:[#allocation2 + $0xc8] sm:$0xff] %vm1551_vm2, %v1413_v27  ;;  %v1433_v28 = vpop.permute.xlu2 %1432  ;;  %v8639_v27 = vld [vmem:[%s14273_s0 + $0x263] ss:$2 sm:$0xff] }
 0x207   :  { %1587 = vst.msk [vmem:[#allocation2 + $0x118] sm:$0xff] %vm1551_vm2, %v1433_v28 }
 0x20a   :  { %1816 = vrot.lane.b32.xlu0 %v8607_v29, %s9147_s12 }
 0x20b   :  { %1818 = vrot.lane.b32.xlu1 %v8608_v30, %s9147_s12 }
 0x20c   :  { %v1417_v32 = vpop.permute.xlu0 %1416  ;;  %1820 = vrot.lane.b32.xlu2 %v8609_v31, %s9147_s12  ;;  %v8640_v31 = vld [vmem:[%s14273_s0 + $0x273] ss:$2 sm:$0xff] }
 0x20d   :  { %v1419_v33 = vpop.permute.xlu1 %1418  ;;  %1579 = vst.msk [vmem:[#allocation2 + $0xd8] sm:$0xff] %vm1551_vm2, %v1417_v32  ;;  %v8641_v32 = vld [vmem:[%s14273_s0 + $0x283] ss:$2 sm:$0xff] }
 0x20e   :  { %1580 = vst.msk [vmem:[#allocation2 + $0xe0] sm:$0xff] %vm1551_vm2, %v1419_v33  ;;  %v1439_v34 = vpop.permute.xlu2 %1438  ;;  %v8642_v33 = vld [vmem:[%s14273_s0 + $0x293] ss:$2 sm:$0xff] }
 0x20f   :  { %1590 = vst.msk [vmem:[#allocation2 + $0x130] sm:$0xff] %vm1551_vm2, %v1439_v34 }
 0x212   :  { %1822 = vrot.lane.b32.xlu0 %v8610_v35, %s9147_s12 }
 0x213   :  { %1824 = vrot.lane.b32.xlu1 %v8611_v36, %s9147_s12 }
 0x214   :  { %v1423_v38 = vpop.permute.xlu0 %1422  ;;  %1826 = vrot.lane.b32.xlu2 %v8612_v37, %s9147_s12  ;;  %v8643_v37 = vld [vmem:[%s14273_s0 + $0x2a3] ss:$2 sm:$0xff] }
 0x215   :  { %v1425_v39 = vpop.permute.xlu1 %1424  ;;  %1582 = vst.msk [vmem:[#allocation2 + $0xf0] sm:$0xff] %vm1551_vm2, %v1423_v38  ;;  %v8644_v38 = vld [vmem:[%s14273_s0 + $0x2b3] ss:$2 sm:$0xff] }
 0x216   :  { %1583 = vst.msk [vmem:[#allocation2 + $0xf8] sm:$0xff] %vm1551_vm2, %v1425_v39  ;;  %v1445_v40 = vpop.permute.xlu2 %1444  ;;  %v8645_v39 = vld [vmem:[%s14273_s0 + $0x2c3] ss:$2 sm:$0xff] }
 0x217   :  { %1593 = vst.msk [vmem:[#allocation2 + $0x148] sm:$0xff] %vm1551_vm2, %v1445_v40 }
 0x21a   :  { %1828 = vrot.lane.b32.xlu0 %v8613_v41, %s9147_s12 }
 0x21b   :  { %1830 = vrot.lane.b32.xlu1 %v8614_v42, %s9147_s12 }
 0x21c   :  { %v1429_v44 = vpop.permute.xlu0 %1428  ;;  %1832 = vrot.lane.b32.xlu2 %v8615_v43, %s9147_s12  ;;  %v8646_v43 = vld [vmem:[%s14273_s0 + $0x2d3] ss:$2 sm:$0xff] }
 0x21d   :  { %v1431_v45 = vpop.permute.xlu1 %1430  ;;  %1585 = vst.msk [vmem:[#allocation2 + $0x108] sm:$0xff] %vm1551_vm2, %v1429_v44  ;;  %v8647_v44 = vld [vmem:[%s14273_s0 + $0x2e3] ss:$2 sm:$0xff] }
 0x21e   :  { %1586 = vst.msk [vmem:[#allocation2 + $0x110] sm:$0xff] %vm1551_vm2, %v1431_v45  ;;  %v1451_v46 = vpop.permute.xlu2 %1450  ;;  %v8648_v45 = vld [vmem:[%s14273_s0 + $0x2f3] ss:$2 sm:$0xff] }
 0x21f   :  { %1596 = vst.msk [vmem:[#allocation2 + $0x160] sm:$0xff] %vm1551_vm2, %v1451_v46 }
 0x222   :  { %1834 = vrot.lane.b32.xlu0 %v8616_v47, %s9147_s12 }
 0x223   :  { %1836 = vrot.lane.b32.xlu1 %v8617_v48, %s9147_s12 }
 0x224   :  { %v1435_v50 = vpop.permute.xlu0 %1434  ;;  %1838 = vrot.lane.b32.xlu2 %v8618_v49, %s9147_s12  ;;  %v8649_v49 = vld [vmem:[%s14273_s0 + $0x303] ss:$2 sm:$0xff] }
 0x225   :  { %v1437_v51 = vpop.permute.xlu1 %1436  ;;  %1588 = vst.msk [vmem:[#allocation2 + $0x120] sm:$0xff] %vm1551_vm2, %v1435_v50  ;;  %v8650_v50 = vld [vmem:[%s14273_s0 + $0x313] ss:$2 sm:$0xff] }
 0x226   :  { %1589 = vst.msk [vmem:[#allocation2 + $0x128] sm:$0xff] %vm1551_vm2, %v1437_v51  ;;  %v1457_v52 = vpop.permute.xlu2 %1456  ;;  %v8651_v51 = vld [vmem:[%s14273_s0 + $0x323] ss:$2 sm:$0xff] }
 0x227   :  { %1599 = vst.msk [vmem:[#allocation2 + $0x178] sm:$0xff] %vm1551_vm2, %v1457_v52 }
 0x22a   :  { %1840 = vrot.lane.b32.xlu0 %v8619_v53, %s9147_s12 }
 0x22b   :  { %1842 = vrot.lane.b32.xlu1 %v8620_v54, %s9147_s12 }
 0x22c   :  { %v1441_v56 = vpop.permute.xlu0 %1440  ;;  %1844 = vrot.lane.b32.xlu2 %v8621_v55, %s9147_s12  ;;  %v8652_v55 = vld [vmem:[%s14273_s0 + $0x333] ss:$2 sm:$0xff] }
 0x22d   :  { %v1443_v57 = vpop.permute.xlu1 %1442  ;;  %1591 = vst.msk [vmem:[#allocation2 + $0x138] sm:$0xff] %vm1551_vm2, %v1441_v56  ;;  %v8653_v56 = vld [vmem:[%s14273_s0 + $0x343] ss:$2 sm:$0xff] }
 0x22e   :  { %1592 = vst.msk [vmem:[#allocation2 + $0x140] sm:$0xff] %vm1551_vm2, %v1443_v57  ;;  %v1463_v58 = vpop.permute.xlu2 %1462  ;;  %v8654_v57 = vld [vmem:[%s14273_s0 + $0x353] ss:$2 sm:$0xff] }
 0x22f   :  { %1602 = vst.msk [vmem:[#allocation2 + $0x190] sm:$0xff] %vm1551_vm2, %v1463_v58 }
 0x232   :  { %1846 = vrot.lane.b32.xlu0 %v8622_v59, %s9147_s12 }
 0x233   :  { %1848 = vrot.lane.b32.xlu1 %v8623_v60, %s9147_s12 }
 0x234   :  { %v1447_v62 = vpop.permute.xlu0 %1446  ;;  %1850 = vrot.lane.b32.xlu2 %v8624_v61, %s9147_s12  ;;  %v8655_v61 = vld [vmem:[%s14273_s0 + $0x363] ss:$2 sm:$0xff] }
 0x235   :  { %v1449_v63 = vpop.permute.xlu1 %1448  ;;  %1594 = vst.msk [vmem:[#allocation2 + $0x150] sm:$0xff] %vm1551_vm2, %v1447_v62  ;;  %v8656_v62 = vld [vmem:[%s14273_s0 + $0x373] ss:$2 sm:$0xff] }
 0x236   :  { %1595 = vst.msk [vmem:[#allocation2 + $0x158] sm:$0xff] %vm1551_vm2, %v1449_v63  ;;  %v1469_v0 = vpop.permute.xlu2 %1468  ;;  %v8657_v63 = vld [vmem:[%s14273_s0 + $0x383] ss:$2 sm:$0xff] }
 0x237   :  { %1605 = vst.msk [vmem:[#allocation2 + $0x1a8] sm:$0xff] %vm1551_vm2, %v1469_v0 }
 0x23a   :  { %1852 = vrot.lane.b32.xlu0 %v8625_v1, %s9147_s12 }
 0x23b   :  { %1854 = vrot.lane.b32.xlu1 %v8626_v2, %s9147_s12 }
 0x23c   :  { %v1453_v4 = vpop.permute.xlu0 %1452  ;;  %1856 = vrot.lane.b32.xlu2 %v8627_v3, %s9147_s12  ;;  %v8658_v3 = vld [vmem:[%s14273_s0 + $0x393] ss:$2 sm:$0xff] }
 0x23d   :  { %v1455_v5 = vpop.permute.xlu1 %1454  ;;  %1597 = vst.msk [vmem:[#allocation2 + $0x168] sm:$0xff] %vm1551_vm2, %v1453_v4  ;;  %v8659_v4 = vld [vmem:[%s14273_s0 + $0x3a3] ss:$2 sm:$0xff] }
 0x23e   :  { %1598 = vst.msk [vmem:[#allocation2 + $0x170] sm:$0xff] %vm1551_vm2, %v1455_v5  ;;  %v1475_v6 = vpop.permute.xlu2 %1474  ;;  %v8660_v5 = vld [vmem:[%s14273_s0 + $0x3b3] ss:$2 sm:$0xff] }
 0x23f   :  { %1608 = vst.msk [vmem:[#allocation2 + $0x1c0] sm:$0xff] %vm1551_vm2, %v1475_v6 }
 0x242   :  { %1858 = vrot.lane.b32.xlu0 %v8628_v7, %s9147_s12 }
 0x243   :  { %1860 = vrot.lane.b32.xlu1 %v8629_v8, %s9147_s12 }
 0x244   :  { %v1459_v10 = vpop.permute.xlu0 %1458  ;;  %1862 = vrot.lane.b32.xlu2 %v8630_v9, %s9147_s12  ;;  %v8661_v9 = vld [vmem:[%s14273_s0 + $0x3c3] ss:$2 sm:$0xff] }
 0x245   :  { %v1461_v11 = vpop.permute.xlu1 %1460  ;;  %1600 = vst.msk [vmem:[#allocation2 + $0x180] sm:$0xff] %vm1551_vm2, %v1459_v10  ;;  %v8662_v10 = vld [vmem:[%s14273_s0 + $0x3d3] ss:$2 sm:$0xff] }
 0x246   :  { %1601 = vst.msk [vmem:[#allocation2 + $0x188] sm:$0xff] %vm1551_vm2, %v1461_v11  ;;  %v1481_v12 = vpop.permute.xlu2 %1480  ;;  %v8663_v11 = vld [vmem:[%s14273_s0 + $0x3e3] ss:$2 sm:$0xff] }
 0x247   :  { %1611 = vst.msk [vmem:[#allocation2 + $0x1d8] sm:$0xff] %vm1551_vm2, %v1481_v12 }
 0x24a   :  { %1864 = vrot.lane.b32.xlu0 %v8631_v13, %s9147_s12 }
 0x24b   :  { %1866 = vrot.lane.b32.xlu1 %v8632_v14, %s9147_s12 }
 0x24c   :  { %v1465_v16 = vpop.permute.xlu0 %1464  ;;  %1868 = vrot.lane.b32.xlu2 %v8633_v15, %s9147_s12  ;;  %v8664_v15 = vld [vmem:[%s14273_s0 + $0x3] ss:$2 sm:$0xff] }
 0x24d   :  { %v1467_v17 = vpop.permute.xlu1 %1466  ;;  %1603 = vst.msk [vmem:[#allocation2 + $0x198] sm:$0xff] %vm1551_vm2, %v1465_v16  ;;  %v8665_v16 = vld [vmem:[%s14273_s0 + $0x13] ss:$2 sm:$0xff] }
 0x24e   :  { %1604 = vst.msk [vmem:[#allocation2 + $0x1a0] sm:$0xff] %vm1551_vm2, %v1467_v17  ;;  %v1487_v18 = vpop.permute.xlu2 %1486  ;;  %v8666_v17 = vld [vmem:[%s14273_s0 + $0x23] ss:$2 sm:$0xff] }
 0x24f   :  { %1614 = vst.msk [vmem:[#allocation2 + $0x1f0] sm:$0xff] %vm1551_vm2, %v1487_v18 }
 0x252   :  { %1870 = vrot.lane.b32.xlu0 %v8634_v19, %s9147_s12 }
 0x253   :  { %1872 = vrot.lane.b32.xlu1 %v8635_v20, %s9147_s12 }
 0x254   :  { %v1471_v22 = vpop.permute.xlu0 %1470  ;;  %1874 = vrot.lane.b32.xlu2 %v8636_v21, %s9147_s12  ;;  %v8667_v21 = vld [vmem:[%s14273_s0 + $0x33] ss:$2 sm:$0xff] }
 0x255   :  { %v1473_v23 = vpop.permute.xlu1 %1472  ;;  %1606 = vst.msk [vmem:[#allocation2 + $0x1b0] sm:$0xff] %vm1551_vm2, %v1471_v22  ;;  %v8668_v22 = vld [vmem:[%s14273_s0 + $0x43] ss:$2 sm:$0xff] }
 0x256   :  { %1607 = vst.msk [vmem:[#allocation2 + $0x1b8] sm:$0xff] %vm1551_vm2, %v1473_v23  ;;  %v1809_v24 = vpop.permute.xlu2 %1808  ;;  %v8669_v23 = vld [vmem:[%s14273_s0 + $0x53] ss:$2 sm:$0xff] }
 0x257   :  { %1995 = vst.msk [vmem:[#allocation3 + $0x10] sm:$0xff] %vm1551_vm2, %v1809_v24 }
 0x25a   :  { %1876 = vrot.lane.b32.xlu0 %v8637_v25, %s9147_s12 }
 0x25b   :  { %1878 = vrot.lane.b32.xlu1 %v8638_v26, %s9147_s12 }
 0x25c   :  { %v1477_v28 = vpop.permute.xlu0 %1476  ;;  %1880 = vrot.lane.b32.xlu2 %v8639_v27, %s9147_s12  ;;  %v8670_v27 = vld [vmem:[%s14273_s0 + $0x63] ss:$2 sm:$0xff] }
 0x25d   :  { %v1479_v29 = vpop.permute.xlu1 %1478  ;;  %1609 = vst.msk [vmem:[#allocation2 + $0x1c8] sm:$0xff] %vm1551_vm2, %v1477_v28  ;;  %v8671_v28 = vld [vmem:[%s14273_s0 + $0x73] ss:$2 sm:$0xff] }
 0x25e   :  { %1610 = vst.msk [vmem:[#allocation2 + $0x1d0] sm:$0xff] %vm1551_vm2, %v1479_v29  ;;  %v1815_v30 = vpop.permute.xlu2 %1814  ;;  %v8672_v29 = vld [vmem:[%s14273_s0 + $0x83] ss:$2 sm:$0xff] }
 0x25f   :  { %1998 = vst.msk [vmem:[#allocation3 + $0x28] sm:$0xff] %vm1551_vm2, %v1815_v30 }
 0x262   :  { %1882 = vrot.lane.b32.xlu0 %v8640_v31, %s9147_s12 }
 0x263   :  { %1884 = vrot.lane.b32.xlu1 %v8641_v32, %s9147_s12 }
 0x264   :  { %v1483_v34 = vpop.permute.xlu0 %1482  ;;  %1886 = vrot.lane.b32.xlu2 %v8642_v33, %s9147_s12  ;;  %v8673_v33 = vld [vmem:[%s14273_s0 + $0x93] ss:$2 sm:$0xff] }
 0x265   :  { %v1485_v35 = vpop.permute.xlu1 %1484  ;;  %1612 = vst.msk [vmem:[#allocation2 + $0x1e0] sm:$0xff] %vm1551_vm2, %v1483_v34  ;;  %v8674_v34 = vld [vmem:[%s14273_s0 + $0xa3] ss:$2 sm:$0xff] }
 0x266   :  { %1613 = vst.msk [vmem:[#allocation2 + $0x1e8] sm:$0xff] %vm1551_vm2, %v1485_v35  ;;  %v1821_v36 = vpop.permute.xlu2 %1820  ;;  %v8675_v35 = vld [vmem:[%s14273_s0 + $0xb3] ss:$2 sm:$0xff] }
 0x267   :  { %2001 = vst.msk [vmem:[#allocation3 + $0x40] sm:$0xff] %vm1551_vm2, %v1821_v36 }
 0x26a   :  { %1888 = vrot.lane.b32.xlu0 %v8643_v37, %s9147_s12 }
 0x26b   :  { %1890 = vrot.lane.b32.xlu1 %v8644_v38, %s9147_s12 }
 0x26c   :  { %v1805_v40 = vpop.permute.xlu0 %1804  ;;  %1892 = vrot.lane.b32.xlu2 %v8645_v39, %s9147_s12  ;;  %v8676_v39 = vld [vmem:[%s14273_s0 + $0xc3] ss:$2 sm:$0xff] }
 0x26d   :  { %v1807_v41 = vpop.permute.xlu1 %1806  ;;  %1993 = vst.msk [vmem:[#allocation3] sm:$0xff] %vm1551_vm2, %v1805_v40  ;;  %v8677_v40 = vld [vmem:[%s14273_s0 + $0xd3] ss:$2 sm:$0xff] }
 0x26e   :  { %1994 = vst.msk [vmem:[#allocation3 + $0x8] sm:$0xff] %vm1551_vm2, %v1807_v41  ;;  %v1827_v42 = vpop.permute.xlu2 %1826  ;;  %v8678_v41 = vld [vmem:[%s14273_s0 + $0xe3] ss:$2 sm:$0xff] }
 0x26f   :  { %2004 = vst.msk [vmem:[#allocation3 + $0x58] sm:$0xff] %vm1551_vm2, %v1827_v42 }
 0x272   :  { %1894 = vrot.lane.b32.xlu0 %v8646_v43, %s9147_s12 }
 0x273   :  { %1896 = vrot.lane.b32.xlu1 %v8647_v44, %s9147_s12 }
 0x274   :  { %v1811_v46 = vpop.permute.xlu0 %1810  ;;  %1898 = vrot.lane.b32.xlu2 %v8648_v45, %s9147_s12  ;;  %v8679_v45 = vld [vmem:[%s14273_s0 + $0xf3] ss:$2 sm:$0xff] }
 0x275   :  { %v1813_v47 = vpop.permute.xlu1 %1812  ;;  %1996 = vst.msk [vmem:[#allocation3 + $0x18] sm:$0xff] %vm1551_vm2, %v1811_v46  ;;  %v8680_v46 = vld [vmem:[%s14273_s0 + $0x103] ss:$2 sm:$0xff] }
 0x276   :  { %1997 = vst.msk [vmem:[#allocation3 + $0x20] sm:$0xff] %vm1551_vm2, %v1813_v47  ;;  %v1833_v48 = vpop.permute.xlu2 %1832  ;;  %v8681_v47 = vld [vmem:[%s14273_s0 + $0x113] ss:$2 sm:$0xff] }
 0x277   :  { %2007 = vst.msk [vmem:[#allocation3 + $0x70] sm:$0xff] %vm1551_vm2, %v1833_v48 }
 0x27a   :  { %1900 = vrot.lane.b32.xlu0 %v8649_v49, %s9147_s12 }
 0x27b   :  { %1902 = vrot.lane.b32.xlu1 %v8650_v50, %s9147_s12 }
 0x27c   :  { %v1817_v52 = vpop.permute.xlu0 %1816  ;;  %1904 = vrot.lane.b32.xlu2 %v8651_v51, %s9147_s12  ;;  %v8682_v51 = vld [vmem:[%s14273_s0 + $0x123] ss:$2 sm:$0xff] }
 0x27d   :  { %v1819_v53 = vpop.permute.xlu1 %1818  ;;  %1999 = vst.msk [vmem:[#allocation3 + $0x30] sm:$0xff] %vm1551_vm2, %v1817_v52  ;;  %v8683_v52 = vld [vmem:[%s14273_s0 + $0x133] ss:$2 sm:$0xff] }
 0x27e   :  { %2000 = vst.msk [vmem:[#allocation3 + $0x38] sm:$0xff] %vm1551_vm2, %v1819_v53  ;;  %v1839_v54 = vpop.permute.xlu2 %1838  ;;  %v8684_v53 = vld [vmem:[%s14273_s0 + $0x143] ss:$2 sm:$0xff] }
 0x27f   :  { %2010 = vst.msk [vmem:[#allocation3 + $0x88] sm:$0xff] %vm1551_vm2, %v1839_v54 }
 0x282   :  { %1906 = vrot.lane.b32.xlu0 %v8652_v55, %s9147_s12 }
 0x283   :  { %1908 = vrot.lane.b32.xlu1 %v8653_v56, %s9147_s12 }
 0x284   :  { %v1823_v58 = vpop.permute.xlu0 %1822  ;;  %1910 = vrot.lane.b32.xlu2 %v8654_v57, %s9147_s12  ;;  %v8685_v57 = vld [vmem:[%s14273_s0 + $0x153] ss:$2 sm:$0xff] }
 0x285   :  { %v1825_v59 = vpop.permute.xlu1 %1824  ;;  %2002 = vst.msk [vmem:[#allocation3 + $0x48] sm:$0xff] %vm1551_vm2, %v1823_v58  ;;  %v8686_v58 = vld [vmem:[%s14273_s0 + $0x163] ss:$2 sm:$0xff] }
 0x286   :  { %2003 = vst.msk [vmem:[#allocation3 + $0x50] sm:$0xff] %vm1551_vm2, %v1825_v59  ;;  %v1845_v60 = vpop.permute.xlu2 %1844  ;;  %v8687_v59 = vld [vmem:[%s14273_s0 + $0x173] ss:$2 sm:$0xff] }
 0x287   :  { %2013 = vst.msk [vmem:[#allocation3 + $0xa0] sm:$0xff] %vm1551_vm2, %v1845_v60 }
 0x28a   :  { %1912 = vrot.lane.b32.xlu0 %v8655_v61, %s9147_s12 }
 0x28b   :  { %1914 = vrot.lane.b32.xlu1 %v8656_v62, %s9147_s12 }
 0x28c   :  { %v1829_v0 = vpop.permute.xlu0 %1828  ;;  %1916 = vrot.lane.b32.xlu2 %v8657_v63, %s9147_s12  ;;  %v8688_v63 = vld [vmem:[%s14273_s0 + $0x183] ss:$2 sm:$0xff] }
 0x28d   :  { %v1831_v1 = vpop.permute.xlu1 %1830  ;;  %2005 = vst.msk [vmem:[#allocation3 + $0x60] sm:$0xff] %vm1551_vm2, %v1829_v0  ;;  %v8689_v0 = vld [vmem:[%s14273_s0 + $0x193] ss:$2 sm:$0xff] }
 0x28e   :  { %2006 = vst.msk [vmem:[#allocation3 + $0x68] sm:$0xff] %vm1551_vm2, %v1831_v1  ;;  %v1851_v2 = vpop.permute.xlu2 %1850  ;;  %v8690_v1 = vld [vmem:[%s14273_s0 + $0x1a3] ss:$2 sm:$0xff] }
 0x28f   :  { %2016 = vst.msk [vmem:[#allocation3 + $0xb8] sm:$0xff] %vm1551_vm2, %v1851_v2 }
 0x292   :  { %1918 = vrot.lane.b32.xlu0 %v8658_v3, %s9147_s12 }
 0x293   :  { %1920 = vrot.lane.b32.xlu1 %v8659_v4, %s9147_s12 }
 0x294   :  { %v1835_v6 = vpop.permute.xlu0 %1834  ;;  %1922 = vrot.lane.b32.xlu2 %v8660_v5, %s9147_s12  ;;  %v8691_v5 = vld [vmem:[%s14273_s0 + $0x1b3] ss:$2 sm:$0xff] }
 0x295   :  { %v1837_v7 = vpop.permute.xlu1 %1836  ;;  %2008 = vst.msk [vmem:[#allocation3 + $0x78] sm:$0xff] %vm1551_vm2, %v1835_v6  ;;  %v8692_v6 = vld [vmem:[%s14273_s0 + $0x1c3] ss:$2 sm:$0xff] }
 0x296   :  { %2009 = vst.msk [vmem:[#allocation3 + $0x80] sm:$0xff] %vm1551_vm2, %v1837_v7  ;;  %v1857_v8 = vpop.permute.xlu2 %1856  ;;  %v8693_v7 = vld [vmem:[%s14273_s0 + $0x1d3] ss:$2 sm:$0xff] }
 0x297   :  { %2019 = vst.msk [vmem:[#allocation3 + $0xd0] sm:$0xff] %vm1551_vm2, %v1857_v8 }
 0x29a   :  { %1924 = vrot.lane.b32.xlu0 %v8661_v9, %s9147_s12 }
 0x29b   :  { %1926 = vrot.lane.b32.xlu1 %v8662_v10, %s9147_s12 }
 0x29c   :  { %v1841_v12 = vpop.permute.xlu0 %1840  ;;  %1928 = vrot.lane.b32.xlu2 %v8663_v11, %s9147_s12  ;;  %s9148_s12 = smov 12   ;;  %v8694_v11 = vld [vmem:[%s14273_s0 + $0x1e3] ss:$2 sm:$0xff] }
 0x29d   :  { %v1843_v13 = vpop.permute.xlu1 %1842  ;;  %2011 = vst.msk [vmem:[#allocation3 + $0x90] sm:$0xff] %vm1551_vm2, %v1841_v12  ;;  %v8695_v12 = vld [vmem:[%s14273_s0 + $0x1f3] ss:$2 sm:$0xff] }
 0x29e   :  { %2012 = vst.msk [vmem:[#allocation3 + $0x98] sm:$0xff] %vm1551_vm2, %v1843_v13  ;;  %v1863_v14 = vpop.permute.xlu2 %1862  ;;  %v8696_v13 = vld [vmem:[%s14273_s0 + $0x203] ss:$2 sm:$0xff] }
 0x29f   :  { %2022 = vst.msk [vmem:[#allocation3 + $0xe8] sm:$0xff] %vm1551_vm2, %v1863_v14 }
 0x2a2   :  { %2182 = vrot.lane.b32.xlu0 %v8664_v15, %s9148_s12 }
 0x2a3   :  { %2184 = vrot.lane.b32.xlu1 %v8665_v16, %s9148_s12 }
 0x2a4   :  { %v1847_v18 = vpop.permute.xlu0 %1846  ;;  %2186 = vrot.lane.b32.xlu2 %v8666_v17, %s9148_s12  ;;  %v8697_v17 = vld [vmem:[%s14273_s0 + $0x213] ss:$2 sm:$0xff] }
 0x2a5   :  { %v1849_v19 = vpop.permute.xlu1 %1848  ;;  %2014 = vst.msk [vmem:[#allocation3 + $0xa8] sm:$0xff] %vm1551_vm2, %v1847_v18  ;;  %v8698_v18 = vld [vmem:[%s14273_s0 + $0x223] ss:$2 sm:$0xff] }
 0x2a6   :  { %2015 = vst.msk [vmem:[#allocation3 + $0xb0] sm:$0xff] %vm1551_vm2, %v1849_v19  ;;  %v1869_v20 = vpop.permute.xlu2 %1868  ;;  %v8699_v19 = vld [vmem:[%s14273_s0 + $0x233] ss:$2 sm:$0xff] }
 0x2a7   :  { %2025 = vst.msk [vmem:[#allocation3 + $0x100] sm:$0xff] %vm1551_vm2, %v1869_v20 }
 0x2aa   :  { %2188 = vrot.lane.b32.xlu0 %v8667_v21, %s9148_s12 }
 0x2ab   :  { %2190 = vrot.lane.b32.xlu1 %v8668_v22, %s9148_s12 }
 0x2ac   :  { %v1853_v24 = vpop.permute.xlu0 %1852  ;;  %2192 = vrot.lane.b32.xlu2 %v8669_v23, %s9148_s12  ;;  %v8700_v23 = vld [vmem:[%s14273_s0 + $0x243] ss:$2 sm:$0xff] }
 0x2ad   :  { %v1855_v25 = vpop.permute.xlu1 %1854  ;;  %2017 = vst.msk [vmem:[#allocation3 + $0xc0] sm:$0xff] %vm1551_vm2, %v1853_v24  ;;  %v8701_v24 = vld [vmem:[%s14273_s0 + $0x253] ss:$2 sm:$0xff] }
 0x2ae   :  { %2018 = vst.msk [vmem:[#allocation3 + $0xc8] sm:$0xff] %vm1551_vm2, %v1855_v25  ;;  %v1875_v26 = vpop.permute.xlu2 %1874  ;;  %v8702_v25 = vld [vmem:[%s14273_s0 + $0x263] ss:$2 sm:$0xff] }
 0x2af   :  { %2028 = vst.msk [vmem:[#allocation3 + $0x118] sm:$0xff] %vm1551_vm2, %v1875_v26 }
 0x2b2   :  { %2194 = vrot.lane.b32.xlu0 %v8670_v27, %s9148_s12 }
 0x2b3   :  { %2196 = vrot.lane.b32.xlu1 %v8671_v28, %s9148_s12 }
 0x2b4   :  { %v1859_v30 = vpop.permute.xlu0 %1858  ;;  %2198 = vrot.lane.b32.xlu2 %v8672_v29, %s9148_s12  ;;  %v8703_v29 = vld [vmem:[%s14273_s0 + $0x273] ss:$2 sm:$0xff] }
 0x2b5   :  { %v1861_v31 = vpop.permute.xlu1 %1860  ;;  %2020 = vst.msk [vmem:[#allocation3 + $0xd8] sm:$0xff] %vm1551_vm2, %v1859_v30  ;;  %v8704_v30 = vld [vmem:[%s14273_s0 + $0x283] ss:$2 sm:$0xff] }
 0x2b6   :  { %2021 = vst.msk [vmem:[#allocation3 + $0xe0] sm:$0xff] %vm1551_vm2, %v1861_v31  ;;  %v1881_v32 = vpop.permute.xlu2 %1880  ;;  %v8705_v31 = vld [vmem:[%s14273_s0 + $0x293] ss:$2 sm:$0xff] }
 0x2b7   :  { %2031 = vst.msk [vmem:[#allocation3 + $0x130] sm:$0xff] %vm1551_vm2, %v1881_v32 }
 0x2ba   :  { %2200 = vrot.lane.b32.xlu0 %v8673_v33, %s9148_s12 }
 0x2bb   :  { %2202 = vrot.lane.b32.xlu1 %v8674_v34, %s9148_s12 }
 0x2bc   :  { %v1865_v36 = vpop.permute.xlu0 %1864  ;;  %2204 = vrot.lane.b32.xlu2 %v8675_v35, %s9148_s12  ;;  %v8706_v35 = vld [vmem:[%s14273_s0 + $0x2a3] ss:$2 sm:$0xff] }
 0x2bd   :  { %v1867_v37 = vpop.permute.xlu1 %1866  ;;  %2023 = vst.msk [vmem:[#allocation3 + $0xf0] sm:$0xff] %vm1551_vm2, %v1865_v36  ;;  %v8707_v36 = vld [vmem:[%s14273_s0 + $0x2b3] ss:$2 sm:$0xff] }
 0x2be   :  { %2024 = vst.msk [vmem:[#allocation3 + $0xf8] sm:$0xff] %vm1551_vm2, %v1867_v37  ;;  %v1887_v38 = vpop.permute.xlu2 %1886  ;;  %v8708_v37 = vld [vmem:[%s14273_s0 + $0x2c3] ss:$2 sm:$0xff] }
 0x2bf   :  { %2034 = vst.msk [vmem:[#allocation3 + $0x148] sm:$0xff] %vm1551_vm2, %v1887_v38 }
 0x2c2   :  { %2206 = vrot.lane.b32.xlu0 %v8676_v39, %s9148_s12 }
 0x2c3   :  { %2208 = vrot.lane.b32.xlu1 %v8677_v40, %s9148_s12 }
 0x2c4   :  { %v1871_v42 = vpop.permute.xlu0 %1870  ;;  %2210 = vrot.lane.b32.xlu2 %v8678_v41, %s9148_s12  ;;  %v8709_v41 = vld [vmem:[%s14273_s0 + $0x2d3] ss:$2 sm:$0xff] }
 0x2c5   :  { %v1873_v43 = vpop.permute.xlu1 %1872  ;;  %2026 = vst.msk [vmem:[#allocation3 + $0x108] sm:$0xff] %vm1551_vm2, %v1871_v42  ;;  %v8710_v42 = vld [vmem:[%s14273_s0 + $0x2e3] ss:$2 sm:$0xff] }
 0x2c6   :  { %2027 = vst.msk [vmem:[#allocation3 + $0x110] sm:$0xff] %vm1551_vm2, %v1873_v43  ;;  %v1893_v44 = vpop.permute.xlu2 %1892  ;;  %v8711_v43 = vld [vmem:[%s14273_s0 + $0x2f3] ss:$2 sm:$0xff] }
 0x2c7   :  { %2037 = vst.msk [vmem:[#allocation3 + $0x160] sm:$0xff] %vm1551_vm2, %v1893_v44 }
 0x2ca   :  { %2212 = vrot.lane.b32.xlu0 %v8679_v45, %s9148_s12 }
 0x2cb   :  { %2214 = vrot.lane.b32.xlu1 %v8680_v46, %s9148_s12 }
 0x2cc   :  { %v1877_v48 = vpop.permute.xlu0 %1876  ;;  %2216 = vrot.lane.b32.xlu2 %v8681_v47, %s9148_s12  ;;  %v8712_v47 = vld [vmem:[%s14273_s0 + $0x303] ss:$2 sm:$0xff] }
 0x2cd   :  { %v1879_v49 = vpop.permute.xlu1 %1878  ;;  %2029 = vst.msk [vmem:[#allocation3 + $0x120] sm:$0xff] %vm1551_vm2, %v1877_v48  ;;  %v8713_v48 = vld [vmem:[%s14273_s0 + $0x313] ss:$2 sm:$0xff] }
 0x2ce   :  { %2030 = vst.msk [vmem:[#allocation3 + $0x128] sm:$0xff] %vm1551_vm2, %v1879_v49  ;;  %v1899_v50 = vpop.permute.xlu2 %1898  ;;  %v8714_v49 = vld [vmem:[%s14273_s0 + $0x323] ss:$2 sm:$0xff] }
 0x2cf   :  { %2040 = vst.msk [vmem:[#allocation3 + $0x178] sm:$0xff] %vm1551_vm2, %v1899_v50 }
 0x2d2   :  { %2218 = vrot.lane.b32.xlu0 %v8682_v51, %s9148_s12 }
 0x2d3   :  { %2220 = vrot.lane.b32.xlu1 %v8683_v52, %s9148_s12 }
 0x2d4   :  { %v1883_v54 = vpop.permute.xlu0 %1882  ;;  %2222 = vrot.lane.b32.xlu2 %v8684_v53, %s9148_s12  ;;  %v8715_v53 = vld [vmem:[%s14273_s0 + $0x333] ss:$2 sm:$0xff] }
 0x2d5   :  { %v1885_v55 = vpop.permute.xlu1 %1884  ;;  %2032 = vst.msk [vmem:[#allocation3 + $0x138] sm:$0xff] %vm1551_vm2, %v1883_v54  ;;  %v8716_v54 = vld [vmem:[%s14273_s0 + $0x343] ss:$2 sm:$0xff] }
 0x2d6   :  { %2033 = vst.msk [vmem:[#allocation3 + $0x140] sm:$0xff] %vm1551_vm2, %v1885_v55  ;;  %v1905_v56 = vpop.permute.xlu2 %1904  ;;  %v8717_v55 = vld [vmem:[%s14273_s0 + $0x353] ss:$2 sm:$0xff] }
 0x2d7   :  { %2043 = vst.msk [vmem:[#allocation3 + $0x190] sm:$0xff] %vm1551_vm2, %v1905_v56 }
 0x2da   :  { %2224 = vrot.lane.b32.xlu0 %v8685_v57, %s9148_s12 }
 0x2db   :  { %2226 = vrot.lane.b32.xlu1 %v8686_v58, %s9148_s12 }
 0x2dc   :  { %v1889_v60 = vpop.permute.xlu0 %1888  ;;  %2228 = vrot.lane.b32.xlu2 %v8687_v59, %s9148_s12  ;;  %v8718_v59 = vld [vmem:[%s14273_s0 + $0x363] ss:$2 sm:$0xff] }
 0x2dd   :  { %v1891_v61 = vpop.permute.xlu1 %1890  ;;  %2035 = vst.msk [vmem:[#allocation3 + $0x150] sm:$0xff] %vm1551_vm2, %v1889_v60  ;;  %v8719_v60 = vld [vmem:[%s14273_s0 + $0x373] ss:$2 sm:$0xff] }
 0x2de   :  { %2036 = vst.msk [vmem:[#allocation3 + $0x158] sm:$0xff] %vm1551_vm2, %v1891_v61  ;;  %v1911_v62 = vpop.permute.xlu2 %1910  ;;  %v8720_v61 = vld [vmem:[%s14273_s0 + $0x383] ss:$2 sm:$0xff] }
 0x2df   :  { %2046 = vst.msk [vmem:[#allocation3 + $0x1a8] sm:$0xff] %vm1551_vm2, %v1911_v62 }
 0x2e2   :  { %2230 = vrot.lane.b32.xlu0 %v8688_v63, %s9148_s12 }
 0x2e3   :  { %2232 = vrot.lane.b32.xlu1 %v8689_v0, %s9148_s12 }
 0x2e4   :  { %v1895_v2 = vpop.permute.xlu0 %1894  ;;  %2234 = vrot.lane.b32.xlu2 %v8690_v1, %s9148_s12  ;;  %v8721_v1 = vld [vmem:[%s14273_s0 + $0x393] ss:$2 sm:$0xff] }
 0x2e5   :  { %v1897_v3 = vpop.permute.xlu1 %1896  ;;  %2038 = vst.msk [vmem:[#allocation3 + $0x168] sm:$0xff] %vm1551_vm2, %v1895_v2  ;;  %v8722_v2 = vld [vmem:[%s14273_s0 + $0x3a3] ss:$2 sm:$0xff] }
 0x2e6   :  { %2039 = vst.msk [vmem:[#allocation3 + $0x170] sm:$0xff] %vm1551_vm2, %v1897_v3  ;;  %v1917_v4 = vpop.permute.xlu2 %1916  ;;  %v8723_v3 = vld [vmem:[%s14273_s0 + $0x3b3] ss:$2 sm:$0xff] }
 0x2e7   :  { %2049 = vst.msk [vmem:[#allocation3 + $0x1c0] sm:$0xff] %vm1551_vm2, %v1917_v4 }
 0x2ea   :  { %2236 = vrot.lane.b32.xlu0 %v8691_v5, %s9148_s12 }
 0x2eb   :  { %2238 = vrot.lane.b32.xlu1 %v8692_v6, %s9148_s12 }
 0x2ec   :  { %v1901_v8 = vpop.permute.xlu0 %1900  ;;  %2240 = vrot.lane.b32.xlu2 %v8693_v7, %s9148_s12  ;;  %v8724_v7 = vld [vmem:[%s14273_s0 + $0x3c3] ss:$2 sm:$0xff] }
 0x2ed   :  { %v1903_v9 = vpop.permute.xlu1 %1902  ;;  %2041 = vst.msk [vmem:[#allocation3 + $0x180] sm:$0xff] %vm1551_vm2, %v1901_v8  ;;  %v8725_v8 = vld [vmem:[%s14273_s0 + $0x3d3] ss:$2 sm:$0xff] }
 0x2ee   :  { %2042 = vst.msk [vmem:[#allocation3 + $0x188] sm:$0xff] %vm1551_vm2, %v1903_v9  ;;  %v1923_v10 = vpop.permute.xlu2 %1922  ;;  %v8726_v9 = vld [vmem:[%s14273_s0 + $0x3e3] ss:$2 sm:$0xff] }
 0x2ef   :  { %2052 = vst.msk [vmem:[#allocation3 + $0x1d8] sm:$0xff] %vm1551_vm2, %v1923_v10 }
 0x2f2   :  { %2242 = vrot.lane.b32.xlu0 %v8694_v11, %s9148_s12 }
 0x2f3   :  { %2244 = vrot.lane.b32.xlu1 %v8695_v12, %s9148_s12 }
 0x2f4   :  { %v1907_v14 = vpop.permute.xlu0 %1906  ;;  %2246 = vrot.lane.b32.xlu2 %v8696_v13, %s9148_s12  ;;  %v8727_v13 = vld [vmem:[%s14273_s0 + $0x4] ss:$2 sm:$0xff] }
 0x2f5   :  { %v1909_v15 = vpop.permute.xlu1 %1908  ;;  %2044 = vst.msk [vmem:[#allocation3 + $0x198] sm:$0xff] %vm1551_vm2, %v1907_v14  ;;  %v8728_v14 = vld [vmem:[%s14273_s0 + $0x14] ss:$2 sm:$0xff] }
 0x2f6   :  { %2045 = vst.msk [vmem:[#allocation3 + $0x1a0] sm:$0xff] %vm1551_vm2, %v1909_v15  ;;  %v1929_v16 = vpop.permute.xlu2 %1928  ;;  %v8729_v15 = vld [vmem:[%s14273_s0 + $0x24] ss:$2 sm:$0xff] }
 0x2f7   :  { %2055 = vst.msk [vmem:[#allocation3 + $0x1f0] sm:$0xff] %vm1551_vm2, %v1929_v16 }
 0x2fa   :  { %2248 = vrot.lane.b32.xlu0 %v8697_v17, %s9148_s12 }
 0x2fb   :  { %2250 = vrot.lane.b32.xlu1 %v8698_v18, %s9148_s12 }
 0x2fc   :  { %v1913_v20 = vpop.permute.xlu0 %1912  ;;  %2252 = vrot.lane.b32.xlu2 %v8699_v19, %s9148_s12  ;;  %v8730_v19 = vld [vmem:[%s14273_s0 + $0x34] ss:$2 sm:$0xff] }
 0x2fd   :  { %v1915_v21 = vpop.permute.xlu1 %1914  ;;  %2047 = vst.msk [vmem:[#allocation3 + $0x1b0] sm:$0xff] %vm1551_vm2, %v1913_v20  ;;  %v8731_v20 = vld [vmem:[%s14273_s0 + $0x44] ss:$2 sm:$0xff] }
 0x2fe   :  { %2048 = vst.msk [vmem:[#allocation3 + $0x1b8] sm:$0xff] %vm1551_vm2, %v1915_v21  ;;  %v2187_v22 = vpop.permute.xlu2 %2186  ;;  %v8732_v21 = vld [vmem:[%s14273_s0 + $0x54] ss:$2 sm:$0xff] }
 0x2ff   :  { %2374 = vst.msk [vmem:[#allocation2 + $0x10] sm:$0xff] %vm2371_vm3, %v2187_v22 }
 0x302   :  { %2254 = vrot.lane.b32.xlu0 %v8700_v23, %s9148_s12 }
 0x303   :  { %2256 = vrot.lane.b32.xlu1 %v8701_v24, %s9148_s12 }
 0x304   :  { %v1919_v26 = vpop.permute.xlu0 %1918  ;;  %2258 = vrot.lane.b32.xlu2 %v8702_v25, %s9148_s12  ;;  %v8733_v25 = vld [vmem:[%s14273_s0 + $0x64] ss:$2 sm:$0xff] }
 0x305   :  { %v1921_v27 = vpop.permute.xlu1 %1920  ;;  %2050 = vst.msk [vmem:[#allocation3 + $0x1c8] sm:$0xff] %vm1551_vm2, %v1919_v26  ;;  %v8734_v26 = vld [vmem:[%s14273_s0 + $0x74] ss:$2 sm:$0xff] }
 0x306   :  { %2051 = vst.msk [vmem:[#allocation3 + $0x1d0] sm:$0xff] %vm1551_vm2, %v1921_v27  ;;  %v2193_v28 = vpop.permute.xlu2 %2192  ;;  %v8735_v27 = vld [vmem:[%s14273_s0 + $0x84] ss:$2 sm:$0xff] }
 0x307   :  { %2377 = vst.msk [vmem:[#allocation2 + $0x28] sm:$0xff] %vm2371_vm3, %v2193_v28 }
 0x30a   :  { %2260 = vrot.lane.b32.xlu0 %v8703_v29, %s9148_s12 }
 0x30b   :  { %2262 = vrot.lane.b32.xlu1 %v8704_v30, %s9148_s12 }
 0x30c   :  { %v1925_v32 = vpop.permute.xlu0 %1924  ;;  %2264 = vrot.lane.b32.xlu2 %v8705_v31, %s9148_s12  ;;  %v8736_v31 = vld [vmem:[%s14273_s0 + $0x94] ss:$2 sm:$0xff] }
 0x30d   :  { %v1927_v33 = vpop.permute.xlu1 %1926  ;;  %2053 = vst.msk [vmem:[#allocation3 + $0x1e0] sm:$0xff] %vm1551_vm2, %v1925_v32  ;;  %v8737_v32 = vld [vmem:[%s14273_s0 + $0xa4] ss:$2 sm:$0xff] }
 0x30e   :  { %2054 = vst.msk [vmem:[#allocation3 + $0x1e8] sm:$0xff] %vm1551_vm2, %v1927_v33  ;;  %v2199_v34 = vpop.permute.xlu2 %2198  ;;  %v8738_v33 = vld [vmem:[%s14273_s0 + $0xb4] ss:$2 sm:$0xff]  ;;  %vm7306_vm2 = vcmask 654848  }
 0x30f   :  { %2380 = vst.msk [vmem:[#allocation2 + $0x40] sm:$0xff] %vm2371_vm3, %v2199_v34 }
 0x312   :  { %2266 = vrot.lane.b32.xlu0 %v8706_v35, %s9148_s12 }
 0x313   :  { %2268 = vrot.lane.b32.xlu1 %v8707_v36, %s9148_s12 }
 0x314   :  { %v2183_v38 = vpop.permute.xlu0 %2182  ;;  %2270 = vrot.lane.b32.xlu2 %v8708_v37, %s9148_s12  ;;  %v8739_v37 = vld [vmem:[%s14273_s0 + $0xc4] ss:$2 sm:$0xff] }
 0x315   :  { %v2185_v39 = vpop.permute.xlu1 %2184  ;;  %2372 = vst.msk [vmem:[#allocation2] sm:$0xff] %vm2371_vm3, %v2183_v38  ;;  %v8740_v38 = vld [vmem:[%s14273_s0 + $0xd4] ss:$2 sm:$0xff] }
 0x316   :  { %2373 = vst.msk [vmem:[#allocation2 + $0x8] sm:$0xff] %vm2371_vm3, %v2185_v39  ;;  %v2205_v40 = vpop.permute.xlu2 %2204  ;;  %v8741_v39 = vld [vmem:[%s14273_s0 + $0xe4] ss:$2 sm:$0xff] }
 0x317   :  { %2383 = vst.msk [vmem:[#allocation2 + $0x58] sm:$0xff] %vm2371_vm3, %v2205_v40 }
 0x31a   :  { %2272 = vrot.lane.b32.xlu0 %v8709_v41, %s9148_s12 }
 0x31b   :  { %2274 = vrot.lane.b32.xlu1 %v8710_v42, %s9148_s12 }
 0x31c   :  { %v2189_v44 = vpop.permute.xlu0 %2188  ;;  %2276 = vrot.lane.b32.xlu2 %v8711_v43, %s9148_s12  ;;  %v8742_v43 = vld [vmem:[%s14273_s0 + $0xf4] ss:$2 sm:$0xff] }
 0x31d   :  { %v2191_v45 = vpop.permute.xlu1 %2190  ;;  %2375 = vst.msk [vmem:[#allocation2 + $0x18] sm:$0xff] %vm2371_vm3, %v2189_v44  ;;  %v8743_v44 = vld [vmem:[%s14273_s0 + $0x104] ss:$2 sm:$0xff] }
 0x31e   :  { %2376 = vst.msk [vmem:[#allocation2 + $0x20] sm:$0xff] %vm2371_vm3, %v2191_v45  ;;  %v2211_v46 = vpop.permute.xlu2 %2210  ;;  %v8744_v45 = vld [vmem:[%s14273_s0 + $0x114] ss:$2 sm:$0xff] }
 0x31f   :  { %2386 = vst.msk [vmem:[#allocation2 + $0x70] sm:$0xff] %vm2371_vm3, %v2211_v46 }
 0x322   :  { %2278 = vrot.lane.b32.xlu0 %v8712_v47, %s9148_s12 }
 0x323   :  { %2280 = vrot.lane.b32.xlu1 %v8713_v48, %s9148_s12 }
 0x324   :  { %v2195_v50 = vpop.permute.xlu0 %2194  ;;  %2282 = vrot.lane.b32.xlu2 %v8714_v49, %s9148_s12  ;;  %v8745_v49 = vld [vmem:[%s14273_s0 + $0x124] ss:$2 sm:$0xff] }
 0x325   :  { %v2197_v51 = vpop.permute.xlu1 %2196  ;;  %2378 = vst.msk [vmem:[#allocation2 + $0x30] sm:$0xff] %vm2371_vm3, %v2195_v50  ;;  %v8746_v50 = vld [vmem:[%s14273_s0 + $0x134] ss:$2 sm:$0xff] }
 0x326   :  { %2379 = vst.msk [vmem:[#allocation2 + $0x38] sm:$0xff] %vm2371_vm3, %v2197_v51  ;;  %v2217_v52 = vpop.permute.xlu2 %2216  ;;  %v8747_v51 = vld [vmem:[%s14273_s0 + $0x144] ss:$2 sm:$0xff] }
 0x327   :  { %2389 = vst.msk [vmem:[#allocation2 + $0x88] sm:$0xff] %vm2371_vm3, %v2217_v52 }
 0x32a   :  { %2284 = vrot.lane.b32.xlu0 %v8715_v53, %s9148_s12 }
 0x32b   :  { %2286 = vrot.lane.b32.xlu1 %v8716_v54, %s9148_s12 }
 0x32c   :  { %v2201_v56 = vpop.permute.xlu0 %2200  ;;  %2288 = vrot.lane.b32.xlu2 %v8717_v55, %s9148_s12  ;;  %v8748_v55 = vld [vmem:[%s14273_s0 + $0x154] ss:$2 sm:$0xff] }
 0x32d   :  { %v2203_v57 = vpop.permute.xlu1 %2202  ;;  %2381 = vst.msk [vmem:[#allocation2 + $0x48] sm:$0xff] %vm2371_vm3, %v2201_v56  ;;  %v8749_v56 = vld [vmem:[%s14273_s0 + $0x164] ss:$2 sm:$0xff] }
 0x32e   :  { %2382 = vst.msk [vmem:[#allocation2 + $0x50] sm:$0xff] %vm2371_vm3, %v2203_v57  ;;  %v2223_v58 = vpop.permute.xlu2 %2222  ;;  %v8750_v57 = vld [vmem:[%s14273_s0 + $0x174] ss:$2 sm:$0xff] }
 0x32f   :  { %2392 = vst.msk [vmem:[#allocation2 + $0xa0] sm:$0xff] %vm2371_vm3, %v2223_v58 }
 0x332   :  { %2290 = vrot.lane.b32.xlu0 %v8718_v59, %s9148_s12 }
 0x333   :  { %2292 = vrot.lane.b32.xlu1 %v8719_v60, %s9148_s12 }
 0x334   :  { %v2207_v62 = vpop.permute.xlu0 %2206  ;;  %2294 = vrot.lane.b32.xlu2 %v8720_v61, %s9148_s12  ;;  %v8751_v61 = vld [vmem:[%s14273_s0 + $0x184] ss:$2 sm:$0xff] }
 0x335   :  { %v2209_v63 = vpop.permute.xlu1 %2208  ;;  %2384 = vst.msk [vmem:[#allocation2 + $0x60] sm:$0xff] %vm2371_vm3, %v2207_v62  ;;  %v8752_v62 = vld [vmem:[%s14273_s0 + $0x194] ss:$2 sm:$0xff] }
 0x336   :  { %2385 = vst.msk [vmem:[#allocation2 + $0x68] sm:$0xff] %vm2371_vm3, %v2209_v63  ;;  %v2229_v0 = vpop.permute.xlu2 %2228  ;;  %v8753_v63 = vld [vmem:[%s14273_s0 + $0x1a4] ss:$2 sm:$0xff] }
 0x337   :  { %2395 = vst.msk [vmem:[#allocation2 + $0xb8] sm:$0xff] %vm2371_vm3, %v2229_v0 }
 0x33a   :  { %2296 = vrot.lane.b32.xlu0 %v8721_v1, %s9148_s12 }
 0x33b   :  { %2298 = vrot.lane.b32.xlu1 %v8722_v2, %s9148_s12 }
 0x33c   :  { %v2213_v4 = vpop.permute.xlu0 %2212  ;;  %2300 = vrot.lane.b32.xlu2 %v8723_v3, %s9148_s12  ;;  %v8754_v3 = vld [vmem:[%s14273_s0 + $0x1b4] ss:$2 sm:$0xff] }
 0x33d   :  { %v2215_v5 = vpop.permute.xlu1 %2214  ;;  %2387 = vst.msk [vmem:[#allocation2 + $0x78] sm:$0xff] %vm2371_vm3, %v2213_v4  ;;  %v8755_v4 = vld [vmem:[%s14273_s0 + $0x1c4] ss:$2 sm:$0xff] }
 0x33e   :  { %2388 = vst.msk [vmem:[#allocation2 + $0x80] sm:$0xff] %vm2371_vm3, %v2215_v5  ;;  %v2235_v6 = vpop.permute.xlu2 %2234  ;;  %v8756_v5 = vld [vmem:[%s14273_s0 + $0x1d4] ss:$2 sm:$0xff] }
 0x33f   :  { %2398 = vst.msk [vmem:[#allocation2 + $0xd0] sm:$0xff] %vm2371_vm3, %v2235_v6 }
 0x342   :  { %2302 = vrot.lane.b32.xlu0 %v8724_v7, %s9148_s12 }
 0x343   :  { %2304 = vrot.lane.b32.xlu1 %v8725_v8, %s9148_s12 }
 0x344   :  { %v2219_v10 = vpop.permute.xlu0 %2218  ;;  %2306 = vrot.lane.b32.xlu2 %v8726_v9, %s9148_s12  ;;  %v8757_v9 = vld [vmem:[%s14273_s0 + $0x1e4] ss:$2 sm:$0xff] }
 0x345   :  { %v2221_v11 = vpop.permute.xlu1 %2220  ;;  %2390 = vst.msk [vmem:[#allocation2 + $0x90] sm:$0xff] %vm2371_vm3, %v2219_v10  ;;  %v8758_v10 = vld [vmem:[%s14273_s0 + $0x1f4] ss:$2 sm:$0xff] }
 0x346   :  { %2391 = vst.msk [vmem:[#allocation2 + $0x98] sm:$0xff] %vm2371_vm3, %v2221_v11  ;;  %v2241_v12 = vpop.permute.xlu2 %2240  ;;  %v8759_v11 = vld [vmem:[%s14273_s0 + $0x204] ss:$2 sm:$0xff] }
 0x347   :  { %2401 = vst.msk [vmem:[#allocation2 + $0xe8] sm:$0xff] %vm2371_vm3, %v2241_v12 }
 0x34a   :  { %2624 = vrot.lane.b32.xlu0 %v8727_v13, %s9148_s12 }
 0x34b   :  { %2626 = vrot.lane.b32.xlu1 %v8728_v14, %s9148_s12 }
 0x34c   :  { %v2225_v16 = vpop.permute.xlu0 %2224  ;;  %2628 = vrot.lane.b32.xlu2 %v8729_v15, %s9148_s12  ;;  %v8760_v15 = vld [vmem:[%s14273_s0 + $0x214] ss:$2 sm:$0xff] }
 0x34d   :  { %v2227_v17 = vpop.permute.xlu1 %2226  ;;  %2393 = vst.msk [vmem:[#allocation2 + $0xa8] sm:$0xff] %vm2371_vm3, %v2225_v16  ;;  %v8761_v16 = vld [vmem:[%s14273_s0 + $0x224] ss:$2 sm:$0xff] }
 0x34e   :  { %2394 = vst.msk [vmem:[#allocation2 + $0xb0] sm:$0xff] %vm2371_vm3, %v2227_v17  ;;  %v2247_v18 = vpop.permute.xlu2 %2246  ;;  %v8790_v17 = vld [vmem:[%s14273_s0 + $0x4] ss:$2 sm:$0xff] }
 0x34f   :  { %2404 = vst.msk [vmem:[#allocation2 + $0x100] sm:$0xff] %vm2371_vm3, %v2247_v18 }
 0x352   :  { %2630 = vrot.lane.b32.xlu0 %v8730_v19, %s9148_s12 }
 0x353   :  { %2632 = vrot.lane.b32.xlu1 %v8731_v20, %s9148_s12 }
 0x354   :  { %v2231_v22 = vpop.permute.xlu0 %2230  ;;  %2634 = vrot.lane.b32.xlu2 %v8732_v21, %s9148_s12  ;;  %v8853_v21 = vld [vmem:[%s14273_s0 + $0x5] ss:$2 sm:$0xff] }
 0x355   :  { %v2233_v23 = vpop.permute.xlu1 %2232  ;;  %2396 = vst.msk [vmem:[#allocation2 + $0xc0] sm:$0xff] %vm2371_vm3, %v2231_v22  ;;  %v8762_v22 = vld [vmem:[%s14273_s0 + $0x234] ss:$2 sm:$0xff] }
 0x356   :  { %2397 = vst.msk [vmem:[#allocation2 + $0xc8] sm:$0xff] %vm2371_vm3, %v2233_v23  ;;  %v2253_v24 = vpop.permute.xlu2 %2252  ;;  %v8791_v23 = vld [vmem:[%s14273_s0 + $0x14] ss:$2 sm:$0xff] }
 0x357   :  { %2407 = vst.msk [vmem:[#allocation2 + $0x118] sm:$0xff] %vm2371_vm3, %v2253_v24 }
 0x35a   :  { %2636 = vrot.lane.b32.xlu0 %v8733_v25, %s9148_s12 }
 0x35b   :  { %2638 = vrot.lane.b32.xlu1 %v8734_v26, %s9148_s12 }
 0x35c   :  { %v2237_v28 = vpop.permute.xlu0 %2236  ;;  %2640 = vrot.lane.b32.xlu2 %v8735_v27, %s9148_s12  ;;  %v8854_v27 = vld [vmem:[%s14273_s0 + $0x15] ss:$2 sm:$0xff] }
 0x35d   :  { %v2239_v29 = vpop.permute.xlu1 %2238  ;;  %2399 = vst.msk [vmem:[#allocation2 + $0xd8] sm:$0xff] %vm2371_vm3, %v2237_v28  ;;  %v8792_v28 = vld [vmem:[%s14273_s0 + $0x24] ss:$2 sm:$0xff] }
 0x35e   :  { %2400 = vst.msk [vmem:[#allocation2 + $0xe0] sm:$0xff] %vm2371_vm3, %v2239_v29  ;;  %v2259_v30 = vpop.permute.xlu2 %2258  ;;  %v8855_v29 = vld [vmem:[%s14273_s0 + $0x25] ss:$2 sm:$0xff] }
 0x35f   :  { %2410 = vst.msk [vmem:[#allocation2 + $0x130] sm:$0xff] %vm2371_vm3, %v2259_v30 }
 0x362   :  { %2642 = vrot.lane.b32.xlu0 %v8736_v31, %s9148_s12 }
 0x363   :  { %2644 = vrot.lane.b32.xlu1 %v8737_v32, %s9148_s12 }
 0x364   :  { %v2243_v34 = vpop.permute.xlu0 %2242  ;;  %2646 = vrot.lane.b32.xlu2 %v8738_v33, %s9148_s12  ;;  %v8793_v33 = vld [vmem:[%s14273_s0 + $0x34] ss:$2 sm:$0xff] }
 0x365   :  { %v2245_v35 = vpop.permute.xlu1 %2244  ;;  %2402 = vst.msk [vmem:[#allocation2 + $0xf0] sm:$0xff] %vm2371_vm3, %v2243_v34  ;;  %v8763_v34 = vld [vmem:[%s14273_s0 + $0x244] ss:$2 sm:$0xff] }
 0x366   :  { %2403 = vst.msk [vmem:[#allocation2 + $0xf8] sm:$0xff] %vm2371_vm3, %v2245_v35  ;;  %v2265_v36 = vpop.permute.xlu2 %2264  ;;  %v8856_v35 = vld [vmem:[%s14273_s0 + $0x35] ss:$2 sm:$0xff] }
 0x367   :  { %2413 = vst.msk [vmem:[#allocation2 + $0x148] sm:$0xff] %vm2371_vm3, %v2265_v36 }
 0x36a   :  { %2648 = vrot.lane.b32.xlu0 %v8739_v37, %s9148_s12 }
 0x36b   :  { %2650 = vrot.lane.b32.xlu1 %v8740_v38, %s9148_s12 }
 0x36c   :  { %v2249_v40 = vpop.permute.xlu0 %2248  ;;  %2652 = vrot.lane.b32.xlu2 %v8741_v39, %s9148_s12  ;;  %v8794_v39 = vld [vmem:[%s14273_s0 + $0x44] ss:$2 sm:$0xff] }
 0x36d   :  { %v2251_v41 = vpop.permute.xlu1 %2250  ;;  %2405 = vst.msk [vmem:[#allocation2 + $0x108] sm:$0xff] %vm2371_vm3, %v2249_v40  ;;  %v8764_v40 = vld [vmem:[%s14273_s0 + $0x254] ss:$2 sm:$0xff] }
 0x36e   :  { %2406 = vst.msk [vmem:[#allocation2 + $0x110] sm:$0xff] %vm2371_vm3, %v2251_v41  ;;  %v2271_v42 = vpop.permute.xlu2 %2270 }
 0x36f   :  { %2416 = vst.msk [vmem:[#allocation2 + $0x160] sm:$0xff] %vm2371_vm3, %v2271_v42 }
 0x372   :  { %2654 = vrot.lane.b32.xlu0 %v8742_v43, %s9148_s12  ;;  %v8857_v43 = vld [vmem:[%s14273_s0 + $0x45] ss:$2 sm:$0xff] }
 0x373   :  { %2656 = vrot.lane.b32.xlu1 %v8743_v44, %s9148_s12 }
 0x374   :  { %v2255_v46 = vpop.permute.xlu0 %2254  ;;  %2658 = vrot.lane.b32.xlu2 %v8744_v45, %s9148_s12  ;;  %v8858_v45 = vld [vmem:[%s14273_s0 + $0x55] ss:$2 sm:$0xff] }
 0x375   :  { %v2257_v47 = vpop.permute.xlu1 %2256  ;;  %2408 = vst.msk [vmem:[#allocation2 + $0x120] sm:$0xff] %vm2371_vm3, %v2255_v46  ;;  %v8795_v46 = vld [vmem:[%s14273_s0 + $0x54] ss:$2 sm:$0xff] }
 0x376   :  { %2409 = vst.msk [vmem:[#allocation2 + $0x128] sm:$0xff] %vm2371_vm3, %v2257_v47  ;;  %v2277_v48 = vpop.permute.xlu2 %2276 }
 0x377   :  { %2419 = vst.msk [vmem:[#allocation2 + $0x178] sm:$0xff] %vm2371_vm3, %v2277_v48 }
 0x37a   :  { %2660 = vrot.lane.b32.xlu0 %v8745_v49, %s9148_s12 }
 0x37b   :  { %2662 = vrot.lane.b32.xlu1 %v8746_v50, %s9148_s12  ;;  %v8859_v50 = vld [vmem:[%s14273_s0 + $0x65] ss:$2 sm:$0xff] }
 0x37c   :  { %v2261_v52 = vpop.permute.xlu0 %2260  ;;  %2664 = vrot.lane.b32.xlu2 %v8747_v51, %s9148_s12  ;;  %v8796_v51 = vld [vmem:[%s14273_s0 + $0x64] ss:$2 sm:$0xff] }
 0x37d   :  { %v2263_v53 = vpop.permute.xlu1 %2262  ;;  %2411 = vst.msk [vmem:[#allocation2 + $0x138] sm:$0xff] %vm2371_vm3, %v2261_v52 }
 0x37e   :  { %2412 = vst.msk [vmem:[#allocation2 + $0x140] sm:$0xff] %vm2371_vm3, %v2263_v53  ;;  %v2283_v54 = vpop.permute.xlu2 %2282 }
 0x37f   :  { %2422 = vst.msk [vmem:[#allocation2 + $0x190] sm:$0xff] %vm2371_vm3, %v2283_v54 }
 0x382   :  { %2666 = vrot.lane.b32.xlu0 %v8748_v55, %s9148_s12 }
 0x383   :  { %2668 = vrot.lane.b32.xlu1 %v8749_v56, %s9148_s12 }
 0x384   :  { %v2267_v58 = vpop.permute.xlu0 %2266  ;;  %2670 = vrot.lane.b32.xlu2 %v8750_v57, %s9148_s12  ;;  %v8860_v57 = vld [vmem:[%s14273_s0 + $0x75] ss:$2 sm:$0xff] }
 0x385   :  { %v2269_v59 = vpop.permute.xlu1 %2268  ;;  %2414 = vst.msk [vmem:[#allocation2 + $0x150] sm:$0xff] %vm2371_vm3, %v2267_v58  ;;  %v8797_v58 = vld [vmem:[%s14273_s0 + $0x74] ss:$2 sm:$0xff] }
 0x386   :  { %2415 = vst.msk [vmem:[#allocation2 + $0x158] sm:$0xff] %vm2371_vm3, %v2269_v59  ;;  %v2289_v60 = vpop.permute.xlu2 %2288 }
 0x387   :  { %2425 = vst.msk [vmem:[#allocation2 + $0x1a8] sm:$0xff] %vm2371_vm3, %v2289_v60 }
 0x38a   :  { %2672 = vrot.lane.b32.xlu0 %v8751_v61, %s9148_s12 }
 0x38b   :  { %2674 = vrot.lane.b32.xlu1 %v8752_v62, %s9148_s12 }
 0x38c   :  { %v2273_v0 = vpop.permute.xlu0 %2272  ;;  %2676 = vrot.lane.b32.xlu2 %v8753_v63, %s9148_s12 }
 0x38d   :  { %v2275_v1 = vpop.permute.xlu1 %2274  ;;  %2417 = vst.msk [vmem:[#allocation2 + $0x168] sm:$0xff] %vm2371_vm3, %v2273_v0 }
 0x38e   :  { %2418 = vst.msk [vmem:[#allocation2 + $0x170] sm:$0xff] %vm2371_vm3, %v2275_v1  ;;  %v2295_v2 = vpop.permute.xlu2 %2294  ;;  %v8861_v1 = vld [vmem:[%s14273_s0 + $0x85] ss:$2 sm:$0xff] }
 0x38f   :  { %2428 = vst.msk [vmem:[#allocation2 + $0x1c0] sm:$0xff] %vm2371_vm3, %v2295_v2 }
 0x392   :  { %2678 = vrot.lane.b32.xlu0 %v8754_v3, %s9148_s12 }
 0x393   :  { %2680 = vrot.lane.b32.xlu1 %v8755_v4, %s9148_s12 }
 0x394   :  { %v2279_v6 = vpop.permute.xlu0 %2278  ;;  %2682 = vrot.lane.b32.xlu2 %v8756_v5, %s9148_s12  ;;  %v8765_v5 = vld [vmem:[%s14273_s0 + $0x264] ss:$2 sm:$0xff] }
 0x395   :  { %v2281_v7 = vpop.permute.xlu1 %2280  ;;  %2420 = vst.msk [vmem:[#allocation2 + $0x180] sm:$0xff] %vm2371_vm3, %v2279_v6 }
 0x396   :  { %2421 = vst.msk [vmem:[#allocation2 + $0x188] sm:$0xff] %vm2371_vm3, %v2281_v7  ;;  %v2301_v8 = vpop.permute.xlu2 %2300 }
 0x397   :  { %2431 = vst.msk [vmem:[#allocation2 + $0x1d8] sm:$0xff] %vm2371_vm3, %v2301_v8 }
 0x39a   :  { %2684 = vrot.lane.b32.xlu0 %v8757_v9, %s9148_s12  ;;  %v3761_v9 = vld [vmem:[%s14274_s1 + $0x10] sm:$0xf] }
 0x39b   :  { %2686 = vrot.lane.b32.xlu1 %v8758_v10, %s9148_s12  ;;  %v3760_v10 = vld [vmem:[%s14274_s1 + $0x8] sm:$0xff]  ;;  %8916 = vmatpush.msk.msra.mxu0 %vm3952_vm5, %v3761_v9 }
 0x39c   :  { %v2285_v12 = vpop.permute.xlu0 %2284  ;;  %2688 = vrot.lane.b32.xlu2 %v8759_v11, %s9148_s12  ;;  %8980 = vmatpush.msk.msra.mxu1 %vm3952_vm5, %v3761_v9 }
 0x39d   :  { %v2287_v13 = vpop.permute.xlu1 %2286  ;;  %2423 = vst.msk [vmem:[#allocation2 + $0x198] sm:$0xff] %vm2371_vm3, %v2285_v12  ;;  %v8766_v12 = vld [vmem:[%s14273_s0 + $0x274] ss:$2 sm:$0xff]  ;;  %3970 = vmatpush.msra.mxu0 %v3760_v10  ;;  %9109 = vmatpush.msk.msra.mxu3 %vm3952_vm5, %v3761_v9 }
 0x39e   :  { %2424 = vst.msk [vmem:[#allocation2 + $0x1a0] sm:$0xff] %vm2371_vm3, %v2287_v13  ;;  %v2307_v14 = vpop.permute.xlu2 %2306  ;;  %v8862_v13 = vld [vmem:[%s14273_s0 + $0x95] ss:$2 sm:$0xff]  ;;  %4428 = vmatpush.msra.mxu1 %v3760_v10 }
 0x39f   :  { %2434 = vst.msk [vmem:[#allocation2 + $0x1f0] sm:$0xff] %vm2371_vm3, %v2307_v14  ;;  %v3759_v14 = vld [vmem:[%s14274_s1] sm:$0xff]  ;;  %9110 = vmatpush.msra.mxu3 %v3760_v10 }
 0x3a0   :  { %3971 = vmatpush.msra.mxu0 %v3759_v14  ;;  %4429 = vmatpush.msra.mxu1 %v3759_v14 }
 0x3a1   :  { %9111 = vmatpush.msra.mxu3 %v3759_v14 }
 0x3a2   :  { %2690 = vrot.lane.b32.xlu0 %v8760_v15, %s9148_s12 }
 0x3a3   :  { %2692 = vrot.lane.b32.xlu1 %v8761_v16, %s9148_s12  ;;  %9112 = vmatpush.msk.msrb.mxu3 %vm3952_vm5, %v3761_v9  ;;  %v8871_v9 = vld [vmem:[%s14273_s0 + $0x125] ss:$2 sm:$0xff]  ;;  %vm7423_vm5 = vcmask 1048448  }
 0x3a4   :  { %v2291_v18 = vpop.permute.xlu0 %2290  ;;  %3002 = vrot.lane.b32.xlu2 %v8790_v17, %s9149_s17  ;;  %v8798_v17 = vld [vmem:[%s14273_s0 + $0x84] ss:$2 sm:$0xff] }
 0x3a5   :  { %v2293_v19 = vpop.permute.xlu1 %2292  ;;  %2426 = vst.msk [vmem:[#allocation2 + $0x1b0] sm:$0xff] %vm2371_vm3, %v2291_v18  ;;  %9113 = vmatpush.msrb.mxu3 %v3760_v10  ;;  %v8807_v10 = vld [vmem:[%s14273_s0 + $0x114] ss:$2 sm:$0xff] }
 0x3a6   :  { %2427 = vst.msk [vmem:[#allocation2 + $0x1b8] sm:$0xff] %vm2371_vm3, %v2293_v19  ;;  %v2629_v20 = vpop.permute.xlu2 %2628 }
 0x3a7   :  { %2815 = vst.msk [vmem:[#allocation3 + $0x10] sm:$0xff] %vm2371_vm3, %v2629_v20  ;;  %9114 = vmatpush.msrb.mxu3 %v3759_v14 }
 0x3aa   :  { %3444 = vrot.lane.b32.xlu0 %v8853_v21, %s9149_s17 }
 0x3ab   :  { %2694 = vrot.lane.b32.xlu1 %v8762_v22, %s9148_s12  ;;  %v8767_v22 = vld [vmem:[%s14273_s0 + $0x284] ss:$2 sm:$0xff] }
 0x3ac   :  { %v2297_v24 = vpop.permute.xlu0 %2296  ;;  %3004 = vrot.lane.b32.xlu2 %v8791_v23, %s9149_s17  ;;  %v8863_v23 = vld [vmem:[%s14273_s0 + $0xa5] ss:$2 sm:$0xff] }
 0x3ad   :  { %v2299_v25 = vpop.permute.xlu1 %2298  ;;  %2429 = vst.msk [vmem:[#allocation2 + $0x1c8] sm:$0xff] %vm2371_vm3, %v2297_v24 }
 0x3ae   :  { %2430 = vst.msk [vmem:[#allocation2 + $0x1d0] sm:$0xff] %vm2371_vm3, %v2299_v25  ;;  %v2635_v26 = vpop.permute.xlu2 %2634 }
 0x3af   :  { %2818 = vst.msk [vmem:[#allocation3 + $0x28] sm:$0xff] %vm2371_vm3, %v2635_v26 }
 0x3b2   :  { %3446 = vrot.lane.b32.xlu0 %v8854_v27, %s9149_s17 }
 0x3b3   :  { %3006 = vrot.lane.b32.xlu1 %v8792_v28, %s9149_s17  ;;  %v8768_v28 = vld [vmem:[%s14273_s0 + $0x294] ss:$2 sm:$0xff] }
 0x3b4   :  { %v2303_v30 = vpop.permute.xlu0 %2302  ;;  %3448 = vrot.lane.b32.xlu2 %v8855_v29, %s9149_s17  ;;  %v8799_v29 = vld [vmem:[%s14273_s0 + $0x94] ss:$2 sm:$0xff] }
 0x3b5   :  { %v2305_v31 = vpop.permute.xlu1 %2304  ;;  %2432 = vst.msk [vmem:[#allocation2 + $0x1e0] sm:$0xff] %vm2371_vm3, %v2303_v30 }
 0x3b6   :  { %2433 = vst.msk [vmem:[#allocation2 + $0x1e8] sm:$0xff] %vm2371_vm3, %v2305_v31  ;;  %v2641_v32 = vpop.permute.xlu2 %2640 }
 0x3b7   :  { %2821 = vst.msk [vmem:[#allocation3 + $0x40] sm:$0xff] %vm2371_vm3, %v2641_v32 }
 0x3ba   :  { %2696 = vrot.lane.b32.xlu0 %v8763_v34, %s9148_s12  ;;  %v8769_v34 = vld [vmem:[%s14273_s0 + $0x2a4] ss:$2 sm:$0xff] }
 0x3bb   :  { %3008 = vrot.lane.b32.xlu1 %v8793_v33, %s9149_s17  ;;  %v8801_v33 = vld [vmem:[%s14273_s0 + $0xb4] ss:$2 sm:$0xff] }
 0x3bc   :  { %v2625_v36 = vpop.permute.xlu0 %2624  ;;  %3450 = vrot.lane.b32.xlu2 %v8856_v35, %s9149_s17  ;;  %v8800_v35 = vld [vmem:[%s14273_s0 + $0xa4] ss:$2 sm:$0xff] }
 0x3bd   :  { %v2627_v37 = vpop.permute.xlu1 %2626  ;;  %2813 = vst.msk [vmem:[#allocation3] sm:$0xff] %vm2371_vm3, %v2625_v36 }
 0x3be   :  { %2814 = vst.msk [vmem:[#allocation3 + $0x8] sm:$0xff] %vm2371_vm3, %v2627_v37  ;;  %v2647_v38 = vpop.permute.xlu2 %2646  ;;  %v8802_v37 = vld [vmem:[%s14273_s0 + $0xc4] ss:$2 sm:$0xff] }
 0x3bf   :  { %2824 = vst.msk [vmem:[#allocation3 + $0x58] sm:$0xff] %vm2371_vm3, %v2647_v38 }
 0x3c2   :  { %2698 = vrot.lane.b32.xlu0 %v8764_v40, %s9148_s12 }
 0x3c3   :  { %3010 = vrot.lane.b32.xlu1 %v8794_v39, %s9149_s17 }
 0x3c4   :  { %v2631_v41 = vpop.permute.xlu0 %2630  ;;  %3452 = vrot.lane.b32.xlu2 %v8857_v43, %s9149_s17  ;;  %v8803_v43 = vld [vmem:[%s14273_s0 + $0xd4] ss:$2 sm:$0xff] }
 0x3c5   :  { %v2633_v42 = vpop.permute.xlu1 %2632  ;;  %2816 = vst.msk [vmem:[#allocation3 + $0x18] sm:$0xff] %vm2371_vm3, %v2631_v41  ;;  %v8770_v41 = vld [vmem:[%s14273_s0 + $0x2b4] ss:$2 sm:$0xff] }
 0x3c6   :  { %2817 = vst.msk [vmem:[#allocation3 + $0x20] sm:$0xff] %vm2371_vm3, %v2633_v42  ;;  %v2653_v44 = vpop.permute.xlu2 %2652  ;;  %v8864_v42 = vld [vmem:[%s14273_s0 + $0xb5] ss:$2 sm:$0xff] }
 0x3c7   :  { %2827 = vst.msk [vmem:[#allocation3 + $0x70] sm:$0xff] %vm2371_vm3, %v2653_v44 }
 0x3ca   :  { %3012 = vrot.lane.b32.xlu0 %v8795_v46, %s9149_s17 }
 0x3cb   :  { %3454 = vrot.lane.b32.xlu1 %v8858_v45, %s9149_s17 }
 0x3cc   :  { %v2637_v47 = vpop.permute.xlu0 %2636  ;;  %2700 = vrot.lane.b32.xlu2 %v8765_v5, %s9148_s12  ;;  %v8772_v5 = vld [vmem:[%s14273_s0 + $0x2d4] ss:$2 sm:$0xff] }
 0x3cd   :  { %v2639_v48 = vpop.permute.xlu1 %2638  ;;  %2819 = vst.msk [vmem:[#allocation3 + $0x30] sm:$0xff] %vm2371_vm3, %v2637_v47  ;;  %v8804_v47 = vld [vmem:[%s14273_s0 + $0xe4] ss:$2 sm:$0xff] }
 0x3ce   :  { %2820 = vst.msk [vmem:[#allocation3 + $0x38] sm:$0xff] %vm2371_vm3, %v2639_v48  ;;  %v2659_v49 = vpop.permute.xlu2 %2658 }
 0x3cf   :  { %2830 = vst.msk [vmem:[#allocation3 + $0x88] sm:$0xff] %vm2371_vm3, %v2659_v49  ;;  %v8865_v49 = vld [vmem:[%s14273_s0 + $0xc5] ss:$2 sm:$0xff] }
 0x3d2   :  { %3014 = vrot.lane.b32.xlu0 %v8796_v51, %s9149_s17  ;;  %v8867_v51 = vld [vmem:[%s14273_s0 + $0xe5] ss:$2 sm:$0xff] }
 0x3d3   :  { %3456 = vrot.lane.b32.xlu1 %v8859_v50, %s9149_s17 }
 0x3d4   :  { %v2643_v52 = vpop.permute.xlu0 %2642  ;;  %2702 = vrot.lane.b32.xlu2 %v8766_v12, %s9148_s12 }
 0x3d5   :  { %v2645_v53 = vpop.permute.xlu1 %2644  ;;  %2822 = vst.msk [vmem:[#allocation3 + $0x48] sm:$0xff] %vm2371_vm3, %v2643_v52 }
 0x3d6   :  { %2823 = vst.msk [vmem:[#allocation3 + $0x50] sm:$0xff] %vm2371_vm3, %v2645_v53  ;;  %v2665_v54 = vpop.permute.xlu2 %2664 }
 0x3d7   :  { %2833 = vst.msk [vmem:[#allocation3 + $0xa0] sm:$0xff] %vm2371_vm3, %v2665_v54 }
 0x3da   :  { %3016 = vrot.lane.b32.xlu0 %v8797_v58, %s9149_s17  ;;  %v8868_v58 = vld [vmem:[%s14273_s0 + $0xf5] ss:$2 sm:$0xff] }
 0x3db   :  { %3458 = vrot.lane.b32.xlu1 %v8860_v57, %s9149_s17 }
 0x3dc   :  { %v2649_v55 = vpop.permute.xlu0 %2648  ;;  %3018 = vrot.lane.b32.xlu2 %v8798_v17, %s9149_s17  ;;  %v8872_v17 = vld [vmem:[%s14273_s0 + $0x135] ss:$2 sm:$0xff] }
 0x3dd   :  { %v2651_v56 = vpop.permute.xlu1 %2650  ;;  %2825 = vst.msk [vmem:[#allocation3 + $0x60] sm:$0xff] %vm2371_vm3, %v2649_v55  ;;  %v8805_v55 = vld [vmem:[%s14273_s0 + $0xf4] ss:$2 sm:$0xff] }
 0x3de   :  { %2826 = vst.msk [vmem:[#allocation3 + $0x68] sm:$0xff] %vm2371_vm3, %v2651_v56  ;;  %v2671_v59 = vpop.permute.xlu2 %2670  ;;  %v8866_v56 = vld [vmem:[%s14273_s0 + $0xd5] ss:$2 sm:$0xff] }
 0x3df   :  { %2836 = vst.msk [vmem:[#allocation3 + $0xb8] sm:$0xff] %vm2371_vm3, %v2671_v59 }
 0x3e2   :  { %3460 = vrot.lane.b32.xlu0 %v8861_v1, %s9149_s17  ;;  %v8869_v1 = vld [vmem:[%s14273_s0 + $0x105] ss:$2 sm:$0xff] }
 0x3e3   :  { %2704 = vrot.lane.b32.xlu1 %v8767_v22, %s9148_s12  ;;  %v8810_v22 = vld [vmem:[%s14273_s0 + $0x144] ss:$2 sm:$0xff] }
 0x3e4   :  { %v2655_v60 = vpop.permute.xlu0 %2654  ;;  %3020 = vrot.lane.b32.xlu2 %v8799_v29, %s9149_s17  ;;  %v8776_v29 = vld [vmem:[%s14273_s0 + $0x314] ss:$2 sm:$0xff] }
 0x3e5   :  { %v2657_v61 = vpop.permute.xlu1 %2656  ;;  %2828 = vst.msk [vmem:[#allocation3 + $0x78] sm:$0xff] %vm2371_vm3, %v2655_v60 }
 0x3e6   :  { %2829 = vst.msk [vmem:[#allocation3 + $0x80] sm:$0xff] %vm2371_vm3, %v2657_v61  ;;  %v2677_v62 = vpop.permute.xlu2 %2676 }
 0x3e7   :  { %2839 = vst.msk [vmem:[#allocation3 + $0xd0] sm:$0xff] %vm2371_vm3, %v2677_v62  ;;  %v8806_v62 = vld [vmem:[%s14273_s0 + $0x104] ss:$2 sm:$0xff] }
 0x3ea   :  { %3462 = vrot.lane.b32.xlu0 %v8862_v13, %s9149_s17 }
 0x3eb   :  { %2706 = vrot.lane.b32.xlu1 %v8768_v28, %s9148_s12  ;;  %v8873_v28 = vld [vmem:[%s14273_s0 + $0x145] ss:$2 sm:$0xff] }
 0x3ec   :  { %v2661_v63 = vpop.permute.xlu0 %2660  ;;  %3022 = vrot.lane.b32.xlu2 %v8800_v35, %s9149_s17 }
 0x3ed   :  { %v2663_v0 = vpop.permute.xlu1 %2662  ;;  %2831 = vst.msk [vmem:[#allocation3 + $0x90] sm:$0xff] %vm2371_vm3, %v2661_v63  ;;  %v8771_v63 = vld [vmem:[%s14273_s0 + $0x2c4] ss:$2 sm:$0xff] }
 0x3ee   :  { %2832 = vst.msk [vmem:[#allocation3 + $0x98] sm:$0xff] %vm2371_vm3, %v2663_v0  ;;  %v2683_v2 = vpop.permute.xlu2 %2682 }
 0x3ef   :  { %2842 = vst.msk [vmem:[#allocation3 + $0xe8] sm:$0xff] %vm2371_vm3, %v2683_v2 }
 0x3f2   :  { %3464 = vrot.lane.b32.xlu0 %v8863_v23, %s9149_s17  ;;  %v8809_v23 = vld [vmem:[%s14273_s0 + $0x134] ss:$2 sm:$0xff] }
 0x3f3   :  { %3024 = vrot.lane.b32.xlu1 %v8801_v33, %s9149_s17  ;;  %v8874_v33 = vld [vmem:[%s14273_s0 + $0x155] ss:$2 sm:$0xff] }
 0x3f4   :  { %v2667_v3 = vpop.permute.xlu0 %2666  ;;  %3466 = vrot.lane.b32.xlu2 %v8864_v42, %s9149_s17 }
 0x3f5   :  { %v2669_v4 = vpop.permute.xlu1 %2668  ;;  %2834 = vst.msk [vmem:[#allocation3 + $0xa8] sm:$0xff] %vm2371_vm3, %v2667_v3 }
 0x3f6   :  { %2835 = vst.msk [vmem:[#allocation3 + $0xb0] sm:$0xff] %vm2371_vm3, %v2669_v4  ;;  %v2689_v6 = vpop.permute.xlu2 %2688  ;;  %v8870_v4 = vld [vmem:[%s14273_s0 + $0x115] ss:$2 sm:$0xff] }
 0x3f7   :  { %2845 = vst.msk [vmem:[#allocation3 + $0x100] sm:$0xff] %vm2371_vm3, %v2689_v6 }
 0x3fa   :  { %2708 = vrot.lane.b32.xlu0 %v8769_v34, %s9148_s12  ;;  %v8813_v34 = vld [vmem:[%s14273_s0 + $0x174] ss:$2 sm:$0xff] }
 0x3fb   :  { %3026 = vrot.lane.b32.xlu1 %v8802_v37, %s9149_s17  ;;  %v8876_v37 = vld [vmem:[%s14273_s0 + $0x175] ss:$2 sm:$0xff] }
 0x3fc   :  { %v2673_v7 = vpop.permute.xlu0 %2672  ;;  %3468 = vrot.lane.b32.xlu2 %v8865_v49, %s9149_s17  ;;  %v8777_v49 = vld [vmem:[%s14273_s0 + $0x324] ss:$2 sm:$0xff] }
 0x3fd   :  { %v2675_v8 = vpop.permute.xlu1 %2674  ;;  %2837 = vst.msk [vmem:[#allocation3 + $0xc0] sm:$0xff] %vm2371_vm3, %v2673_v7 }
 0x3fe   :  { %2838 = vst.msk [vmem:[#allocation3 + $0xc8] sm:$0xff] %vm2371_vm3, %v2675_v8  ;;  %v3003_v11 = vpop.permute.xlu2 %3002  ;;  %v8773_v8 = vld [vmem:[%s14273_s0 + $0x2e4] ss:$2 sm:$0xff] }
 0x3ff   :  { %3192 = vst.msk [vmem:[#allocation2] sm:$0xff] %vm3191_vm4, %v3003_v11 }
 0x402   :  { %2710 = vrot.lane.b32.xlu0 %v8770_v41, %s9148_s12 }
 0x403   :  { %3028 = vrot.lane.b32.xlu1 %v8803_v43, %s9149_s17  ;;  %v8875_v43 = vld [vmem:[%s14273_s0 + $0x165] ss:$2 sm:$0xff] }
 0x404   :  { %v2679_v15 = vpop.permute.xlu0 %2678  ;;  %3470 = vrot.lane.b32.xlu2 %v8866_v56, %s9149_s17 }
 0x405   :  { %v2681_v16 = vpop.permute.xlu1 %2680  ;;  %2840 = vst.msk [vmem:[#allocation3 + $0xd8] sm:$0xff] %vm2371_vm3, %v2679_v15 }
 0x406   :  { %2841 = vst.msk [vmem:[#allocation3 + $0xe0] sm:$0xff] %vm2371_vm3, %v2681_v16  ;;  %v3005_v18 = vpop.permute.xlu2 %3004  ;;  %v3696_v19 = vld [vmem:[#allocation2] sm:$0xff] }
 0x407   :  { %3193 = vst.msk [vmem:[#allocation2 + $0x8] sm:$0xff] %vm3191_vm4, %v3005_v18  ;;  %8917 = vmatmul.msk.f32.vlgmr.msra.gmra.mxu0 %vm3762_vm6, %v3696_v19  ;;  %v8774_v16 = vld [vmem:[%s14273_s0 + $0x2f4] ss:$2 sm:$0xff]  ;;  %v8808_v18 = vld [vmem:[%s14273_s0 + $0x124] ss:$2 sm:$0xff] }
 0x40a   :  { %3030 = vrot.lane.b32.xlu0 %v8804_v47, %s9149_s17 }
 0x40b   :  { %3472 = vrot.lane.b32.xlu1 %v8867_v51, %s9149_s17 }
 0x40c   :  { %v2685_v20 = vpop.permute.xlu0 %2684  ;;  %2712 = vrot.lane.b32.xlu2 %v8771_v63, %s9148_s12 }
 0x40d   :  { %v2687_v21 = vpop.permute.xlu1 %2686  ;;  %2843 = vst.msk [vmem:[#allocation3 + $0xf0] sm:$0xff] %vm2371_vm3, %v2685_v20 }
 0x40e   :  { %2844 = vst.msk [vmem:[#allocation3 + $0xf8] sm:$0xff] %vm2371_vm3, %v2687_v21  ;;  %v3449_v24 = vpop.permute.xlu2 %3448  ;;  %v3697_v25 = vld [vmem:[#allocation2 + $0x8] sm:$0xff] }
 0x40f   :  { %3635 = vst.msk [vmem:[#allocation3 + $0x10] sm:$0xff] %vm3191_vm4, %v3449_v24  ;;  %8918 = vmatmul.msk.f32.gmra.mxu0 %vm3762_vm6, %v3697_v25  ;;  %v8775_v24 = vld [vmem:[%s14273_s0 + $0x304] ss:$2 sm:$0xff] }
 0x412   :  { %3032 = vrot.lane.b32.xlu0 %v8805_v55, %s9149_s17 }
 0x413   :  { %3474 = vrot.lane.b32.xlu1 %v8868_v58, %s9149_s17  ;;  %v11812_v58 = vld [vmem:[%s14275_s2] ss:$0 sm:$0xff] }
 0x414   :  { %v2691_v26 = vpop.permute.xlu0 %2690  ;;  %2714 = vrot.lane.b32.xlu2 %v8772_v5, %s9148_s12 }
 0x415   :  { %v2693_v27 = vpop.permute.xlu1 %2692  ;;  %2846 = vst.msk [vmem:[#allocation3 + $0x108] sm:$0xff] %vm2371_vm3, %v2691_v26 }
 0x416   :  { %2847 = vst.msk [vmem:[#allocation3 + $0x110] sm:$0xff] %vm2371_vm3, %v2693_v27  ;;  %v3451_v30 = vpop.permute.xlu2 %3450  ;;  %v4164_v50 = vld [vmem:[#allocation3 + $0x10] sm:$0xff]  ;;  %v8811_v27 = vld [vmem:[%s14273_s0 + $0x154] ss:$2 sm:$0xff] }
 0x417   :  { %3636 = vst.msk [vmem:[#allocation3 + $0x18] sm:$0xff] %vm3191_vm4, %v3451_v30 }
 0x41a   :  { %3034 = vrot.lane.b32.xlu0 %v8806_v62, %s9149_s17 }
 0x41b   :  { %3476 = vrot.lane.b32.xlu1 %v8869_v1, %s9149_s17 }
 0x41c   :  { %v3445_v31 = vpop.permute.xlu0 %3444  ;;  %3036 = vrot.lane.b32.xlu2 %v8807_v10, %s9149_s17 }
 0x41d   :  { %v2695_v32 = vpop.permute.xlu1 %2694  ;;  %3633 = vst.msk [vmem:[#allocation3] sm:$0xff] %vm3191_vm4, %v3445_v31 }
 0x41e   :  { %2848 = vst.msk [vmem:[#allocation3 + $0x118] sm:$0xff] %vm2371_vm3, %v2695_v32  ;;  %v3453_v36 = vpop.permute.xlu2 %3452  ;;  %v4165_v57 = vld [vmem:[#allocation3 + $0x18] sm:$0xff] }
 0x41f   :  { %3637 = vst.msk [vmem:[#allocation3 + $0x20] sm:$0xff] %vm3191_vm4, %v3453_v36  ;;  %v8812_v32 = vld [vmem:[%s14273_s0 + $0x164] ss:$2 sm:$0xff] }
 0x422   :  { %3478 = vrot.lane.b32.xlu0 %v8870_v4, %s9149_s17 }
 0x423   :  { %2716 = vrot.lane.b32.xlu1 %v8773_v8, %s9148_s12 }
 0x424   :  { %v3447_v38 = vpop.permute.xlu0 %3446  ;;  %v4162_v39 = vld [vmem:[#allocation3] sm:$0xff]  ;;  %3038 = vrot.lane.b32.xlu2 %v8808_v18, %s9149_s17 }
 0x425   :  { %v3007_v40 = vpop.permute.xlu1 %3006  ;;  %3634 = vst.msk [vmem:[#allocation3 + $0x8] sm:$0xff] %vm3191_vm4, %v3447_v38  ;;  %8981 = vmatmul.msk.f32.vlgmr.msra.gmra.mxu1 %vm3762_vm6, %v4162_v39 }
 0x426   :  { %3194 = vst.msk [vmem:[#allocation2 + $0x10] sm:$0xff] %vm3191_vm4, %v3007_v40  ;;  %v4166_v0 = vld [vmem:[#allocation3 + $0x20] sm:$0xff]  ;;  %v2701_v12 = vpop.permute.xlu2 %2700 }
 0x427   :  { %2851 = vst.msk [vmem:[#allocation3 + $0x130] sm:$0xff] %vm2371_vm3, %v2701_v12 }
 0x42a   :  { %3480 = vrot.lane.b32.xlu0 %v8871_v9, %s9149_s17 }
 0x42b   :  { %2718 = vrot.lane.b32.xlu1 %v8774_v16, %s9148_s12 }
 0x42c   :  { %v4163_v44 = vld [vmem:[#allocation3 + $0x8] sm:$0xff]  ;;  %v2697_v46 = vpop.permute.xlu0 %2696  ;;  %3040 = vrot.lane.b32.xlu2 %v8809_v23, %s9149_s17 }
 0x42d   :  { %v3009_v45 = vpop.permute.xlu1 %3008  ;;  %8982 = vmatmul.msk.f32.gmra.mxu1 %vm3762_vm6, %v4163_v44  ;;  %v3698_v48 = vld [vmem:[#allocation2 + $0x10] sm:$0xff]  ;;  %2849 = vst.msk [vmem:[#allocation3 + $0x120] sm:$0xff] %vm2371_vm3, %v2697_v46 }
 0x42e   :  { %3195 = vst.msk [vmem:[#allocation2 + $0x18] sm:$0xff] %vm3191_vm4, %v3009_v45  ;;  %8919 = vmatmul.msk.f32.gmra.mxu0 %vm3762_vm6, %v3698_v48  ;;  %v2703_v19 = vpop.permute.xlu2 %2702  ;;  %v8877_v44 = vld [vmem:[%s14273_s0 + $0x185] ss:$2 sm:$0xff]  ;;  %v8814_v45 = vld [vmem:[%s14273_s0 + $0x184] ss:$2 sm:$0xff] }
 0x42f   :  { %2852 = vst.msk [vmem:[#allocation3 + $0x138] sm:$0xff] %vm2371_vm3, %v2703_v19 }
 0x432   :  { %3482 = vrot.lane.b32.xlu0 %v8872_v17, %s9149_s17 }
 0x433   :  { %3042 = vrot.lane.b32.xlu1 %v8810_v22, %s9149_s17 }
 0x434   :  { %v2699_v54 = vpop.permute.xlu0 %2698  ;;  %3484 = vrot.lane.b32.xlu2 %v8873_v28, %s9149_s17 }
 0x435   :  { %v3699_v52 = vld [vmem:[#allocation2 + $0x18] sm:$0xff]  ;;  %v3011_v53 = vpop.permute.xlu1 %3010  ;;  %8983 = vmatmul.msk.f32.gmra.mxu1 %vm3762_vm6, %v4164_v50  ;;  %2850 = vst.msk [vmem:[#allocation3 + $0x128] sm:$0xff] %vm2371_vm3, %v2699_v54 }
 0x436   :  { %3196 = vst.msk [vmem:[#allocation2 + $0x20] sm:$0xff] %vm3191_vm4, %v3011_v53  ;;  %8920 = vmatmul.msk.f32.gmra.mxu0 %vm3762_vm6, %v3699_v52  ;;  %v3019_v26 = vpop.permute.xlu2 %3018 }
 0x437   :  { %3200 = vst.msk [vmem:[#allocation2 + $0x40] sm:$0xff] %vm3191_vm4, %v3019_v26 }
 0x43a   :  { %2720 = vrot.lane.b32.xlu0 %v8775_v24, %s9148_s12 }
 0x43b   :  { %3044 = vrot.lane.b32.xlu1 %v8811_v27, %s9149_s17 }
 0x43c   :  { %v3013_v61 = vpop.permute.xlu0 %3012  ;;  %3486 = vrot.lane.b32.xlu2 %v8874_v33, %s9149_s17 }
 0x43d   :  { %v3700_v59 = vld [vmem:[#allocation2 + $0x20] sm:$0xff]  ;;  %v3455_v60 = vpop.permute.xlu1 %3454  ;;  %8984 = vmatmul.msk.f32.gmra.mxu1 %vm3762_vm6, %v4165_v57  ;;  %3197 = vst.msk [vmem:[#allocation2 + $0x28] sm:$0xff] %vm3191_vm4, %v3013_v61 }
 0x43e   :  { %3638 = vst.msk [vmem:[#allocation3 + $0x28] sm:$0xff] %vm3191_vm4, %v3455_v60  ;;  %8921 = vmatmul.msk.f32.gmra.mxu0 %vm3762_vm6, %v3700_v59  ;;  %v3704_v31 = vld [vmem:[#allocation2 + $0x40] sm:$0xff]  ;;  %v3021_v35 = vpop.permute.xlu2 %3020 }
 0x43f   :  { %3201 = vst.msk [vmem:[#allocation2 + $0x48] sm:$0xff] %vm3191_vm4, %v3021_v35 }
 0x442   :  { %2722 = vrot.lane.b32.xlu0 %v8776_v29, %s9148_s12 }
 0x443   :  { %3046 = vrot.lane.b32.xlu1 %v8812_v32, %s9149_s17 }
 0x444   :  { %v3015_v3 = vpop.permute.xlu0 %3014  ;;  %v3701_v6 = vld [vmem:[#allocation2 + $0x28] sm:$0xff]  ;;  %3488 = vrot.lane.b32.xlu2 %v8875_v43, %s9149_s17 }
 0x445   :  { %v3457_v2 = vpop.permute.xlu1 %3456  ;;  %8985 = vmatmul.msk.f32.gmra.mxu1 %vm3762_vm6, %v4166_v0  ;;  %3198 = vst.msk [vmem:[#allocation2 + $0x30] sm:$0xff] %vm3191_vm4, %v3015_v3  ;;  %v4167_v7 = vld [vmem:[#allocation3 + $0x28] sm:$0xff] }
 0x446   :  { %3639 = vst.msk [vmem:[#allocation3 + $0x30] sm:$0xff] %vm3191_vm4, %v3457_v2  ;;  %8922 = vmatmul.msk.f32.gmra.mxu0 %vm3762_vm6, %v3701_v6  ;;  %v3705_v38 = vld [vmem:[#allocation2 + $0x48] sm:$0xff]  ;;  %v3023_v41 = vpop.permute.xlu2 %3022 }
 0x447   :  { %3202 = vst.msk [vmem:[#allocation2 + $0x50] sm:$0xff] %vm3191_vm4, %v3023_v41 }
 0x44a   :  { %3048 = vrot.lane.b32.xlu0 %v8813_v34, %s9149_s17 }
 0x44b   :  { %3490 = vrot.lane.b32.xlu1 %v8876_v37, %s9149_s17  ;;  %v8878_v37 = vld [vmem:[%s14273_s0 + $0x195] ss:$2 sm:$0xff] }
 0x44c   :  { %v3702_v11 = vld [vmem:[#allocation2 + $0x30] sm:$0xff]  ;;  %v3017_v14 = vpop.permute.xlu0 %3016  ;;  %2724 = vrot.lane.b32.xlu2 %v8777_v49, %s9148_s12 }
 0x44d   :  { %8986 = vmatmul.msk.f32.gmra.mxu1 %vm3762_vm6, %v4167_v7  ;;  %v3459_v13 = vpop.permute.xlu1 %3458  ;;  %v4168_v15 = vld [vmem:[#allocation3 + $0x30] sm:$0xff]  ;;  %3199 = vst.msk [vmem:[#allocation2 + $0x38] sm:$0xff] %vm3191_vm4, %v3017_v14 }
 0x44e   :  { %8923 = vmatmul.msk.f32.gmra.mxu0 %vm3762_vm6, %v3702_v11  ;;  %3640 = vst.msk [vmem:[#allocation3 + $0x38] sm:$0xff] %vm3191_vm4, %v3459_v13  ;;  %v3706_v47 = vld [vmem:[#allocation2 + $0x50] sm:$0xff]  ;;  %v3467_v50 = vpop.permute.xlu2 %3466 }
 0x44f   :  { %3644 = vst.msk [vmem:[#allocation3 + $0x58] sm:$0xff] %vm3191_vm4, %v3467_v50 }
 0x452   :  { %3050 = vrot.lane.b32.xlu0 %v8814_v45, %s9149_s17 }
 0x453   :  { %3492 = vrot.lane.b32.xlu1 %v8877_v44, %s9149_s17 }
 0x454   :  { %v3703_v20 = vld [vmem:[#allocation2 + $0x38] sm:$0xff]  ;;  %v3461_v25 = vpop.permute.xlu0 %3460 }
 0x455   :  { %8987 = vmatmul.msk.f32.gmra.mxu1 %vm3762_vm6, %v4168_v15  ;;  %v4169_v21 = vld [vmem:[#allocation3 + $0x38] sm:$0xff]  ;;  %3641 = vst.msk [vmem:[#allocation3 + $0x40] sm:$0xff] %vm3191_vm4, %v3461_v25  ;;  %v2705_v40 = vpop.permute.xlu1 %2704 }
 0x456   :  { %8924 = vmatmul.msk.f32.gmra.mxu0 %vm3762_vm6, %v3703_v20  ;;  %2853 = vst.msk [vmem:[#allocation3 + $0x140] sm:$0xff] %vm2371_vm3, %v2705_v40  ;;  %v3469_v53 = vpop.permute.xlu2 %3468  ;;  %v4173_v56 = vld [vmem:[#allocation3 + $0x58] sm:$0xff] }
 0x457   :  { %3645 = vst.msk [vmem:[#allocation3 + $0x60] sm:$0xff] %vm3191_vm4, %v3469_v53 }
 0x45c   :  { %v4170_v30 = vld [vmem:[#allocation3 + $0x40] sm:$0xff]  ;;  %v3463_v36 = vpop.permute.xlu0 %3462 }
 0x45d   :  { %8988 = vmatmul.msk.f32.gmra.mxu1 %vm3762_vm6, %v4169_v21  ;;  %3642 = vst.msk [vmem:[#allocation3 + $0x48] sm:$0xff] %vm3191_vm4, %v3463_v36  ;;  %v2707_v46 = vpop.permute.xlu1 %2706 }
 0x45e   :  { %8925 = vmatmul.msk.f32.gmra.mxu0 %vm3762_vm6, %v3704_v31  ;;  %2854 = vst.msk [vmem:[#allocation3 + $0x148] sm:$0xff] %vm2371_vm3, %v2707_v46  ;;  %v3471_v62 = vpop.permute.xlu2 %3470  ;;  %v4174_v0 = vld [vmem:[#allocation3 + $0x60] sm:$0xff] }
 0x45f   :  { %3646 = vst.msk [vmem:[#allocation3 + $0x68] sm:$0xff] %vm3191_vm4, %v3471_v62 }
 0x464   :  { %v4171_v39 = vld [vmem:[#allocation3 + $0x48] sm:$0xff]  ;;  %v3465_v42 = vpop.permute.xlu0 %3464 }
 0x465   :  { %8989 = vmatmul.msk.f32.gmra.mxu1 %vm3762_vm6, %v4170_v30  ;;  %3643 = vst.msk [vmem:[#allocation3 + $0x50] sm:$0xff] %vm3191_vm4, %v3465_v42  ;;  %v3025_v51 = vpop.permute.xlu1 %3024 }
 0x466   :  { %8926 = vmatmul.msk.f32.gmra.mxu0 %vm3762_vm6, %v3705_v38  ;;  %3203 = vst.msk [vmem:[#allocation2 + $0x58] sm:$0xff] %vm3191_vm4, %v3025_v51  ;;  %v2713_v7 = vpop.permute.xlu2 %2712  ;;  %v4175_v9 = vld [vmem:[#allocation3 + $0x68] sm:$0xff] }
 0x467   :  { %2857 = vst.msk [vmem:[#allocation3 + $0x160] sm:$0xff] %vm2371_vm3, %v2713_v7  ;;  %v8815_v38 = vld [vmem:[%s14273_s0 + $0x194] ss:$2 sm:$0xff] }
 0x46c   :  { %v4172_v48 = vld [vmem:[#allocation3 + $0x50] sm:$0xff]  ;;  %v2709_v57 = vpop.permute.xlu0 %2708 }
 0x46d   :  { %8990 = vmatmul.msk.f32.gmra.mxu1 %vm3762_vm6, %v4171_v39  ;;  %v3027_v54 = vpop.permute.xlu1 %3026  ;;  %v3707_v55 = vld [vmem:[#allocation2 + $0x58] sm:$0xff]  ;;  %2855 = vst.msk [vmem:[#allocation3 + $0x150] sm:$0xff] %vm2371_vm3, %v2709_v57 }
 0x46e   :  { %8927 = vmatmul.msk.f32.gmra.mxu0 %vm3762_vm6, %v3706_v47  ;;  %3204 = vst.msk [vmem:[#allocation2 + $0x60] sm:$0xff] %vm3191_vm4, %v3027_v54  ;;  %v2715_v18 = vpop.permute.xlu2 %2714 }
 0x46f   :  { %2858 = vst.msk [vmem:[#allocation3 + $0x168] sm:$0xff] %vm2371_vm3, %v2715_v18 }
 0x474   :  { %v2711_v2 = vpop.permute.xlu0 %2710 }
 0x475   :  { %8991 = vmatmul.msk.f32.gmra.mxu1 %vm3762_vm6, %v4172_v48  ;;  %v3029_v63 = vpop.permute.xlu1 %3028  ;;  %v3708_v3 = vld [vmem:[#allocation2 + $0x60] sm:$0xff]  ;;  %2856 = vst.msk [vmem:[#allocation3 + $0x158] sm:$0xff] %vm2371_vm3, %v2711_v2 }
 0x476   :  { %8928 = vmatmul.msk.f32.gmra.mxu0 %vm3762_vm6, %v3707_v55  ;;  %3205 = vst.msk [vmem:[#allocation2 + $0x68] sm:$0xff] %vm3191_vm4, %v3029_v63  ;;  %v3037_v32 = vpop.permute.xlu2 %3036  ;;  %v8879_v2 = vld [vmem:[%s14273_s0 + $0x1a5] ss:$2 sm:$0xff] }
 0x477   :  { %3209 = vst.msk [vmem:[#allocation2 + $0x88] sm:$0xff] %vm3191_vm4, %v3037_v32 }
 0x47c   :  { %v3031_v11 = vpop.permute.xlu0 %3030 }
 0x47d   :  { %8992 = vmatmul.msk.f32.gmra.mxu1 %vm3762_vm6, %v4173_v56  ;;  %v3473_v8 = vpop.permute.xlu1 %3472  ;;  %v3709_v12 = vld [vmem:[#allocation2 + $0x68] sm:$0xff]  ;;  %3206 = vst.msk [vmem:[#allocation2 + $0x70] sm:$0xff] %vm3191_vm4, %v3031_v11 }
 0x47e   :  { %8929 = vmatmul.msk.f32.gmra.mxu0 %vm3762_vm6, %v3708_v3  ;;  %3647 = vst.msk [vmem:[#allocation3 + $0x70] sm:$0xff] %vm3191_vm4, %v3473_v8  ;;  %v3039_v46 = vpop.permute.xlu2 %3038  ;;  %v3713_v62 = vld [vmem:[#allocation2 + $0x88] sm:$0xff] }
 0x47f   :  { %3210 = vst.msk [vmem:[#allocation2 + $0x90] sm:$0xff] %vm3191_vm4, %v3039_v46  ;;  %v8816_v3 = vld [vmem:[%s14273_s0 + $0x1a4] ss:$2 sm:$0xff] }
 0x484   :  { %v3973_v52 = vpop.f32.mrf.mxu0  ;;  %v3033_v21 = vpop.permute.xlu0 %3032  ;;  %v3710_v23 = vld [vmem:[#allocation2 + $0x70] sm:$0xff] }
 0x485   :  { %8993 = vmatmul.msk.f32.gmra.mxu1 %vm3762_vm6, %v4174_v0  ;;  %v3475_v19 = vpop.permute.xlu1 %3474  ;;  %v4176_v22 = vld [vmem:[#allocation3 + $0x70] sm:$0xff]  ;;  %3207 = vst.msk [vmem:[#allocation2 + $0x78] sm:$0xff] %vm3191_vm4, %v3033_v21 }
 0x486   :  { %8930 = vmatmul.msk.f32.gmra.mxu0 %vm3762_vm6, %v3709_v12  ;;  %3648 = vst.msk [vmem:[#allocation3 + $0x78] sm:$0xff] %vm3191_vm4, %v3475_v19  ;;  %v3714_v12 = vld [vmem:[#allocation2 + $0x90] sm:$0xff] }
 0x48c   :  { %v3976_v61 = vpop.f32.mrf.mxu0  ;;  %v3035_v35 = vpop.permute.xlu0 %3034  ;;  %v3711_v39 = vld [vmem:[#allocation2 + $0x78] sm:$0xff] }
 0x48d   :  { %8994 = vmatmul.msk.f32.gmra.mxu1 %vm3762_vm6, %v4175_v9  ;;  %v3477_v33 = vpop.permute.xlu1 %3476  ;;  %v4177_v36 = vld [vmem:[#allocation3 + $0x78] sm:$0xff]  ;;  %3208 = vst.msk [vmem:[#allocation2 + $0x80] sm:$0xff] %vm3191_vm4, %v3035_v35 }
 0x48e   :  { %8931 = vmatmul.msk.f32.gmra.mxu0 %vm3762_vm6, %v3710_v23  ;;  %3649 = vst.msk [vmem:[#allocation3 + $0x80] sm:$0xff] %vm3191_vm4, %v3477_v33 }
 0x494   :  { %v3479_v48 = vpop.permute.xlu0 %3478  ;;  %v3712_v50 = vld [vmem:[#allocation2 + $0x80] sm:$0xff] }
 0x495   :  { %8995 = vmatmul.msk.f32.gmra.mxu1 %vm3762_vm6, %v4176_v22  ;;  %v4178_v49 = vld [vmem:[#allocation3 + $0x80] sm:$0xff]  ;;  %3650 = vst.msk [vmem:[#allocation3 + $0x88] sm:$0xff] %vm3191_vm4, %v3479_v48 }
 0x496   :  { %8932 = vmatmul.msk.f32.gmra.mxu0 %vm3762_vm6, %v3711_v39 }
 0x49c   :  { %v3481_v0 = vpop.permute.xlu0 %3480 }
 0x49d   :  { %8996 = vmatmul.msk.f32.gmra.mxu1 %vm3762_vm6, %v4177_v36  ;;  %3651 = vst.msk [vmem:[#allocation3 + $0x90] sm:$0xff] %vm3191_vm4, %v3481_v0 }
 0x49e   :  { %8933 = vmatmul.msk.f32.gmra.mxu0 %vm3762_vm6, %v3712_v50 }
 0x4a2   :  { %v4431_v59 = vpop.f32.mrf.mxu1 }
 0x4a3   :  { %v4622_v60 = vmax.f32 %v3973_v52, %v4431_v59  ;;  %v2717_v59 = vpop.permute.xlu1 %2716 }
 0x4a4   :  { %2859 = vst.msk [vmem:[#allocation3 + $0x170] sm:$0xff] %vm2371_vm3, %v2717_v59 }
 0x4a5   :  { %v4689_v1 = vadd.f32 %v11812_v58, %v4622_v60  ;;  %8997 = vmatmul.msk.f32.gmra.mxu1 %vm3762_vm6, %v4178_v49 }
 0x4a6   :  { %8934 = vmatmul.msk.f32.gmra.mxu0 %vm3762_vm6, %v3713_v62 }
 0x4a7   :  { %v4752_v4 = vmax.f32 %v4689_v1, 0.0  ;;  %v4179_v1 = vld [vmem:[#allocation3 + $0x88] sm:$0xff] }
 0x4a9   :  { %4815 = vst.msk [vmem:[#allocation4] sm:$0xff] %vm4620_vm7, %v4752_v4 }
 0x4aa   :  { %v4434_v5 = vpop.f32.mrf.mxu1 }
 0x4ab   :  { %v4623_v6 = vmax.f32 %v3976_v61, %v4434_v5  ;;  %v3979_v13 = vpop.f32.mrf.mxu0  ;;  %v3041_v61 = vpop.permute.xlu2 %3040 }
 0x4ac   :  { %3211 = vst.msk [vmem:[#allocation2 + $0x98] sm:$0xff] %vm3191_vm4, %v3041_v61  ;;  %v2719_v9 = vpop.permute.xlu1 %2718 }
 0x4ad   :  { %v4690_v10 = vadd.f32 %v11812_v58, %v4623_v6  ;;  %8998 = vmatmul.msk.f32.gmra.mxu1 %vm3762_vm6, %v4179_v1  ;;  %2860 = vst.msk [vmem:[#allocation3 + $0x178] sm:$0xff] %vm2371_vm3, %v2719_v9  ;;  %v8819_v9 = vld [vmem:[%s14273_s0 + $0x1d4] ss:$2 sm:$0xff] }
 0x4ae   :  { %8935 = vmatmul.msk.f32.gmra.mxu0 %vm3762_vm6, %v3714_v12 }
 0x4af   :  { %v4753_v14 = vmax.f32 %v4690_v10, 0.0 }
 0x4b0   :  { %v4878_v15 = vld [vmem:[#allocation4] sm:$0xff] }
 0x4b1   :  { %4816 = vst.msk [vmem:[#allocation4 + $0x8] sm:$0xff] %vm4620_vm7, %v4753_v14  ;;  %v3483_v14 = vpop.permute.xlu0 %3482 }
 0x4b2   :  { %v4437_v16 = vpop.f32.mrf.mxu1  ;;  %4941 = vst.msk [vmem:[#allocation5] sm:$0xff] %vm4620_vm7, %v4878_v15  ;;  %v4180_v15 = vld [vmem:[#allocation3 + $0x90] sm:$0xff] }
 0x4b3   :  { %v4624_v17 = vmax.f32 %v3979_v13, %v4437_v16  ;;  %v3982_v28 = vpop.f32.mrf.mxu0  ;;  %v3485_v11 = vpop.permute.xlu2 %3484  ;;  %3652 = vst.msk [vmem:[#allocation3 + $0x98] sm:$0xff] %vm3191_vm4, %v3483_v14 }
 0x4b4   :  { %3653 = vst.msk [vmem:[#allocation3 + $0xa0] sm:$0xff] %vm3191_vm4, %v3485_v11 }
 0x4b5   :  { %v4691_v20 = vadd.f32 %v11812_v58, %v4624_v17  ;;  %8999 = vmatmul.msk.f32.gmra.mxu1 %vm3762_vm6, %v4180_v15 }
 0x4b7   :  { %v4754_v24 = vmax.f32 %v4691_v20, 0.0 }
 0x4b8   :  { %v5762_v25 = vld [vmem:[#allocation4 + $0x3] sm:$0xff] }
 0x4b9   :  { %v5383_v26 = vld [vmem:[#allocation4 + $0x2] sm:$0xff]  ;;  %4817 = vst.msk [vmem:[#allocation4 + $0x10] sm:$0xff] %vm4620_vm7, %v4754_v24  ;;  %5888 = vrot.lane.b32.xlu1 %v5762_v25, %s9150_s14  ;;  %v3043_v24 = vpop.permute.xlu1 %3042  ;;  %v2721_v33 = vpop.permute.xlu0 %2720 }
 0x4ba   :  { %v5004_v27 = vld [vmem:[#allocation4 + $0x1] sm:$0xff]  ;;  %5509 = vrot.lane.b32.xlu0 %v5383_v26, %s9148_s12  ;;  %v4440_v30 = vpop.f32.mrf.mxu1  ;;  %3212 = vst.msk [vmem:[#allocation2 + $0xa0] sm:$0xff] %vm3191_vm4, %v3043_v24 }
 0x4bb   :  { %v4879_v29 = vld [vmem:[#allocation4 + $0x8] sm:$0xff]  ;;  %5130 = vrot.lane.b32.xlu2 %v5004_v27, %s9151_s15  ;;  %v4625_v31 = vmax.f32 %v3982_v28, %v4440_v30  ;;  %v3985_v41 = vpop.f32.mrf.mxu0  ;;  %v3487_v25 = vpop.permute.xlu2 %3486  ;;  %v4181_v28 = vld [vmem:[#allocation3 + $0x98] sm:$0xff]  ;;  %2861 = vst.msk [vmem:[#allocation3 + $0x180] sm:$0xff] %vm2371_vm3, %v2721_v33 }
 0x4bc   :  { %4942 = vst.msk [vmem:[#allocation5 + $0x8] sm:$0xff] %vm4620_vm7, %v4879_v29  ;;  %v6141_v42 = vld [vmem:[#allocation4 + $0x4] sm:$0xff] }
 0x4bd   :  { %v4692_v34 = vadd.f32 %v11812_v58, %v4625_v31  ;;  %v3715_v26 = vld [vmem:[#allocation2 + $0x98] sm:$0xff]  ;;  %3654 = vst.msk [vmem:[#allocation3 + $0xa8] sm:$0xff] %vm3191_vm4, %v3487_v25  ;;  %9000 = vmatmul.msk.f32.gmra.mxu1 %vm3762_vm6, %v4181_v28  ;;  %v11981_v25 = vld [vmem:[%s14276_s3 + $0x10] sm:$0xff]  ;;  %v11991_v28 = vld [vmem:[%s14276_s3 + $0x8] sm:$0xff] }
 0x4be   :  { %v8880_v29 = vld [vmem:[%s14273_s0 + $0x1b5] ss:$2 sm:$0xff]  ;;  %v8817_v30 = vld [vmem:[%s14273_s0 + $0x1b4] ss:$2 sm:$0xff]  ;;  %8936 = vmatmul.msk.f32.gmra.mxu0 %vm3762_vm6, %v3715_v26 }
 0x4bf   :  { %v4755_v40 = vmax.f32 %v4692_v34, 0.0  ;;  %v4182_v35 = vld [vmem:[#allocation3 + $0xa0] sm:$0xff] }
 0x4c0   :  { %v4880_v43 = vld [vmem:[#allocation4 + $0x10] sm:$0xff]  ;;  %v11974_v24 = vld [vmem:[%s14276_s3 + $0x18] sm:$0x3f] }
 0x4c1   :  { %4818 = vst.msk [vmem:[#allocation4 + $0x18] sm:$0xff] %vm4620_vm7, %v4755_v40  ;;  %3494 = vrot.lane.b32.xlu1 %v8878_v37, %s9149_s17  ;;  %v5763_v52 = vld [vmem:[#allocation4 + $0xb] sm:$0xff]  ;;  %v3045_v34 = vpop.permute.xlu1 %3044  ;;  %9044 = vmatpush.msk.msra.mxu2 %vm6783_vm8, %v11974_v24 }
 0x4c2   :  { %3052 = vrot.lane.b32.xlu0 %v8815_v38, %s9149_s17  ;;  %v4443_v44 = vpop.f32.mrf.mxu1  ;;  %4943 = vst.msk [vmem:[#allocation5 + $0x10] sm:$0xff] %vm4620_vm7, %v4880_v43  ;;  %v5384_v53 = vld [vmem:[#allocation4 + $0xa] sm:$0xff] }
 0x4c3   :  { %6267 = vrot.lane.b32.xlu2 %v6141_v42, %s9152_s20  ;;  %v4626_v45 = vmax.f32 %v3985_v41, %v4443_v44  ;;  %v3988_v54 = vpop.f32.mrf.mxu0  ;;  %v5005_v55 = vld [vmem:[#allocation4 + $0x9] sm:$0xff]  ;;  %v3489_v36 = vpop.permute.xlu2 %3488  ;;  %3213 = vst.msk [vmem:[#allocation2 + $0xa8] sm:$0xff] %vm3191_vm4, %v3045_v34  ;;  %6800 = vmatpush.msra.mxu2 %v11981_v25 }
 0x4c4   :  { %v6142_v6 = vld [vmem:[#allocation4 + $0xc] sm:$0xff]  ;;  %3655 = vst.msk [vmem:[#allocation3 + $0xb0] sm:$0xff] %vm3191_vm4, %v3489_v36 }
 0x4c5   :  { %v4693_v47 = vadd.f32 %v11812_v58, %v4626_v45  ;;  %v3716_v37 = vld [vmem:[#allocation2 + $0xa0] sm:$0xff]  ;;  %9001 = vmatmul.msk.f32.gmra.mxu1 %vm3762_vm6, %v4182_v35  ;;  %v2723_v45 = vpop.permute.xlu0 %2722  ;;  %6801 = vmatpush.msra.mxu2 %v11991_v28 }
 0x4c6   :  { %8937 = vmatmul.msk.f32.gmra.mxu0 %vm3762_vm6, %v3716_v37  ;;  %v4183_v46 = vld [vmem:[#allocation3 + $0xa8] sm:$0xff]  ;;  %2862 = vst.msk [vmem:[#allocation3 + $0x188] sm:$0xff] %vm2371_vm3, %v2723_v45 }
 0x4c7   :  { %v4756_v51 = vmax.f32 %v4693_v47, 0.0 }
 0x4c8   :  { %v4881_v56 = vld [vmem:[#allocation4 + $0x18] sm:$0xff] }
 0x4c9   :  { %5890 = vrot.lane.b32.xlu1 %v5763_v52, %s9150_s14  ;;  %4819 = vst.msk [vmem:[#allocation4 + $0x20] sm:$0xff] %vm4620_vm7, %v4756_v51  ;;  %v5764_v17 = vld [vmem:[#allocation4 + $0x13] sm:$0xff]  ;;  %v3047_v44 = vpop.permute.xlu1 %3046 }
 0x4ca   :  { %5511 = vrot.lane.b32.xlu0 %v5384_v53, %s9148_s12  ;;  %v4446_v57 = vpop.f32.mrf.mxu1  ;;  %4944 = vst.msk [vmem:[#allocation5 + $0x18] sm:$0xff] %vm4620_vm7, %v4881_v56  ;;  %v5385_v18 = vld [vmem:[#allocation4 + $0x12] sm:$0xff] }
 0x4cb   :  { %5132 = vrot.lane.b32.xlu2 %v5005_v55, %s9151_s15  ;;  %v4627_v60 = vmax.f32 %v3988_v54, %v4446_v57  ;;  %v3991_v5 = vpop.f32.mrf.mxu0  ;;  %v5006_v19 = vld [vmem:[#allocation4 + $0x11] sm:$0xff]  ;;  %v2725_v47 = vpop.permute.xlu2 %2724  ;;  %3214 = vst.msk [vmem:[#allocation2 + $0xb0] sm:$0xff] %vm3191_vm4, %v3047_v44 }
 0x4cc   :  { %v6143_v32 = vld [vmem:[#allocation4 + $0x14] sm:$0xff]  ;;  %2863 = vst.msk [vmem:[#allocation3 + $0x190] sm:$0xff] %vm2371_vm3, %v2725_v47 }
 0x4cd   :  { %v4694_v63 = vadd.f32 %v11812_v58, %v4627_v60  ;;  %v3717_v48 = vld [vmem:[#allocation2 + $0xa8] sm:$0xff]  ;;  %9002 = vmatmul.msk.f32.gmra.mxu1 %vm3762_vm6, %v4183_v46  ;;  %v3049_v56 = vpop.permute.xlu0 %3048 }
 0x4ce   :  { %v8881_v51 = vld [vmem:[%s14273_s0 + $0x1c5] ss:$2 sm:$0xff]  ;;  %v8818_v52 = vld [vmem:[%s14273_s0 + $0x1c4] ss:$2 sm:$0xff]  ;;  %8938 = vmatmul.msk.f32.gmra.mxu0 %vm3762_vm6, %v3717_v48  ;;  %3215 = vst.msk [vmem:[#allocation2 + $0xb8] sm:$0xff] %vm3191_vm4, %v3049_v56 }
 0x4cf   :  { %v4757_v4 = vmax.f32 %v4694_v63, 0.0  ;;  %v4184_v59 = vld [vmem:[#allocation3 + $0xb0] sm:$0xff] }
 0x4d0   :  { %v4882_v7 = vld [vmem:[#allocation4 + $0x20] sm:$0xff] }
 0x4d1   :  { %3496 = vrot.lane.b32.xlu1 %v8879_v2, %s9149_s17  ;;  %4820 = vst.msk [vmem:[#allocation4 + $0x28] sm:$0xff] %vm4620_vm7, %v4757_v4  ;;  %v5765_v38 = vld [vmem:[#allocation4 + $0x1b] sm:$0xff]  ;;  %v3491_v55 = vpop.permute.xlu1 %3490 }
 0x4d2   :  { %3054 = vrot.lane.b32.xlu0 %v8816_v3, %s9149_s17  ;;  %v4449_v8 = vpop.f32.mrf.mxu1  ;;  %4945 = vst.msk [vmem:[#allocation5 + $0x20] sm:$0xff] %vm4620_vm7, %v4882_v7  ;;  %v5386_v39 = vld [vmem:[#allocation4 + $0x1a] sm:$0xff] }
 0x4d3   :  { %6269 = vrot.lane.b32.xlu2 %v6142_v6, %s9152_s20  ;;  %v4628_v10 = vmax.f32 %v3991_v5, %v4449_v8  ;;  %v3994_v20 = vpop.f32.mrf.mxu0  ;;  %v5007_v40 = vld [vmem:[#allocation4 + $0x19] sm:$0xff]  ;;  %3656 = vst.msk [vmem:[#allocation3 + $0xb8] sm:$0xff] %vm3191_vm4, %v3491_v55  ;;  %v8882_v8 = vld [vmem:[%s14273_s0 + $0x1d5] ss:$2 sm:$0xff] }
 0x4d4   :  { %v6144_v54 = vld [vmem:[#allocation4 + $0x1c] sm:$0xff] }
 0x4d5   :  { %v4695_v13 = vadd.f32 %v11812_v58, %v4628_v10  ;;  %v3718_v57 = vld [vmem:[#allocation2 + $0xb0] sm:$0xff]  ;;  %9003 = vmatmul.msk.f32.gmra.mxu1 %vm3762_vm6, %v4184_v59  ;;  %v3051_v4 = vpop.permute.xlu0 %3050  ;;  %v3719_v5 = vld [vmem:[#allocation2 + $0xb8] sm:$0xff] }
 0x4d6   :  { %8939 = vmatmul.msk.f32.gmra.mxu0 %vm3762_vm6, %v3718_v57  ;;  %3216 = vst.msk [vmem:[#allocation2 + $0xc0] sm:$0xff] %vm3191_vm4, %v3051_v4 }
 0x4d7   :  { %v4758_v16 = vmax.f32 %v4695_v13, 0.0 }
 0x4d8   :  { %v4883_v22 = vld [vmem:[#allocation4 + $0x28] sm:$0xff] }
 0x4d9   :  { %5892 = vrot.lane.b32.xlu1 %v5764_v17, %s9150_s14  ;;  %4821 = vst.msk [vmem:[#allocation4 + $0x30] sm:$0xff] %vm4620_vm7, %v4758_v16  ;;  %v5766_v60 = vld [vmem:[#allocation4 + $0x23] sm:$0xff]  ;;  %v3493_v3 = vpop.permute.xlu1 %3492 }
 0x4da   :  { %5513 = vrot.lane.b32.xlu0 %v5385_v18, %s9148_s12  ;;  %v4452_v21 = vpop.f32.mrf.mxu1  ;;  %4946 = vst.msk [vmem:[#allocation5 + $0x28] sm:$0xff] %vm4620_vm7, %v4883_v22  ;;  %v5387_v61 = vld [vmem:[#allocation4 + $0x22] sm:$0xff] }
 0x4db   :  { %5134 = vrot.lane.b32.xlu2 %v5006_v19, %s9151_s15  ;;  %v4629_v23 = vmax.f32 %v3994_v20, %v4452_v21  ;;  %v3997_v41 = vpop.f32.mrf.mxu0  ;;  %v5008_v62 = vld [vmem:[#allocation4 + $0x21] sm:$0xff]  ;;  %3657 = vst.msk [vmem:[#allocation3 + $0xc0] sm:$0xff] %vm3191_vm4, %v3493_v3 }
 0x4dc   :  { %v4185_v6 = vld [vmem:[#allocation3 + $0xb8] sm:$0xff] }
 0x4dd   :  { %v4696_v27 = vadd.f32 %v11812_v58, %v4629_v23  ;;  %9004 = vmatmul.msk.f32.gmra.mxu1 %vm3762_vm6, %v4185_v6  ;;  %v6145_v11 = vld [vmem:[#allocation4 + $0x24] sm:$0xff]  ;;  %v3720_v12 = vld [vmem:[#allocation2 + $0xc0] sm:$0xff] }
 0x4de   :  { %8940 = vmatmul.msk.f32.gmra.mxu0 %vm3762_vm6, %v3719_v5  ;;  %v8883_v21 = vld [vmem:[%s14273_s0 + $0x1e5] ss:$2 sm:$0xff]  ;;  %v8820_v22 = vld [vmem:[%s14273_s0 + $0x1e4] ss:$2 sm:$0xff] }
 0x4df   :  { %v4759_v31 = vmax.f32 %v4696_v27, 0.0 }
 0x4e0   :  { %v4884_v49 = vld [vmem:[#allocation4 + $0x30] sm:$0xff] }
 0x4e1   :  { %3498 = vrot.lane.b32.xlu1 %v8880_v29, %s9149_s17  ;;  %4822 = vst.msk [vmem:[#allocation4 + $0x38] sm:$0xff] %vm4620_vm7, %v4759_v31  ;;  %v5767_v14 = vld [vmem:[#allocation4 + $0x2b] sm:$0xff] }
 0x4e2   :  { %3056 = vrot.lane.b32.xlu0 %v8817_v30, %s9149_s17  ;;  %v4455_v42 = vpop.f32.mrf.mxu1  ;;  %4947 = vst.msk [vmem:[#allocation5 + $0x30] sm:$0xff] %vm4620_vm7, %v4884_v49  ;;  %v4186_v13 = vld [vmem:[#allocation3 + $0xc0] sm:$0xff]  ;;  %v11998_v30 = vld [vmem:[%s14276_s3] sm:$0xff] }
 0x4e3   :  { %6271 = vrot.lane.b32.xlu2 %v6143_v32, %s9152_s20  ;;  %v4630_v43 = vmax.f32 %v3997_v41, %v4455_v42  ;;  %v4000_v63 = vpop.f32.mrf.mxu0  ;;  %v5388_v15 = vld [vmem:[#allocation4 + $0x2a] sm:$0xff]  ;;  %6802 = vmatpush.msra.mxu2 %v11998_v30 }
 0x4e4   :  { %v5009_v16 = vld [vmem:[#allocation4 + $0x29] sm:$0xff] }
 0x4e5   :  { %v4697_v50 = vadd.f32 %v11812_v58, %v4630_v43  ;;  %9005 = vmatmul.msk.f32.gmra.mxu1 %vm3762_vm6, %v4186_v13  ;;  %v6146_v27 = vld [vmem:[#allocation4 + $0x2c] sm:$0xff] }
 0x4e6   :  { %8941 = vmatmul.msk.f32.gmra.mxu0 %vm3762_vm6, %v3720_v12  ;;  %v8821_v41 = vld [vmem:[%s14273_s0 + $0x1f4] ss:$2 sm:$0xff] }
 0x4e7   :  { %v4760_v53 = vmax.f32 %v4697_v50, 0.0 }
 0x4e8   :  { %v4885_v1 = vld [vmem:[#allocation4 + $0x38] sm:$0xff] }
 0x4e9   :  { %5894 = vrot.lane.b32.xlu1 %v5765_v38, %s9150_s14  ;;  %4823 = vst.msk [vmem:[#allocation4 + $0x40] sm:$0xff] %vm4620_vm7, %v4760_v53  ;;  %v5768_v31 = vld [vmem:[#allocation4 + $0x33] sm:$0xff] }
 0x4ea   :  { %5515 = vrot.lane.b32.xlu0 %v5386_v39, %s9148_s12  ;;  %v4458_v0 = vpop.f32.mrf.mxu1  ;;  %4948 = vst.msk [vmem:[#allocation5 + $0x38] sm:$0xff] %vm4620_vm7, %v4885_v1  ;;  %v5389_v32 = vld [vmem:[#allocation4 + $0x32] sm:$0xff] }
 0x4eb   :  { %5136 = vrot.lane.b32.xlu2 %v5007_v40, %s9151_s15  ;;  %v4631_v2 = vmax.f32 %v4000_v63, %v4458_v0  ;;  %v4003_v17 = vpop.f32.mrf.mxu0  ;;  %v5010_v33 = vld [vmem:[#allocation4 + $0x31] sm:$0xff] }
 0x4ec   :  { %v8884_v40 = vld [vmem:[%s14273_s0 + $0x1f5] ss:$2 sm:$0xff]  ;;  %v6147_v43 = vld [vmem:[#allocation4 + $0x34] sm:$0xff] }
 0x4ed   :  { %v4698_v7 = vadd.f32 %v11812_v58, %v4631_v2 }
 0x4ef   :  { %v4761_v10 = vmax.f32 %v4698_v7, 0.0 }
 0x4f0   :  { %v4886_v19 = vld [vmem:[#allocation4 + $0x40] sm:$0xff] }
 0x4f1   :  { %3500 = vrot.lane.b32.xlu1 %v8881_v51, %s9149_s17  ;;  %4824 = vst.msk [vmem:[#allocation4 + $0x48] sm:$0xff] %vm4620_vm7, %v4761_v10  ;;  %v5769_v49 = vld [vmem:[#allocation4 + $0x3b] sm:$0xff] }
 0x4f2   :  { %3058 = vrot.lane.b32.xlu0 %v8818_v52, %s9149_s17  ;;  %v4461_v18 = vpop.f32.mrf.mxu1  ;;  %4949 = vst.msk [vmem:[#allocation5 + $0x40] sm:$0xff] %vm4620_vm7, %v4886_v19  ;;  %v5390_v50 = vld [vmem:[#allocation4 + $0x3a] sm:$0xff] }
 0x4f3   :  { %6273 = vrot.lane.b32.xlu2 %v6144_v54, %s9152_s20  ;;  %v4632_v20 = vmax.f32 %v4003_v17, %v4461_v18  ;;  %v4006_v35 = vpop.f32.mrf.mxu0  ;;  %v5011_v52 = vld [vmem:[#allocation4 + $0x39] sm:$0xff] }
 0x4f4   :  { %v6148_v0 = vld [vmem:[#allocation4 + $0x3c] sm:$0xff] }
 0x4f5   :  { %v4699_v23 = vadd.f32 %v11812_v58, %v4632_v20 }
 0x4f7   :  { %v4762_v26 = vmax.f32 %v4699_v23, 0.0 }
 0x4f8   :  { %v4887_v37 = vld [vmem:[#allocation4 + $0x48] sm:$0xff] }
 0x4f9   :  { %5896 = vrot.lane.b32.xlu1 %v5766_v60, %s9150_s14  ;;  %4825 = vst.msk [vmem:[#allocation4 + $0x50] sm:$0xff] %vm4620_vm7, %v4762_v26  ;;  %v5391_v10 = vld [vmem:[#allocation4 + $0x42] sm:$0xff] }
 0x4fa   :  { %5517 = vrot.lane.b32.xlu0 %v5387_v61, %s9148_s12  ;;  %v4464_v34 = vpop.f32.mrf.mxu1  ;;  %4950 = vst.msk [vmem:[#allocation5 + $0x48] sm:$0xff] %vm4620_vm7, %v4887_v37  ;;  %v8885_v61 = vld [vmem:[%s14273_s0 + $0x205] ss:$2 sm:$0xff]  ;;  %v6149_v26 = vld [vmem:[#allocation4 + $0x44] sm:$0xff] }
 0x4fb   :  { %5138 = vrot.lane.b32.xlu2 %v5008_v62, %s9151_s15  ;;  %v4633_v36 = vmax.f32 %v4006_v35, %v4464_v34  ;;  %v4009_v45 = vpop.f32.mrf.mxu0  ;;  %v8822_v62 = vld [vmem:[%s14273_s0 + $0x204] ss:$2 sm:$0xff] }
 0x4fd   :  { %v4700_v39 = vadd.f32 %v11812_v58, %v4633_v36 }
 0x4ff   :  { %v4763_v42 = vmax.f32 %v4700_v39, 0.0  ;;  %v8843_v39 = vld [vmem:[%s14273_s0 + $0x354] ss:$2 sm:$0xff] }
 0x500   :  { %v4888_v59 = vld [vmem:[#allocation4 + $0x50] sm:$0xff] }
 0x501   :  { %3502 = vrot.lane.b32.xlu1 %v8882_v8, %s9149_s17  ;;  %4826 = vst.msk [vmem:[#allocation4 + $0x58] sm:$0xff] %vm4620_vm7, %v4763_v42  ;;  %v5013_v42 = vld [vmem:[#allocation4 + $0x49] sm:$0xff] }
 0x502   :  { %3060 = vrot.lane.b32.xlu0 %v8819_v9, %s9149_s17  ;;  %v4467_v44 = vpop.f32.mrf.mxu1  ;;  %4951 = vst.msk [vmem:[#allocation5 + $0x50] sm:$0xff] %vm4620_vm7, %v4888_v59  ;;  %v8842_v9 = vld [vmem:[%s14273_s0 + $0x344] ss:$2 sm:$0xff] }
 0x503   :  { %6275 = vrot.lane.b32.xlu2 %v6145_v11, %s9152_s20  ;;  %v4634_v47 = vmax.f32 %v4009_v45, %v4467_v44  ;;  %v4012_v57 = vpop.f32.mrf.mxu0  ;;  %v5012_v11 = vld [vmem:[#allocation4 + $0x41] sm:$0xff] }
 0x505   :  { %v4701_v48 = vadd.f32 %v11812_v58, %v4634_v47 }
 0x507   :  { %v4764_v51 = vmax.f32 %v4701_v48, 0.0 }
 0x509   :  { %5898 = vrot.lane.b32.xlu1 %v5767_v14, %s9150_s14  ;;  %4827 = vst.msk [vmem:[#allocation4 + $0x60] sm:$0xff] %vm4620_vm7, %v4764_v51 }
 0x50a   :  { %5519 = vrot.lane.b32.xlu0 %v5388_v15, %s9148_s12  ;;  %v4470_v53 = vpop.f32.mrf.mxu1 }
 0x50b   :  { %5140 = vrot.lane.b32.xlu2 %v5009_v16, %s9151_s15  ;;  %v4635_v60 = vmax.f32 %v4012_v57, %v4470_v53  ;;  %v4015_v7 = vpop.f32.mrf.mxu0  ;;  %v5392_v57 = vld [vmem:[#allocation4 + $0x4a] sm:$0xff] }
 0x50d   :  { %v4702_v63 = vadd.f32 %v11812_v58, %v4635_v60 }
 0x50f   :  { %v4765_v1 = vmax.f32 %v4702_v63, 0.0 }
 0x511   :  { %3504 = vrot.lane.b32.xlu1 %v8883_v21, %s9149_s17  ;;  %4828 = vst.msk [vmem:[#allocation4 + $0x68] sm:$0xff] %vm4620_vm7, %v4765_v1  ;;  %v4889_v21 = vld [vmem:[#allocation4 + $0x58] sm:$0xff] }
 0x512   :  { %3062 = vrot.lane.b32.xlu0 %v8820_v22, %s9149_s17  ;;  %v4473_v5 = vpop.f32.mrf.mxu1  ;;  %v8823_v22 = vld [vmem:[%s14273_s0 + $0x214] ss:$2 sm:$0xff]  ;;  %4952 = vst.msk [vmem:[#allocation5 + $0x58] sm:$0xff] %vm4620_vm7, %v4889_v21 }
 0x513   :  { %6277 = vrot.lane.b32.xlu2 %v6146_v27, %s9152_s20  ;;  %v4636_v8 = vmax.f32 %v4015_v7, %v4473_v5  ;;  %v4018_v20 = vpop.f32.mrf.mxu0  ;;  %v5014_v21 = vld [vmem:[#allocation4 + $0x51] sm:$0xff] }
 0x515   :  { %v5131_v29 = vpop.permute.xlu2 %5130  ;;  %v4703_v12 = vadd.f32 %v11812_v58, %v4636_v8 }
 0x516   :  { %5320 = vst.msk [vmem:[#allocation5] sm:$0xff] %vm5319_vm9, %v5131_v29  ;;  %v5770_v29 = vld [vmem:[#allocation4 + $0x43] sm:$0xff] }
 0x517   :  { %v4766_v16 = vmax.f32 %v4703_v12, 0.0 }
 0x519   :  { %5900 = vrot.lane.b32.xlu1 %v5768_v31, %s9150_s14  ;;  %4829 = vst.msk [vmem:[#allocation4 + $0x70] sm:$0xff] %vm4620_vm7, %v4766_v16 }
 0x51a   :  { %5521 = vrot.lane.b32.xlu0 %v5389_v32, %s9148_s12  ;;  %v4476_v19 = vpop.f32.mrf.mxu1 }
 0x51b   :  { %5142 = vrot.lane.b32.xlu2 %v5010_v33, %s9151_s15  ;;  %v4637_v23 = vmax.f32 %v4018_v20, %v4476_v19  ;;  %v4021_v37 = vpop.f32.mrf.mxu0  ;;  %v5393_v19 = vld [vmem:[#allocation4 + $0x52] sm:$0xff] }
 0x51d   :  { %v6268_v38 = vpop.permute.xlu2 %6267  ;;  %v4704_v27 = vadd.f32 %v11812_v58, %v4637_v23 }
 0x51f   :  { %v4767_v33 = vmax.f32 %v4704_v27, 0.0 }
 0x521   :  { %3506 = vrot.lane.b32.xlu1 %v8884_v40, %s9149_s17  ;;  %4830 = vst.msk [vmem:[#allocation4 + $0x78] sm:$0xff] %vm4620_vm7, %v4767_v33 }
 0x522   :  { %3064 = vrot.lane.b32.xlu0 %v8821_v41, %s9149_s17  ;;  %v4479_v35 = vpop.f32.mrf.mxu1  ;;  %v8886_v41 = vld [vmem:[%s14273_s0 + $0x215] ss:$2 sm:$0xff] }
 0x523   :  { %6279 = vrot.lane.b32.xlu2 %v6147_v43, %s9152_s20  ;;  %v4638_v40 = vmax.f32 %v4021_v37, %v4479_v35  ;;  %v4024_v51 = vpop.f32.mrf.mxu0  ;;  %v8825_v35 = vld [vmem:[%s14273_s0 + $0x234] ss:$2 sm:$0xff] }
 0x525   :  { %v5133_v46 = vpop.permute.xlu2 %5132  ;;  %v4705_v43 = vadd.f32 %v11812_v58, %v4638_v40 }
 0x526   :  { %5321 = vst.msk [vmem:[#allocation5 + $0x8] sm:$0xff] %vm5319_vm9, %v5133_v46 }
 0x527   :  { %v4768_v47 = vmax.f32 %v4705_v43, 0.0 }
 0x528   :  { %v4893_v16 = vld [vmem:[#allocation4 + $0x78] sm:$0xff] }
 0x529   :  { %5902 = vrot.lane.b32.xlu1 %v5769_v49, %s9150_s14  ;;  %4831 = vst.msk [vmem:[#allocation4 + $0x80] sm:$0xff] %vm4620_vm7, %v4768_v47 }
 0x52a   :  { %5523 = vrot.lane.b32.xlu0 %v5390_v50, %s9148_s12  ;;  %v4482_v50 = vpop.f32.mrf.mxu1  ;;  %4956 = vst.msk [vmem:[#allocation5 + $0x78] sm:$0xff] %vm4620_vm7, %v4893_v16  ;;  %v5016_v16 = vld [vmem:[#allocation4 + $0x61] sm:$0xff] }
 0x52b   :  { %5144 = vrot.lane.b32.xlu2 %v5011_v52, %s9151_s15  ;;  %v5889_v54 = vpop.permute.xlu1 %5888  ;;  %v4891_v52 = vld [vmem:[#allocation4 + $0x68] sm:$0xff]  ;;  %v4639_v53 = vmax.f32 %v4024_v51, %v4482_v50  ;;  %v4027_v1 = vpop.f32.mrf.mxu0  ;;  %v5015_v50 = vld [vmem:[#allocation4 + $0x59] sm:$0xff]  ;;  %v12147_v51 = vld [vmem:[%s14275_s2] ss:$0 sm:$0xff] }
 0x52c   :  { %v5510_v55 = vpop.permute.xlu0 %5509  ;;  %4954 = vst.msk [vmem:[#allocation5 + $0x68] sm:$0xff] %vm4620_vm7, %v4891_v52 }
 0x52d   :  { %5699 = vst.msk [vmem:[#allocation5] sm:$0xff] %vm5698_vm10, %v5510_v55  ;;  %v6270_v56 = vpop.permute.xlu2 %6269  ;;  %v6150_v55 = vld [vmem:[#allocation4 + $0x4c] sm:$0xff] }
 0x52e   :  { %6078 = vst.msk [vmem:[#allocation5] sm:$0xff] %vm6077_vm11, %v5889_v54  ;;  %v5771_v54 = vld [vmem:[#allocation4 + $0x4b] sm:$0xff] }
 0x52f   :  { %6457 = vst.msk [vmem:[#allocation5] sm:$0xff] %vm6456_vm12, %v6268_v38  ;;  %v4890_v38 = vld [vmem:[#allocation4 + $0x60] sm:$0xff] }
 0x530   :  { %4953 = vst.msk [vmem:[#allocation5 + $0x60] sm:$0xff] %vm4620_vm7, %v4890_v38  ;;  %v4894_v33 = vld [vmem:[#allocation4 + $0x80] sm:$0xff]  ;;  %v6151_v38 = vld [vmem:[#allocation4 + $0x54] sm:$0xff] }
 0x531   :  { %3508 = vrot.lane.b32.xlu1 %v8885_v61, %s9149_s17  ;;  %4957 = vst.msk [vmem:[#allocation5 + $0x80] sm:$0xff] %vm4620_vm7, %v4894_v33 }
 0x532   :  { %3066 = vrot.lane.b32.xlu0 %v8822_v62, %s9149_s17  ;;  %v4485_v63 = vpop.f32.mrf.mxu1 }
 0x533   :  { %6281 = vrot.lane.b32.xlu2 %v6148_v0, %s9152_s20  ;;  %v3495_v2 = vpop.permute.xlu1 %3494  ;;  %v4640_v5 = vmax.f32 %v4027_v1, %v4485_v63 }
 0x534   :  { %v3053_v3 = vpop.permute.xlu0 %3052  ;;  %3658 = vst.msk [vmem:[#allocation3 + $0xc8] sm:$0xff] %vm3191_vm4, %v3495_v2  ;;  %v4892_v2 = vld [vmem:[#allocation4 + $0x70] sm:$0xff] }
 0x535   :  { %v5135_v4 = vpop.permute.xlu2 %5134  ;;  %3217 = vst.msk [vmem:[#allocation2 + $0xc8] sm:$0xff] %vm3191_vm4, %v3053_v3  ;;  %v8887_v3 = vld [vmem:[%s14273_s0 + $0x225] ss:$2 sm:$0xff]  ;;  %v4707_v7 = vadd.f32 %v11812_v58, %v4640_v5 }
 0x536   :  { %v6520_v6 = vld [vmem:[#allocation5] sm:$0xff]  ;;  %5322 = vst.msk [vmem:[#allocation5 + $0x10] sm:$0xff] %vm5319_vm9, %v5135_v4 }
 0x537   :  { %9045 = vmatmul.msk.f32.vlgmr.msra.gmra.mxu2 %vm6593_vm13, %v6520_v6  ;;  %v8844_v4 = vld [vmem:[%s14273_s0 + $0x364] ss:$2 sm:$0xff]  ;;  %4955 = vst.msk [vmem:[#allocation5 + $0x70] sm:$0xff] %vm4620_vm7, %v4892_v2 }
 0x538   :  { %v8824_v6 = vld [vmem:[%s14273_s0 + $0x224] ss:$2 sm:$0xff] }
 0x539   :  { %5525 = vrot.lane.b32.xlu1 %v5391_v10, %s9148_s12  ;;  %v5773_v2 = vld [vmem:[#allocation4 + $0x5b] sm:$0xff] }
 0x53a   :  { %5146 = vrot.lane.b32.xlu0 %v5012_v11, %s9151_s15  ;;  %v4770_v11 = vmax.f32 %v4707_v7, 0.0 }
 0x53b   :  { %3106 = vrot.lane.b32.xlu2 %v8842_v9, %s9149_s17  ;;  %v5891_v13 = vpop.permute.xlu1 %5890  ;;  %v4187_v15 = vld [vmem:[#allocation3 + $0xc8] sm:$0xff] }
 0x53c   :  { %v5512_v14 = vpop.permute.xlu0 %5511  ;;  %v3721_v18 = vld [vmem:[#allocation2 + $0xc8] sm:$0xff]  ;;  %9006 = vmatmul.msk.f32.gmra.mxu1 %vm3762_vm6, %v4187_v15  ;;  %v4030_v15 = vpop.f32.mrf.mxu0  ;;  %4833 = vst.msk [vmem:[#allocation4 + $0x90] sm:$0xff] %vm4620_vm7, %v4770_v11 }
 0x53d   :  { %5700 = vst.msk [vmem:[#allocation5 + $0x8] sm:$0xff] %vm5698_vm10, %v5512_v14  ;;  %v6272_v17 = vpop.permute.xlu2 %6271  ;;  %8942 = vmatmul.msk.f32.gmra.mxu0 %vm3762_vm6, %v3721_v18  ;;  %v4488_v14 = vpop.f32.mrf.mxu1  ;;  %v5772_v18 = vld [vmem:[#allocation4 + $0x53] sm:$0xff] }
 0x53e   :  { %6079 = vst.msk [vmem:[#allocation5 + $0x8] sm:$0xff] %vm6077_vm11, %v5891_v13 }
 0x53f   :  { %6458 = vst.msk [vmem:[#allocation5 + $0x8] sm:$0xff] %vm6456_vm12, %v6270_v56  ;;  %v4706_v56 = vadd.f32 %v11812_v58, %v4639_v53 }
 0x541   :  { %3068 = vrot.lane.b32.xlu1 %v8823_v22, %s9149_s17  ;;  %v4769_v61 = vmax.f32 %v4706_v56, 0.0 }
 0x542   :  { %6283 = vrot.lane.b32.xlu0 %v6149_v26, %s9152_s20 }
 0x543   :  { %5904 = vrot.lane.b32.xlu2 %v5770_v29, %s9150_s14  ;;  %v3497_v31 = vpop.permute.xlu1 %3496  ;;  %4832 = vst.msk [vmem:[#allocation4 + $0x88] sm:$0xff] %vm4620_vm7, %v4769_v61  ;;  %v4896_v61 = vld [vmem:[#allocation4 + $0x90] sm:$0xff] }
 0x544   :  { %v3055_v32 = vpop.permute.xlu0 %3054  ;;  %3659 = vst.msk [vmem:[#allocation3 + $0xd0] sm:$0xff] %vm3191_vm4, %v3497_v31 }
 0x545   :  { %v5137_v34 = vpop.permute.xlu2 %5136  ;;  %3218 = vst.msk [vmem:[#allocation2 + $0xd0] sm:$0xff] %vm3191_vm4, %v3055_v32  ;;  %v4491_v29 = vpop.f32.mrf.mxu1 }
 0x546   :  { %v6521_v36 = vld [vmem:[#allocation5 + $0x8] sm:$0xff]  ;;  %5323 = vst.msk [vmem:[#allocation5 + $0x18] sm:$0xff] %vm5319_vm9, %v5137_v34  ;;  %v4033_v32 = vpop.f32.mrf.mxu0 }
 0x547   :  { %9046 = vmatmul.msk.f32.gmra.mxu2 %vm6593_vm13, %v6521_v36  ;;  %v8888_v34 = vld [vmem:[%s14273_s0 + $0x235] ss:$2 sm:$0xff]  ;;  %v4642_v36 = vmax.f32 %v4033_v32, %v4491_v29  ;;  %4959 = vst.msk [vmem:[#allocation5 + $0x90] sm:$0xff] %vm4620_vm7, %v4896_v61  ;;  %v8891_v61 = vld [vmem:[%s14273_s0 + $0x265] ss:$2 sm:$0xff] }
 0x548   :  { %v6153_v32 = vld [vmem:[#allocation4 + $0x64] sm:$0xff] }
 0x549   :  { %5148 = vrot.lane.b32.xlu1 %v5013_v42, %s9151_s15  ;;  %v4709_v37 = vadd.f32 %v11812_v58, %v4642_v36 }
 0x54a   :  { %3108 = vrot.lane.b32.xlu0 %v8843_v39, %s9149_s17 }
 0x54b   :  { %3510 = vrot.lane.b32.xlu2 %v8886_v41, %s9149_s17  ;;  %v5893_v44 = vpop.permute.xlu1 %5892  ;;  %v4188_v46 = vld [vmem:[#allocation3 + $0xd0] sm:$0xff]  ;;  %v4772_v42 = vmax.f32 %v4709_v37, 0.0 }
 0x54c   :  { %v5514_v45 = vpop.permute.xlu0 %5513  ;;  %v3722_v49 = vld [vmem:[#allocation2 + $0xd0] sm:$0xff]  ;;  %9007 = vmatmul.msk.f32.gmra.mxu1 %vm3762_vm6, %v4188_v46  ;;  %v4895_v46 = vld [vmem:[#allocation4 + $0x88] sm:$0xff] }
 0x54d   :  { %5701 = vst.msk [vmem:[#allocation5 + $0x10] sm:$0xff] %vm5698_vm10, %v5514_v45  ;;  %v6274_v48 = vpop.permute.xlu2 %6273  ;;  %8943 = vmatmul.msk.f32.gmra.mxu0 %vm3762_vm6, %v3722_v49  ;;  %v5394_v49 = vld [vmem:[#allocation4 + $0x5a] sm:$0xff] }
 0x54e   :  { %6080 = vst.msk [vmem:[#allocation5 + $0x10] sm:$0xff] %vm6077_vm11, %v5893_v44  ;;  %v4036_v45 = vpop.f32.mrf.mxu0 }
 0x54f   :  { %6459 = vst.msk [vmem:[#allocation5 + $0x10] sm:$0xff] %vm6456_vm12, %v6272_v17  ;;  %v4641_v17 = vmax.f32 %v4030_v15, %v4488_v14  ;;  %v8889_v15 = vld [vmem:[%s14273_s0 + $0x245] ss:$2 sm:$0xff] }
 0x550   :  { %4835 = vst.msk [vmem:[#allocation4 + $0xa0] sm:$0xff] %vm4620_vm7, %v4772_v42  ;;  %v8890_v42 = vld [vmem:[%s14273_s0 + $0x255] ss:$2 sm:$0xff] }
 0x551   :  { %6285 = vrot.lane.b32.xlu1 %v6150_v55, %s9152_s20  ;;  %v4708_v20 = vadd.f32 %v11812_v58, %v4641_v17  ;;  %v4494_v58 = vpop.f32.mrf.mxu1  ;;  %4958 = vst.msk [vmem:[#allocation5 + $0x88] sm:$0xff] %vm4620_vm7, %v4895_v46 }
 0x552   :  { %5906 = vrot.lane.b32.xlu0 %v5771_v54, %s9150_s14  ;;  %v4643_v47 = vmax.f32 %v4036_v45, %v4494_v58 }
 0x553   :  { %5527 = vrot.lane.b32.xlu2 %v5392_v57, %s9148_s12  ;;  %v3499_v59 = vpop.permute.xlu1 %3498  ;;  %v4771_v26 = vmax.f32 %v4708_v20, 0.0 }
 0x554   :  { %v3057_v60 = vpop.permute.xlu0 %3056  ;;  %3660 = vst.msk [vmem:[#allocation3 + $0xd8] sm:$0xff] %vm3191_vm4, %v3499_v59  ;;  %v4710_v52 = vadd.f32 %v12147_v51, %v4643_v47 }
 0x555   :  { %v5139_v62 = vpop.permute.xlu2 %5138  ;;  %3219 = vst.msk [vmem:[#allocation2 + $0xd8] sm:$0xff] %vm3191_vm4, %v3057_v60 }
 0x556   :  { %v6522_v0 = vld [vmem:[#allocation5 + $0x10] sm:$0xff]  ;;  %5324 = vst.msk [vmem:[#allocation5 + $0x20] sm:$0xff] %vm5319_vm9, %v5139_v62  ;;  %v4773_v55 = vmax.f32 %v4710_v52, 0.0  ;;  %v4039_v60 = vpop.f32.mrf.mxu0 }
 0x557   :  { %9047 = vmatmul.msk.f32.gmra.mxu2 %vm6593_vm13, %v6522_v0  ;;  %4834 = vst.msk [vmem:[#allocation4 + $0x98] sm:$0xff] %vm4620_vm7, %v4771_v26  ;;  %v8826_v62 = vld [vmem:[%s14273_s0 + $0x244] ss:$2 sm:$0xff]  ;;  %v5017_v52 = vld [vmem:[#allocation4 + $0x69] sm:$0xff] }
 0x558   :  { %4836 = vst.msk [vmem:[#allocation4 + $0xa8] sm:$0xff] %vm4620_vm7, %v4773_v55  ;;  %v6152_v0 = vld [vmem:[#allocation4 + $0x5c] sm:$0xff] }
 0x559   :  { %3110 = vrot.lane.b32.xlu1 %v8844_v4, %s9149_s17  ;;  %v4497_v57 = vpop.f32.mrf.mxu1  ;;  %v4898_v14 = vld [vmem:[#allocation4 + $0xa0] sm:$0xff] }
 0x55a   :  { %3512 = vrot.lane.b32.xlu0 %v8887_v3, %s9149_s17  ;;  %v4644_v63 = vmax.f32 %v4039_v60, %v4497_v57  ;;  %4961 = vst.msk [vmem:[#allocation5 + $0xa0] sm:$0xff] %vm4620_vm7, %v4898_v14 }
 0x55b   :  { %3070 = vrot.lane.b32.xlu2 %v8824_v6, %s9149_s17  ;;  %v5895_v8 = vpop.permute.xlu1 %5894  ;;  %v4189_v10 = vld [vmem:[#allocation3 + $0xd8] sm:$0xff] }
 0x55c   :  { %v5516_v9 = vpop.permute.xlu0 %5515  ;;  %v3723_v13 = vld [vmem:[#allocation2 + $0xd8] sm:$0xff]  ;;  %9008 = vmatmul.msk.f32.gmra.mxu1 %vm3762_vm6, %v4189_v10  ;;  %v4711_v1 = vadd.f32 %v12147_v51, %v4644_v63 }
 0x55d   :  { %5702 = vst.msk [vmem:[#allocation5 + $0x18] sm:$0xff] %vm5698_vm10, %v5516_v9  ;;  %v6276_v12 = vpop.permute.xlu2 %6275  ;;  %8944 = vmatmul.msk.f32.gmra.mxu0 %vm3762_vm6, %v3723_v13  ;;  %v6154_v63 = vld [vmem:[#allocation4 + $0x6c] sm:$0xff] }
 0x55e   :  { %6081 = vst.msk [vmem:[#allocation5 + $0x18] sm:$0xff] %vm6077_vm11, %v5895_v8  ;;  %v4774_v6 = vmax.f32 %v4711_v1, 0.0  ;;  %v4042_v10 = vpop.f32.mrf.mxu0  ;;  %v4897_v11 = vld [vmem:[#allocation4 + $0x98] sm:$0xff] }
 0x55f   :  { %6460 = vst.msk [vmem:[#allocation5 + $0x18] sm:$0xff] %vm6456_vm12, %v6274_v48  ;;  %v8845_v48 = vld [vmem:[%s14273_s0 + $0x374] ss:$2 sm:$0xff] }
 0x560   :  { %4837 = vst.msk [vmem:[#allocation4 + $0xb0] sm:$0xff] %vm4620_vm7, %v4774_v6 }
 0x561   :  { %5908 = vrot.lane.b32.xlu1 %v5772_v18, %s9150_s14  ;;  %v4500_v9 = vpop.f32.mrf.mxu1  ;;  %4960 = vst.msk [vmem:[#allocation5 + $0x98] sm:$0xff] %vm4620_vm7, %v4897_v11 }
 0x562   :  { %5529 = vrot.lane.b32.xlu0 %v5393_v19, %s9148_s12  ;;  %v4645_v13 = vmax.f32 %v4042_v10, %v4500_v9  ;;  %v6155_v9 = vld [vmem:[#allocation4 + $0x74] sm:$0xff] }
 0x563   :  { %5150 = vrot.lane.b32.xlu2 %v5014_v21, %s9151_s15  ;;  %v3501_v22 = vpop.permute.xlu1 %3500  ;;  %v5776_v10 = vld [vmem:[#allocation4 + $0x73] sm:$0xff] }
 0x564   :  { %v3059_v23 = vpop.permute.xlu0 %3058  ;;  %3661 = vst.msk [vmem:[#allocation3 + $0xe0] sm:$0xff] %vm3191_vm4, %v3501_v22  ;;  %v4712_v17 = vadd.f32 %v12147_v51, %v4645_v13 }
 0x565   :  { %v5141_v27 = vpop.permute.xlu2 %5140  ;;  %3220 = vst.msk [vmem:[#allocation2 + $0xe0] sm:$0xff] %vm3191_vm4, %v3059_v23 }
 0x566   :  { %v6523_v31 = vld [vmem:[#allocation5 + $0x18] sm:$0xff]  ;;  %5325 = vst.msk [vmem:[#allocation5 + $0x28] sm:$0xff] %vm5319_vm9, %v5141_v27  ;;  %v4775_v20 = vmax.f32 %v4712_v17, 0.0  ;;  %v4045_v26 = vpop.f32.mrf.mxu0  ;;  %v4899_v27 = vld [vmem:[#allocation4 + $0xa8] sm:$0xff] }
 0x567   :  { %9048 = vmatmul.msk.f32.gmra.mxu2 %vm6593_vm13, %v6523_v31  ;;  %v5774_v31 = vld [vmem:[#allocation4 + $0x63] sm:$0xff]  ;;  %4962 = vst.msk [vmem:[#allocation5 + $0xa8] sm:$0xff] %vm4620_vm7, %v4899_v27 }
 0x568   :  { %4838 = vst.msk [vmem:[#allocation4 + $0xb8] sm:$0xff] %vm4620_vm7, %v4775_v20  ;;  %v8892_v17 = vld [vmem:[%s14273_s0 + $0x275] ss:$2 sm:$0xff] }
 0x569   :  { %3514 = vrot.lane.b32.xlu1 %v8888_v34, %s9149_s17  ;;  %v4503_v22 = vpop.f32.mrf.mxu1  ;;  %v5395_v34 = vld [vmem:[#allocation4 + $0x62] sm:$0xff] }
 0x56a   :  { %3072 = vrot.lane.b32.xlu0 %v8825_v35, %s9149_s17  ;;  %v4646_v29 = vmax.f32 %v4045_v26, %v4503_v22 }
 0x56b   :  { %6287 = vrot.lane.b32.xlu2 %v6151_v38, %s9152_s20  ;;  %v5897_v39 = vpop.permute.xlu1 %5896  ;;  %v4190_v41 = vld [vmem:[#allocation3 + $0xe0] sm:$0xff] }
 0x56c   :  { %v5518_v40 = vpop.permute.xlu0 %5517  ;;  %v3724_v44 = vld [vmem:[#allocation2 + $0xe0] sm:$0xff]  ;;  %9009 = vmatmul.msk.f32.gmra.mxu1 %vm3762_vm6, %v4190_v41  ;;  %v4713_v33 = vadd.f32 %v12147_v51, %v4646_v29 }
 0x56d   :  { %5703 = vst.msk [vmem:[#allocation5 + $0x20] sm:$0xff] %vm5698_vm10, %v5518_v40  ;;  %v6278_v43 = vpop.permute.xlu2 %6277  ;;  %8945 = vmatmul.msk.f32.gmra.mxu0 %vm3762_vm6, %v3724_v44  ;;  %v4900_v41 = vld [vmem:[#allocation4 + $0xb0] sm:$0xff] }
 0x56e   :  { %6082 = vst.msk [vmem:[#allocation5 + $0x20] sm:$0xff] %vm6077_vm11, %v5897_v39  ;;  %v4776_v38 = vmax.f32 %v4713_v33, 0.0  ;;  %v8827_v44 = vld [vmem:[%s14273_s0 + $0x254] ss:$2 sm:$0xff] }
 0x56f   :  { %6461 = vst.msk [vmem:[#allocation5 + $0x20] sm:$0xff] %vm6456_vm12, %v6276_v12  ;;  %v8846_v12 = vld [vmem:[%s14273_s0 + $0x384] ss:$2 sm:$0xff] }
 0x570   :  { %4839 = vst.msk [vmem:[#allocation4 + $0xc0] sm:$0xff] %vm4620_vm7, %v4776_v38  ;;  %v4901_v47 = vld [vmem:[#allocation4 + $0xb8] sm:$0xff] }
 0x571   :  { %5531 = vrot.lane.b32.xlu1 %v5394_v49, %s9148_s12  ;;  %4963 = vst.msk [vmem:[#allocation5 + $0xb0] sm:$0xff] %vm4620_vm7, %v4900_v41  ;;  %v5775_v49 = vld [vmem:[#allocation4 + $0x6b] sm:$0xff]  ;;  %v5398_v38 = vld [vmem:[#allocation4 + $0x7a] sm:$0xff] }
 0x572   :  { %5152 = vrot.lane.b32.xlu0 %v5015_v50, %s9151_s15  ;;  %4964 = vst.msk [vmem:[#allocation5 + $0xb8] sm:$0xff] %vm4620_vm7, %v4901_v47  ;;  %v5396_v50 = vld [vmem:[#allocation4 + $0x6a] sm:$0xff] }
 0x573   :  { %3112 = vrot.lane.b32.xlu2 %v8845_v48, %s9149_s17  ;;  %v3503_v53 = vpop.permute.xlu1 %3502 }
 0x574   :  { %v3061_v54 = vpop.permute.xlu0 %3060  ;;  %3662 = vst.msk [vmem:[#allocation3 + $0xe8] sm:$0xff] %vm3191_vm4, %v3503_v53 }
 0x575   :  { %v5143_v56 = vpop.permute.xlu2 %5142  ;;  %3221 = vst.msk [vmem:[#allocation2 + $0xe8] sm:$0xff] %vm3191_vm4, %v3061_v54 }
 0x576   :  { %v6524_v59 = vld [vmem:[#allocation5 + $0x20] sm:$0xff]  ;;  %5326 = vst.msk [vmem:[#allocation5 + $0x30] sm:$0xff] %vm5319_vm9, %v5143_v56 }
 0x577   :  { %9049 = vmatmul.msk.f32.gmra.mxu2 %vm6593_vm13, %v6524_v59  ;;  %v4902_v59 = vld [vmem:[#allocation4 + $0xc0] sm:$0xff] }
 0x578   :  { %4965 = vst.msk [vmem:[#allocation5 + $0xc0] sm:$0xff] %vm4620_vm7, %v4902_v59 }
 0x579   :  { %3074 = vrot.lane.b32.xlu1 %v8826_v62, %s9149_s17  ;;  %v8828_v62 = vld [vmem:[%s14273_s0 + $0x264] ss:$2 sm:$0xff] }
 0x57a   :  { %6289 = vrot.lane.b32.xlu0 %v6152_v0, %s9152_s20 }
 0x57b   :  { %5910 = vrot.lane.b32.xlu2 %v5773_v2, %s9150_s14  ;;  %v5899_v3 = vpop.permute.xlu1 %5898  ;;  %v4191_v5 = vld [vmem:[#allocation3 + $0xe8] sm:$0xff] }
 0x57c   :  { %v5520_v4 = vpop.permute.xlu0 %5519  ;;  %v3725_v8 = vld [vmem:[#allocation2 + $0xe8] sm:$0xff]  ;;  %9010 = vmatmul.msk.f32.gmra.mxu1 %vm3762_vm6, %v4191_v5 }
 0x57d   :  { %5704 = vst.msk [vmem:[#allocation5 + $0x28] sm:$0xff] %vm5698_vm10, %v5520_v4  ;;  %v6280_v7 = vpop.permute.xlu2 %6279  ;;  %8946 = vmatmul.msk.f32.gmra.mxu0 %vm3762_vm6, %v3725_v8  ;;  %v5018_v4 = vld [vmem:[#allocation4 + $0x71] sm:$0xff] }
 0x57e   :  { %6083 = vst.msk [vmem:[#allocation5 + $0x28] sm:$0xff] %vm6077_vm11, %v5899_v3 }
 0x57f   :  { %6462 = vst.msk [vmem:[#allocation5 + $0x28] sm:$0xff] %vm6456_vm12, %v6278_v43  ;;  %v8847_v43 = vld [vmem:[%s14273_s0 + $0x394] ss:$2 sm:$0xff] }
 0x581   :  { %5154 = vrot.lane.b32.xlu1 %v5016_v16, %s9151_s15  ;;  %v8849_v16 = vld [vmem:[%s14273_s0 + $0x3b4] ss:$2 sm:$0xff] }
 0x582   :  { %3114 = vrot.lane.b32.xlu0 %v8846_v12, %s9149_s17 }
 0x583   :  { %3516 = vrot.lane.b32.xlu2 %v8889_v15, %s9149_s17  ;;  %v3505_v18 = vpop.permute.xlu1 %3504  ;;  %v12271_v15 = vld [vmem:[%s14277_s4] ss:$0 sm:$0xff] }
 0x584   :  { %v3063_v19 = vpop.permute.xlu0 %3062  ;;  %3663 = vst.msk [vmem:[#allocation3 + $0xf0] sm:$0xff] %vm3191_vm4, %v3505_v18  ;;  %v5019_v18 = vld [vmem:[#allocation4 + $0x79] sm:$0xff] }
 0x585   :  { %v5145_v21 = vpop.permute.xlu2 %5144  ;;  %3222 = vst.msk [vmem:[#allocation2 + $0xf0] sm:$0xff] %vm3191_vm4, %v3063_v19 }
 0x586   :  { %v6525_v23 = vld [vmem:[#allocation5 + $0x28] sm:$0xff]  ;;  %5327 = vst.msk [vmem:[#allocation5 + $0x38] sm:$0xff] %vm5319_vm9, %v5145_v21 }
 0x587   :  { %9050 = vmatmul.msk.f32.gmra.mxu2 %vm6593_vm13, %v6525_v23 }
 0x589   :  { %6291 = vrot.lane.b32.xlu1 %v6153_v32, %s9152_s20 }
 0x58a   :  { %5912 = vrot.lane.b32.xlu0 %v5774_v31, %s9150_s14 }
 0x58b   :  { %5533 = vrot.lane.b32.xlu2 %v5395_v34, %s9148_s12  ;;  %v5901_v35 = vpop.permute.xlu1 %5900  ;;  %v4192_v37 = vld [vmem:[#allocation3 + $0xf0] sm:$0xff] }
 0x58c   :  { %v5522_v36 = vpop.permute.xlu0 %5521  ;;  %v3726_v40 = vld [vmem:[#allocation2 + $0xf0] sm:$0xff]  ;;  %9011 = vmatmul.msk.f32.gmra.mxu1 %vm3762_vm6, %v4192_v37 }
 0x58d   :  { %5705 = vst.msk [vmem:[#allocation5 + $0x30] sm:$0xff] %vm5698_vm10, %v5522_v36  ;;  %v6282_v39 = vpop.permute.xlu2 %6281  ;;  %8947 = vmatmul.msk.f32.gmra.mxu0 %vm3762_vm6, %v3726_v40  ;;  %v5777_v36 = vld [vmem:[#allocation4 + $0x7b] sm:$0xff] }
 0x58e   :  { %6084 = vst.msk [vmem:[#allocation5 + $0x30] sm:$0xff] %vm6077_vm11, %v5901_v35  ;;  %v6156_v37 = vld [vmem:[#allocation4 + $0x7c] sm:$0xff] }
 0x58f   :  { %6463 = vst.msk [vmem:[#allocation5 + $0x30] sm:$0xff] %vm6456_vm12, %v6280_v7 }
 0x591   :  { %3116 = vrot.lane.b32.xlu1 %v8847_v43, %s9149_s17 }
 0x592   :  { %3518 = vrot.lane.b32.xlu0 %v8890_v42, %s9149_s17 }
 0x593   :  { %3076 = vrot.lane.b32.xlu2 %v8827_v44, %s9149_s17  ;;  %v3507_v58 = vpop.permute.xlu1 %3506  ;;  %v8893_v44 = vld [vmem:[%s14273_s0 + $0x285] ss:$2 sm:$0xff] }
 0x594   :  { %v3065_v45 = vpop.permute.xlu0 %3064  ;;  %3664 = vst.msk [vmem:[#allocation3 + $0xf8] sm:$0xff] %vm3191_vm4, %v3507_v58  ;;  %v8850_v58 = vld [vmem:[%s14273_s0 + $0x3c4] ss:$2 sm:$0xff] }
 0x595   :  { %v3107_v46 = vpop.permute.xlu2 %3106  ;;  %3223 = vst.msk [vmem:[#allocation2 + $0xf8] sm:$0xff] %vm3191_vm4, %v3065_v45  ;;  %v8830_v45 = vld [vmem:[%s14273_s0 + $0x284] ss:$2 sm:$0xff] }
 0x596   :  { %v6526_v48 = vld [vmem:[#allocation5 + $0x30] sm:$0xff]  ;;  %3244 = vst.msk [vmem:[#allocation2 + $0x1a0] sm:$0xff] %vm3191_vm4, %v3107_v46 }
 0x597   :  { %9051 = vmatmul.msk.f32.gmra.mxu2 %vm6593_vm13, %v6526_v48 }
 0x599   :  { %5914 = vrot.lane.b32.xlu1 %v5775_v49, %s9150_s14 }
 0x59a   :  { %5535 = vrot.lane.b32.xlu0 %v5396_v50, %s9148_s12 }
 0x59b   :  { %5156 = vrot.lane.b32.xlu2 %v5017_v52, %s9151_s15  ;;  %v5903_v53 = vpop.permute.xlu1 %5902  ;;  %v4193_v55 = vld [vmem:[#allocation3 + $0xf8] sm:$0xff] }
 0x59c   :  { %v5524_v54 = vpop.permute.xlu0 %5523  ;;  %v3727_v57 = vld [vmem:[#allocation2 + $0xf8] sm:$0xff]  ;;  %9012 = vmatmul.msk.f32.gmra.mxu1 %vm3762_vm6, %v4193_v55 }
 0x59d   :  { %5706 = vst.msk [vmem:[#allocation5 + $0x38] sm:$0xff] %vm5698_vm10, %v5524_v54  ;;  %v5905_v56 = vpop.permute.xlu2 %5904  ;;  %8948 = vmatmul.msk.f32.gmra.mxu0 %vm3762_vm6, %v3727_v57  ;;  %v3748_v60 = vld [vmem:[#allocation2 + $0x1a0] sm:$0xff] }
 0x59e   :  { %6085 = vst.msk [vmem:[#allocation5 + $0x38] sm:$0xff] %vm6077_vm11, %v5903_v53  ;;  %8969 = vmatmul.msk.f32.vlgmr.msra.gmra.mxu3 %vm3762_vm6, %v3748_v60 }
 0x59f   :  { %6464 = vst.msk [vmem:[#allocation5 + $0x38] sm:$0xff] %vm6456_vm12, %v6282_v39  ;;  %9115 = vmatpush.msk.msra.mxu3 %vm6783_vm8, %v11974_v24  ;;  %v8848_v24 = vld [vmem:[%s14273_s0 + $0x3a4] ss:$2 sm:$0xff] }
 0x5a1   :  { %3520 = vrot.lane.b32.xlu1 %v8891_v61, %s9149_s17  ;;  %9116 = vmatpush.msra.mxu3 %v11981_v25  ;;  %v5397_v25 = vld [vmem:[#allocation4 + $0x72] sm:$0xff]  ;;  %v5778_v61 = vld [vmem:[#allocation4 + $0x83] sm:$0xff] }
 0x5a2   :  { %3078 = vrot.lane.b32.xlu0 %v8828_v62, %s9149_s17  ;;  %v5399_v62 = vld [vmem:[#allocation4 + $0x82] sm:$0xff] }
 0x5a3   :  { %6293 = vrot.lane.b32.xlu2 %v6154_v63, %s9152_s20  ;;  %v3509_v0 = vpop.permute.xlu1 %3508  ;;  %9117 = vmatpush.msra.mxu3 %v11991_v28  ;;  %v5020_v63 = vld [vmem:[#allocation4 + $0x81] sm:$0xff] }
 0x5a4   :  { %v3067_v1 = vpop.permute.xlu0 %3066  ;;  %3665 = vst.msk [vmem:[#allocation3 + $0x100] sm:$0xff] %vm3191_vm4, %v3509_v0 }
 0x5a5   :  { %v3511_v2 = vpop.permute.xlu2 %3510  ;;  %3224 = vst.msk [vmem:[#allocation2 + $0x100] sm:$0xff] %vm3191_vm4, %v3067_v1  ;;  %9118 = vmatpush.msra.mxu3 %v11998_v30  ;;  %v8829_v30 = vld [vmem:[%s14273_s0 + $0x274] ss:$2 sm:$0xff] }
 0x5a6   :  { %v6527_v3 = vld [vmem:[#allocation5 + $0x38] sm:$0xff]  ;;  %3666 = vst.msk [vmem:[#allocation3 + $0x108] sm:$0xff] %vm3191_vm4, %v3511_v2 }
 0x5a7   :  { %9052 = vmatmul.msk.f32.gmra.mxu2 %vm6593_vm13, %v6527_v3 }
 0x5a9   :  { %5537 = vrot.lane.b32.xlu1 %v5397_v25, %s9148_s12  ;;  %v8894_v25 = vld [vmem:[%s14273_s0 + $0x295] ss:$2 sm:$0xff] }
 0x5aa   :  { %5158 = vrot.lane.b32.xlu0 %v5018_v4, %s9151_s15  ;;  %v8831_v4 = vld [vmem:[%s14273_s0 + $0x294] ss:$2 sm:$0xff] }
 0x5ab   :  { %3118 = vrot.lane.b32.xlu2 %v8848_v24, %s9149_s17  ;;  %v5526_v28 = vpop.permute.xlu1 %5525  ;;  %v4194_v6 = vld [vmem:[#allocation3 + $0x100] sm:$0xff] }
 0x5ac   :  { %v5147_v5 = vpop.permute.xlu0 %5146  ;;  %v3728_v8 = vld [vmem:[#allocation2 + $0x100] sm:$0xff]  ;;  %9013 = vmatmul.msk.f32.gmra.mxu1 %vm3762_vm6, %v4194_v6  ;;  %v6157_v6 = vld [vmem:[#allocation4 + $0x84] sm:$0xff] }
 0x5ad   :  { %5328 = vst.msk [vmem:[#allocation5 + $0x40] sm:$0xff] %vm5319_vm9, %v5147_v5  ;;  %v5528_v7 = vpop.permute.xlu2 %5527  ;;  %8949 = vmatmul.msk.f32.gmra.mxu0 %vm3762_vm6, %v3728_v8  ;;  %v4195_v11 = vld [vmem:[#allocation3 + $0x108] sm:$0xff] }
 0x5ae   :  { %5707 = vst.msk [vmem:[#allocation5 + $0x40] sm:$0xff] %vm5698_vm10, %v5526_v28 }
 0x5af   :  { %6086 = vst.msk [vmem:[#allocation5 + $0x40] sm:$0xff] %vm6077_vm11, %v5905_v56 }
 0x5b1   :  { %3080 = vrot.lane.b32.xlu1 %v8829_v30, %s9149_s17 }
 0x5b2   :  { %6295 = vrot.lane.b32.xlu0 %v6155_v9, %s9152_s20 }
 0x5b3   :  { %5916 = vrot.lane.b32.xlu2 %v5776_v10, %s9150_s14  ;;  %v3069_v12 = vpop.permute.xlu1 %3068 }
 0x5b4   :  { %v6284_v13 = vpop.permute.xlu0 %6283  ;;  %3225 = vst.msk [vmem:[#allocation2 + $0x108] sm:$0xff] %vm3191_vm4, %v3069_v12  ;;  %9014 = vmatmul.msk.f32.gmra.mxu1 %vm3762_vm6, %v4195_v11 }
 0x5b5   :  { %v3071_v14 = vpop.permute.xlu2 %3070  ;;  %6465 = vst.msk [vmem:[#allocation5 + $0x40] sm:$0xff] %vm6456_vm12, %v6284_v13 }
 0x5b6   :  { %3226 = vst.msk [vmem:[#allocation2 + $0x110] sm:$0xff] %vm3191_vm4, %v3071_v14 }
 0x5b9   :  { %v4506_v19 = vpop.f32.mrf.mxu1  ;;  %5160 = vrot.lane.b32.xlu1 %v5019_v18, %s9151_s15 }
 0x5ba   :  { %v6804_v20 = vpop.f32.mrf.mxu2  ;;  %3120 = vrot.lane.b32.xlu0 %v8849_v16, %s9149_s17  ;;  %v4048_v22 = vpop.f32.mrf.mxu0 }
 0x5bb   :  { %v6805_v21 = vadd.f32 %v12271_v15, %v6804_v20  ;;  %3522 = vrot.lane.b32.xlu2 %v8892_v17, %s9149_s17  ;;  %v4647_v23 = vmax.f32 %v4048_v22, %v4506_v19  ;;  %v5149_v27 = vpop.permute.xlu1 %5148  ;;  %v3729_v29 = vld [vmem:[#allocation2 + $0x108] sm:$0xff]  ;;  %v8851_v19 = vld [vmem:[%s14273_s0 + $0x3d4] ss:$2 sm:$0xff] }
 0x5bc   :  { %v3109_v26 = vpop.permute.xlu0 %3108  ;;  %8950 = vmatmul.msk.f32.gmra.mxu0 %vm3762_vm6, %v3729_v29  ;;  %v6528_v33 = vld [vmem:[#allocation5 + $0x40] sm:$0xff]  ;;  %5329 = vst.msk [vmem:[#allocation5 + $0x48] sm:$0xff] %vm5319_vm9, %v5149_v27  ;;  %v5400_v20 = vld [vmem:[#allocation4 + $0x8a] sm:$0xff] }
 0x5bd   :  { %v6993_v31 = vmax.f32 %v6805_v21, 0.0  ;;  %3245 = vst.msk [vmem:[#allocation2 + $0x1a8] sm:$0xff] %vm3191_vm4, %v3109_v26  ;;  %v5151_v32 = vpop.permute.xlu2 %5150  ;;  %v4714_v34 = vadd.f32 %v12147_v51, %v4647_v23  ;;  %9053 = vmatmul.msk.f32.gmra.mxu2 %vm6593_vm13, %v6528_v33  ;;  %v3730_v39 = vld [vmem:[#allocation2 + $0x110] sm:$0xff]  ;;  %v5021_v21 = vld [vmem:[#allocation4 + $0x89] sm:$0xff] }
 0x5be   :  { %5708 = vst.msk [vmem:[#allocation5 + $0x48] sm:$0xff] %vm5698_vm10, %v5528_v7 }
 0x5bf   :  { %7056 = vst.msk [vmem:[#allocation6] sm:$0xff] %vm6587_vm14, %v6993_v31  ;;  %v4777_v35 = vmax.f32 %v4714_v34, 0.0  ;;  %v8832_v31 = vld [vmem:[%s14273_s0 + $0x2a4] ss:$2 sm:$0xff] }
 0x5c0   :  { %5330 = vst.msk [vmem:[#allocation5 + $0x50] sm:$0xff] %vm5319_vm9, %v5151_v32  ;;  %v6158_v32 = vld [vmem:[#allocation4 + $0x8c] sm:$0xff] }
 0x5c1   :  { %4840 = vst.msk [vmem:[#allocation4 + $0xc8] sm:$0xff] %vm4620_vm7, %v4777_v35  ;;  %6297 = vrot.lane.b32.xlu1 %v6156_v37, %s9152_s20  ;;  %v5779_v35 = vld [vmem:[#allocation4 + $0x8b] sm:$0xff] }
 0x5c2   :  { %5918 = vrot.lane.b32.xlu0 %v5777_v36, %s9150_s14 }
 0x5c3   :  { %5539 = vrot.lane.b32.xlu2 %v5398_v38, %s9148_s12  ;;  %v6286_v41 = vpop.permute.xlu1 %6285 }
 0x5c4   :  { %v5907_v40 = vpop.permute.xlu0 %5906  ;;  %v3749_v42 = vld [vmem:[#allocation2 + $0x1a8] sm:$0xff]  ;;  %8951 = vmatmul.msk.f32.gmra.mxu0 %vm3762_vm6, %v3730_v39 }
 0x5c5   :  { %6087 = vst.msk [vmem:[#allocation5 + $0x48] sm:$0xff] %vm6077_vm11, %v5907_v40  ;;  %v6288_v43 = vpop.permute.xlu2 %6287  ;;  %8970 = vmatmul.msk.f32.gmra.mxu3 %vm3762_vm6, %v3749_v42 }
 0x5c6   :  { %6466 = vst.msk [vmem:[#allocation5 + $0x48] sm:$0xff] %vm6456_vm12, %v6286_v41 }
 0x5c8   :  { %v4903_v48 = vld [vmem:[#allocation4 + $0xc8] sm:$0xff] }
 0x5c9   :  { %v4509_v46 = vpop.f32.mrf.mxu1  ;;  %3122 = vrot.lane.b32.xlu1 %v8850_v58, %s9149_s17  ;;  %4966 = vst.msk [vmem:[#allocation5 + $0xc8] sm:$0xff] %vm4620_vm7, %v4903_v48  ;;  %v5022_v48 = vld [vmem:[#allocation4 + $0x91] sm:$0xff] }
 0x5ca   :  { %v6807_v47 = vpop.f32.mrf.mxu2  ;;  %3524 = vrot.lane.b32.xlu0 %v8893_v44, %s9149_s17  ;;  %v4051_v50 = vpop.f32.mrf.mxu0 }
 0x5cb   :  { %v6808_v49 = vadd.f32 %v12271_v15, %v6807_v47  ;;  %3082 = vrot.lane.b32.xlu2 %v8830_v45, %s9149_s17  ;;  %v4648_v52 = vmax.f32 %v4051_v50, %v4509_v46  ;;  %v3111_v54 = vpop.permute.xlu1 %3110  ;;  %v8852_v45 = vld [vmem:[%s14273_s0 + $0x3e4] ss:$2 sm:$0xff]  ;;  %v8895_v47 = vld [vmem:[%s14273_s0 + $0x2a5] ss:$2 sm:$0xff] }
 0x5cc   :  { %v3513_v53 = vpop.permute.xlu0 %3512  ;;  %3246 = vst.msk [vmem:[#allocation2 + $0x1b0] sm:$0xff] %vm3191_vm4, %v3111_v54 }
 0x5cd   :  { %v6994_v55 = vmax.f32 %v6808_v49, 0.0  ;;  %3667 = vst.msk [vmem:[#allocation3 + $0x110] sm:$0xff] %vm3191_vm4, %v3513_v53  ;;  %v3113_v56 = vpop.permute.xlu2 %3112  ;;  %v6529_v57 = vld [vmem:[#allocation5 + $0x48] sm:$0xff]  ;;  %v4715_v59 = vadd.f32 %v12147_v51, %v4648_v52 }
 0x5ce   :  { %9054 = vmatmul.msk.f32.gmra.mxu2 %vm6593_vm13, %v6529_v57  ;;  %3247 = vst.msk [vmem:[#allocation2 + $0x1b8] sm:$0xff] %vm3191_vm4, %v3113_v56  ;;  %v6159_v56 = vld [vmem:[#allocation4 + $0x94] sm:$0xff] }
 0x5cf   :  { %7057 = vst.msk [vmem:[#allocation6 + $0x8] sm:$0xff] %vm6587_vm14, %v6994_v55  ;;  %v4778_v60 = vmax.f32 %v4715_v59, 0.0  ;;  %v5780_v55 = vld [vmem:[#allocation4 + $0x93] sm:$0xff] }
 0x5d1   :  { %4841 = vst.msk [vmem:[#allocation4 + $0xd0] sm:$0xff] %vm4620_vm7, %v4778_v60  ;;  %5920 = vrot.lane.b32.xlu1 %v5778_v61, %s9150_s14  ;;  %v5401_v60 = vld [vmem:[#allocation4 + $0x92] sm:$0xff] }
 0x5d2   :  { %5541 = vrot.lane.b32.xlu0 %v5399_v62, %s9148_s12 }
 0x5d3   :  { %5162 = vrot.lane.b32.xlu2 %v5020_v63, %s9151_s15  ;;  %v5909_v0 = vpop.permute.xlu1 %5908  ;;  %v3750_v24 = vld [vmem:[#allocation2 + $0x1b0] sm:$0xff] }
 0x5d4   :  { %v5530_v1 = vpop.permute.xlu0 %5529  ;;  %v4196_v2 = vld [vmem:[#allocation3 + $0x110] sm:$0xff]  ;;  %8971 = vmatmul.msk.f32.gmra.mxu3 %vm3762_vm6, %v3750_v24 }
 0x5d5   :  { %5709 = vst.msk [vmem:[#allocation5 + $0x50] sm:$0xff] %vm5698_vm10, %v5530_v1  ;;  %v5911_v3 = vpop.permute.xlu2 %5910  ;;  %9015 = vmatmul.msk.f32.gmra.mxu1 %vm3762_vm6, %v4196_v2  ;;  %v3751_v9 = vld [vmem:[#allocation2 + $0x1b8] sm:$0xff] }
 0x5d6   :  { %6088 = vst.msk [vmem:[#allocation5 + $0x50] sm:$0xff] %vm6077_vm11, %v5909_v0 }
 0x5d7   :  { %6467 = vst.msk [vmem:[#allocation5 + $0x50] sm:$0xff] %vm6456_vm12, %v6288_v43 }
 0x5d8   :  { %v4904_v7 = vld [vmem:[#allocation4 + $0xd0] sm:$0xff] }
 0x5d9   :  { %v4512_v28 = vpop.f32.mrf.mxu1  ;;  %3526 = vrot.lane.b32.xlu1 %v8894_v25, %s9149_s17  ;;  %4967 = vst.msk [vmem:[#allocation5 + $0xd0] sm:$0xff] %vm4620_vm7, %v4904_v7 }
 0x5da   :  { %v6810_v5 = vpop.f32.mrf.mxu2  ;;  %3084 = vrot.lane.b32.xlu0 %v8831_v4, %s9149_s17  ;;  %v4054_v30 = vpop.f32.mrf.mxu0 }
 0x5db   :  { %v6811_v8 = vadd.f32 %v12271_v15, %v6810_v5  ;;  %6299 = vrot.lane.b32.xlu2 %v6157_v6, %s9152_s20  ;;  %v4649_v10 = vmax.f32 %v4054_v30, %v4512_v28  ;;  %v3515_v11 = vpop.permute.xlu1 %3514  ;;  %v8896_v5 = vld [vmem:[%s14273_s0 + $0x2b5] ss:$2 sm:$0xff]  ;;  %v8779_v6 = vld [vmem:[%s14273_s0 + $0x344] ss:$2 sm:$0xff] }
 0x5dc   :  { %v3073_v12 = vpop.permute.xlu0 %3072  ;;  %3668 = vst.msk [vmem:[#allocation3 + $0x118] sm:$0xff] %vm3191_vm4, %v3515_v11  ;;  %8972 = vmatmul.msk.f32.gmra.mxu3 %vm3762_vm6, %v3751_v9 }
 0x5dd   :  { %v6995_v13 = vmax.f32 %v6811_v8, 0.0  ;;  %v3517_v14 = vpop.permute.xlu2 %3516  ;;  %v4716_v16 = vadd.f32 %v12147_v51, %v4649_v10  ;;  %3227 = vst.msk [vmem:[#allocation2 + $0x118] sm:$0xff] %vm3191_vm4, %v3073_v12  ;;  %v8833_v8 = vld [vmem:[%s14273_s0 + $0x2b4] ss:$2 sm:$0xff]  ;;  %v8905_v12 = vld [vmem:[%s14273_s0 + $0x345] ss:$2 sm:$0xff] }
 0x5de   :  { %v6530_v17 = vld [vmem:[#allocation5 + $0x50] sm:$0xff]  ;;  %3669 = vst.msk [vmem:[#allocation3 + $0x120] sm:$0xff] %vm3191_vm4, %v3517_v14  ;;  %v5023_v14 = vld [vmem:[#allocation4 + $0x99] sm:$0xff] }
 0x5df   :  { %7058 = vst.msk [vmem:[#allocation6 + $0x10] sm:$0xff] %vm6587_vm14, %v6995_v13  ;;  %9055 = vmatmul.msk.f32.gmra.mxu2 %vm6593_vm13, %v6530_v17  ;;  %v4779_v18 = vmax.f32 %v4716_v16, 0.0  ;;  %v5402_v13 = vld [vmem:[#allocation4 + $0x9a] sm:$0xff] }
 0x5e1   :  { %4842 = vst.msk [vmem:[#allocation4 + $0xd8] sm:$0xff] %vm4620_vm7, %v4779_v18  ;;  %5543 = vrot.lane.b32.xlu1 %v5400_v20, %s9148_s12 }
 0x5e2   :  { %5164 = vrot.lane.b32.xlu0 %v5021_v21, %s9151_s15 }
 0x5e3   :  { %3124 = vrot.lane.b32.xlu2 %v8851_v19, %s9149_s17  ;;  %v5532_v22 = vpop.permute.xlu1 %5531  ;;  %v4197_v26 = vld [vmem:[#allocation3 + $0x118] sm:$0xff] }
 0x5e4   :  { %v5153_v23 = vpop.permute.xlu0 %5152  ;;  %v3731_v29 = vld [vmem:[#allocation2 + $0x118] sm:$0xff]  ;;  %9016 = vmatmul.msk.f32.gmra.mxu1 %vm3762_vm6, %v4197_v26 }
 0x5e5   :  { %5331 = vst.msk [vmem:[#allocation5 + $0x58] sm:$0xff] %vm5319_vm9, %v5153_v23  ;;  %v5534_v27 = vpop.permute.xlu2 %5533  ;;  %8952 = vmatmul.msk.f32.gmra.mxu0 %vm3762_vm6, %v3731_v29  ;;  %v4198_v36 = vld [vmem:[#allocation3 + $0x120] sm:$0xff] }
 0x5e6   :  { %5710 = vst.msk [vmem:[#allocation5 + $0x58] sm:$0xff] %vm5698_vm10, %v5532_v22 }
 0x5e7   :  { %6089 = vst.msk [vmem:[#allocation5 + $0x58] sm:$0xff] %vm6077_vm11, %v5911_v3 }
 0x5e8   :  { %v4905_v37 = vld [vmem:[#allocation4 + $0xd8] sm:$0xff] }
 0x5e9   :  { %v4515_v33 = vpop.f32.mrf.mxu1  ;;  %3086 = vrot.lane.b32.xlu1 %v8832_v31, %s9149_s17  ;;  %4968 = vst.msk [vmem:[#allocation5 + $0xd8] sm:$0xff] %vm4620_vm7, %v4905_v37 }
 0x5ea   :  { %v6813_v34 = vpop.f32.mrf.mxu2  ;;  %6301 = vrot.lane.b32.xlu0 %v6158_v32, %s9152_s20  ;;  %v4057_v39 = vpop.f32.mrf.mxu0 }
 0x5eb   :  { %v6814_v38 = vadd.f32 %v12271_v15, %v6813_v34  ;;  %5922 = vrot.lane.b32.xlu2 %v5779_v35, %s9150_s14  ;;  %v4650_v40 = vmax.f32 %v4057_v39, %v4515_v33  ;;  %v3075_v41 = vpop.permute.xlu1 %3074  ;;  %v8834_v33 = vld [vmem:[%s14273_s0 + $0x2c4] ss:$2 sm:$0xff] }
 0x5ec   :  { %v6290_v42 = vpop.permute.xlu0 %6289  ;;  %3228 = vst.msk [vmem:[#allocation2 + $0x120] sm:$0xff] %vm3191_vm4, %v3075_v41  ;;  %9017 = vmatmul.msk.f32.gmra.mxu1 %vm3762_vm6, %v4198_v36  ;;  %v6160_v35 = vld [vmem:[#allocation4 + $0x9c] sm:$0xff] }
 0x5ed   :  { %v6996_v43 = vmax.f32 %v6814_v38, 0.0  ;;  %v3077_v44 = vpop.permute.xlu2 %3076  ;;  %v4717_v58 = vadd.f32 %v12147_v51, %v4650_v40  ;;  %6468 = vst.msk [vmem:[#allocation5 + $0x58] sm:$0xff] %vm6456_vm12, %v6290_v42  ;;  %v5781_v36 = vld [vmem:[#allocation4 + $0x9b] sm:$0xff]  ;;  %v8906_v42 = vld [vmem:[%s14273_s0 + $0x355] ss:$2 sm:$0xff] }
 0x5ee   :  { %3229 = vst.msk [vmem:[#allocation2 + $0x128] sm:$0xff] %vm3191_vm4, %v3077_v44  ;;  %v8897_v44 = vld [vmem:[%s14273_s0 + $0x2c5] ss:$2 sm:$0xff] }
 0x5ef   :  { %7059 = vst.msk [vmem:[#allocation6 + $0x18] sm:$0xff] %vm6587_vm14, %v6996_v43  ;;  %v4780_v46 = vmax.f32 %v4717_v58, 0.0  ;;  %v8780_v43 = vld [vmem:[%s14273_s0 + $0x354] ss:$2 sm:$0xff] }
 0x5f1   :  { %4843 = vst.msk [vmem:[#allocation4 + $0xe0] sm:$0xff] %vm4620_vm7, %v4780_v46  ;;  %5166 = vrot.lane.b32.xlu1 %v5022_v48, %s9151_s15 }
 0x5f2   :  { %3126 = vrot.lane.b32.xlu0 %v8852_v45, %s9149_s17 }
 0x5f3   :  { %3528 = vrot.lane.b32.xlu2 %v8895_v47, %s9149_s17  ;;  %v5155_v50 = vpop.permute.xlu1 %5154  ;;  %v3732_v52 = vld [vmem:[#allocation2 + $0x120] sm:$0xff] }
 0x5f4   :  { %v3115_v49 = vpop.permute.xlu0 %3114  ;;  %8953 = vmatmul.msk.f32.gmra.mxu0 %vm3762_vm6, %v3732_v52  ;;  %v6531_v54 = vld [vmem:[#allocation5 + $0x58] sm:$0xff]  ;;  %5332 = vst.msk [vmem:[#allocation5 + $0x60] sm:$0xff] %vm5319_vm9, %v5155_v50 }
 0x5f5   :  { %3248 = vst.msk [vmem:[#allocation2 + $0x1c0] sm:$0xff] %vm3191_vm4, %v3115_v49  ;;  %v5157_v53 = vpop.permute.xlu2 %5156  ;;  %9056 = vmatmul.msk.f32.gmra.mxu2 %vm6593_vm13, %v6531_v54  ;;  %v3733_v61 = vld [vmem:[#allocation2 + $0x128] sm:$0xff] }
 0x5f6   :  { %5711 = vst.msk [vmem:[#allocation5 + $0x60] sm:$0xff] %vm5698_vm10, %v5534_v27 }
 0x5f7   :  { %5333 = vst.msk [vmem:[#allocation5 + $0x68] sm:$0xff] %vm5319_vm9, %v5157_v53 }
 0x5f8   :  { %v4906_v62 = vld [vmem:[#allocation4 + $0xe0] sm:$0xff] }
 0x5f9   :  { %v4518_v57 = vpop.f32.mrf.mxu1  ;;  %6303 = vrot.lane.b32.xlu1 %v6159_v56, %s9152_s20  ;;  %4969 = vst.msk [vmem:[#allocation5 + $0xe0] sm:$0xff] %vm4620_vm7, %v4906_v62  ;;  %v5024_v62 = vld [vmem:[#allocation4 + $0xa1] sm:$0xff] }
 0x5fa   :  { %v6816_v59 = vpop.f32.mrf.mxu2  ;;  %5924 = vrot.lane.b32.xlu0 %v5780_v55, %s9150_s14  ;;  %v4060_v0 = vpop.f32.mrf.mxu0 }
 0x5fb   :  { %v6817_v63 = vadd.f32 %v12271_v15, %v6816_v59  ;;  %5545 = vrot.lane.b32.xlu2 %v5401_v60, %s9148_s12  ;;  %v4651_v1 = vmax.f32 %v4060_v0, %v4518_v57  ;;  %v6292_v3 = vpop.permute.xlu1 %6291  ;;  %v5782_v60 = vld [vmem:[#allocation4 + $0xa3] sm:$0xff] }
 0x5fc   :  { %v5913_v2 = vpop.permute.xlu0 %5912  ;;  %v3752_v24 = vld [vmem:[#allocation2 + $0x1c0] sm:$0xff]  ;;  %8954 = vmatmul.msk.f32.gmra.mxu0 %vm3762_vm6, %v3733_v61  ;;  %v5403_v61 = vld [vmem:[#allocation4 + $0xa2] sm:$0xff] }
 0x5fd   :  { %v6997_v25 = vmax.f32 %v6817_v63, 0.0  ;;  %6090 = vst.msk [vmem:[#allocation5 + $0x60] sm:$0xff] %vm6077_vm11, %v5913_v2  ;;  %v6294_v4 = vpop.permute.xlu2 %6293  ;;  %8973 = vmatmul.msk.f32.gmra.mxu3 %vm3762_vm6, %v3752_v24  ;;  %v4718_v28 = vadd.f32 %v12147_v51, %v4651_v1  ;;  %v8835_v24 = vld [vmem:[%s14273_s0 + $0x2d4] ss:$2 sm:$0xff] }
 0x5fe   :  { %6469 = vst.msk [vmem:[#allocation5 + $0x60] sm:$0xff] %vm6456_vm12, %v6292_v3  ;;  %v8898_v3 = vld [vmem:[%s14273_s0 + $0x2d5] ss:$2 sm:$0xff] }
 0x5ff   :  { %7060 = vst.msk [vmem:[#allocation6 + $0x20] sm:$0xff] %vm6587_vm14, %v6997_v25  ;;  %v4781_v7 = vmax.f32 %v4718_v28, 0.0  ;;  %v6161_v28 = vld [vmem:[#allocation4 + $0xa4] sm:$0xff] }
 0x601   :  { %4844 = vst.msk [vmem:[#allocation4 + $0xe8] sm:$0xff] %vm4620_vm7, %v4781_v7  ;;  %2728 = vrot.lane.b32.xlu1 %v8779_v6, %s9148_s12 }
 0x602   :  { %3530 = vrot.lane.b32.xlu0 %v8896_v5, %s9149_s17 }
 0x603   :  { %3088 = vrot.lane.b32.xlu2 %v8833_v8, %s9149_s17  ;;  %v3117_v9 = vpop.permute.xlu1 %3116 }
 0x604   :  { %v3519_v30 = vpop.permute.xlu0 %3518  ;;  %3249 = vst.msk [vmem:[#allocation2 + $0x1c8] sm:$0xff] %vm3191_vm4, %v3117_v9 }
 0x605   :  { %3670 = vst.msk [vmem:[#allocation3 + $0x128] sm:$0xff] %vm3191_vm4, %v3519_v30  ;;  %v3119_v10 = vpop.permute.xlu2 %3118  ;;  %v6532_v11 = vld [vmem:[#allocation5 + $0x60] sm:$0xff] }
 0x606   :  { %9057 = vmatmul.msk.f32.gmra.mxu2 %vm6593_vm13, %v6532_v11  ;;  %3250 = vst.msk [vmem:[#allocation2 + $0x1d0] sm:$0xff] %vm3191_vm4, %v3119_v10 }
 0x608   :  { %v4907_v18 = vld [vmem:[#allocation4 + $0xe8] sm:$0xff] }
 0x609   :  { %v4521_v16 = vpop.f32.mrf.mxu1  ;;  %5547 = vrot.lane.b32.xlu1 %v5402_v13, %s9148_s12  ;;  %4970 = vst.msk [vmem:[#allocation5 + $0xe8] sm:$0xff] %vm4620_vm7, %v4907_v18  ;;  %v8907_v13 = vld [vmem:[%s14273_s0 + $0x365] ss:$2 sm:$0xff] }
 0x60a   :  { %v6819_v17 = vpop.f32.mrf.mxu2  ;;  %5168 = vrot.lane.b32.xlu0 %v5023_v14, %s9151_s15  ;;  %v4063_v20 = vpop.f32.mrf.mxu0 }
 0x60b   :  { %v6820_v19 = vadd.f32 %v12271_v15, %v6819_v17  ;;  %3548 = vrot.lane.b32.xlu2 %v8905_v12, %s9149_s17  ;;  %v4652_v21 = vmax.f32 %v4063_v20, %v4521_v16  ;;  %v5915_v22 = vpop.permute.xlu1 %5914  ;;  %v3753_v31 = vld [vmem:[#allocation2 + $0x1c8] sm:$0xff]  ;;  %v5025_v17 = vld [vmem:[#allocation4 + $0xa9] sm:$0xff] }
 0x60c   :  { %v5536_v23 = vpop.permute.xlu0 %5535  ;;  %v4199_v26 = vld [vmem:[#allocation3 + $0x128] sm:$0xff]  ;;  %8974 = vmatmul.msk.f32.gmra.mxu3 %vm3762_vm6, %v3753_v31 }
 0x60d   :  { %v6998_v27 = vmax.f32 %v6820_v19, 0.0  ;;  %5712 = vst.msk [vmem:[#allocation5 + $0x68] sm:$0xff] %vm5698_vm10, %v5536_v23  ;;  %v5917_v29 = vpop.permute.xlu2 %5916  ;;  %9018 = vmatmul.msk.f32.gmra.mxu1 %vm3762_vm6, %v4199_v26  ;;  %v4719_v32 = vadd.f32 %v12147_v51, %v4652_v21  ;;  %v3754_v37 = vld [vmem:[#allocation2 + $0x1d0] sm:$0xff]  ;;  %v5783_v23 = vld [vmem:[#allocation4 + $0xab] sm:$0xff] }
 0x60e   :  { %6091 = vst.msk [vmem:[#allocation5 + $0x68] sm:$0xff] %vm6077_vm11, %v5915_v22  ;;  %v8781_v16 = vld [vmem:[%s14273_s0 + $0x364] ss:$2 sm:$0xff]  ;;  %v6162_v26 = vld [vmem:[#allocation4 + $0xac] sm:$0xff] }
 0x60f   :  { %7061 = vst.msk [vmem:[#allocation6 + $0x28] sm:$0xff] %vm6587_vm14, %v6998_v27  ;;  %v4782_v34 = vmax.f32 %v4719_v32, 0.0  ;;  %v5404_v27 = vld [vmem:[#allocation4 + $0xaa] sm:$0xff] }
 0x610   :  { %6470 = vst.msk [vmem:[#allocation5 + $0x68] sm:$0xff] %vm6456_vm12, %v6294_v4 }
 0x611   :  { %4845 = vst.msk [vmem:[#allocation4 + $0xf0] sm:$0xff] %vm4620_vm7, %v4782_v34  ;;  %3090 = vrot.lane.b32.xlu1 %v8834_v33, %s9149_s17 }
 0x612   :  { %6305 = vrot.lane.b32.xlu0 %v6160_v35, %s9152_s20  ;;  %v12510_v35 = vld [vmem:[%s14275_s2] ss:$0 sm:$0xff] }
 0x613   :  { %5926 = vrot.lane.b32.xlu2 %v5781_v36, %s9150_s14  ;;  %v3521_v38 = vpop.permute.xlu1 %3520 }
 0x614   :  { %v3079_v39 = vpop.permute.xlu0 %3078  ;;  %3671 = vst.msk [vmem:[#allocation3 + $0x130] sm:$0xff] %vm3191_vm4, %v3521_v38  ;;  %8975 = vmatmul.msk.f32.gmra.mxu3 %vm3762_vm6, %v3754_v37 }
 0x615   :  { %v3523_v40 = vpop.permute.xlu2 %3522  ;;  %3230 = vst.msk [vmem:[#allocation2 + $0x130] sm:$0xff] %vm3191_vm4, %v3079_v39 }
 0x616   :  { %3672 = vst.msk [vmem:[#allocation3 + $0x138] sm:$0xff] %vm3191_vm4, %v3523_v40  ;;  %v8899_v40 = vld [vmem:[%s14273_s0 + $0x2e5] ss:$2 sm:$0xff] }
 0x617   :  { %v6533_v41 = vld [vmem:[#allocation5 + $0x68] sm:$0xff] }
 0x618   :  { %9058 = vmatmul.msk.f32.gmra.mxu2 %vm6593_vm13, %v6533_v41  ;;  %v4908_v46 = vld [vmem:[#allocation4 + $0xf0] sm:$0xff] }
 0x619   :  { %v4524_v58 = vpop.f32.mrf.mxu1  ;;  %3550 = vrot.lane.b32.xlu1 %v8906_v42, %s9149_s17  ;;  %4971 = vst.msk [vmem:[#allocation5 + $0xf0] sm:$0xff] %vm4620_vm7, %v4908_v46  ;;  %v8782_v41 = vld [vmem:[%s14273_s0 + $0x374] ss:$2 sm:$0xff]  ;;  %v8836_v42 = vld [vmem:[%s14273_s0 + $0x2e4] ss:$2 sm:$0xff] }
 0x61a   :  { %v6822_v45 = vpop.f32.mrf.mxu2  ;;  %2730 = vrot.lane.b32.xlu0 %v8780_v43, %s9148_s12  ;;  %v4066_v48 = vpop.f32.mrf.mxu0 }
 0x61b   :  { %v6823_v47 = vadd.f32 %v12271_v15, %v6822_v45  ;;  %3532 = vrot.lane.b32.xlu2 %v8897_v44, %s9149_s17  ;;  %v4653_v49 = vmax.f32 %v4066_v48, %v4524_v58  ;;  %v5538_v50 = vpop.permute.xlu1 %5537  ;;  %v4200_v53 = vld [vmem:[#allocation3 + $0x130] sm:$0xff] }
 0x61c   :  { %v5159_v52 = vpop.permute.xlu0 %5158  ;;  %v3734_v56 = vld [vmem:[#allocation2 + $0x130] sm:$0xff]  ;;  %9019 = vmatmul.msk.f32.gmra.mxu1 %vm3762_vm6, %v4200_v53  ;;  %v5026_v53 = vld [vmem:[#allocation4 + $0xb1] sm:$0xff] }
 0x61d   :  { %v6999_v54 = vmax.f32 %v6823_v47, 0.0  ;;  %5334 = vst.msk [vmem:[#allocation5 + $0x70] sm:$0xff] %vm5319_vm9, %v5159_v52  ;;  %v5540_v55 = vpop.permute.xlu2 %5539  ;;  %v4720_v57 = vadd.f32 %v12147_v51, %v4653_v49  ;;  %8955 = vmatmul.msk.f32.gmra.mxu0 %vm3762_vm6, %v3734_v56  ;;  %v4201_v63 = vld [vmem:[#allocation3 + $0x138] sm:$0xff]  ;;  %v5405_v52 = vld [vmem:[#allocation4 + $0xb2] sm:$0xff] }
 0x61e   :  { %5713 = vst.msk [vmem:[#allocation5 + $0x70] sm:$0xff] %vm5698_vm10, %v5538_v50  ;;  %v8908_v50 = vld [vmem:[%s14273_s0 + $0x375] ss:$2 sm:$0xff] }
 0x61f   :  { %7062 = vst.msk [vmem:[#allocation6 + $0x30] sm:$0xff] %vm6587_vm14, %v6999_v54  ;;  %v4783_v59 = vmax.f32 %v4720_v57, 0.0 }
 0x620   :  { %6092 = vst.msk [vmem:[#allocation5 + $0x70] sm:$0xff] %vm6077_vm11, %v5917_v29 }
 0x621   :  { %4846 = vst.msk [vmem:[#allocation4 + $0xf8] sm:$0xff] %vm4620_vm7, %v4783_v59  ;;  %5928 = vrot.lane.b32.xlu1 %v5782_v60, %s9150_s14 }
 0x622   :  { %5549 = vrot.lane.b32.xlu0 %v5403_v61, %s9148_s12  ;;  %v8837_v61 = vld [vmem:[%s14273_s0 + $0x2f4] ss:$2 sm:$0xff] }
 0x623   :  { %5170 = vrot.lane.b32.xlu2 %v5024_v62, %s9151_s15  ;;  %v3081_v0 = vpop.permute.xlu1 %3080 }
 0x624   :  { %v6296_v1 = vpop.permute.xlu0 %6295  ;;  %3231 = vst.msk [vmem:[#allocation2 + $0x138] sm:$0xff] %vm3191_vm4, %v3081_v0  ;;  %9020 = vmatmul.msk.f32.gmra.mxu1 %vm3762_vm6, %v4201_v63  ;;  %v6163_v0 = vld [vmem:[#allocation4 + $0xb4] sm:$0xff] }
 0x625   :  { %v3083_v2 = vpop.permute.xlu2 %3082  ;;  %6471 = vst.msk [vmem:[#allocation5 + $0x70] sm:$0xff] %vm6456_vm12, %v6296_v1 }
 0x626   :  { %3232 = vst.msk [vmem:[#allocation2 + $0x140] sm:$0xff] %vm3191_vm4, %v3083_v2 }
 0x628   :  { %v4909_v5 = vld [vmem:[#allocation4 + $0xf8] sm:$0xff] }
 0x629   :  { %v4527_v25 = vpop.f32.mrf.mxu1  ;;  %3534 = vrot.lane.b32.xlu1 %v8898_v3, %s9149_s17  ;;  %4972 = vst.msk [vmem:[#allocation5 + $0xf8] sm:$0xff] %vm4620_vm7, %v4909_v5  ;;  %v5784_v3 = vld [vmem:[#allocation4 + $0xb3] sm:$0xff] }
 0x62a   :  { %v6825_v4 = vpop.f32.mrf.mxu2  ;;  %3092 = vrot.lane.b32.xlu0 %v8835_v24, %s9149_s17  ;;  %v4069_v6 = vpop.f32.mrf.mxu0 }
 0x62b   :  { %6307 = vrot.lane.b32.xlu2 %v6161_v28, %s9152_s20  ;;  %v4654_v7 = vmax.f32 %v4069_v6, %v4527_v25  ;;  %v5161_v30 = vpop.permute.xlu1 %5160  ;;  %v3735_v9 = vld [vmem:[#allocation2 + $0x138] sm:$0xff] }
 0x62c   :  { %v3121_v8 = vpop.permute.xlu0 %3120  ;;  %8956 = vmatmul.msk.f32.gmra.mxu0 %vm3762_vm6, %v3735_v9  ;;  %5335 = vst.msk [vmem:[#allocation5 + $0x78] sm:$0xff] %vm5319_vm9, %v5161_v30  ;;  %v6534_v12 = vld [vmem:[#allocation5 + $0x70] sm:$0xff] }
 0x62d   :  { %3251 = vst.msk [vmem:[#allocation2 + $0x1d8] sm:$0xff] %vm3191_vm4, %v3121_v8  ;;  %v5163_v10 = vpop.permute.xlu2 %5162  ;;  %v4721_v11 = vadd.f32 %v12147_v51, %v4654_v7  ;;  %9059 = vmatmul.msk.f32.gmra.mxu2 %vm6593_vm13, %v6534_v12  ;;  %v3736_v51 = vld [vmem:[#allocation2 + $0x140] sm:$0xff] }
 0x62e   :  { %5714 = vst.msk [vmem:[#allocation5 + $0x78] sm:$0xff] %vm5698_vm10, %v5540_v55  ;;  %v8909_v9 = vld [vmem:[%s14273_s0 + $0x385] ss:$2 sm:$0xff] }
 0x62f   :  { %v4784_v14 = vmax.f32 %v4721_v11, 0.0  ;;  %5336 = vst.msk [vmem:[#allocation5 + $0x80] sm:$0xff] %vm5319_vm9, %v5163_v10  ;;  %v8783_v10 = vld [vmem:[%s14273_s0 + $0x384] ss:$2 sm:$0xff]  ;;  %v8900_v11 = vld [vmem:[%s14273_s0 + $0x2f5] ss:$2 sm:$0xff] }
 0x631   :  { %4847 = vst.msk [vmem:[#allocation4 + $0x100] sm:$0xff] %vm4620_vm7, %v4784_v14  ;;  %5172 = vrot.lane.b32.xlu1 %v5025_v17, %s9151_s15  ;;  %v4530_v22 = vpop.f32.mrf.mxu1  ;;  %v5785_v17 = vld [vmem:[#allocation4 + $0xbb] sm:$0xff] }
 0x632   :  { %3552 = vrot.lane.b32.xlu0 %v8907_v13, %s9149_s17 }
 0x633   :  { %2732 = vrot.lane.b32.xlu2 %v8781_v16, %s9148_s12  ;;  %v6298_v19 = vpop.permute.xlu1 %6297 }
 0x634   :  { %v5919_v18 = vpop.permute.xlu0 %5918  ;;  %v3755_v20 = vld [vmem:[#allocation2 + $0x1d8] sm:$0xff]  ;;  %8957 = vmatmul.msk.f32.gmra.mxu0 %vm3762_vm6, %v3736_v51  ;;  %v5406_v51 = vld [vmem:[#allocation4 + $0xba] sm:$0xff] }
 0x635   :  { %6093 = vst.msk [vmem:[#allocation5 + $0x78] sm:$0xff] %vm6077_vm11, %v5919_v18  ;;  %v6300_v21 = vpop.permute.xlu2 %6299  ;;  %8976 = vmatmul.msk.f32.gmra.mxu3 %vm3762_vm6, %v3755_v20 }
 0x636   :  { %6472 = vst.msk [vmem:[#allocation5 + $0x78] sm:$0xff] %vm6456_vm12, %v6298_v19 }
 0x638   :  { %v4910_v31 = vld [vmem:[#allocation4 + $0x100] sm:$0xff] }
 0x639   :  { %6309 = vrot.lane.b32.xlu1 %v6162_v26, %s9152_s20  ;;  %v4072_v29 = vpop.f32.mrf.mxu0  ;;  %4973 = vst.msk [vmem:[#allocation5 + $0x100] sm:$0xff] %vm4620_vm7, %v4910_v31 }
 0x63a   :  { %5930 = vrot.lane.b32.xlu0 %v5783_v23, %s9150_s14  ;;  %v4655_v32 = vmax.f32 %v4072_v29, %v4530_v22 }
 0x63b   :  { %5551 = vrot.lane.b32.xlu2 %v5404_v27, %s9148_s12  ;;  %v3123_v34 = vpop.permute.xlu1 %3122 }
 0x63c   :  { %v3525_v33 = vpop.permute.xlu0 %3524  ;;  %v4722_v36 = vadd.f32 %v12510_v35, %v4655_v32  ;;  %3252 = vst.msk [vmem:[#allocation2 + $0x1e0] sm:$0xff] %vm3191_vm4, %v3123_v34 }
 0x63d   :  { %3673 = vst.msk [vmem:[#allocation3 + $0x140] sm:$0xff] %vm3191_vm4, %v3525_v33  ;;  %v3125_v37 = vpop.permute.xlu2 %3124  ;;  %v6535_v38 = vld [vmem:[#allocation5 + $0x78] sm:$0xff] }
 0x63e   :  { %9060 = vmatmul.msk.f32.gmra.mxu2 %vm6593_vm13, %v6535_v38  ;;  %v4785_v39 = vmax.f32 %v4722_v36, 0.0  ;;  %3253 = vst.msk [vmem:[#allocation2 + $0x1e8] sm:$0xff] %vm3191_vm4, %v3125_v37  ;;  %v8838_v37 = vld [vmem:[%s14273_s0 + $0x304] ss:$2 sm:$0xff] }
 0x640   :  { %4848 = vst.msk [vmem:[#allocation4 + $0x108] sm:$0xff] %vm4620_vm7, %v4785_v39  ;;  %v6828_v43 = vpop.f32.mrf.mxu2  ;;  %v6164_v39 = vld [vmem:[#allocation4 + $0xbc] sm:$0xff] }
 0x641   :  { %v6829_v44 = vadd.f32 %v12271_v15, %v6828_v43  ;;  %2734 = vrot.lane.b32.xlu1 %v8782_v41, %s9148_s12  ;;  %v4075_v62 = vpop.f32.mrf.mxu0 }
 0x642   :  { %3536 = vrot.lane.b32.xlu0 %v8899_v40, %s9149_s17 }
 0x643   :  { %3094 = vrot.lane.b32.xlu2 %v8836_v42, %s9149_s17  ;;  %v7001_v58 = vmax.f32 %v6829_v44, 0.0  ;;  %v5921_v45 = vpop.permute.xlu1 %5920  ;;  %v3756_v49 = vld [vmem:[#allocation2 + $0x1e0] sm:$0xff] }
 0x644   :  { %v5542_v46 = vpop.permute.xlu0 %5541  ;;  %v4202_v47 = vld [vmem:[#allocation3 + $0x140] sm:$0xff]  ;;  %8977 = vmatmul.msk.f32.gmra.mxu3 %vm3762_vm6, %v3756_v49 }
 0x645   :  { %5715 = vst.msk [vmem:[#allocation5 + $0x80] sm:$0xff] %vm5698_vm10, %v5542_v46  ;;  %v5923_v48 = vpop.permute.xlu2 %5922  ;;  %9021 = vmatmul.msk.f32.gmra.mxu1 %vm3762_vm6, %v4202_v47  ;;  %v3757_v55 = vld [vmem:[#allocation2 + $0x1e8] sm:$0xff]  ;;  %v8784_v46 = vld [vmem:[%s14273_s0 + $0x394] ss:$2 sm:$0xff] }
 0x646   :  { %7064 = vst.msk [vmem:[#allocation6 + $0x40] sm:$0xff] %vm6587_vm14, %v7001_v58  ;;  %v8910_v58 = vld [vmem:[%s14273_s0 + $0x395] ss:$2 sm:$0xff] }
 0x647   :  { %6094 = vst.msk [vmem:[#allocation5 + $0x80] sm:$0xff] %vm6077_vm11, %v5921_v45  ;;  %v4911_v54 = vld [vmem:[#allocation4 + $0x108] sm:$0xff] }
 0x648   :  { %6473 = vst.msk [vmem:[#allocation5 + $0x80] sm:$0xff] %vm6456_vm12, %v6300_v21  ;;  %v5027_v21 = vld [vmem:[#allocation4 + $0xb9] sm:$0xff]  ;;  %v5028_v47 = vld [vmem:[#allocation4 + $0xc1] sm:$0xff] }
 0x649   :  { %5553 = vrot.lane.b32.xlu1 %v5405_v52, %s9148_s12  ;;  %4974 = vst.msk [vmem:[#allocation5 + $0x108] sm:$0xff] %vm4620_vm7, %v4911_v54 }
 0x64a   :  { %5174 = vrot.lane.b32.xlu0 %v5026_v53, %s9151_s15 }
 0x64b   :  { %3554 = vrot.lane.b32.xlu2 %v8908_v50, %s9149_s17  ;;  %v3527_v56 = vpop.permute.xlu1 %3526 }
 0x64c   :  { %v3085_v57 = vpop.permute.xlu0 %3084  ;;  %3674 = vst.msk [vmem:[#allocation3 + $0x148] sm:$0xff] %vm3191_vm4, %v3527_v56  ;;  %8978 = vmatmul.msk.f32.gmra.mxu3 %vm3762_vm6, %v3757_v55 }
 0x64d   :  { %v3529_v59 = vpop.permute.xlu2 %3528  ;;  %3233 = vst.msk [vmem:[#allocation2 + $0x148] sm:$0xff] %vm3191_vm4, %v3085_v57 }
 0x64e   :  { %3675 = vst.msk [vmem:[#allocation3 + $0x150] sm:$0xff] %vm3191_vm4, %v3529_v59 }
 0x64f   :  { %v6536_v60 = vld [vmem:[#allocation5 + $0x80] sm:$0xff] }
 0x650   :  { %9061 = vmatmul.msk.f32.gmra.mxu2 %vm6593_vm13, %v6536_v60  ;;  %v5786_v60 = vld [vmem:[#allocation4 + $0xc3] sm:$0xff] }
 0x651   :  { %v6831_v63 = vpop.f32.mrf.mxu2  ;;  %3096 = vrot.lane.b32.xlu1 %v8837_v61, %s9149_s17  ;;  %v6165_v61 = vld [vmem:[#allocation4 + $0xc4] sm:$0xff] }
 0x652   :  { %v6832_v1 = vadd.f32 %v12271_v15, %v6831_v63  ;;  %v4533_v2 = vpop.f32.mrf.mxu1  ;;  %6311 = vrot.lane.b32.xlu0 %v6163_v0, %s9152_s20  ;;  %v5407_v0 = vld [vmem:[#allocation4 + $0xc2] sm:$0xff] }
 0x653   :  { %v4656_v24 = vmax.f32 %v4075_v62, %v4533_v2  ;;  %5932 = vrot.lane.b32.xlu2 %v5784_v3, %s9150_s14  ;;  %v5544_v4 = vpop.permute.xlu1 %5543  ;;  %v4203_v5 = vld [vmem:[#allocation3 + $0x148] sm:$0xff] }
 0x654   :  { %v7002_v25 = vmax.f32 %v6832_v1, 0.0  ;;  %v5165_v28 = vpop.permute.xlu0 %5164  ;;  %v3737_v8 = vld [vmem:[#allocation2 + $0x148] sm:$0xff]  ;;  %9022 = vmatmul.msk.f32.gmra.mxu1 %vm3762_vm6, %v4203_v5  ;;  %v12626_v62 = vld [vmem:[%s14277_s4] ss:$0 sm:$0xff] }
 0x655   :  { %v4723_v6 = vadd.f32 %v12510_v35, %v4656_v24  ;;  %5337 = vst.msk [vmem:[#allocation5 + $0x88] sm:$0xff] %vm5319_vm9, %v5165_v28  ;;  %v5546_v7 = vpop.permute.xlu2 %5545  ;;  %8958 = vmatmul.msk.f32.gmra.mxu0 %vm3762_vm6, %v3737_v8  ;;  %v4204_v12 = vld [vmem:[#allocation3 + $0x150] sm:$0xff]  ;;  %v8902_v28 = vld [vmem:[%s14273_s0 + $0x315] ss:$2 sm:$0xff] }
 0x656   :  { %7065 = vst.msk [vmem:[#allocation6 + $0x48] sm:$0xff] %vm6587_vm14, %v7002_v25  ;;  %v8785_v5 = vld [vmem:[%s14273_s0 + $0x3a4] ss:$2 sm:$0xff] }
 0x657   :  { %v4786_v30 = vmax.f32 %v4723_v6, 0.0  ;;  %5716 = vst.msk [vmem:[#allocation5 + $0x88] sm:$0xff] %vm5698_vm10, %v5544_v4  ;;  %v8839_v6 = vld [vmem:[%s14273_s0 + $0x314] ss:$2 sm:$0xff] }
 0x658   :  { %6095 = vst.msk [vmem:[#allocation5 + $0x88] sm:$0xff] %vm6077_vm11, %v5923_v48 }
 0x659   :  { %4849 = vst.msk [vmem:[#allocation4 + $0x110] sm:$0xff] %vm4620_vm7, %v4786_v30  ;;  %3556 = vrot.lane.b32.xlu1 %v8909_v9, %s9149_s17 }
 0x65a   :  { %2736 = vrot.lane.b32.xlu0 %v8783_v10, %s9148_s12 }
 0x65b   :  { %3538 = vrot.lane.b32.xlu2 %v8900_v11, %s9149_s17  ;;  %v3087_v13 = vpop.permute.xlu1 %3086 }
 0x65c   :  { %v6302_v14 = vpop.permute.xlu0 %6301  ;;  %3234 = vst.msk [vmem:[#allocation2 + $0x150] sm:$0xff] %vm3191_vm4, %v3087_v13  ;;  %9023 = vmatmul.msk.f32.gmra.mxu1 %vm3762_vm6, %v4204_v12  ;;  %v8911_v12 = vld [vmem:[%s14273_s0 + $0x3a5] ss:$2 sm:$0xff] }
 0x65d   :  { %v3089_v16 = vpop.permute.xlu2 %3088  ;;  %6474 = vst.msk [vmem:[#allocation5 + $0x88] sm:$0xff] %vm6456_vm12, %v6302_v14  ;;  %v5408_v14 = vld [vmem:[#allocation4 + $0xca] sm:$0xff] }
 0x65e   :  { %3235 = vst.msk [vmem:[#allocation2 + $0x158] sm:$0xff] %vm3191_vm4, %v3089_v16  ;;  %v5029_v16 = vld [vmem:[#allocation4 + $0xc9] sm:$0xff] }
 0x660   :  { %v4912_v18 = vld [vmem:[#allocation4 + $0x110] sm:$0xff] }
 0x661   :  { %v4536_v19 = vpop.f32.mrf.mxu1  ;;  %5934 = vrot.lane.b32.xlu1 %v5785_v17, %s9150_s14  ;;  %4975 = vst.msk [vmem:[#allocation5 + $0x110] sm:$0xff] %vm4620_vm7, %v4912_v18 }
 0x662   :  { %v6834_v20 = vpop.f32.mrf.mxu2  ;;  %5555 = vrot.lane.b32.xlu0 %v5406_v51, %s9148_s12  ;;  %v4078_v23 = vpop.f32.mrf.mxu0 }
 0x663   :  { %v6835_v22 = vadd.f32 %v12271_v15, %v6834_v20  ;;  %5176 = vrot.lane.b32.xlu2 %v5027_v21, %s9151_s15  ;;  %v4657_v26 = vmax.f32 %v4078_v23, %v4536_v19  ;;  %v5167_v29 = vpop.permute.xlu1 %5166  ;;  %v3738_v31 = vld [vmem:[#allocation2 + $0x150] sm:$0xff] }
 0x664   :  { %v3127_v27 = vpop.permute.xlu0 %3126  ;;  %8959 = vmatmul.msk.f32.gmra.mxu0 %vm3762_vm6, %v3738_v31  ;;  %v6537_v34 = vld [vmem:[#allocation5 + $0x88] sm:$0xff]  ;;  %5338 = vst.msk [vmem:[#allocation5 + $0x90] sm:$0xff] %vm5319_vm9, %v5167_v29  ;;  %v8901_v15 = vld [vmem:[%s14273_s0 + $0x305] ss:$2 sm:$0xff]  ;;  %v8840_v31 = vld [vmem:[%s14273_s0 + $0x324] ss:$2 sm:$0xff] }
 0x665   :  { %v7003_v32 = vmax.f32 %v6835_v22, 0.0  ;;  %3254 = vst.msk [vmem:[#allocation2 + $0x1f0] sm:$0xff] %vm3191_vm4, %v3127_v27  ;;  %v3549_v33 = vpop.permute.xlu2 %3548  ;;  %v4724_v36 = vadd.f32 %v12510_v35, %v4657_v26  ;;  %9062 = vmatmul.msk.f32.gmra.mxu2 %vm6593_vm13, %v6537_v34  ;;  %v3739_v40 = vld [vmem:[#allocation2 + $0x158] sm:$0xff] }
 0x666   :  { %5717 = vst.msk [vmem:[#allocation5 + $0x90] sm:$0xff] %vm5698_vm10, %v5546_v7 }
 0x667   :  { %7066 = vst.msk [vmem:[#allocation6 + $0x50] sm:$0xff] %vm6587_vm14, %v7003_v32  ;;  %v4787_v38 = vmax.f32 %v4724_v36, 0.0  ;;  %v6166_v32 = vld [vmem:[#allocation4 + $0xcc] sm:$0xff] }
 0x669   :  { %4850 = vst.msk [vmem:[#allocation4 + $0x118] sm:$0xff] %vm4620_vm7, %v4787_v38  ;;  %3540 = vrot.lane.b32.xlu1 %v8901_v15, %s9149_s17  ;;  %v4539_v45 = vpop.f32.mrf.mxu1  ;;  %v8912_v38 = vld [vmem:[%s14273_s0 + $0x3b5] ss:$2 sm:$0xff] }
 0x66a   :  { %3098 = vrot.lane.b32.xlu0 %v8838_v37, %s9149_s17 }
 0x66b   :  { %6313 = vrot.lane.b32.xlu2 %v6164_v39, %s9152_s20  ;;  %v6304_v42 = vpop.permute.xlu1 %6303  ;;  %v8786_v39 = vld [vmem:[%s14273_s0 + $0x3b4] ss:$2 sm:$0xff] }
 0x66c   :  { %v5925_v41 = vpop.permute.xlu0 %5924  ;;  %v3758_v43 = vld [vmem:[#allocation2 + $0x1f0] sm:$0xff]  ;;  %8960 = vmatmul.msk.f32.gmra.mxu0 %vm3762_vm6, %v3739_v40 }
 0x66d   :  { %6096 = vst.msk [vmem:[#allocation5 + $0x90] sm:$0xff] %vm6077_vm11, %v5925_v41  ;;  %v5927_v44 = vpop.permute.xlu2 %5926  ;;  %8979 = vmatmul.msk.f32.gmra.mxu3 %vm3762_vm6, %v3758_v43  ;;  %v8903_v40 = vld [vmem:[%s14273_s0 + $0x325] ss:$2 sm:$0xff] }
 0x66e   :  { %6475 = vst.msk [vmem:[#allocation5 + $0x90] sm:$0xff] %vm6456_vm12, %v6304_v42 }
 0x670   :  { %v4913_v49 = vld [vmem:[#allocation4 + $0x118] sm:$0xff] }
 0x671   :  { %5178 = vrot.lane.b32.xlu1 %v5028_v47, %s9151_s15  ;;  %v4081_v48 = vpop.f32.mrf.mxu0  ;;  %4976 = vst.msk [vmem:[#allocation5 + $0x118] sm:$0xff] %vm4620_vm7, %v4913_v49 }
 0x672   :  { %3558 = vrot.lane.b32.xlu0 %v8910_v58, %s9149_s17  ;;  %v4658_v50 = vmax.f32 %v4081_v48, %v4539_v45 }
 0x673   :  { %2738 = vrot.lane.b32.xlu2 %v8784_v46, %s9148_s12  ;;  %v2729_v53 = vpop.permute.xlu1 %2728 }
 0x674   :  { %v3531_v52 = vpop.permute.xlu0 %3530  ;;  %v4725_v54 = vadd.f32 %v12510_v35, %v4658_v50  ;;  %2865 = vst.msk [vmem:[#allocation3 + $0x1a0] sm:$0xff] %vm2371_vm3, %v2729_v53 }
 0x675   :  { %3676 = vst.msk [vmem:[#allocation3 + $0x158] sm:$0xff] %vm3191_vm4, %v3531_v52  ;;  %v3533_v55 = vpop.permute.xlu2 %3532  ;;  %v6538_v56 = vld [vmem:[#allocation5 + $0x90] sm:$0xff] }
 0x676   :  { %9063 = vmatmul.msk.f32.gmra.mxu2 %vm6593_vm13, %v6538_v56  ;;  %v4788_v57 = vmax.f32 %v4725_v54, 0.0  ;;  %3685 = vst.msk [vmem:[#allocation3 + $0x1a0] sm:$0xff] %vm3191_vm4, %v3549_v33  ;;  %v5787_v33 = vld [vmem:[#allocation4 + $0xcb] sm:$0xff]  ;;  %v5788_v54 = vld [vmem:[#allocation4 + $0xd3] sm:$0xff] }
 0x677   :  { %3677 = vst.msk [vmem:[#allocation3 + $0x160] sm:$0xff] %vm3191_vm4, %v3533_v55  ;;  %v5409_v55 = vld [vmem:[#allocation4 + $0xd2] sm:$0xff] }
 0x678   :  { %4851 = vst.msk [vmem:[#allocation4 + $0x120] sm:$0xff] %vm4620_vm7, %v4788_v57  ;;  %v6837_v59 = vpop.f32.mrf.mxu2  ;;  %v5030_v56 = vld [vmem:[#allocation4 + $0xd1] sm:$0xff] }
 0x679   :  { %v6838_v63 = vadd.f32 %v12626_v62, %v6837_v59  ;;  %6315 = vrot.lane.b32.xlu1 %v6165_v61, %s9152_s20  ;;  %v4084_v11 = vpop.f32.mrf.mxu0 }
 0x67a   :  { %5936 = vrot.lane.b32.xlu0 %v5786_v60, %s9150_s14 }
 0x67b   :  { %5557 = vrot.lane.b32.xlu2 %v5407_v0, %s9148_s12  ;;  %v7004_v1 = vmax.f32 %v6838_v63, 0.0  ;;  %v5548_v2 = vpop.permute.xlu1 %5547  ;;  %v8913_v0 = vld [vmem:[%s14273_s0 + $0x3c5] ss:$2 sm:$0xff] }
 0x67c   :  { %v5169_v3 = vpop.permute.xlu0 %5168  ;;  %v4205_v24 = vld [vmem:[#allocation3 + $0x158] sm:$0xff] }
 0x67d   :  { %5339 = vst.msk [vmem:[#allocation5 + $0x98] sm:$0xff] %vm5319_vm9, %v5169_v3  ;;  %v5171_v25 = vpop.permute.xlu2 %5170  ;;  %9024 = vmatmul.msk.f32.gmra.mxu1 %vm3762_vm6, %v4205_v24  ;;  %v4214_v4 = vld [vmem:[#allocation3 + $0x1a0] sm:$0xff]  ;;  %v12715_v3 = vpop.f32.mrf.mxu3  ;;  %v6167_v24 = vld [vmem:[#allocation4 + $0xd4] sm:$0xff] }
 0x67e   :  { %7067 = vst.msk [vmem:[#allocation6 + $0x58] sm:$0xff] %vm6587_vm14, %v7004_v1  ;;  %9033 = vmatmul.msk.f32.vlgmr.msrb.gmra.mxu3 %vm3762_vm6, %v4214_v4  ;;  %v4206_v8 = vld [vmem:[#allocation3 + $0x160] sm:$0xff]  ;;  %v8787_v1 = vld [vmem:[%s14273_s0 + $0x3c4] ss:$2 sm:$0xff] }
 0x67f   :  { %5718 = vst.msk [vmem:[#allocation5 + $0x98] sm:$0xff] %vm5698_vm10, %v5548_v2  ;;  %v4914_v7 = vld [vmem:[#allocation4 + $0x120] sm:$0xff] }
 0x680   :  { %6097 = vst.msk [vmem:[#allocation5 + $0x98] sm:$0xff] %vm6077_vm11, %v5927_v44 }
 0x681   :  { %5340 = vst.msk [vmem:[#allocation5 + $0xa0] sm:$0xff] %vm5319_vm9, %v5171_v25  ;;  %2740 = vrot.lane.b32.xlu1 %v8785_v5, %s9148_s12 }
 0x682   :  { %3542 = vrot.lane.b32.xlu0 %v8902_v28, %s9149_s17  ;;  %4977 = vst.msk [vmem:[#allocation5 + $0x120] sm:$0xff] %vm4620_vm7, %v4914_v7 }
 0x683   :  { %3100 = vrot.lane.b32.xlu2 %v8839_v6, %s9149_s17  ;;  %v3091_v30 = vpop.permute.xlu1 %3090 }
 0x684   :  { %v6306_v9 = vpop.permute.xlu0 %6305  ;;  %3236 = vst.msk [vmem:[#allocation2 + $0x160] sm:$0xff] %vm3191_vm4, %v3091_v30 }
 0x685   :  { %v6308_v10 = vpop.permute.xlu2 %6307  ;;  %9025 = vmatmul.msk.f32.gmra.mxu1 %vm3762_vm6, %v4206_v8  ;;  %6476 = vst.msk [vmem:[#allocation5 + $0x98] sm:$0xff] %vm6456_vm12, %v6306_v9 }
 0x689   :  { %v6840_v13 = vpop.f32.mrf.mxu2  ;;  %5559 = vrot.lane.b32.xlu1 %v5408_v14, %s9148_s12 }
 0x68a   :  { %v6841_v17 = vadd.f32 %v12626_v62, %v6840_v13  ;;  %v4542_v51 = vpop.f32.mrf.mxu1  ;;  %5180 = vrot.lane.b32.xlu0 %v5029_v16, %s9151_s15  ;;  %v12727_v13 = vpop.f32.mrf.mxu3  ;;  %v5031_v16 = vld [vmem:[#allocation4 + $0xd9] sm:$0xff] }
 0x68b   :  { %v4659_v18 = vmax.f32 %v4084_v11, %v4542_v51  ;;  %3560 = vrot.lane.b32.xlu2 %v8911_v12, %s9149_s17  ;;  %v3551_v20 = vpop.permute.xlu1 %3550  ;;  %v3740_v22 = vld [vmem:[#allocation2 + $0x160] sm:$0xff]  ;;  %v5789_v11 = vld [vmem:[#allocation4 + $0xdb] sm:$0xff] }
 0x68c   :  { %v7005_v19 = vmax.f32 %v6841_v17, 0.0  ;;  %v2731_v21 = vpop.permute.xlu0 %2730  ;;  %8961 = vmatmul.msk.f32.gmra.mxu0 %vm3762_vm6, %v3740_v22  ;;  %v6539_v27 = vld [vmem:[#allocation5 + $0x98] sm:$0xff]  ;;  %v8841_v22 = vld [vmem:[%s14273_s0 + $0x334] ss:$2 sm:$0xff] }
 0x68d   :  { %v4726_v23 = vadd.f32 %v12510_v35, %v4659_v18  ;;  %2866 = vst.msk [vmem:[#allocation3 + $0x1a8] sm:$0xff] %vm2371_vm3, %v2731_v21  ;;  %v2733_v26 = vpop.permute.xlu2 %2732  ;;  %9064 = vmatmul.msk.f32.gmra.mxu2 %vm6593_vm13, %v6539_v27  ;;  %v5410_v12 = vld [vmem:[#allocation4 + $0xda] sm:$0xff] }
 0x68e   :  { %7068 = vst.msk [vmem:[#allocation6 + $0x60] sm:$0xff] %vm6587_vm14, %v7005_v19 }
 0x68f   :  { %v4789_v29 = vmax.f32 %v4726_v23, 0.0  ;;  %3686 = vst.msk [vmem:[#allocation3 + $0x1a8] sm:$0xff] %vm3191_vm4, %v3551_v20  ;;  %v8778_v23 = vld [vmem:[%s14273_s0 + $0x334] ss:$2 sm:$0xff] }
 0x690   :  { %2867 = vst.msk [vmem:[#allocation3 + $0x1b0] sm:$0xff] %vm2371_vm3, %v2733_v26  ;;  %v6168_v26 = vld [vmem:[#allocation4 + $0xdc] sm:$0xff] }
 0x691   :  { %4852 = vst.msk [vmem:[#allocation4 + $0x128] sm:$0xff] %vm4620_vm7, %v4789_v29  ;;  %3102 = vrot.lane.b32.xlu1 %v8840_v31, %s9149_s17 }
 0x692   :  { %6317 = vrot.lane.b32.xlu0 %v6166_v32, %s9152_s20  ;;  %v12745_v29 = vpop.f32.mrf.mxu3 }
 0x693   :  { %5938 = vrot.lane.b32.xlu2 %v5787_v33, %s9150_s14  ;;  %v5929_v34 = vpop.permute.xlu1 %5928 }
 0x694   :  { %v5550_v36 = vpop.permute.xlu0 %5549 }
 0x695   :  { %5719 = vst.msk [vmem:[#allocation5 + $0xa0] sm:$0xff] %vm5698_vm10, %v5550_v36  ;;  %v5552_v15 = vpop.permute.xlu2 %5551 }
 0x696   :  { %6098 = vst.msk [vmem:[#allocation5 + $0xa0] sm:$0xff] %vm6077_vm11, %v5929_v34  ;;  %v4215_v37 = vld [vmem:[#allocation3 + $0x1a8] sm:$0xff] }
 0x697   :  { %6477 = vst.msk [vmem:[#allocation5 + $0xa0] sm:$0xff] %vm6456_vm12, %v6308_v10  ;;  %9034 = vmatmul.msk.f32.gmra.mxu3 %vm3762_vm6, %v4215_v37  ;;  %v8788_v37 = vld [vmem:[%s14273_s0 + $0x3d4] ss:$2 sm:$0xff] }
 0x698   :  { %v4915_v41 = vld [vmem:[#allocation4 + $0x128] sm:$0xff] }
 0x699   :  { %v4545_v42 = vpop.f32.mrf.mxu1  ;;  %3562 = vrot.lane.b32.xlu1 %v8912_v38, %s9149_s17  ;;  %4978 = vst.msk [vmem:[#allocation5 + $0x128] sm:$0xff] %vm4620_vm7, %v4915_v41 }
 0x69a   :  { %2742 = vrot.lane.b32.xlu0 %v8786_v39, %s9148_s12  ;;  %v4087_v44 = vpop.f32.mrf.mxu0  ;;  %v8904_v39 = vld [vmem:[%s14273_s0 + $0x335] ss:$2 sm:$0xff]  ;;  %v12766_v41 = vpop.f32.mrf.mxu3 }
 0x69b   :  { %v6843_v43 = vpop.f32.mrf.mxu2  ;;  %3544 = vrot.lane.b32.xlu2 %v8903_v40, %s9149_s17  ;;  %v4660_v45 = vmax.f32 %v4087_v44, %v4545_v42  ;;  %v3535_v46 = vpop.permute.xlu1 %3534 }
 0x69c   :  { %v6844_v58 = vadd.f32 %v12626_v62, %v6843_v43  ;;  %v3093_v47 = vpop.permute.xlu0 %3092  ;;  %3678 = vst.msk [vmem:[#allocation3 + $0x168] sm:$0xff] %vm3191_vm4, %v3535_v46 }
 0x69d   :  { %v3095_v48 = vpop.permute.xlu2 %3094  ;;  %v4727_v50 = vadd.f32 %v12510_v35, %v4660_v45  ;;  %3237 = vst.msk [vmem:[#allocation2 + $0x168] sm:$0xff] %vm3191_vm4, %v3093_v47 }
 0x69e   :  { %v7006_v49 = vmax.f32 %v6844_v58, 0.0  ;;  %v6540_v52 = vld [vmem:[#allocation5 + $0xa0] sm:$0xff]  ;;  %3238 = vst.msk [vmem:[#allocation2 + $0x170] sm:$0xff] %vm3191_vm4, %v3095_v48 }
 0x69f   :  { %9065 = vmatmul.msk.f32.gmra.mxu2 %vm6593_vm13, %v6540_v52  ;;  %v4790_v53 = vmax.f32 %v4727_v50, 0.0  ;;  %v5411_v50 = vld [vmem:[#allocation4 + $0xe2] sm:$0xff] }
 0x6a0   :  { %7069 = vst.msk [vmem:[#allocation6 + $0x68] sm:$0xff] %vm6587_vm14, %v7006_v49  ;;  %v5790_v49 = vld [vmem:[#allocation4 + $0xe3] sm:$0xff] }
 0x6a1   :  { %4853 = vst.msk [vmem:[#allocation4 + $0x130] sm:$0xff] %vm4620_vm7, %v4790_v53  ;;  %5940 = vrot.lane.b32.xlu1 %v5788_v54, %s9150_s14  ;;  %v4548_v2 = vpop.f32.mrf.mxu1  ;;  %v5032_v53 = vld [vmem:[#allocation4 + $0xe1] sm:$0xff] }
 0x6a2   :  { %5561 = vrot.lane.b32.xlu0 %v5409_v55, %s9148_s12  ;;  %v12776_v52 = vpop.f32.mrf.mxu3 }
 0x6a3   :  { %5182 = vrot.lane.b32.xlu2 %v5030_v56, %s9151_s15  ;;  %v5173_v59 = vpop.permute.xlu1 %5172  ;;  %v4207_v60 = vld [vmem:[#allocation3 + $0x168] sm:$0xff] }
 0x6a4   :  { %v3553_v57 = vpop.permute.xlu0 %3552  ;;  %v3741_v63 = vld [vmem:[#allocation2 + $0x168] sm:$0xff]  ;;  %9026 = vmatmul.msk.f32.gmra.mxu1 %vm3762_vm6, %v4207_v60  ;;  %5341 = vst.msk [vmem:[#allocation5 + $0xa8] sm:$0xff] %vm5319_vm9, %v5173_v59 }
 0x6a5   :  { %3687 = vst.msk [vmem:[#allocation3 + $0x1b0] sm:$0xff] %vm3191_vm4, %v3553_v57  ;;  %v3555_v61 = vpop.permute.xlu2 %3554  ;;  %8962 = vmatmul.msk.f32.gmra.mxu0 %vm3762_vm6, %v3741_v63  ;;  %v3742_v5 = vld [vmem:[#allocation2 + $0x170] sm:$0xff] }
 0x6a6   :  { %5720 = vst.msk [vmem:[#allocation5 + $0xa8] sm:$0xff] %vm5698_vm10, %v5552_v15  ;;  %v8914_v15 = vld [vmem:[%s14273_s0 + $0x3d5] ss:$2 sm:$0xff]  ;;  %v8915_v60 = vld [vmem:[%s14273_s0 + $0x3e5] ss:$2 sm:$0xff] }
 0x6a8   :  { %v4916_v4 = vld [vmem:[#allocation4 + $0x130] sm:$0xff] }
 0x6a9   :  { %3564 = vrot.lane.b32.xlu1 %v8913_v0, %s9149_s17  ;;  %v4090_v25 = vpop.f32.mrf.mxu0  ;;  %4979 = vst.msk [vmem:[#allocation5 + $0x130] sm:$0xff] %vm4620_vm7, %v4916_v4 }
 0x6aa   :  { %2744 = vrot.lane.b32.xlu0 %v8787_v1, %s9148_s12  ;;  %v4661_v28 = vmax.f32 %v4090_v25, %v4548_v2  ;;  %v12792_v0 = vpop.f32.mrf.mxu3  ;;  %v6169_v2 = vld [vmem:[#allocation4 + $0xe4] sm:$0xff] }
 0x6ab   :  { %6319 = vrot.lane.b32.xlu2 %v6167_v24, %s9152_s20  ;;  %v6310_v7 = vpop.permute.xlu1 %6309 }
 0x6ac   :  { %v5931_v6 = vpop.permute.xlu0 %5930  ;;  %v4216_v8 = vld [vmem:[#allocation3 + $0x1b0] sm:$0xff]  ;;  %v4728_v30 = vadd.f32 %v12510_v35, %v4661_v28 }
 0x6ad   :  { %6099 = vst.msk [vmem:[#allocation5 + $0xa8] sm:$0xff] %vm6077_vm11, %v5931_v6  ;;  %v5933_v9 = vpop.permute.xlu2 %5932  ;;  %9035 = vmatmul.msk.f32.gmra.mxu3 %vm3762_vm6, %v4216_v8  ;;  %8963 = vmatmul.msk.f32.gmra.mxu0 %vm3762_vm6, %v3742_v5 }
 0x6ae   :  { %6478 = vst.msk [vmem:[#allocation5 + $0xa8] sm:$0xff] %vm6456_vm12, %v6310_v7  ;;  %v4791_v10 = vmax.f32 %v4728_v30, 0.0 }
 0x6b0   :  { %4854 = vst.msk [vmem:[#allocation4 + $0x138] sm:$0xff] %vm4620_vm7, %v4791_v10  ;;  %v6846_v14 = vpop.f32.mrf.mxu2 }
 0x6b1   :  { %5942 = vrot.lane.b32.xlu1 %v5789_v11, %s9150_s14  ;;  %v6847_v17 = vadd.f32 %v12626_v62, %v6846_v14  ;;  %v4093_v38 = vpop.f32.mrf.mxu0  ;;  %v5791_v11 = vld [vmem:[#allocation4 + $0xeb] sm:$0xff] }
 0x6b2   :  { %5563 = vrot.lane.b32.xlu0 %v5410_v12, %s9148_s12  ;;  %v5412_v12 = vld [vmem:[#allocation4 + $0xea] sm:$0xff]  ;;  %v12805_v14 = vpop.f32.mrf.mxu3 }
 0x6b3   :  { %5184 = vrot.lane.b32.xlu2 %v5031_v16, %s9151_s15  ;;  %v2735_v18 = vpop.permute.xlu1 %2734  ;;  %v7007_v19 = vmax.f32 %v6847_v17, 0.0  ;;  %v5033_v16 = vld [vmem:[#allocation4 + $0xe9] sm:$0xff] }
 0x6b4   :  { %v3537_v51 = vpop.permute.xlu0 %3536  ;;  %2868 = vst.msk [vmem:[#allocation3 + $0x1b8] sm:$0xff] %vm2371_vm3, %v2735_v18 }
 0x6b5   :  { %3679 = vst.msk [vmem:[#allocation3 + $0x170] sm:$0xff] %vm3191_vm4, %v3537_v51  ;;  %v3539_v20 = vpop.permute.xlu2 %3538  ;;  %v6541_v21 = vld [vmem:[#allocation5 + $0xa8] sm:$0xff] }
 0x6b6   :  { %9066 = vmatmul.msk.f32.gmra.mxu2 %vm6593_vm13, %v6541_v21  ;;  %7070 = vst.msk [vmem:[#allocation6 + $0x70] sm:$0xff] %vm6587_vm14, %v7007_v19  ;;  %v5413_v21 = vld [vmem:[#allocation4 + $0xf2] sm:$0xff] }
 0x6b7   :  { %3688 = vst.msk [vmem:[#allocation3 + $0x1b8] sm:$0xff] %vm3191_vm4, %v3555_v61  ;;  %v4917_v27 = vld [vmem:[#allocation4 + $0x138] sm:$0xff] }
 0x6b8   :  { %3680 = vst.msk [vmem:[#allocation3 + $0x178] sm:$0xff] %vm3191_vm4, %v3539_v20  ;;  %v8789_v61 = vld [vmem:[%s14273_s0 + $0x3e4] ss:$2 sm:$0xff] }
 0x6b9   :  { %3104 = vrot.lane.b32.xlu1 %v8841_v22, %s9149_s17  ;;  %4980 = vst.msk [vmem:[#allocation5 + $0x138] sm:$0xff] %vm4620_vm7, %v4917_v27  ;;  %v5034_v22 = vld [vmem:[#allocation4 + $0xf1] sm:$0xff] }
 0x6ba   :  { %6321 = vrot.lane.b32.xlu0 %v6168_v26, %s9152_s20  ;;  %v6170_v26 = vld [vmem:[#allocation4 + $0xec] sm:$0xff] }
 0x6bb   :  { %2726 = vrot.lane.b32.xlu2 %v8778_v23, %s9148_s12  ;;  %v5554_v31 = vpop.permute.xlu1 %5553  ;;  %v12815_v23 = vpop.f32.mrf.mxu3 }
 0x6bc   :  { %v5175_v32 = vpop.permute.xlu0 %5174  ;;  %v4208_v33 = vld [vmem:[#allocation3 + $0x170] sm:$0xff] }
 0x6bd   :  { %5342 = vst.msk [vmem:[#allocation5 + $0xb0] sm:$0xff] %vm5319_vm9, %v5175_v32  ;;  %v5177_v34 = vpop.permute.xlu2 %5176  ;;  %9027 = vmatmul.msk.f32.gmra.mxu1 %vm3762_vm6, %v4208_v33 }
 0x6be   :  { %5721 = vst.msk [vmem:[#allocation5 + $0xb0] sm:$0xff] %vm5698_vm10, %v5554_v31  ;;  %v4217_v36 = vld [vmem:[#allocation3 + $0x1b8] sm:$0xff] }
 0x6bf   :  { %6100 = vst.msk [vmem:[#allocation5 + $0xb0] sm:$0xff] %vm6077_vm11, %v5933_v9  ;;  %9036 = vmatmul.msk.f32.gmra.mxu3 %vm3762_vm6, %v4217_v36  ;;  %v4209_v43 = vld [vmem:[#allocation3 + $0x178] sm:$0xff] }
 0x6c0   :  { %5343 = vst.msk [vmem:[#allocation5 + $0xb8] sm:$0xff] %vm5319_vm9, %v5177_v34 }
 0x6c1   :  { %v6849_v40 = vpop.f32.mrf.mxu2  ;;  %3566 = vrot.lane.b32.xlu1 %v8914_v15, %s9149_s17 }
 0x6c2   :  { %v4551_v42 = vpop.f32.mrf.mxu1  ;;  %2746 = vrot.lane.b32.xlu0 %v8788_v37, %s9148_s12 }
 0x6c3   :  { %v4662_v44 = vmax.f32 %v4093_v38, %v4551_v42  ;;  %3546 = vrot.lane.b32.xlu2 %v8904_v39, %s9149_s17  ;;  %v3097_v58 = vpop.permute.xlu1 %3096  ;;  %v6171_v42 = vld [vmem:[#allocation4 + $0xf4] sm:$0xff] }
 0x6c4   :  { %v6312_v45 = vpop.permute.xlu0 %6311  ;;  %3239 = vst.msk [vmem:[#allocation2 + $0x178] sm:$0xff] %vm3191_vm4, %v3097_v58 }
 0x6c5   :  { %v4729_v46 = vadd.f32 %v12510_v35, %v4662_v44  ;;  %v6314_v47 = vpop.permute.xlu2 %6313  ;;  %9028 = vmatmul.msk.f32.gmra.mxu1 %vm3762_vm6, %v4209_v43  ;;  %6479 = vst.msk [vmem:[#allocation5 + $0xb0] sm:$0xff] %vm6456_vm12, %v6312_v45  ;;  %v5035_v43 = vld [vmem:[#allocation4 + $0xf9] sm:$0xff] }
 0x6c6   :  { %v5792_v45 = vld [vmem:[#allocation4 + $0xf3] sm:$0xff] }
 0x6c7   :  { %v4792_v48 = vmax.f32 %v4729_v46, 0.0  ;;  %v12828_v44 = vpop.f32.mrf.mxu3 }
 0x6c9   :  { %4855 = vst.msk [vmem:[#allocation4 + $0x140] sm:$0xff] %vm4620_vm7, %v4792_v48  ;;  %5944 = vrot.lane.b32.xlu1 %v5790_v49, %s9150_s14 }
 0x6ca   :  { %5565 = vrot.lane.b32.xlu0 %v5411_v50, %s9148_s12 }
 0x6cb   :  { %5186 = vrot.lane.b32.xlu2 %v5032_v53, %s9151_s15  ;;  %v3557_v54 = vpop.permute.xlu1 %3556  ;;  %v3743_v56 = vld [vmem:[#allocation2 + $0x178] sm:$0xff] }
 0x6cc   :  { %v2737_v55 = vpop.permute.xlu0 %2736  ;;  %8964 = vmatmul.msk.f32.gmra.mxu0 %vm3762_vm6, %v3743_v56  ;;  %v6542_v59 = vld [vmem:[#allocation5 + $0xb0] sm:$0xff] }
 0x6cd   :  { %2869 = vst.msk [vmem:[#allocation3 + $0x1c0] sm:$0xff] %vm2371_vm3, %v2737_v55  ;;  %v2739_v57 = vpop.permute.xlu2 %2738  ;;  %9067 = vmatmul.msk.f32.gmra.mxu2 %vm6593_vm13, %v6542_v59  ;;  %v6172_v55 = vld [vmem:[#allocation4 + $0xfc] sm:$0xff] }
 0x6ce   :  { %3689 = vst.msk [vmem:[#allocation3 + $0x1c0] sm:$0xff] %vm3191_vm4, %v3557_v54  ;;  %v5793_v54 = vld [vmem:[#allocation4 + $0xfb] sm:$0xff] }
 0x6cf   :  { %2870 = vst.msk [vmem:[#allocation3 + $0x1c8] sm:$0xff] %vm2371_vm3, %v2739_v57  ;;  %v12839_v57 = vpop.f32.mrf.mxu3  ;;  %v5414_v59 = vld [vmem:[#allocation4 + $0xfa] sm:$0xff] }
 0x6d0   :  { %v4918_v63 = vld [vmem:[#allocation4 + $0x140] sm:$0xff] }
 0x6d1   :  { %v4554_v1 = vpop.f32.mrf.mxu1  ;;  %3568 = vrot.lane.b32.xlu1 %v8915_v60, %s9149_s17  ;;  %4981 = vst.msk [vmem:[#allocation5 + $0x140] sm:$0xff] %vm4620_vm7, %v4918_v63 }
 0x6d2   :  { %2748 = vrot.lane.b32.xlu0 %v8789_v61, %s9148_s12  ;;  %v4096_v25 = vpop.f32.mrf.mxu0 }
 0x6d3   :  { %v6852_v24 = vpop.f32.mrf.mxu2  ;;  %6323 = vrot.lane.b32.xlu2 %v6169_v2, %s9152_s20  ;;  %v4663_v28 = vmax.f32 %v4096_v25, %v4554_v1  ;;  %v5935_v5 = vpop.permute.xlu1 %5934  ;;  %v5794_v25 = vld [vmem:[#allocation4 + $0x103] sm:$0xff] }
 0x6d4   :  { %v6853_v4 = vadd.f32 %v12626_v62, %v6852_v24  ;;  %v5556_v6 = vpop.permute.xlu0 %5555 }
 0x6d5   :  { %5722 = vst.msk [vmem:[#allocation5 + $0xb8] sm:$0xff] %vm5698_vm10, %v5556_v6  ;;  %v5558_v7 = vpop.permute.xlu2 %5557  ;;  %v4218_v8 = vld [vmem:[#allocation3 + $0x1c0] sm:$0xff]  ;;  %v4730_v9 = vadd.f32 %v12510_v35, %v4663_v28 }
 0x6d6   :  { %v7009_v30 = vmax.f32 %v6853_v4, 0.0  ;;  %6101 = vst.msk [vmem:[#allocation5 + $0xb8] sm:$0xff] %vm6077_vm11, %v5935_v5  ;;  %9037 = vmatmul.msk.f32.gmra.mxu3 %vm3762_vm6, %v4218_v8  ;;  %v5415_v4 = vld [vmem:[#allocation4 + $0x102] sm:$0xff] }
 0x6d7   :  { %6480 = vst.msk [vmem:[#allocation5 + $0xb8] sm:$0xff] %vm6456_vm12, %v6314_v47  ;;  %v4793_v10 = vmax.f32 %v4730_v9, 0.0 }
 0x6d8   :  { %7072 = vst.msk [vmem:[#allocation6 + $0x80] sm:$0xff] %vm6587_vm14, %v7009_v30 }
 0x6d9   :  { %4856 = vst.msk [vmem:[#allocation4 + $0x148] sm:$0xff] %vm4620_vm7, %v4793_v10  ;;  %5946 = vrot.lane.b32.xlu1 %v5791_v11, %s9150_s14  ;;  %v4557_v20 = vpop.f32.mrf.mxu1 }
 0x6da   :  { %5567 = vrot.lane.b32.xlu0 %v5412_v12, %s9148_s12 }
 0x6db   :  { %5188 = vrot.lane.b32.xlu2 %v5033_v16, %s9151_s15  ;;  %v3541_v17 = vpop.permute.xlu1 %3540 }
 0x6dc   :  { %v3099_v51 = vpop.permute.xlu0 %3098  ;;  %3681 = vst.msk [vmem:[#allocation3 + $0x180] sm:$0xff] %vm3191_vm4, %v3541_v17 }
 0x6dd   :  { %v3101_v18 = vpop.permute.xlu2 %3100  ;;  %3240 = vst.msk [vmem:[#allocation2 + $0x180] sm:$0xff] %vm3191_vm4, %v3099_v51 }
 0x6de   :  { %v6543_v19 = vld [vmem:[#allocation5 + $0xb8] sm:$0xff]  ;;  %3241 = vst.msk [vmem:[#allocation2 + $0x188] sm:$0xff] %vm3191_vm4, %v3101_v18  ;;  %v5416_v18 = vld [vmem:[#allocation4 + $0x10a] sm:$0xff] }
 0x6df   :  { %9068 = vmatmul.msk.f32.gmra.mxu2 %vm6593_vm13, %v6543_v19  ;;  %v5037_v19 = vld [vmem:[#allocation4 + $0x109] sm:$0xff] }
 0x6e0   :  { %v4919_v31 = vld [vmem:[#allocation4 + $0x148] sm:$0xff] }
 0x6e1   :  { %5569 = vrot.lane.b32.xlu1 %v5413_v21, %s9148_s12  ;;  %v4099_v27 = vpop.f32.mrf.mxu0  ;;  %4982 = vst.msk [vmem:[#allocation5 + $0x148] sm:$0xff] %vm4620_vm7, %v4919_v31  ;;  %v12872_v31 = vld [vmem:[%s14275_s2] ss:$0 sm:$0xff] }
 0x6e2   :  { %5190 = vrot.lane.b32.xlu0 %v5034_v22, %s9151_s15  ;;  %v4664_v32 = vmax.f32 %v4099_v27, %v4557_v20  ;;  %v6173_v20 = vld [vmem:[#allocation4 + $0x104] sm:$0xff] }
 0x6e3   :  { %6325 = vrot.lane.b32.xlu2 %v6170_v26, %s9152_s20  ;;  %v5179_v34 = vpop.permute.xlu1 %5178  ;;  %v4210_v36 = vld [vmem:[#allocation3 + $0x180] sm:$0xff] }
 0x6e4   :  { %v3559_v33 = vpop.permute.xlu0 %3558  ;;  %v4731_v15 = vadd.f32 %v12510_v35, %v4664_v32  ;;  %v3744_v38 = vld [vmem:[#allocation2 + $0x180] sm:$0xff]  ;;  %9029 = vmatmul.msk.f32.gmra.mxu1 %vm3762_vm6, %v4210_v36  ;;  %5344 = vst.msk [vmem:[#allocation5 + $0xc0] sm:$0xff] %vm5319_vm9, %v5179_v34 }
 0x6e5   :  { %3690 = vst.msk [vmem:[#allocation3 + $0x1c8] sm:$0xff] %vm3191_vm4, %v3559_v33  ;;  %v3561_v37 = vpop.permute.xlu2 %3560  ;;  %8965 = vmatmul.msk.f32.gmra.mxu0 %vm3762_vm6, %v3744_v38  ;;  %v3745_v46 = vld [vmem:[#allocation2 + $0x188] sm:$0xff]  ;;  %v6174_v36 = vld [vmem:[#allocation4 + $0x10c] sm:$0xff] }
 0x6e6   :  { %v4794_v39 = vmax.f32 %v4731_v15, 0.0  ;;  %5723 = vst.msk [vmem:[#allocation5 + $0xc0] sm:$0xff] %vm5698_vm10, %v5558_v7  ;;  %v5036_v7 = vld [vmem:[#allocation4 + $0x101] sm:$0xff]  ;;  %v5038_v15 = vld [vmem:[#allocation4 + $0x111] sm:$0xff] }
 0x6e7   :  { %v5795_v38 = vld [vmem:[#allocation4 + $0x10b] sm:$0xff] }
 0x6e8   :  { %4857 = vst.msk [vmem:[#allocation4 + $0x150] sm:$0xff] %vm4620_vm7, %v4794_v39  ;;  %v6855_v40 = vpop.f32.mrf.mxu2 }
 0x6e9   :  { %v6856_v58 = vadd.f32 %v12626_v62, %v6855_v40  ;;  %5192 = vrot.lane.b32.xlu1 %v5035_v43, %s9151_s15  ;;  %v4102_v2 = vpop.f32.mrf.mxu0 }
 0x6ea   :  { %6327 = vrot.lane.b32.xlu0 %v6171_v42, %s9152_s20 }
 0x6eb   :  { %5948 = vrot.lane.b32.xlu2 %v5792_v45, %s9150_s14  ;;  %v7010_v47 = vmax.f32 %v6856_v58, 0.0  ;;  %v6316_v49 = vpop.permute.xlu1 %6315 }
 0x6ec   :  { %v5937_v48 = vpop.permute.xlu0 %5936  ;;  %v4219_v50 = vld [vmem:[#allocation3 + $0x1c8] sm:$0xff] }
 0x6ed   :  { %6102 = vst.msk [vmem:[#allocation5 + $0xc0] sm:$0xff] %vm6077_vm11, %v5937_v48  ;;  %v5939_v53 = vpop.permute.xlu2 %5938  ;;  %9038 = vmatmul.msk.f32.gmra.mxu3 %vm3762_vm6, %v4219_v50  ;;  %8966 = vmatmul.msk.f32.gmra.mxu0 %vm3762_vm6, %v3745_v46 }
 0x6ee   :  { %7073 = vst.msk [vmem:[#allocation6 + $0x88] sm:$0xff] %vm6587_vm14, %v7010_v47 }
 0x6ef   :  { %6481 = vst.msk [vmem:[#allocation5 + $0xc0] sm:$0xff] %vm6456_vm12, %v6316_v49  ;;  %v4920_v56 = vld [vmem:[#allocation4 + $0x150] sm:$0xff] }
 0x6f0   :  { %4983 = vst.msk [vmem:[#allocation5 + $0x150] sm:$0xff] %vm4620_vm7, %v4920_v56  ;;  %v12850_v28 = vpop.f32.mrf.mxu3  ;;  %v5417_v56 = vld [vmem:[#allocation4 + $0x112] sm:$0xff] }
 0x6f1   :  { %6329 = vrot.lane.b32.xlu1 %v6172_v55, %s9152_s20 }
 0x6f2   :  { %5950 = vrot.lane.b32.xlu0 %v5793_v54, %s9150_s14  ;;  %v6175_v54 = vld [vmem:[#allocation4 + $0x114] sm:$0xff] }
 0x6f3   :  { %5571 = vrot.lane.b32.xlu2 %v5414_v59, %s9148_s12  ;;  %v2741_v61 = vpop.permute.xlu1 %2740 }
 0x6f4   :  { %v3543_v60 = vpop.permute.xlu0 %3542  ;;  %2871 = vst.msk [vmem:[#allocation3 + $0x1d0] sm:$0xff] %vm2371_vm3, %v2741_v61 }
 0x6f5   :  { %3682 = vst.msk [vmem:[#allocation3 + $0x188] sm:$0xff] %vm3191_vm4, %v3543_v60  ;;  %v3545_v63 = vpop.permute.xlu2 %3544 }
 0x6f6   :  { %v6544_v1 = vld [vmem:[#allocation5 + $0xc0] sm:$0xff]  ;;  %3691 = vst.msk [vmem:[#allocation3 + $0x1d0] sm:$0xff] %vm3191_vm4, %v3561_v37 }
 0x6f7   :  { %9069 = vmatmul.msk.f32.gmra.mxu2 %vm6593_vm13, %v6544_v1  ;;  %3683 = vst.msk [vmem:[#allocation3 + $0x190] sm:$0xff] %vm3191_vm4, %v3545_v63 }
 0x6f9   :  { %v6858_v24 = vpop.f32.mrf.mxu2  ;;  %5952 = vrot.lane.b32.xlu1 %v5794_v25, %s9150_s14 }
 0x6fa   :  { %v6859_v5 = vadd.f32 %v12626_v62, %v6858_v24  ;;  %v4560_v6 = vpop.f32.mrf.mxu1  ;;  %5573 = vrot.lane.b32.xlu0 %v5415_v4, %s9148_s12  ;;  %v5418_v24 = vld [vmem:[#allocation4 + $0x11a] sm:$0xff] }
 0x6fb   :  { %v4665_v8 = vmax.f32 %v4102_v2, %v4560_v6  ;;  %5194 = vrot.lane.b32.xlu2 %v5036_v7, %s9151_s15  ;;  %v5560_v9 = vpop.permute.xlu1 %5559  ;;  %v5797_v2 = vld [vmem:[#allocation4 + $0x11b] sm:$0xff] }
 0x6fc   :  { %v7011_v30 = vmax.f32 %v6859_v5, 0.0  ;;  %v5181_v10 = vpop.permute.xlu0 %5180  ;;  %v4211_v11 = vld [vmem:[#allocation3 + $0x188] sm:$0xff]  ;;  %v5039_v5 = vld [vmem:[#allocation4 + $0x119] sm:$0xff] }
 0x6fd   :  { %v4732_v12 = vadd.f32 %v12510_v35, %v4665_v8  ;;  %5345 = vst.msk [vmem:[#allocation5 + $0xc8] sm:$0xff] %vm5319_vm9, %v5181_v10  ;;  %v5183_v16 = vpop.permute.xlu2 %5182  ;;  %9030 = vmatmul.msk.f32.gmra.mxu1 %vm3762_vm6, %v4211_v11  ;;  %v4220_v17 = vld [vmem:[#allocation3 + $0x1d0] sm:$0xff] }
 0x6fe   :  { %7074 = vst.msk [vmem:[#allocation6 + $0x90] sm:$0xff] %vm6587_vm14, %v7011_v30  ;;  %9039 = vmatmul.msk.f32.gmra.mxu3 %vm3762_vm6, %v4220_v17  ;;  %v4212_v21 = vld [vmem:[#allocation3 + $0x190] sm:$0xff] }
 0x6ff   :  { %v4795_v51 = vmax.f32 %v4732_v12, 0.0  ;;  %5724 = vst.msk [vmem:[#allocation5 + $0xc8] sm:$0xff] %vm5698_vm10, %v5560_v9  ;;  %v5040_v12 = vld [vmem:[#allocation4 + $0x121] sm:$0xff] }
 0x700   :  { %6103 = vst.msk [vmem:[#allocation5 + $0xc8] sm:$0xff] %vm6077_vm11, %v5939_v53  ;;  %v5796_v53 = vld [vmem:[#allocation4 + $0x113] sm:$0xff] }
 0x701   :  { %4858 = vst.msk [vmem:[#allocation4 + $0x158] sm:$0xff] %vm4620_vm7, %v4795_v51  ;;  %v4587_v35 = vpop.f32.mrf.mxu3  ;;  %5575 = vrot.lane.b32.xlu1 %v5416_v18, %s9148_s12  ;;  %v6176_v51 = vld [vmem:[#allocation4 + $0x11c] sm:$0xff] }
 0x702   :  { %5346 = vst.msk [vmem:[#allocation5 + $0xd0] sm:$0xff] %vm5319_vm9, %v5183_v16  ;;  %5196 = vrot.lane.b32.xlu0 %v5037_v19, %s9151_s15  ;;  %v4674_v22 = vmax.f32 %v12715_v3, %v4587_v35  ;;  %v4563_v3 = vpop.f32.mrf.mxu1 }
 0x703   :  { %6331 = vrot.lane.b32.xlu2 %v6173_v20, %s9152_s20  ;;  %v3103_v26 = vpop.permute.xlu1 %3102 }
 0x704   :  { %v6318_v27 = vpop.permute.xlu0 %6317  ;;  %v4741_v32 = vadd.f32 %v12872_v31, %v4674_v22  ;;  %3242 = vst.msk [vmem:[#allocation2 + $0x190] sm:$0xff] %vm3191_vm4, %v3103_v26 }
 0x705   :  { %v6320_v33 = vpop.permute.xlu2 %6319  ;;  %9031 = vmatmul.msk.f32.gmra.mxu1 %vm3762_vm6, %v4212_v21  ;;  %6482 = vst.msk [vmem:[#allocation5 + $0xc8] sm:$0xff] %vm6456_vm12, %v6318_v27 }
 0x706   :  { %v4804_v34 = vmax.f32 %v4741_v32, 0.0 }
 0x708   :  { %4867 = vst.msk [vmem:[#allocation4 + $0x1a0] sm:$0xff] %vm4620_vm7, %v4804_v34  ;;  %v4921_v37 = vld [vmem:[#allocation4 + $0x158] sm:$0xff] }
 0x709   :  { %5198 = vrot.lane.b32.xlu1 %v5038_v15, %s9151_s15  ;;  %v4105_v39 = vpop.f32.mrf.mxu0  ;;  %4984 = vst.msk [vmem:[#allocation5 + $0x158] sm:$0xff] %vm4620_vm7, %v4921_v37  ;;  %v5798_v37 = vld [vmem:[#allocation4 + $0x123] sm:$0xff] }
 0x70a   :  { %6333 = vrot.lane.b32.xlu0 %v6174_v36, %s9152_s20  ;;  %v4666_v40 = vmax.f32 %v4105_v39, %v4563_v3  ;;  %v6177_v3 = vld [vmem:[#allocation4 + $0x124] sm:$0xff] }
 0x70b   :  { %5954 = vrot.lane.b32.xlu2 %v5795_v38, %s9150_s14  ;;  %v3563_v42 = vpop.permute.xlu1 %3562  ;;  %v3746_v58 = vld [vmem:[#allocation2 + $0x190] sm:$0xff]  ;;  %v5041_v36 = vld [vmem:[#allocation4 + $0x129] sm:$0xff] }
 0x70c   :  { %v2743_v43 = vpop.permute.xlu0 %2742  ;;  %v4733_v45 = vadd.f32 %v12872_v31, %v4666_v40  ;;  %8967 = vmatmul.msk.f32.gmra.mxu0 %vm3762_vm6, %v3746_v58  ;;  %v6545_v47 = vld [vmem:[#allocation5 + $0xc8] sm:$0xff] }
 0x70d   :  { %2872 = vst.msk [vmem:[#allocation3 + $0x1d8] sm:$0xff] %vm2371_vm3, %v2743_v43  ;;  %v5185_v46 = vpop.permute.xlu2 %5184  ;;  %9070 = vmatmul.msk.f32.gmra.mxu2 %vm6593_vm13, %v6545_v47  ;;  %v5799_v58 = vld [vmem:[#allocation4 + $0x12b] sm:$0xff] }
 0x70e   :  { %3692 = vst.msk [vmem:[#allocation3 + $0x1d8] sm:$0xff] %vm3191_vm4, %v3563_v42  ;;  %v4796_v48 = vmax.f32 %v4733_v45, 0.0  ;;  %v6178_v45 = vld [vmem:[#allocation4 + $0x12c] sm:$0xff] }
 0x70f   :  { %5347 = vst.msk [vmem:[#allocation5 + $0xd8] sm:$0xff] %vm5319_vm9, %v5185_v46  ;;  %v4930_v49 = vld [vmem:[#allocation4 + $0x1a0] sm:$0xff]  ;;  %v5420_v46 = vld [vmem:[#allocation4 + $0x12a] sm:$0xff] }
 0x710   :  { %4859 = vst.msk [vmem:[#allocation4 + $0x160] sm:$0xff] %vm4620_vm7, %v4796_v48  ;;  %v6861_v50 = vpop.f32.mrf.mxu2 }
 0x711   :  { %v6862_v55 = vadd.f32 %v12626_v62, %v6861_v50  ;;  %6335 = vrot.lane.b32.xlu1 %v6175_v54, %s9152_s20  ;;  %4993 = vst.msk [vmem:[#allocation5 + $0x1a0] sm:$0xff] %vm4620_vm7, %v4930_v49 }
 0x712   :  { %5956 = vrot.lane.b32.xlu0 %v5796_v53, %s9150_s14 }
 0x713   :  { %5577 = vrot.lane.b32.xlu2 %v5417_v56, %s9148_s12  ;;  %v7012_v59 = vmax.f32 %v6862_v55, 0.0  ;;  %v5941_v60 = vpop.permute.xlu1 %5940 }
 0x714   :  { %v5562_v61 = vpop.permute.xlu0 %5561 }
 0x715   :  { %5725 = vst.msk [vmem:[#allocation5 + $0xd0] sm:$0xff] %vm5698_vm10, %v5562_v61  ;;  %v2727_v63 = vpop.permute.xlu2 %2726  ;;  %v4221_v1 = vld [vmem:[#allocation3 + $0x1d8] sm:$0xff]  ;;  %v5421_v61 = vld [vmem:[#allocation4 + $0x132] sm:$0xff] }
 0x716   :  { %7075 = vst.msk [vmem:[#allocation6 + $0x98] sm:$0xff] %vm6587_vm14, %v7012_v59  ;;  %9040 = vmatmul.msk.f32.gmra.mxu3 %vm3762_vm6, %v4221_v1 }
 0x717   :  { %6104 = vst.msk [vmem:[#allocation5 + $0xd0] sm:$0xff] %vm6077_vm11, %v5941_v60  ;;  %v4922_v25 = vld [vmem:[#allocation4 + $0x160] sm:$0xff]  ;;  %v5800_v60 = vld [vmem:[#allocation4 + $0x133] sm:$0xff] }
 0x718   :  { %6483 = vst.msk [vmem:[#allocation5 + $0xd0] sm:$0xff] %vm6456_vm12, %v6320_v33 }
 0x719   :  { %2864 = vst.msk [vmem:[#allocation3 + $0x198] sm:$0xff] %vm2371_vm3, %v2727_v63  ;;  %5958 = vrot.lane.b32.xlu1 %v5797_v2, %s9150_s14  ;;  %v5042_v2 = vld [vmem:[#allocation4 + $0x131] sm:$0xff] }
 0x71a   :  { %v4590_v4 = vpop.f32.mrf.mxu3  ;;  %5579 = vrot.lane.b32.xlu0 %v5418_v24, %s9148_s12  ;;  %4985 = vst.msk [vmem:[#allocation5 + $0x160] sm:$0xff] %vm4620_vm7, %v4922_v25 }
 0x71b   :  { %v4675_v6 = vmax.f32 %v12727_v13, %v4590_v4  ;;  %5200 = vrot.lane.b32.xlu2 %v5039_v5, %s9151_s15  ;;  %v3565_v7 = vpop.permute.xlu1 %3564  ;;  %v5419_v13 = vld [vmem:[#allocation4 + $0x122] sm:$0xff] }
 0x71c   :  { %v2745_v8 = vpop.permute.xlu0 %2744 }
 0x71d   :  { %v4742_v30 = vadd.f32 %v12872_v31, %v4675_v6  ;;  %2873 = vst.msk [vmem:[#allocation3 + $0x1e0] sm:$0xff] %vm2371_vm3, %v2745_v8  ;;  %v3547_v9 = vpop.permute.xlu2 %3546 }
 0x71e   :  { %3693 = vst.msk [vmem:[#allocation3 + $0x1e0] sm:$0xff] %vm3191_vm4, %v3565_v7 }
 0x71f   :  { %v4805_v10 = vmax.f32 %v4742_v30, 0.0  ;;  %3684 = vst.msk [vmem:[#allocation3 + $0x198] sm:$0xff] %vm3191_vm4, %v3547_v9  ;;  %v6546_v11 = vld [vmem:[#allocation5 + $0xd0] sm:$0xff]  ;;  %v5422_v9 = vld [vmem:[#allocation4 + $0x13a] sm:$0xff] }
 0x720   :  { %9071 = vmatmul.msk.f32.gmra.mxu2 %vm6593_vm13, %v6546_v11  ;;  %v6179_v11 = vld [vmem:[#allocation4 + $0x134] sm:$0xff] }
 0x721   :  { %4868 = vst.msk [vmem:[#allocation4 + $0x1a8] sm:$0xff] %vm4620_vm7, %v4805_v10  ;;  %v4566_v16 = vpop.f32.mrf.mxu1  ;;  %5581 = vrot.lane.b32.xlu1 %v5419_v13, %s9148_s12  ;;  %v5043_v10 = vld [vmem:[#allocation4 + $0x139] sm:$0xff] }
 0x722   :  { %v6864_v17 = vpop.f32.mrf.mxu2  ;;  %5202 = vrot.lane.b32.xlu0 %v5040_v12, %s9151_s15  ;;  %v4108_v19 = vpop.f32.mrf.mxu0 }
 0x723   :  { %v6865_v18 = vadd.f32 %v12626_v62, %v6864_v17  ;;  %6337 = vrot.lane.b32.xlu2 %v6176_v51, %s9152_s20  ;;  %v4667_v35 = vmax.f32 %v4108_v19, %v4566_v16  ;;  %v5943_v20 = vpop.permute.xlu1 %5942 }
 0x724   :  { %v5564_v21 = vpop.permute.xlu0 %5563 }
 0x725   :  { %v7013_v22 = vmax.f32 %v6865_v18, 0.0  ;;  %5726 = vst.msk [vmem:[#allocation5 + $0xd8] sm:$0xff] %vm5698_vm10, %v5564_v21  ;;  %v5187_v26 = vpop.permute.xlu2 %5186  ;;  %v4222_v27 = vld [vmem:[#allocation3 + $0x1e0] sm:$0xff]  ;;  %v4734_v32 = vadd.f32 %v12872_v31, %v4667_v35  ;;  %v6180_v21 = vld [vmem:[#allocation4 + $0x13c] sm:$0xff] }
 0x726   :  { %6105 = vst.msk [vmem:[#allocation5 + $0xd8] sm:$0xff] %vm6077_vm11, %v5943_v20  ;;  %9041 = vmatmul.msk.f32.gmra.mxu3 %vm3762_vm6, %v4222_v27  ;;  %v4213_v33 = vld [vmem:[#allocation3 + $0x198] sm:$0xff] }
 0x727   :  { %7076 = vst.msk [vmem:[#allocation6 + $0xa0] sm:$0xff] %vm6587_vm14, %v7013_v22  ;;  %9032 = vmatmul.msk.f32.gmra.mxu1 %vm3762_vm6, %v4213_v33  ;;  %v4797_v34 = vmax.f32 %v4734_v32, 0.0  ;;  %v5044_v22 = vld [vmem:[#allocation4 + $0x141] sm:$0xff] }
 0x728   :  { %5348 = vst.msk [vmem:[#allocation5 + $0xe0] sm:$0xff] %vm5319_vm9, %v5187_v26  ;;  %v4931_v15 = vld [vmem:[#allocation4 + $0x1a8] sm:$0xff] }
 0x729   :  { %4860 = vst.msk [vmem:[#allocation4 + $0x168] sm:$0xff] %vm4620_vm7, %v4797_v34  ;;  %5204 = vrot.lane.b32.xlu1 %v5041_v36, %s9151_s15 }
 0x72a   :  { %6339 = vrot.lane.b32.xlu0 %v6177_v3, %s9152_s20  ;;  %4994 = vst.msk [vmem:[#allocation5 + $0x1a8] sm:$0xff] %vm4620_vm7, %v4931_v15  ;;  %v4111_v56 = vpop.f32.mrf.mxu0 }
 0x72b   :  { %5960 = vrot.lane.b32.xlu2 %v5798_v37, %s9150_s14  ;;  %v3105_v38 = vpop.permute.xlu1 %3104 }
 0x72c   :  { %v6322_v39 = vpop.permute.xlu0 %6321  ;;  %3243 = vst.msk [vmem:[#allocation2 + $0x198] sm:$0xff] %vm3191_vm4, %v3105_v38  ;;  %v5802_v38 = vld [vmem:[#allocation4 + $0x143] sm:$0xff] }
 0x72d   :  { %v6324_v40 = vpop.permute.xlu2 %6323  ;;  %6484 = vst.msk [vmem:[#allocation5 + $0xd8] sm:$0xff] %vm6456_vm12, %v6322_v39  ;;  %v6181_v39 = vld [vmem:[#allocation4 + $0x144] sm:$0xff] }
 0x730   :  { %v4593_v42 = vpop.f32.mrf.mxu3  ;;  %v4923_v47 = vld [vmem:[#allocation4 + $0x168] sm:$0xff] }
 0x731   :  { %v4676_v43 = vmax.f32 %v12745_v29, %v4593_v42  ;;  %6341 = vrot.lane.b32.xlu1 %v6178_v45, %s9152_s20  ;;  %4986 = vst.msk [vmem:[#allocation5 + $0x168] sm:$0xff] %vm4620_vm7, %v4923_v47  ;;  %v5423_v42 = vld [vmem:[#allocation4 + $0x142] sm:$0xff] }
 0x732   :  { %5962 = vrot.lane.b32.xlu0 %v5799_v58, %s9150_s14  ;;  %v12978_v58 = vld [vmem:[%s14277_s4] ss:$0 sm:$0xff] }
 0x733   :  { %v4743_v48 = vadd.f32 %v12872_v31, %v4676_v43  ;;  %5583 = vrot.lane.b32.xlu2 %v5420_v46, %s9148_s12  ;;  %v3567_v49 = vpop.permute.xlu1 %3566  ;;  %v3747_v53 = vld [vmem:[#allocation2 + $0x198] sm:$0xff] }
 0x734   :  { %v2747_v50 = vpop.permute.xlu0 %2746  ;;  %8968 = vmatmul.msk.f32.gmra.mxu0 %vm3762_vm6, %v3747_v53  ;;  %v6547_v55 = vld [vmem:[#allocation5 + $0xd8] sm:$0xff] }
 0x735   :  { %v4806_v54 = vmax.f32 %v4743_v48, 0.0  ;;  %2874 = vst.msk [vmem:[#allocation3 + $0x1e8] sm:$0xff] %vm2371_vm3, %v2747_v50  ;;  %v5189_v29 = vpop.permute.xlu2 %5188  ;;  %9072 = vmatmul.msk.f32.gmra.mxu2 %vm6593_vm13, %v6547_v55 }
 0x736   :  { %3694 = vst.msk [vmem:[#allocation3 + $0x1e8] sm:$0xff] %vm3191_vm4, %v3567_v49 }
 0x737   :  { %4869 = vst.msk [vmem:[#allocation4 + $0x1b0] sm:$0xff] %vm4620_vm7, %v4806_v54  ;;  %v5803_v54 = vld [vmem:[#allocation4 + $0x14b] sm:$0xff] }
 0x738   :  { %5349 = vst.msk [vmem:[#allocation5 + $0xe8] sm:$0xff] %vm5319_vm9, %v5189_v29  ;;  %v5424_v29 = vld [vmem:[#allocation4 + $0x14a] sm:$0xff] }
 0x739   :  { %v6867_v59 = vpop.f32.mrf.mxu2  ;;  %5964 = vrot.lane.b32.xlu1 %v5800_v60, %s9150_s14 }
 0x73a   :  { %v6868_v63 = vadd.f32 %v12626_v62, %v6867_v59  ;;  %v4569_v1 = vpop.f32.mrf.mxu1  ;;  %5585 = vrot.lane.b32.xlu0 %v5421_v61, %s9148_s12  ;;  %v5045_v59 = vld [vmem:[#allocation4 + $0x149] sm:$0xff] }
 0x73b   :  { %v4668_v24 = vmax.f32 %v4111_v56, %v4569_v1  ;;  %5206 = vrot.lane.b32.xlu2 %v5042_v2, %s9151_s15  ;;  %v5945_v4 = vpop.permute.xlu1 %5944 }
 0x73c   :  { %v7014_v25 = vmax.f32 %v6868_v63, 0.0  ;;  %v5566_v5 = vpop.permute.xlu0 %5565 }
 0x73d   :  { %v4735_v6 = vadd.f32 %v12872_v31, %v4668_v24  ;;  %5727 = vst.msk [vmem:[#allocation5 + $0xe0] sm:$0xff] %vm5698_vm10, %v5566_v5  ;;  %v6326_v7 = vpop.permute.xlu2 %6325  ;;  %v4223_v8 = vld [vmem:[#allocation3 + $0x1e8] sm:$0xff] }
 0x73e   :  { %7077 = vst.msk [vmem:[#allocation6 + $0xa8] sm:$0xff] %vm6587_vm14, %v7014_v25  ;;  %9042 = vmatmul.msk.f32.gmra.mxu3 %vm3762_vm6, %v4223_v8  ;;  %v4932_v30 = vld [vmem:[#allocation4 + $0x1b0] sm:$0xff] }
 0x73f   :  { %v4798_v62 = vmax.f32 %v4735_v6, 0.0  ;;  %6106 = vst.msk [vmem:[#allocation5 + $0xe0] sm:$0xff] %vm6077_vm11, %v5945_v4  ;;  %v5046_v24 = vld [vmem:[#allocation4 + $0x151] sm:$0xff] }
 0x740   :  { %6485 = vst.msk [vmem:[#allocation5 + $0xe0] sm:$0xff] %vm6456_vm12, %v6324_v40  ;;  %v6182_v5 = vld [vmem:[#allocation4 + $0x14c] sm:$0xff] }
 0x741   :  { %4861 = vst.msk [vmem:[#allocation4 + $0x170] sm:$0xff] %vm4620_vm7, %v4798_v62  ;;  %5587 = vrot.lane.b32.xlu1 %v5422_v9, %s9148_s12 }
 0x742   :  { %5208 = vrot.lane.b32.xlu0 %v5043_v10, %s9151_s15  ;;  %4995 = vst.msk [vmem:[#allocation5 + $0x1b0] sm:$0xff] %vm4620_vm7, %v4932_v30  ;;  %v4596_v13 = vpop.f32.mrf.mxu3  ;;  %v4572_v20 = vpop.f32.mrf.mxu1 }
 0x743   :  { %6343 = vrot.lane.b32.xlu2 %v6179_v11, %s9152_s20  ;;  %v4677_v12 = vmax.f32 %v12766_v41, %v4596_v13  ;;  %v3569_v16 = vpop.permute.xlu1 %3568  ;;  %v5801_v41 = vld [vmem:[#allocation4 + $0x13b] sm:$0xff] }
 0x744   :  { %v2749_v17 = vpop.permute.xlu0 %2748  ;;  %v6183_v13 = vld [vmem:[#allocation4 + $0x154] sm:$0xff] }
 0x745   :  { %2875 = vst.msk [vmem:[#allocation3 + $0x1f0] sm:$0xff] %vm2371_vm3, %v2749_v17  ;;  %v5949_v51 = vpop.permute.xlu2 %5948  ;;  %v4744_v18 = vadd.f32 %v12872_v31, %v4677_v12  ;;  %v5047_v12 = vld [vmem:[#allocation4 + $0x159] sm:$0xff]  ;;  %vm7345_vm3 = vcmask 786048  }
 0x746   :  { %3695 = vst.msk [vmem:[#allocation3 + $0x1f0] sm:$0xff] %vm3191_vm4, %v3569_v16  ;;  %v5804_v17 = vld [vmem:[#allocation4 + $0x153] sm:$0xff]  ;;  %vm7384_vm4 = vcmask 917248  }
 0x747   :  { %v6548_v19 = vld [vmem:[#allocation5 + $0xe0] sm:$0xff]  ;;  %v4807_v35 = vmax.f32 %v4744_v18, 0.0 }
 0x748   :  { %9073 = vmatmul.msk.f32.gmra.mxu2 %vm6593_vm13, %v6548_v19  ;;  %v4924_v26 = vld [vmem:[#allocation4 + $0x170] sm:$0xff] }
 0x749   :  { %4870 = vst.msk [vmem:[#allocation4 + $0x1b8] sm:$0xff] %vm4620_vm7, %v4807_v35  ;;  %5210 = vrot.lane.b32.xlu1 %v5044_v22, %s9151_s15  ;;  %v4114_v27 = vpop.f32.mrf.mxu0  ;;  %v5805_v22 = vld [vmem:[#allocation4 + $0x15b] sm:$0xff] }
 0x74a   :  { %6345 = vrot.lane.b32.xlu0 %v6180_v21, %s9152_s20  ;;  %v4669_v32 = vmax.f32 %v4114_v27, %v4572_v20  ;;  %4987 = vst.msk [vmem:[#allocation5 + $0x170] sm:$0xff] %vm4620_vm7, %v4924_v26  ;;  %v6184_v26 = vld [vmem:[#allocation4 + $0x15c] sm:$0xff] }
 0x74b   :  { %5966 = vrot.lane.b32.xlu2 %v5801_v41, %s9150_s14  ;;  %v5947_v33 = vpop.permute.xlu1 %5946  ;;  %v5426_v41 = vld [vmem:[#allocation4 + $0x15a] sm:$0xff] }
 0x74c   :  { %v5568_v34 = vpop.permute.xlu0 %5567  ;;  %v4736_v3 = vadd.f32 %v12872_v31, %v4669_v32 }
 0x74d   :  { %5728 = vst.msk [vmem:[#allocation5 + $0xe8] sm:$0xff] %vm5698_vm10, %v5568_v34  ;;  %v5572_v36 = vpop.permute.xlu2 %5571  ;;  %v4224_v15 = vld [vmem:[#allocation3 + $0x1f0] sm:$0xff] }
 0x74e   :  { %6107 = vst.msk [vmem:[#allocation5 + $0xe8] sm:$0xff] %vm6077_vm11, %v5947_v33  ;;  %9043 = vmatmul.msk.f32.gmra.mxu3 %vm3762_vm6, %v4224_v15  ;;  %v4799_v37 = vmax.f32 %v4736_v3, 0.0 }
 0x74f   :  { %6486 = vst.msk [vmem:[#allocation5 + $0xe8] sm:$0xff] %vm6456_vm12, %v6326_v7 }
 0x750   :  { %4862 = vst.msk [vmem:[#allocation4 + $0x178] sm:$0xff] %vm4620_vm7, %v4799_v37  ;;  %v6870_v40 = vpop.f32.mrf.mxu2  ;;  %v4933_v43 = vld [vmem:[#allocation4 + $0x1b8] sm:$0xff]  ;;  %v5056_v37 = vld [vmem:[#allocation4 + $0x1a1] sm:$0xff] }
 0x751   :  { %6347 = vrot.lane.b32.xlu1 %v6181_v39, %s9152_s20  ;;  %v6871_v45 = vadd.f32 %v12978_v58, %v6870_v40  ;;  %4996 = vst.msk [vmem:[#allocation5 + $0x1b8] sm:$0xff] %vm4620_vm7, %v4933_v43 }
 0x752   :  { %5968 = vrot.lane.b32.xlu0 %v5802_v38, %s9150_s14  ;;  %v5427_v38 = vld [vmem:[#allocation4 + $0x162] sm:$0xff] }
 0x753   :  { %5589 = vrot.lane.b32.xlu2 %v5423_v42, %s9148_s12  ;;  %v5570_v46 = vpop.permute.xlu1 %5569  ;;  %v7015_v48 = vmax.f32 %v6871_v45, 0.0  ;;  %v5048_v42 = vld [vmem:[#allocation4 + $0x161] sm:$0xff] }
 0x754   :  { %v5191_v47 = vpop.permute.xlu0 %5190 }
 0x755   :  { %5350 = vst.msk [vmem:[#allocation5 + $0xf0] sm:$0xff] %vm5319_vm9, %v5191_v47  ;;  %v5195_v49 = vpop.permute.xlu2 %5194 }
 0x756   :  { %5729 = vst.msk [vmem:[#allocation5 + $0xf0] sm:$0xff] %vm5698_vm10, %v5570_v46  ;;  %v6549_v50 = vld [vmem:[#allocation5 + $0xe8] sm:$0xff] }
 0x757   :  { %7078 = vst.msk [vmem:[#allocation6 + $0xb0] sm:$0xff] %vm6587_vm14, %v7015_v48  ;;  %9074 = vmatmul.msk.f32.gmra.mxu2 %vm6593_vm13, %v6549_v50  ;;  %v4925_v55 = vld [vmem:[#allocation4 + $0x178] sm:$0xff] }
 0x758   :  { %6108 = vst.msk [vmem:[#allocation5 + $0xf0] sm:$0xff] %vm6077_vm11, %v5949_v51 }
 0x759   :  { %5352 = vst.msk [vmem:[#allocation5 + $0x100] sm:$0xff] %vm5319_vm9, %v5195_v49  ;;  %v4599_v53 = vpop.f32.mrf.mxu3  ;;  %5970 = vrot.lane.b32.xlu1 %v5803_v54, %s9150_s14 }
 0x75a   :  { %v4678_v56 = vmax.f32 %v12776_v52, %v4599_v53  ;;  %5591 = vrot.lane.b32.xlu0 %v5424_v29, %s9148_s12  ;;  %4988 = vst.msk [vmem:[#allocation5 + $0x178] sm:$0xff] %vm4620_vm7, %v4925_v55  ;;  %v5425_v52 = vld [vmem:[#allocation4 + $0x152] sm:$0xff]  ;;  %v5806_v29 = vld [vmem:[#allocation4 + $0x163] sm:$0xff] }
 0x75b   :  { %5212 = vrot.lane.b32.xlu2 %v5045_v59, %s9151_s15  ;;  %v5193_v63 = vpop.permute.xlu1 %5192  ;;  %v5814_v55 = vld [vmem:[#allocation4 + $0x1a3] sm:$0xff] }
 0x75c   :  { %v4745_v60 = vadd.f32 %v12872_v31, %v4678_v56  ;;  %v6328_v61 = vpop.permute.xlu0 %6327  ;;  %5351 = vst.msk [vmem:[#allocation5 + $0xf8] sm:$0xff] %vm5319_vm9, %v5193_v63  ;;  %v5435_v59 = vld [vmem:[#allocation4 + $0x1a2] sm:$0xff] }
 0x75d   :  { %6487 = vst.msk [vmem:[#allocation5 + $0xf0] sm:$0xff] %vm6456_vm12, %v6328_v61  ;;  %v6332_v1 = vpop.permute.xlu2 %6331 }
 0x75e   :  { %v4808_v2 = vmax.f32 %v4745_v60, 0.0  ;;  %5730 = vst.msk [vmem:[#allocation5 + $0xf8] sm:$0xff] %vm5698_vm10, %v5572_v36 }
 0x760   :  { %4871 = vst.msk [vmem:[#allocation4 + $0x1c0] sm:$0xff] %vm4620_vm7, %v4808_v2 }
 0x761   :  { %v4575_v25 = vpop.f32.mrf.mxu1  ;;  %5593 = vrot.lane.b32.xlu1 %v5425_v52, %s9148_s12 }
 0x762   :  { %v6873_v4 = vpop.f32.mrf.mxu2  ;;  %5214 = vrot.lane.b32.xlu0 %v5046_v24, %s9151_s15  ;;  %v4117_v6 = vpop.f32.mrf.mxu0 }
 0x763   :  { %6349 = vrot.lane.b32.xlu2 %v6182_v5, %s9152_s20  ;;  %v4670_v7 = vmax.f32 %v4117_v6, %v4575_v25  ;;  %v6330_v62 = vpop.permute.xlu1 %6329  ;;  %v6193_v4 = vld [vmem:[#allocation4 + $0x1a4] sm:$0xff] }
 0x764   :  { %v5951_v8 = vpop.permute.xlu0 %5950  ;;  %v6550_v30 = vld [vmem:[#allocation5 + $0xf0] sm:$0xff]  ;;  %v6185_v6 = vld [vmem:[#allocation4 + $0x164] sm:$0xff] }
 0x765   :  { %6109 = vst.msk [vmem:[#allocation5 + $0xf8] sm:$0xff] %vm6077_vm11, %v5951_v8  ;;  %v5955_v9 = vpop.permute.xlu2 %5954  ;;  %9075 = vmatmul.msk.f32.gmra.mxu2 %vm6593_vm13, %v6550_v30  ;;  %v4737_v10 = vadd.f32 %v12872_v31, %v4670_v7 }
 0x766   :  { %6488 = vst.msk [vmem:[#allocation5 + $0xf8] sm:$0xff] %vm6456_vm12, %v6330_v62 }
 0x767   :  { %v4800_v11 = vmax.f32 %v4737_v10, 0.0  ;;  %v4934_v16 = vld [vmem:[#allocation4 + $0x1c0] sm:$0xff] }
 0x768   :  { %4997 = vst.msk [vmem:[#allocation5 + $0x1c0] sm:$0xff] %vm4620_vm7, %v4934_v16  ;;  %v5428_v16 = vld [vmem:[#allocation4 + $0x16a] sm:$0xff] }
 0x769   :  { %4863 = vst.msk [vmem:[#allocation4 + $0x180] sm:$0xff] %vm4620_vm7, %v4800_v11  ;;  %5216 = vrot.lane.b32.xlu1 %v5047_v12, %s9151_s15 }
 0x76a   :  { %6351 = vrot.lane.b32.xlu0 %v6183_v13, %s9152_s20  ;;  %v4120_v15 = vpop.f32.mrf.mxu0 }
 0x76b   :  { %5972 = vrot.lane.b32.xlu2 %v5804_v17, %s9150_s14  ;;  %v5953_v51 = vpop.permute.xlu1 %5952  ;;  %v5436_v17 = vld [vmem:[#allocation4 + $0x1aa] sm:$0xff] }
 0x76c   :  { %v5574_v18 = vpop.permute.xlu0 %5573 }
 0x76d   :  { %5731 = vst.msk [vmem:[#allocation5 + $0x100] sm:$0xff] %vm5698_vm10, %v5574_v18  ;;  %v5578_v19 = vpop.permute.xlu2 %5577  ;;  %v6551_v35 = vld [vmem:[#allocation5 + $0xf8] sm:$0xff] }
 0x76e   :  { %6110 = vst.msk [vmem:[#allocation5 + $0x100] sm:$0xff] %vm6077_vm11, %v5953_v51  ;;  %9076 = vmatmul.msk.f32.gmra.mxu2 %vm6593_vm13, %v6551_v35 }
 0x76f   :  { %6489 = vst.msk [vmem:[#allocation5 + $0x100] sm:$0xff] %vm6456_vm12, %v6332_v1 }
 0x770   :  { %v4602_v20 = vpop.f32.mrf.mxu3  ;;  %v4926_v27 = vld [vmem:[#allocation4 + $0x180] sm:$0xff] }
 0x771   :  { %v4679_v21 = vmax.f32 %v12792_v0, %v4602_v20  ;;  %6353 = vrot.lane.b32.xlu1 %v6184_v26, %s9152_s20  ;;  %4989 = vst.msk [vmem:[#allocation5 + $0x180] sm:$0xff] %vm4620_vm7, %v4926_v27  ;;  %v5815_v27 = vld [vmem:[#allocation4 + $0x1ab] sm:$0xff] }
 0x772   :  { %5974 = vrot.lane.b32.xlu0 %v5805_v22, %s9150_s14 }
 0x773   :  { %v4746_v32 = vadd.f32 %v12872_v31, %v4679_v21  ;;  %5595 = vrot.lane.b32.xlu2 %v5426_v41, %s9148_s12  ;;  %v5576_v33 = vpop.permute.xlu1 %5575 }
 0x774   :  { %v5197_v34 = vpop.permute.xlu0 %5196 }
 0x775   :  { %v4809_v3 = vmax.f32 %v4746_v32, 0.0  ;;  %5353 = vst.msk [vmem:[#allocation5 + $0x108] sm:$0xff] %vm5319_vm9, %v5197_v34  ;;  %v5201_v0 = vpop.permute.xlu2 %5200  ;;  %v6186_v32 = vld [vmem:[#allocation4 + $0x16c] sm:$0xff] }
 0x776   :  { %5732 = vst.msk [vmem:[#allocation5 + $0x108] sm:$0xff] %vm5698_vm10, %v5576_v33  ;;  %v6552_v36 = vld [vmem:[#allocation5 + $0x100] sm:$0xff] }
 0x777   :  { %4872 = vst.msk [vmem:[#allocation4 + $0x1c8] sm:$0xff] %vm4620_vm7, %v4809_v3  ;;  %9077 = vmatmul.msk.f32.gmra.mxu2 %vm6593_vm13, %v6552_v36  ;;  %v5807_v3 = vld [vmem:[#allocation4 + $0x16b] sm:$0xff] }
 0x778   :  { %6111 = vst.msk [vmem:[#allocation5 + $0x108] sm:$0xff] %vm6077_vm11, %v5955_v9 }
 0x779   :  { %5355 = vst.msk [vmem:[#allocation5 + $0x118] sm:$0xff] %vm5319_vm9, %v5201_v0  ;;  %5597 = vrot.lane.b32.xlu1 %v5427_v38, %s9148_s12 }
 0x77a   :  { %v6876_v39 = vpop.f32.mrf.mxu2  ;;  %v4578_v40 = vpop.f32.mrf.mxu1  ;;  %5234 = vrot.lane.b32.xlu0 %v5056_v37, %s9151_s15 }
 0x77b   :  { %v6877_v43 = vadd.f32 %v12978_v58, %v6876_v39  ;;  %v4671_v45 = vmax.f32 %v4120_v15, %v4578_v40  ;;  %5218 = vrot.lane.b32.xlu2 %v5048_v42, %s9151_s15  ;;  %v5199_v47 = vpop.permute.xlu1 %5198  ;;  %v5050_v39 = vld [vmem:[#allocation4 + $0x171] sm:$0xff] }
 0x77c   :  { %v6334_v46 = vpop.permute.xlu0 %6333  ;;  %5354 = vst.msk [vmem:[#allocation5 + $0x110] sm:$0xff] %vm5319_vm9, %v5199_v47  ;;  %v6194_v40 = vld [vmem:[#allocation4 + $0x1ac] sm:$0xff] }
 0x77d   :  { %v7017_v48 = vmax.f32 %v6877_v43, 0.0  ;;  %v4738_v49 = vadd.f32 %v12872_v31, %v4671_v45  ;;  %6490 = vst.msk [vmem:[#allocation5 + $0x108] sm:$0xff] %vm6456_vm12, %v6334_v46  ;;  %v6338_v50 = vpop.permute.xlu2 %6337 }
 0x77e   :  { %v4935_v54 = vld [vmem:[#allocation4 + $0x1c8] sm:$0xff]  ;;  %5733 = vst.msk [vmem:[#allocation5 + $0x110] sm:$0xff] %vm5698_vm10, %v5578_v19 }
 0x77f   :  { %7080 = vst.msk [vmem:[#allocation6 + $0xc0] sm:$0xff] %vm6587_vm14, %v7017_v48  ;;  %v4801_v53 = vmax.f32 %v4738_v49, 0.0  ;;  %v5057_v19 = vld [vmem:[#allocation4 + $0x1a9] sm:$0xff] }
 0x780   :  { %4998 = vst.msk [vmem:[#allocation5 + $0x1c8] sm:$0xff] %vm4620_vm7, %v4935_v54  ;;  %v5808_v54 = vld [vmem:[#allocation4 + $0x173] sm:$0xff] }
 0x781   :  { %4864 = vst.msk [vmem:[#allocation4 + $0x188] sm:$0xff] %vm4620_vm7, %v4801_v53  ;;  %v4605_v56 = vpop.f32.mrf.mxu3  ;;  %5992 = vrot.lane.b32.xlu1 %v5814_v55, %s9150_s14 }
 0x782   :  { %5976 = vrot.lane.b32.xlu0 %v5806_v29, %s9150_s14  ;;  %v4680_v60 = vmax.f32 %v12805_v14, %v4605_v56  ;;  %v4581_v25 = vpop.f32.mrf.mxu1  ;;  %v5049_v14 = vld [vmem:[#allocation4 + $0x169] sm:$0xff]  ;;  %v5437_v29 = vld [vmem:[#allocation4 + $0x1b2] sm:$0xff] }
 0x783   :  { %5613 = vrot.lane.b32.xlu2 %v5435_v59, %s9148_s12  ;;  %v6336_v63 = vpop.permute.xlu1 %6335  ;;  %v5429_v56 = vld [vmem:[#allocation4 + $0x172] sm:$0xff] }
 0x784   :  { %v5957_v61 = vpop.permute.xlu0 %5956  ;;  %v6553_v1 = vld [vmem:[#allocation5 + $0x108] sm:$0xff]  ;;  %v4747_v2 = vadd.f32 %v12872_v31, %v4680_v60 }
 0x785   :  { %6112 = vst.msk [vmem:[#allocation5 + $0x110] sm:$0xff] %vm6077_vm11, %v5957_v61  ;;  %v5961_v52 = vpop.permute.xlu2 %5960  ;;  %9078 = vmatmul.msk.f32.gmra.mxu2 %vm6593_vm13, %v6553_v1 }
 0x786   :  { %6491 = vst.msk [vmem:[#allocation5 + $0x110] sm:$0xff] %vm6456_vm12, %v6336_v63  ;;  %v4810_v24 = vmax.f32 %v4747_v2, 0.0 }
 0x788   :  { %4873 = vst.msk [vmem:[#allocation4 + $0x1d0] sm:$0xff] %vm4620_vm7, %v4810_v24  ;;  %v4927_v5 = vld [vmem:[#allocation4 + $0x188] sm:$0xff]  ;;  %v6187_v24 = vld [vmem:[#allocation4 + $0x174] sm:$0xff] }
 0x789   :  { %5220 = vrot.lane.b32.xlu1 %v5049_v14, %s9151_s15  ;;  %v4123_v7 = vpop.f32.mrf.mxu0  ;;  %4990 = vst.msk [vmem:[#allocation5 + $0x188] sm:$0xff] %vm4620_vm7, %v4927_v5 }
 0x78a   :  { %6371 = vrot.lane.b32.xlu0 %v6193_v4, %s9152_s20  ;;  %v4672_v8 = vmax.f32 %v4123_v7, %v4581_v25  ;;  %v5816_v25 = vld [vmem:[#allocation4 + $0x1b3] sm:$0xff] }
 0x78b   :  { %6355 = vrot.lane.b32.xlu2 %v6185_v6, %s9152_s20  ;;  %v5959_v62 = vpop.permute.xlu1 %5958 }
 0x78c   :  { %v5580_v30 = vpop.permute.xlu0 %5579  ;;  %v4739_v9 = vadd.f32 %v12872_v31, %v4672_v8 }
 0x78d   :  { %5734 = vst.msk [vmem:[#allocation5 + $0x118] sm:$0xff] %vm5698_vm10, %v5580_v30  ;;  %v5584_v10 = vpop.permute.xlu2 %5583  ;;  %v6554_v11 = vld [vmem:[#allocation5 + $0x110] sm:$0xff] }
 0x78e   :  { %6113 = vst.msk [vmem:[#allocation5 + $0x118] sm:$0xff] %vm6077_vm11, %v5959_v62  ;;  %9079 = vmatmul.msk.f32.gmra.mxu2 %vm6593_vm13, %v6554_v11  ;;  %v4802_v13 = vmax.f32 %v4739_v9, 0.0  ;;  %v5059_v11 = vld [vmem:[#allocation4 + $0x1b9] sm:$0xff] }
 0x78f   :  { %6492 = vst.msk [vmem:[#allocation5 + $0x118] sm:$0xff] %vm6456_vm12, %v6338_v50  ;;  %v4936_v51 = vld [vmem:[#allocation4 + $0x1d0] sm:$0xff] }
 0x790   :  { %4865 = vst.msk [vmem:[#allocation4 + $0x190] sm:$0xff] %vm4620_vm7, %v4802_v13  ;;  %v6879_v12 = vpop.f32.mrf.mxu2  ;;  %v5430_v13 = vld [vmem:[#allocation4 + $0x17a] sm:$0xff] }
 0x791   :  { %v6880_v18 = vadd.f32 %v12978_v58, %v6879_v12  ;;  %5615 = vrot.lane.b32.xlu1 %v5436_v17, %s9148_s12  ;;  %4999 = vst.msk [vmem:[#allocation5 + $0x1d0] sm:$0xff] %vm4620_vm7, %v4936_v51 }
 0x792   :  { %5599 = vrot.lane.b32.xlu0 %v5428_v16, %s9148_s12  ;;  %v5051_v16 = vld [vmem:[#allocation4 + $0x179] sm:$0xff] }
 0x793   :  { %5236 = vrot.lane.b32.xlu2 %v5057_v19, %s9151_s15  ;;  %v7018_v35 = vmax.f32 %v6880_v18, 0.0  ;;  %v5582_v20 = vpop.permute.xlu1 %5581 }
 0x794   :  { %v5203_v21 = vpop.permute.xlu0 %5202 }
 0x795   :  { %5356 = vst.msk [vmem:[#allocation5 + $0x120] sm:$0xff] %vm5319_vm9, %v5203_v21  ;;  %v5207_v22 = vpop.permute.xlu2 %5206  ;;  %v5817_v21 = vld [vmem:[#allocation4 + $0x1bb] sm:$0xff] }
 0x796   :  { %7081 = vst.msk [vmem:[#allocation6 + $0xc8] sm:$0xff] %vm6587_vm14, %v7018_v35  ;;  %v6555_v26 = vld [vmem:[#allocation5 + $0x118] sm:$0xff] }
 0x797   :  { %5735 = vst.msk [vmem:[#allocation5 + $0x120] sm:$0xff] %vm5698_vm10, %v5582_v20  ;;  %9080 = vmatmul.msk.f32.gmra.mxu2 %vm6593_vm13, %v6555_v26  ;;  %v4928_v33 = vld [vmem:[#allocation4 + $0x190] sm:$0xff]  ;;  %v5809_v20 = vld [vmem:[#allocation4 + $0x17b] sm:$0xff] }
 0x798   :  { %6114 = vst.msk [vmem:[#allocation5 + $0x120] sm:$0xff] %vm6077_vm11, %v5961_v52  ;;  %v6195_v52 = vld [vmem:[#allocation4 + $0x1b4] sm:$0xff] }
 0x799   :  { %5358 = vst.msk [vmem:[#allocation5 + $0x130] sm:$0xff] %vm5319_vm9, %v5207_v22  ;;  %v4608_v41 = vpop.f32.mrf.mxu3  ;;  %6357 = vrot.lane.b32.xlu1 %v6186_v32, %s9152_s20  ;;  %v9153_v22 = vmov 0.0  }
 0x79a   :  { %v4681_v34 = vmax.f32 %v12815_v23, %v4608_v41  ;;  %5994 = vrot.lane.b32.xlu0 %v5815_v27, %s9150_s14  ;;  %4991 = vst.msk [vmem:[#allocation5 + $0x190] sm:$0xff] %vm4620_vm7, %v4928_v33  ;;  %v5058_v23 = vld [vmem:[#allocation4 + $0x1b1] sm:$0xff]  ;;  %v5438_v41 = vld [vmem:[#allocation4 + $0x1ba] sm:$0xff] }
 0x79b   :  { %5978 = vrot.lane.b32.xlu2 %v5807_v3, %s9150_s14  ;;  %v5205_v15 = vpop.permute.xlu1 %5204  ;;  %4621 = vst.msk [vmem:[#allocation4 + $0x1f8] sm:$0xff] %vm4620_vm7, %v9153_v22  ;;  %v5819_v22 = vld [vmem:[#allocation4 + $0x1cb] sm:$0xff] }
 0x79c   :  { %v4748_v0 = vadd.f32 %v12872_v31, %v4681_v34  ;;  %v6340_v36 = vpop.permute.xlu0 %6339  ;;  %5357 = vst.msk [vmem:[#allocation5 + $0x128] sm:$0xff] %vm5319_vm9, %v5205_v15  ;;  %v5052_v15 = vld [vmem:[#allocation4 + $0x181] sm:$0xff] }
 0x79d   :  { %6493 = vst.msk [vmem:[#allocation5 + $0x120] sm:$0xff] %vm6456_vm12, %v6340_v36  ;;  %v6344_v37 = vpop.permute.xlu2 %6343  ;;  %v6196_v36 = vld [vmem:[#allocation4 + $0x1bc] sm:$0xff] }
 0x79e   :  { %v4811_v38 = vmax.f32 %v4748_v0, 0.0  ;;  %5736 = vst.msk [vmem:[#allocation5 + $0x128] sm:$0xff] %vm5698_vm10, %v5584_v10 }
 0x7a0   :  { %4874 = vst.msk [vmem:[#allocation4 + $0x1d8] sm:$0xff] %vm4620_vm7, %v4811_v38 }
 0x7a1   :  { %5238 = vrot.lane.b32.xlu1 %v5058_v23, %s9151_s15 }
 0x7a2   :  { %5222 = vrot.lane.b32.xlu0 %v5050_v39, %s9151_s15 }
 0x7a3   :  { %v6882_v42 = vpop.f32.mrf.mxu2  ;;  %6373 = vrot.lane.b32.xlu2 %v6194_v40, %s9152_s20  ;;  %v6342_v46 = vpop.permute.xlu1 %6341 }
 0x7a4   :  { %v6883_v43 = vadd.f32 %v12978_v58, %v6882_v42  ;;  %v5963_v45 = vpop.permute.xlu0 %5962  ;;  %v6556_v47 = vld [vmem:[#allocation5 + $0x120] sm:$0xff] }
 0x7a5   :  { %6115 = vst.msk [vmem:[#allocation5 + $0x128] sm:$0xff] %vm6077_vm11, %v5963_v45  ;;  %v5967_v48 = vpop.permute.xlu2 %5966  ;;  %9081 = vmatmul.msk.f32.gmra.mxu2 %vm6593_vm13, %v6556_v47  ;;  %v5431_v47 = vld [vmem:[#allocation4 + $0x182] sm:$0xff] }
 0x7a6   :  { %v7019_v49 = vmax.f32 %v6883_v43, 0.0  ;;  %6494 = vst.msk [vmem:[#allocation5 + $0x128] sm:$0xff] %vm6456_vm12, %v6342_v46 }
 0x7a7   :  { %v4937_v50 = vld [vmem:[#allocation4 + $0x1d8] sm:$0xff] }
 0x7a8   :  { %7082 = vst.msk [vmem:[#allocation6 + $0xd0] sm:$0xff] %vm6587_vm14, %v7019_v49 }
 0x7a9   :  { %v4611_v53 = vpop.f32.mrf.mxu3  ;;  %5000 = vst.msk [vmem:[#allocation5 + $0x1d8] sm:$0xff] %vm4620_vm7, %v4937_v50  ;;  %5980 = vrot.lane.b32.xlu1 %v5808_v54, %s9150_s14  ;;  %v5060_v50 = vld [vmem:[#allocation4 + $0x1c1] sm:$0xff] }
 0x7aa   :  { %v4682_v55 = vmax.f32 %v12828_v44, %v4611_v53  ;;  %5617 = vrot.lane.b32.xlu0 %v5437_v29, %s9148_s12  ;;  %v4584_v44 = vpop.f32.mrf.mxu1  ;;  %v9143_v53 = vld [vmem:[%s14275_s2] ss:$0 sm:$0xff] }
 0x7ab   :  { %5601 = vrot.lane.b32.xlu2 %v5429_v56, %s9148_s12  ;;  %v5965_v60 = vpop.permute.xlu1 %5964 }
 0x7ac   :  { %v4749_v59 = vadd.f32 %v12872_v31, %v4682_v55  ;;  %v5586_v61 = vpop.permute.xlu0 %5585 }
 0x7ad   :  { %5737 = vst.msk [vmem:[#allocation5 + $0x130] sm:$0xff] %vm5698_vm10, %v5586_v61  ;;  %v5590_v63 = vpop.permute.xlu2 %5589  ;;  %v6557_v1 = vld [vmem:[#allocation5 + $0x128] sm:$0xff] }
 0x7ae   :  { %v4812_v2 = vmax.f32 %v4749_v59, 0.0  ;;  %6116 = vst.msk [vmem:[#allocation5 + $0x130] sm:$0xff] %vm6077_vm11, %v5965_v60  ;;  %9082 = vmatmul.msk.f32.gmra.mxu2 %vm6593_vm13, %v6557_v1  ;;  %v5818_v60 = vld [vmem:[#allocation4 + $0x1c3] sm:$0xff] }
 0x7af   :  { %6495 = vst.msk [vmem:[#allocation5 + $0x130] sm:$0xff] %vm6456_vm12, %v6344_v37  ;;  %v6188_v37 = vld [vmem:[#allocation4 + $0x17c] sm:$0xff]  ;;  %v6189_v61 = vld [vmem:[#allocation4 + $0x184] sm:$0xff] }
 0x7b0   :  { %4875 = vst.msk [vmem:[#allocation4 + $0x1e0] sm:$0xff] %vm4620_vm7, %v4812_v2  ;;  %v5810_v1 = vld [vmem:[#allocation4 + $0x183] sm:$0xff] }
 0x7b1   :  { %6375 = vrot.lane.b32.xlu1 %v6195_v52, %s9152_s20  ;;  %v4126_v4 = vpop.f32.mrf.mxu0 }
 0x7b2   :  { %6359 = vrot.lane.b32.xlu0 %v6187_v24, %s9152_s20  ;;  %v4673_v14 = vmax.f32 %v4126_v4, %v4584_v44  ;;  %v5061_v4 = vld [vmem:[#allocation4 + $0x1c9] sm:$0xff] }
 0x7b3   :  { %5996 = vrot.lane.b32.xlu2 %v5816_v25, %s9150_s14  ;;  %v5588_v5 = vpop.permute.xlu1 %5587 }
 0x7b4   :  { %v5209_v6 = vpop.permute.xlu0 %5208  ;;  %v4740_v7 = vadd.f32 %v12872_v31, %v4673_v14  ;;  %v5053_v14 = vld [vmem:[#allocation4 + $0x189] sm:$0xff] }
 0x7b5   :  { %5359 = vst.msk [vmem:[#allocation5 + $0x138] sm:$0xff] %vm5319_vm9, %v5209_v6  ;;  %v5213_v8 = vpop.permute.xlu2 %5212  ;;  %v6197_v6 = vld [vmem:[#allocation4 + $0x1c4] sm:$0xff] }
 0x7b6   :  { %5738 = vst.msk [vmem:[#allocation5 + $0x138] sm:$0xff] %vm5698_vm10, %v5588_v5  ;;  %v6558_v62 = vld [vmem:[#allocation5 + $0x130] sm:$0xff]  ;;  %v4803_v30 = vmax.f32 %v4740_v7, 0.0 }
 0x7b7   :  { %6117 = vst.msk [vmem:[#allocation5 + $0x138] sm:$0xff] %vm6077_vm11, %v5967_v48  ;;  %9083 = vmatmul.msk.f32.gmra.mxu2 %vm6593_vm13, %v6558_v62  ;;  %v4938_v9 = vld [vmem:[#allocation4 + $0x1e0] sm:$0xff] }
 0x7b8   :  { %5361 = vst.msk [vmem:[#allocation5 + $0x148] sm:$0xff] %vm5319_vm9, %v5213_v8  ;;  %v6885_v10 = vpop.f32.mrf.mxu2  ;;  %v5439_v48 = vld [vmem:[#allocation4 + $0x1c2] sm:$0xff] }
 0x7b9   :  { %4866 = vst.msk [vmem:[#allocation4 + $0x198] sm:$0xff] %vm4620_vm7, %v4803_v30  ;;  %v6886_v12 = vadd.f32 %v12978_v58, %v6885_v10  ;;  %5603 = vrot.lane.b32.xlu1 %v5430_v13, %s9148_s12  ;;  %v5440_v13 = vld [vmem:[#allocation4 + $0x1ca] sm:$0xff] }
 0x7ba   :  { %5240 = vrot.lane.b32.xlu0 %v5059_v11, %s9151_s15  ;;  %5001 = vst.msk [vmem:[#allocation5 + $0x1e0] sm:$0xff] %vm4620_vm7, %v4938_v9  ;;  %v5811_v11 = vld [vmem:[#allocation4 + $0x18b] sm:$0xff] }
 0x7bb   :  { %5224 = vrot.lane.b32.xlu2 %v5051_v16, %s9151_s15  ;;  %v7020_v17 = vmax.f32 %v6886_v12, 0.0  ;;  %v5211_v18 = vpop.permute.xlu1 %5210  ;;  %v5432_v12 = vld [vmem:[#allocation4 + $0x18a] sm:$0xff] }
 0x7bc   :  { %v6346_v51 = vpop.permute.xlu0 %6345  ;;  %5360 = vst.msk [vmem:[#allocation5 + $0x140] sm:$0xff] %vm5319_vm9, %v5211_v18 }
 0x7bd   :  { %6496 = vst.msk [vmem:[#allocation5 + $0x138] sm:$0xff] %vm6456_vm12, %v6346_v51  ;;  %v6350_v19 = vpop.permute.xlu2 %6349 }
 0x7be   :  { %7083 = vst.msk [vmem:[#allocation6 + $0xd8] sm:$0xff] %vm6587_vm14, %v7020_v17 }
 0x7bf   :  { %5739 = vst.msk [vmem:[#allocation5 + $0x140] sm:$0xff] %vm5698_vm10, %v5590_v63 }
 0x7c0   :  { %v4929_v27 = vld [vmem:[#allocation4 + $0x198] sm:$0xff] }
 0x7c1   :  { %v4614_v35 = vpop.f32.mrf.mxu3  ;;  %5998 = vrot.lane.b32.xlu1 %v5817_v21, %s9150_s14  ;;  %4992 = vst.msk [vmem:[#allocation5 + $0x198] sm:$0xff] %vm4620_vm7, %v4929_v27  ;;  %v6190_v21 = vld [vmem:[#allocation4 + $0x18c] sm:$0xff] }
 0x7c2   :  { %v4683_v26 = vmax.f32 %v12839_v57, %v4614_v35  ;;  %5982 = vrot.lane.b32.xlu0 %v5809_v20, %s9150_s14  ;;  %v6198_v20 = vld [vmem:[#allocation4 + $0x1cc] sm:$0xff] }
 0x7c3   :  { %5619 = vrot.lane.b32.xlu2 %v5438_v41, %s9148_s12  ;;  %v6348_v34 = vpop.permute.xlu1 %6347 }
 0x7c4   :  { %v4750_v32 = vadd.f32 %v12872_v31, %v4683_v26  ;;  %v5969_v33 = vpop.permute.xlu0 %5968  ;;  %v6559_v3 = vld [vmem:[#allocation5 + $0x138] sm:$0xff] }
 0x7c5   :  { %6118 = vst.msk [vmem:[#allocation5 + $0x140] sm:$0xff] %vm6077_vm11, %v5969_v33  ;;  %v5973_v0 = vpop.permute.xlu2 %5972  ;;  %9084 = vmatmul.msk.f32.gmra.mxu2 %vm6593_vm13, %v6559_v3  ;;  %v5441_v33 = vld [vmem:[#allocation4 + $0x1d2] sm:$0xff] }
 0x7c6   :  { %v4813_v57 = vmax.f32 %v4750_v32, 0.0  ;;  %6497 = vst.msk [vmem:[#allocation5 + $0x140] sm:$0xff] %vm6456_vm12, %v6348_v34  ;;  %v5820_v32 = vld [vmem:[#allocation4 + $0x1d3] sm:$0xff] }
 0x7c7   :  { %v5062_v3 = vld [vmem:[#allocation4 + $0x1d1] sm:$0xff] }
 0x7c8   :  { %4876 = vst.msk [vmem:[#allocation4 + $0x1e8] sm:$0xff] %vm4620_vm7, %v4813_v57 }
 0x7c9   :  { %5226 = vrot.lane.b32.xlu1 %v5052_v15, %s9151_s15 }
 0x7ca   :  { %6377 = vrot.lane.b32.xlu0 %v6196_v36, %s9152_s20 }
 0x7cb   :  { %v6888_v31 = vpop.f32.mrf.mxu2  ;;  %6361 = vrot.lane.b32.xlu2 %v6188_v37, %s9152_s20  ;;  %v5971_v23 = vpop.permute.xlu1 %5970 }
 0x7cc   :  { %v6889_v38 = vadd.f32 %v12978_v58, %v6888_v31  ;;  %v5592_v39 = vpop.permute.xlu0 %5591 }
 0x7cd   :  { %5740 = vst.msk [vmem:[#allocation5 + $0x148] sm:$0xff] %vm5698_vm10, %v5592_v39  ;;  %v5596_v40 = vpop.permute.xlu2 %5595  ;;  %v6560_v42 = vld [vmem:[#allocation5 + $0x140] sm:$0xff]  ;;  %v6199_v39 = vld [vmem:[#allocation4 + $0x1d4] sm:$0xff] }
 0x7ce   :  { %v7021_v43 = vmax.f32 %v6889_v38, 0.0  ;;  %6119 = vst.msk [vmem:[#allocation5 + $0x148] sm:$0xff] %vm6077_vm11, %v5971_v23  ;;  %9085 = vmatmul.msk.f32.gmra.mxu2 %vm6593_vm13, %v6560_v42  ;;  %v5433_v38 = vld [vmem:[#allocation4 + $0x192] sm:$0xff] }
 0x7cf   :  { %6498 = vst.msk [vmem:[#allocation5 + $0x148] sm:$0xff] %vm6456_vm12, %v6350_v19  ;;  %v4939_v45 = vld [vmem:[#allocation4 + $0x1e8] sm:$0xff]  ;;  %v5054_v23 = vld [vmem:[#allocation4 + $0x191] sm:$0xff] }
 0x7d0   :  { %7084 = vst.msk [vmem:[#allocation6 + $0xe0] sm:$0xff] %vm6587_vm14, %v7021_v43 }
 0x7d1   :  { %v4617_v46 = vpop.f32.mrf.mxu3  ;;  %5002 = vst.msk [vmem:[#allocation5 + $0x1e8] sm:$0xff] %vm4620_vm7, %v4939_v45  ;;  %5621 = vrot.lane.b32.xlu1 %v5439_v48, %s9148_s12  ;;  %v5442_v48 = vld [vmem:[#allocation4 + $0x1da] sm:$0xff] }
 0x7d2   :  { %v4684_v49 = vmax.f32 %v12850_v28, %v4617_v46  ;;  %5605 = vrot.lane.b32.xlu0 %v5431_v47, %s9148_s12 }
 0x7d3   :  { %5242 = vrot.lane.b32.xlu2 %v5060_v50, %s9151_s15  ;;  %v5594_v29 = vpop.permute.xlu1 %5593  ;;  %v5063_v50 = vld [vmem:[#allocation4 + $0x1d9] sm:$0xff] }
 0x7d4   :  { %v4751_v54 = vadd.f32 %v9143_v53, %v4684_v49  ;;  %v5215_v55 = vpop.permute.xlu0 %5214  ;;  %v5812_v49 = vld [vmem:[#allocation4 + $0x193] sm:$0xff] }
 0x7d5   :  { %5362 = vst.msk [vmem:[#allocation5 + $0x150] sm:$0xff] %vm5319_vm9, %v5215_v55  ;;  %v5219_v56 = vpop.permute.xlu2 %5218 }
 0x7d6   :  { %v4814_v59 = vmax.f32 %v4751_v54, 0.0  ;;  %5741 = vst.msk [vmem:[#allocation5 + $0x150] sm:$0xff] %vm5698_vm10, %v5594_v29  ;;  %v6561_v28 = vld [vmem:[#allocation5 + $0x148] sm:$0xff] }
 0x7d7   :  { %6120 = vst.msk [vmem:[#allocation5 + $0x150] sm:$0xff] %vm6077_vm11, %v5973_v0  ;;  %9086 = vmatmul.msk.f32.gmra.mxu2 %vm6593_vm13, %v6561_v28  ;;  %v5821_v28 = vld [vmem:[#allocation4 + $0x1db] sm:$0xff] }
 0x7d8   :  { %4877 = vst.msk [vmem:[#allocation4 + $0x1f0] sm:$0xff] %vm4620_vm7, %v4814_v59  ;;  %v6200_v59 = vld [vmem:[#allocation4 + $0x1dc] sm:$0xff] }
 0x7d9   :  { %5364 = vst.msk [vmem:[#allocation5 + $0x160] sm:$0xff] %vm5319_vm9, %v5219_v56  ;;  %6363 = vrot.lane.b32.xlu1 %v6189_v61, %s9152_s20  ;;  %v6191_v61 = vld [vmem:[#allocation4 + $0x194] sm:$0xff] }
 0x7da   :  { %v6891_v63 = vpop.f32.mrf.mxu2  ;;  %6000 = vrot.lane.b32.xlu0 %v5818_v60, %s9150_s14 }
 0x7db   :  { %v6892_v2 = vadd.f32 %v12978_v58, %v6891_v63  ;;  %5984 = vrot.lane.b32.xlu2 %v5810_v1, %s9150_s14  ;;  %v5217_v52 = vpop.permute.xlu1 %5216 }
 0x7dc   :  { %v6352_v44 = vpop.permute.xlu0 %6351  ;;  %5363 = vst.msk [vmem:[#allocation5 + $0x158] sm:$0xff] %vm5319_vm9, %v5217_v52 }
 0x7dd   :  { %v7022_v24 = vmax.f32 %v6892_v2, 0.0  ;;  %6499 = vst.msk [vmem:[#allocation5 + $0x150] sm:$0xff] %vm6456_vm12, %v6352_v44  ;;  %v5614_v25 = vpop.permute.xlu2 %5613 }
 0x7de   :  { %5742 = vst.msk [vmem:[#allocation5 + $0x158] sm:$0xff] %vm5698_vm10, %v5596_v40 }
 0x7df   :  { %7085 = vst.msk [vmem:[#allocation6 + $0xe8] sm:$0xff] %vm6587_vm14, %v7022_v24  ;;  %v4940_v5 = vld [vmem:[#allocation4 + $0x1f0] sm:$0xff] }
 0x7e0   :  { %5003 = vst.msk [vmem:[#allocation5 + $0x1f0] sm:$0xff] %vm4620_vm7, %v4940_v5  ;;  %v5055_v5 = vld [vmem:[#allocation4 + $0x199] sm:$0xff] }
 0x7e1   :  { %5244 = vrot.lane.b32.xlu1 %v5061_v4, %s9151_s15  ;;  %v5434_v4 = vld [vmem:[#allocation4 + $0x19a] sm:$0xff] }
 0x7e2   :  { %5228 = vrot.lane.b32.xlu0 %v5053_v14, %s9151_s15 }
 0x7e3   :  { %6379 = vrot.lane.b32.xlu2 %v6197_v6, %s9152_s20  ;;  %v6354_v8 = vpop.permute.xlu1 %6353 }
 0x7e4   :  { %v5975_v7 = vpop.permute.xlu0 %5974  ;;  %v6562_v62 = vld [vmem:[#allocation5 + $0x150] sm:$0xff] }
 0x7e5   :  { %6121 = vst.msk [vmem:[#allocation5 + $0x158] sm:$0xff] %vm6077_vm11, %v5975_v7  ;;  %v6356_v30 = vpop.permute.xlu2 %6355  ;;  %9087 = vmatmul.msk.f32.gmra.mxu2 %vm6593_vm13, %v6562_v62 }
 0x7e6   :  { %6500 = vst.msk [vmem:[#allocation5 + $0x158] sm:$0xff] %vm6456_vm12, %v6354_v8 }
 0x7e8   :  { %v6894_v9 = vpop.f32.mrf.mxu2 }
 0x7e9   :  { %v6895_v10 = vadd.f32 %v12978_v58, %v6894_v9  ;;  %5986 = vrot.lane.b32.xlu1 %v5811_v11, %s9150_s14  ;;  %v6192_v9 = vld [vmem:[#allocation4 + $0x19c] sm:$0xff] }
 0x7ea   :  { %5623 = vrot.lane.b32.xlu0 %v5440_v13, %s9148_s12  ;;  %v5813_v11 = vld [vmem:[#allocation4 + $0x19b] sm:$0xff] }
 0x7eb   :  { %v7023_v16 = vmax.f32 %v6895_v10, 0.0  ;;  %5607 = vrot.lane.b32.xlu2 %v5432_v12, %s9148_s12  ;;  %v5598_v51 = vpop.permute.xlu1 %5597  ;;  %v5443_v10 = vld [vmem:[#allocation4 + $0x1e2] sm:$0xff] }
 0x7ec   :  { %v5235_v17 = vpop.permute.xlu0 %5234  ;;  %5743 = vst.msk [vmem:[#allocation5 + $0x160] sm:$0xff] %vm5698_vm10, %v5598_v51 }
 0x7ed   :  { %7086 = vst.msk [vmem:[#allocation6 + $0xf0] sm:$0xff] %vm6587_vm14, %v7023_v16  ;;  %v5237_v18 = vpop.permute.xlu2 %5236  ;;  %v6563_v19 = vld [vmem:[#allocation5 + $0x158] sm:$0xff] }
 0x7ee   :  { %5372 = vst.msk [vmem:[#allocation5 + $0x1a0] sm:$0xff] %vm5319_vm9, %v5235_v17  ;;  %9088 = vmatmul.msk.f32.gmra.mxu2 %vm6593_vm13, %v6563_v19  ;;  %v6201_v19 = vld [vmem:[#allocation4 + $0x1e4] sm:$0xff] }
 0x7ef   :  { %5751 = vst.msk [vmem:[#allocation5 + $0x1a0] sm:$0xff] %vm5698_vm10, %v5614_v25  ;;  %v5064_v25 = vld [vmem:[#allocation4 + $0x1e1] sm:$0xff] }
 0x7f0   :  { %5373 = vst.msk [vmem:[#allocation5 + $0x1a8] sm:$0xff] %vm5319_vm9, %v5237_v18  ;;  %v5065_v18 = vld [vmem:[#allocation4 + $0x1e9] sm:$0xff] }
 0x7f1   :  { %v6897_v35 = vpop.f32.mrf.mxu2  ;;  %6381 = vrot.lane.b32.xlu1 %v6198_v20, %s9152_s20 }
 0x7f2   :  { %6365 = vrot.lane.b32.xlu0 %v6190_v21, %s9152_s20  ;;  %v5822_v35 = vld [vmem:[#allocation4 + $0x1e3] sm:$0xff] }
 0x7f3   :  { %6002 = vrot.lane.b32.xlu2 %v5819_v22, %s9150_s14  ;;  %v5993_v41 = vpop.permute.xlu1 %5992 }
 0x7f4   :  { %v5977_v26 = vpop.permute.xlu0 %5976  ;;  %6130 = vst.msk [vmem:[#allocation5 + $0x1a0] sm:$0xff] %vm6077_vm11, %v5993_v41 }
 0x7f5   :  { %6122 = vst.msk [vmem:[#allocation5 + $0x160] sm:$0xff] %vm6077_vm11, %v5977_v26  ;;  %v5979_v27 = vpop.permute.xlu2 %5978 }
 0x7f6   :  { %6501 = vst.msk [vmem:[#allocation5 + $0x160] sm:$0xff] %vm6456_vm12, %v6356_v30 }
 0x7f9   :  { %6004 = vrot.lane.b32.xlu1 %v5820_v32, %s9150_s14  ;;  %v6202_v32 = vld [vmem:[#allocation4 + $0x1ec] sm:$0xff] }
 0x7fa   :  { %v6900_v34 = vpop.f32.mrf.mxu2  ;;  %5625 = vrot.lane.b32.xlu0 %v5441_v33, %s9148_s12  ;;  %v5823_v33 = vld [vmem:[#allocation4 + $0x1eb] sm:$0xff] }
 0x7fb   :  { %v6901_v0 = vadd.f32 %v12978_v58, %v6900_v34  ;;  %5246 = vrot.lane.b32.xlu2 %v5062_v3, %s9151_s15  ;;  %v5221_v36 = vpop.permute.xlu1 %5220  ;;  %v13242_v34 = vld [vmem:[%s14277_s4] ss:$0 sm:$0xff] }
 0x7fc   :  { %v6372_v57 = vpop.permute.xlu0 %6371  ;;  %5365 = vst.msk [vmem:[#allocation5 + $0x168] sm:$0xff] %vm5319_vm9, %v5221_v36 }
 0x7fd   :  { %v7025_v15 = vmax.f32 %v6901_v0, 0.0  ;;  %6509 = vst.msk [vmem:[#allocation5 + $0x1a0] sm:$0xff] %vm6456_vm12, %v6372_v57  ;;  %v6374_v37 = vpop.permute.xlu2 %6373  ;;  %v6564_v31 = vld [vmem:[#allocation5 + $0x160] sm:$0xff]  ;;  %v5444_v0 = vld [vmem:[#allocation4 + $0x1ea] sm:$0xff] }
 0x7fe   :  { %9089 = vmatmul.msk.f32.gmra.mxu2 %vm6593_vm13, %v6564_v31  ;;  %v5824_v31 = vld [vmem:[#allocation4 + $0x1f3] sm:$0xff] }
 0x7ff   :  { %7088 = vst.msk [vmem:[#allocation6 + $0x100] sm:$0xff] %vm6587_vm14, %v7025_v15 }
 0x801   :  { %5609 = vrot.lane.b32.xlu1 %v5433_v38, %s9148_s12  ;;  %v5445_v38 = vld [vmem:[#allocation4 + $0x1f2] sm:$0xff] }
 0x802   :  { %5230 = vrot.lane.b32.xlu0 %v5054_v23, %s9151_s15 }
 0x803   :  { %6383 = vrot.lane.b32.xlu2 %v6199_v39, %s9152_s20  ;;  %v5616_v42 = vpop.permute.xlu1 %5615  ;;  %v5066_v39 = vld [vmem:[#allocation4 + $0x1f1] sm:$0xff] }
 0x804   :  { %v5600_v40 = vpop.permute.xlu0 %5599  ;;  %v6572_v43 = vld [vmem:[#allocation5 + $0x1a0] sm:$0xff]  ;;  %5752 = vst.msk [vmem:[#allocation5 + $0x1a8] sm:$0xff] %vm5698_vm10, %v5616_v42 }
 0x805   :  { %5744 = vst.msk [vmem:[#allocation5 + $0x168] sm:$0xff] %vm5698_vm10, %v5600_v40  ;;  %v5602_v45 = vpop.permute.xlu2 %5601  ;;  %9097 = vmatmul.msk.f32.vlgmr.msra.gmra.mxu3 %vm6593_vm13, %v6572_v43 }
 0x806   :  { %6123 = vst.msk [vmem:[#allocation5 + $0x168] sm:$0xff] %vm6077_vm11, %v5979_v27 }
 0x808   :  { %v6903_v46 = vpop.f32.mrf.mxu2 }
 0x809   :  { %v6904_v47 = vadd.f32 %v12978_v58, %v6903_v46  ;;  %5627 = vrot.lane.b32.xlu1 %v5442_v48, %s9148_s12  ;;  %v6203_v48 = vld [vmem:[#allocation4 + $0x1f4] sm:$0xff] }
 0x80a   :  { %5988 = vrot.lane.b32.xlu0 %v5812_v49, %s9150_s14 }
 0x80b   :  { %v7026_v53 = vmax.f32 %v6904_v47, 0.0  ;;  %5248 = vrot.lane.b32.xlu2 %v5063_v50, %s9151_s15  ;;  %v6358_v29 = vpop.permute.xlu1 %6357 }
 0x80c   :  { %v5995_v54 = vpop.permute.xlu0 %5994  ;;  %6502 = vst.msk [vmem:[#allocation5 + $0x168] sm:$0xff] %vm6456_vm12, %v6358_v29 }
 0x80d   :  { %7089 = vst.msk [vmem:[#allocation6 + $0x108] sm:$0xff] %vm6587_vm14, %v7026_v53  ;;  %v5997_v55 = vpop.permute.xlu2 %5996 }
 0x80e   :  { %6131 = vst.msk [vmem:[#allocation5 + $0x1a8] sm:$0xff] %vm6077_vm11, %v5995_v54 }
 0x80f   :  { %6510 = vst.msk [vmem:[#allocation5 + $0x1a8] sm:$0xff] %vm6456_vm12, %v6374_v37 }
 0x811   :  { %v6906_v56 = vpop.f32.mrf.mxu2  ;;  %6385 = vrot.lane.b32.xlu1 %v6200_v59, %s9152_s20 }
 0x812   :  { %v6907_v60 = vadd.f32 %v12978_v58, %v6906_v56  ;;  %6006 = vrot.lane.b32.xlu0 %v5821_v28, %s9150_s14 }
 0x813   :  { %6367 = vrot.lane.b32.xlu2 %v6191_v61, %s9152_s20  ;;  %v5239_v1 = vpop.permute.xlu1 %5238  ;;  %v6565_v24 = vld [vmem:[#allocation5 + $0x168] sm:$0xff] }
 0x814   :  { %v7027_v63 = vmax.f32 %v6907_v60, 0.0  ;;  %v5223_v2 = vpop.permute.xlu0 %5222  ;;  %5374 = vst.msk [vmem:[#allocation5 + $0x1b0] sm:$0xff] %vm5319_vm9, %v5239_v1  ;;  %9090 = vmatmul.msk.f32.gmra.mxu2 %vm6593_vm13, %v6565_v24 }
 0x815   :  { %v5225_v44 = vpop.permute.xlu2 %5224  ;;  %5366 = vst.msk [vmem:[#allocation5 + $0x170] sm:$0xff] %vm5319_vm9, %v5223_v2 }
 0x816   :  { %7090 = vst.msk [vmem:[#allocation6 + $0x110] sm:$0xff] %vm6587_vm14, %v7027_v63  ;;  %v6573_v52 = vld [vmem:[#allocation5 + $0x1a8] sm:$0xff] }
 0x817   :  { %9098 = vmatmul.msk.f32.gmra.mxu3 %vm6593_vm13, %v6573_v52  ;;  %5745 = vst.msk [vmem:[#allocation5 + $0x170] sm:$0xff] %vm5698_vm10, %v5602_v45 }
 0x818   :  { %5367 = vst.msk [vmem:[#allocation5 + $0x178] sm:$0xff] %vm5319_vm9, %v5225_v44 }
 0x819   :  { %5250 = vrot.lane.b32.xlu1 %v5064_v25, %s9151_s15 }
 0x81a   :  { %v6909_v14 = vpop.f32.mrf.mxu2  ;;  %5611 = vrot.lane.b32.xlu0 %v5434_v4, %s9148_s12 }
 0x81b   :  { %v6910_v6 = vadd.f32 %v12978_v58, %v6909_v14  ;;  %5232 = vrot.lane.b32.xlu2 %v5055_v5, %s9151_s15  ;;  %v5981_v7 = vpop.permute.xlu1 %5980 }
 0x81c   :  { %v5618_v8 = vpop.permute.xlu0 %5617  ;;  %6124 = vst.msk [vmem:[#allocation5 + $0x170] sm:$0xff] %vm6077_vm11, %v5981_v7 }
 0x81d   :  { %v7028_v62 = vmax.f32 %v6910_v6, 0.0  ;;  %v5620_v30 = vpop.permute.xlu2 %5619  ;;  %5753 = vst.msk [vmem:[#allocation5 + $0x1b0] sm:$0xff] %vm5698_vm10, %v5618_v8 }
 0x81e   :  { %6132 = vst.msk [vmem:[#allocation5 + $0x1b0] sm:$0xff] %vm6077_vm11, %v5997_v55 }
 0x81f   :  { %7091 = vst.msk [vmem:[#allocation6 + $0x118] sm:$0xff] %vm6587_vm14, %v7028_v62 }
 0x821   :  { %6369 = vrot.lane.b32.xlu1 %v6192_v9, %s9152_s20 }
 0x822   :  { %5629 = vrot.lane.b32.xlu0 %v5443_v10, %s9148_s12 }
 0x823   :  { %5990 = vrot.lane.b32.xlu2 %v5813_v11, %s9150_s14  ;;  %v6376_v13 = vpop.permute.xlu1 %6375 }
 0x824   :  { %v6360_v12 = vpop.permute.xlu0 %6359  ;;  %6511 = vst.msk [vmem:[#allocation5 + $0x1b0] sm:$0xff] %vm6456_vm12, %v6376_v13 }
 0x825   :  { %v6362_v16 = vpop.permute.xlu2 %6361  ;;  %6503 = vst.msk [vmem:[#allocation5 + $0x170] sm:$0xff] %vm6456_vm12, %v6360_v12 }
 0x828   :  { %v6912_v17 = vpop.f32.mrf.mxu2 }
 0x829   :  { %v6913_v51 = vadd.f32 %v12978_v58, %v6912_v17  ;;  %5252 = vrot.lane.b32.xlu1 %v5065_v18, %s9151_s15 }
 0x82a   :  { %6387 = vrot.lane.b32.xlu0 %v6201_v19, %s9152_s20 }
 0x82b   :  { %v7029_v20 = vmax.f32 %v6913_v51, 0.0  ;;  %6008 = vrot.lane.b32.xlu2 %v5822_v35, %s9150_s14  ;;  %v5604_v22 = vpop.permute.xlu1 %5603  ;;  %v6574_v26 = vld [vmem:[#allocation5 + $0x1b0] sm:$0xff] }
 0x82c   :  { %v5241_v21 = vpop.permute.xlu0 %5240  ;;  %v6566_v27 = vld [vmem:[#allocation5 + $0x170] sm:$0xff]  ;;  %9099 = vmatmul.msk.f32.gmra.mxu3 %vm6593_vm13, %v6574_v26  ;;  %5746 = vst.msk [vmem:[#allocation5 + $0x178] sm:$0xff] %vm5698_vm10, %v5604_v22 }
 0x82d   :  { %7092 = vst.msk [vmem:[#allocation6 + $0x120] sm:$0xff] %vm6587_vm14, %v7029_v20  ;;  %v5243_v41 = vpop.permute.xlu2 %5242  ;;  %9091 = vmatmul.msk.f32.gmra.mxu2 %vm6593_vm13, %v6566_v27 }
 0x82e   :  { %5375 = vst.msk [vmem:[#allocation5 + $0x1b8] sm:$0xff] %vm5319_vm9, %v5241_v21 }
 0x82f   :  { %5754 = vst.msk [vmem:[#allocation5 + $0x1b8] sm:$0xff] %vm5698_vm10, %v5620_v30 }
 0x830   :  { %5376 = vst.msk [vmem:[#allocation5 + $0x1c0] sm:$0xff] %vm5319_vm9, %v5243_v41 }
 0x831   :  { %v6915_v58 = vpop.f32.mrf.mxu2  ;;  %6389 = vrot.lane.b32.xlu1 %v6202_v32, %s9152_s20 }
 0x832   :  { %v6916_v3 = vadd.f32 %v13242_v34, %v6915_v58  ;;  %6010 = vrot.lane.b32.xlu0 %v5823_v33, %s9150_s14 }
 0x833   :  { %5631 = vrot.lane.b32.xlu2 %v5444_v0, %s9148_s12  ;;  %v5999_v15 = vpop.permute.xlu1 %5998 }
 0x834   :  { %v7030_v57 = vmax.f32 %v6916_v3, 0.0  ;;  %v5983_v36 = vpop.permute.xlu0 %5982  ;;  %6133 = vst.msk [vmem:[#allocation5 + $0x1b8] sm:$0xff] %vm6077_vm11, %v5999_v15 }
 0x835   :  { %6125 = vst.msk [vmem:[#allocation5 + $0x178] sm:$0xff] %vm6077_vm11, %v5983_v36  ;;  %v5985_v37 = vpop.permute.xlu2 %5984 }
 0x836   :  { %7093 = vst.msk [vmem:[#allocation6 + $0x128] sm:$0xff] %vm6587_vm14, %v7030_v57 }
 0x837   :  { %6504 = vst.msk [vmem:[#allocation5 + $0x178] sm:$0xff] %vm6456_vm12, %v6362_v16 }
 0x839   :  { %6012 = vrot.lane.b32.xlu1 %v5824_v31, %s9150_s14  ;;  %s9155_s14 = smov 48  }
 0x83a   :  { %v6918_v23 = vpop.f32.mrf.mxu2  ;;  %5633 = vrot.lane.b32.xlu0 %v5445_v38, %s9148_s12  ;;  %s9154_s12 = smov 32  }
 0x83b   :  { %v6919_v40 = vadd.f32 %v13242_v34, %v6918_v23  ;;  %5254 = vrot.lane.b32.xlu2 %v5066_v39, %s9151_s15  ;;  %v5227_v43 = vpop.permute.xlu1 %5226  ;;  %s9156_s15 = smov 80  }
 0x83c   :  { %v6378_v42 = vpop.permute.xlu0 %6377  ;;  %5368 = vst.msk [vmem:[#allocation5 + $0x180] sm:$0xff] %vm5319_vm9, %v5227_v43 }
 0x83d   :  { %v7031_v45 = vmax.f32 %v6919_v40, 0.0  ;;  %6512 = vst.msk [vmem:[#allocation5 + $0x1b8] sm:$0xff] %vm6456_vm12, %v6378_v42  ;;  %v6380_v46 = vpop.permute.xlu2 %6379 }
 0x83e   :  { %v6567_v47 = vld [vmem:[#allocation5 + $0x178] sm:$0xff] }
 0x83f   :  { %7094 = vst.msk [vmem:[#allocation6 + $0x130] sm:$0xff] %vm6587_vm14, %v7031_v45  ;;  %9092 = vmatmul.msk.f32.gmra.mxu2 %vm6593_vm13, %v6567_v47 }
 0x843   :  { %6391 = vrot.lane.b32.xlu2 %v6203_v48, %s9152_s20  ;;  %v5622_v50 = vpop.permute.xlu1 %5621  ;;  %s9157_s20 = smov 96  }
 0x844   :  { %v5606_v49 = vpop.permute.xlu0 %5605  ;;  %v6575_v53 = vld [vmem:[#allocation5 + $0x1b8] sm:$0xff]  ;;  %5755 = vst.msk [vmem:[#allocation5 + $0x1c0] sm:$0xff] %vm5698_vm10, %v5622_v50 }
 0x845   :  { %5747 = vst.msk [vmem:[#allocation5 + $0x180] sm:$0xff] %vm5698_vm10, %v5606_v49  ;;  %v5608_v54 = vpop.permute.xlu2 %5607  ;;  %9100 = vmatmul.msk.f32.gmra.mxu3 %vm6593_vm13, %v6575_v53 }
 0x846   :  { %6126 = vst.msk [vmem:[#allocation5 + $0x180] sm:$0xff] %vm6077_vm11, %v5985_v37 }
 0x848   :  { %v6921_v29 = vpop.f32.mrf.mxu2 }
 0x84b   :  { %v6364_v56 = vpop.permute.xlu1 %6363 }
 0x84c   :  { %v6001_v55 = vpop.permute.xlu0 %6000  ;;  %6505 = vst.msk [vmem:[#allocation5 + $0x180] sm:$0xff] %vm6456_vm12, %v6364_v56 }
 0x84d   :  { %v6003_v59 = vpop.permute.xlu2 %6002  ;;  %6134 = vst.msk [vmem:[#allocation5 + $0x1c0] sm:$0xff] %vm6077_vm11, %v6001_v55 }
 0x84e   :  { %6513 = vst.msk [vmem:[#allocation5 + $0x1c0] sm:$0xff] %vm6456_vm12, %v6380_v46 }
 0x851   :  { %v6924_v28 = vpop.f32.mrf.mxu2 }
 0x852   :  { %v6925_v60 = vadd.f32 %v13242_v34, %v6924_v28 }
 0x853   :  { %v5245_v63 = vpop.permute.xlu1 %5244  ;;  %v6568_v52 = vld [vmem:[#allocation5 + $0x180] sm:$0xff] }
 0x854   :  { %v7033_v61 = vmax.f32 %v6925_v60, 0.0  ;;  %v5229_v1 = vpop.permute.xlu0 %5228  ;;  %5377 = vst.msk [vmem:[#allocation5 + $0x1c8] sm:$0xff] %vm5319_vm9, %v5245_v63  ;;  %9093 = vmatmul.msk.f32.gmra.mxu2 %vm6593_vm13, %v6568_v52 }
 0x855   :  { %v5247_v2 = vpop.permute.xlu2 %5246  ;;  %v6576_v44 = vld [vmem:[#allocation5 + $0x1c0] sm:$0xff]  ;;  %5369 = vst.msk [vmem:[#allocation5 + $0x188] sm:$0xff] %vm5319_vm9, %v5229_v1 }
 0x856   :  { %7096 = vst.msk [vmem:[#allocation6 + $0x140] sm:$0xff] %vm6587_vm14, %v7033_v61  ;;  %9101 = vmatmul.msk.f32.gmra.mxu3 %vm6593_vm13, %v6576_v44 }
 0x857   :  { %5378 = vst.msk [vmem:[#allocation5 + $0x1d0] sm:$0xff] %vm5319_vm9, %v5247_v2 }
 0x858   :  { %5748 = vst.msk [vmem:[#allocation5 + $0x188] sm:$0xff] %vm5698_vm10, %v5608_v54 }
 0x85a   :  { %v6927_v24 = vpop.f32.mrf.mxu2 }
 0x85b   :  { %v6928_v25 = vadd.f32 %v13242_v34, %v6927_v24  ;;  %v5987_v4 = vpop.permute.xlu1 %5986 }
 0x85c   :  { %v5624_v14 = vpop.permute.xlu0 %5623  ;;  %6127 = vst.msk [vmem:[#allocation5 + $0x188] sm:$0xff] %vm6077_vm11, %v5987_v4 }
 0x85d   :  { %v7034_v5 = vmax.f32 %v6928_v25, 0.0  ;;  %v6384_v6 = vpop.permute.xlu2 %6383  ;;  %5756 = vst.msk [vmem:[#allocation5 + $0x1c8] sm:$0xff] %vm5698_vm10, %v5624_v14 }
 0x85e   :  { %6135 = vst.msk [vmem:[#allocation5 + $0x1c8] sm:$0xff] %vm6077_vm11, %v6003_v59 }
 0x85f   :  { %7097 = vst.msk [vmem:[#allocation6 + $0x148] sm:$0xff] %vm6587_vm14, %v7034_v5 }
 0x863   :  { %v6382_v7 = vpop.permute.xlu1 %6381 }
 0x864   :  { %v6366_v8 = vpop.permute.xlu0 %6365  ;;  %6514 = vst.msk [vmem:[#allocation5 + $0x1c8] sm:$0xff] %vm6456_vm12, %v6382_v7  ;;  %v7193_v7 = vld [vmem:[#allocation6 + $0x4] ss:$64 sm:$0x2] }
 0x865   :  { %v5249_v62 = vpop.permute.xlu2 %5248  ;;  %6506 = vst.msk [vmem:[#allocation5 + $0x188] sm:$0xff] %vm6456_vm12, %v6366_v8 }
 0x866   :  { %5379 = vst.msk [vmem:[#allocation5 + $0x1d8] sm:$0xff] %vm5319_vm9, %v5249_v62  ;;  %v7209_v62 = vld [vmem:[#allocation6 + $0x5] ss:$64 sm:$0x2] }
 0x868   :  { %v6930_v30 = vpop.f32.mrf.mxu2 }
 0x869   :  { %v6931_v9 = vadd.f32 %v13242_v34, %v6930_v30  ;;  %v7232_v30 = vld [vmem:[#allocation6 + $0x6] ss:$64 sm:$0x2] }
 0x86b   :  { %v7035_v10 = vmax.f32 %v6931_v9, 0.0  ;;  %v6005_v11 = vpop.permute.xlu1 %6004  ;;  %v6577_v12 = vld [vmem:[#allocation5 + $0x1c8] sm:$0xff] }
 0x86c   :  { %v5626_v13 = vpop.permute.xlu0 %5625  ;;  %9102 = vmatmul.msk.f32.gmra.mxu3 %vm6593_vm13, %v6577_v12  ;;  %v6569_v17 = vld [vmem:[#allocation5 + $0x188] sm:$0xff]  ;;  %v7208_v12 = vld [vmem:[#allocation6 + $0x5] ss:$64 sm:$0x1] }
 0x86d   :  { %7098 = vst.msk [vmem:[#allocation6 + $0x150] sm:$0xff] %vm6587_vm14, %v7035_v10  ;;  %v6368_v16 = vpop.permute.xlu2 %6367  ;;  %9094 = vmatmul.msk.f32.gmra.mxu2 %vm6593_vm13, %v6569_v17 }
 0x86e   :  { %5757 = vst.msk [vmem:[#allocation5 + $0x1d0] sm:$0xff] %vm5698_vm10, %v5626_v13  ;;  %v7195_v13 = vld [vmem:[#allocation6 + $0x4] ss:$64 sm:$0x4] }
 0x86f   :  { %6136 = vst.msk [vmem:[#allocation5 + $0x1d0] sm:$0xff] %vm6077_vm11, %v6005_v11  ;;  %v7192_v11 = vld [vmem:[#allocation6 + $0x4] ss:$64 sm:$0x1] }
 0x870   :  { %6515 = vst.msk [vmem:[#allocation5 + $0x1d0] sm:$0xff] %vm6456_vm12, %v6384_v6 }
 0x871   :  { %v6933_v51 = vpop.f32.mrf.mxu2 }
 0x872   :  { %v6934_v18 = vadd.f32 %v13242_v34, %v6933_v51  ;;  %v7211_v51 = vld [vmem:[#allocation6 + $0x5] ss:$64 sm:$0x4] }
 0x873   :  { %v5610_v35 = vpop.permute.xlu1 %5609 }
 0x874   :  { %v7036_v19 = vmax.f32 %v6934_v18, 0.0  ;;  %v5231_v20 = vpop.permute.xlu0 %5230  ;;  %v7231_v18 = vld [vmem:[#allocation6 + $0x6] ss:$64 sm:$0x1] }
 0x875   :  { %v5233_v21 = vpop.permute.xlu2 %5232  ;;  %5370 = vst.msk [vmem:[#allocation5 + $0x190] sm:$0xff] %vm5319_vm9, %v5231_v20 }
 0x876   :  { %7099 = vst.msk [vmem:[#allocation6 + $0x158] sm:$0xff] %vm6587_vm14, %v7036_v19  ;;  %v7234_v19 = vld [vmem:[#allocation6 + $0x6] ss:$64 sm:$0x4] }
 0x877   :  { %5371 = vst.msk [vmem:[#allocation5 + $0x198] sm:$0xff] %vm5319_vm9, %v5233_v21  ;;  %v6578_v22 = vld [vmem:[#allocation5 + $0x1d0] sm:$0xff]  ;;  %v7197_v21 = vld [vmem:[#allocation6 + $0x4] ss:$64 sm:$0x8] }
 0x878   :  { %5749 = vst.msk [vmem:[#allocation5 + $0x190] sm:$0xff] %vm5698_vm10, %v5610_v35  ;;  %9103 = vmatmul.msk.f32.gmra.mxu3 %vm6593_vm13, %v6578_v22  ;;  %v7154_v35 = vld [vmem:[#allocation6 + $0x2] ss:$64 sm:$0x2] }
 0x879   :  { %v7213_v22 = vld [vmem:[#allocation6 + $0x5] ss:$64 sm:$0x8] }
 0x87b   :  { %v5628_v26 = vpop.permute.xlu1 %5627 }
 0x87c   :  { %v5989_v41 = vpop.permute.xlu0 %5988  ;;  %5758 = vst.msk [vmem:[#allocation5 + $0x1d8] sm:$0xff] %vm5698_vm10, %v5628_v26  ;;  %v7247_v26 = vld [vmem:[#allocation6 + $0x7] ss:$64 sm:$0x1] }
 0x87d   :  { %v5991_v27 = vpop.permute.xlu2 %5990  ;;  %6128 = vst.msk [vmem:[#allocation5 + $0x190] sm:$0xff] %vm6077_vm11, %v5989_v41  ;;  %v7250_v41 = vld [vmem:[#allocation6 + $0x7] ss:$64 sm:$0x4] }
 0x87e   :  { %6507 = vst.msk [vmem:[#allocation5 + $0x190] sm:$0xff] %vm6456_vm12, %v6368_v16  ;;  %v7248_v16 = vld [vmem:[#allocation6 + $0x7] ss:$64 sm:$0x2] }
 0x881   :  { %v6936_v58 = vpop.f32.mrf.mxu2 }
 0x882   :  { %v6937_v32 = vadd.f32 %v13242_v34, %v6936_v58 }
 0x883   :  { %v6386_v3 = vpop.permute.xlu1 %6385 }
 0x884   :  { %v7037_v33 = vmax.f32 %v6937_v32, 0.0  ;;  %v6007_v0 = vpop.permute.xlu0 %6006  ;;  %v7194_v32 = vor.u32 %v7193_v7, %v7192_v11  ;;  %v7126_v11 = vld [vmem:[#allocation6] ss:$64 sm:$0x10] }
 0x885   :  { %v6009_v57 = vpop.permute.xlu2 %6008  ;;  %6137 = vst.msk [vmem:[#allocation5 + $0x1d8] sm:$0xff] %vm6077_vm11, %v6007_v0  ;;  %v6570_v36 = vld [vmem:[#allocation5 + $0x190] sm:$0xff]  ;;  %v7153_v0 = vld [vmem:[#allocation6 + $0x2] ss:$64 sm:$0x1] }
 0x886   :  { %7100 = vst.msk [vmem:[#allocation6 + $0x160] sm:$0xff] %vm6587_vm14, %v7037_v33  ;;  %9095 = vmatmul.msk.f32.gmra.mxu2 %vm6593_vm13, %v6570_v36  ;;  %v7210_v33 = vor.u32 %v7209_v62, %v7208_v12  ;;  %v7120_v36 = vld [vmem:[#allocation6] ss:$64 sm:$0x2] }
 0x887   :  { %6516 = vst.msk [vmem:[#allocation5 + $0x1d8] sm:$0xff] %vm6456_vm12, %v6386_v3  ;;  %v7236_v3 = vld [vmem:[#allocation6 + $0x6] ss:$64 sm:$0x8] }
 0x888   :  { %v6960_v15 = vpop.f32.mrf.mxu3 }
 0x889   :  { %v6961_v37 = vadd.f32 %v13242_v34, %v6960_v15  ;;  %v7136_v15 = vld [vmem:[#allocation6 + $0x1] ss:$64 sm:$0x2] }
 0x88b   :  { %v7045_v31 = vmax.f32 %v6961_v37, 0.0  ;;  %v5251_v38 = vpop.permute.xlu1 %5250  ;;  %v7199_v37 = vld [vmem:[#allocation6 + $0x4] ss:$64 sm:$0x10] }
 0x88c   :  { %v5612_v23 = vpop.permute.xlu0 %5611  ;;  %5380 = vst.msk [vmem:[#allocation5 + $0x1e0] sm:$0xff] %vm5319_vm9, %v5251_v38  ;;  %v7252_v38 = vld [vmem:[#allocation6 + $0x7] ss:$64 sm:$0x8] }
 0x88d   :  { %7108 = vst.msk [vmem:[#allocation6 + $0x1a0] sm:$0xff] %vm6587_vm14, %v7045_v31  ;;  %v5632_v39 = vpop.permute.xlu2 %5631  ;;  %v7233_v31 = vor.u32 %v7232_v30, %v7231_v18  ;;  %v7256_v30 = vld [vmem:[#allocation6 + $0x7] ss:$64 sm:$0x20] }
 0x88e   :  { %v6579_v40 = vld [vmem:[#allocation5 + $0x1d8] sm:$0xff]  ;;  %5750 = vst.msk [vmem:[#allocation5 + $0x198] sm:$0xff] %vm5698_vm10, %v5612_v23 }
 0x88f   :  { %9104 = vmatmul.msk.f32.gmra.mxu3 %vm6593_vm13, %v6579_v40  ;;  %6129 = vst.msk [vmem:[#allocation5 + $0x198] sm:$0xff] %vm6077_vm11, %v5991_v27  ;;  %v7170_v27 = vld [vmem:[#allocation6 + $0x3] ss:$64 sm:$0x2]  ;;  %v7196_v40 = vor.u32 %v7195_v13, %v7194_v32 }
 0x890   :  { %v7169_v23 = vld [vmem:[#allocation6 + $0x3] ss:$64 sm:$0x1]  ;;  %v7142_v13 = vld [vmem:[#allocation6 + $0x1] ss:$64 sm:$0x10] }
 0x893   :  { %v6370_v42 = vpop.permute.xlu1 %6369 }
 0x894   :  { %v5630_v43 = vpop.permute.xlu0 %5629  ;;  %6508 = vst.msk [vmem:[#allocation5 + $0x198] sm:$0xff] %vm6456_vm12, %v6370_v42  ;;  %v7212_v42 = vor.u32 %v7211_v51, %v7210_v33 }
 0x895   :  { %v5255_v45 = vpop.permute.xlu2 %5254  ;;  %5759 = vst.msk [vmem:[#allocation5 + $0x1e0] sm:$0xff] %vm5698_vm10, %v5630_v43  ;;  %v7215_v43 = vld [vmem:[#allocation6 + $0x5] ss:$64 sm:$0x10] }
 0x896   :  { %5382 = vst.msk [vmem:[#allocation5 + $0x1f0] sm:$0xff] %vm5319_vm9, %v5255_v45  ;;  %v7249_v45 = vor.u32 %v7248_v16, %v7247_v26 }
 0x897   :  { %6138 = vst.msk [vmem:[#allocation5 + $0x1e0] sm:$0xff] %vm6077_vm11, %v6009_v57  ;;  %v6939_v47 = vpop.f32.mrf.mxu2  ;;  %v7156_v57 = vld [vmem:[#allocation6 + $0x2] ss:$64 sm:$0x4] }
 0x898   :  { %v6940_v49 = vadd.f32 %v13242_v34, %v6939_v47  ;;  %v7119_v47 = vld [vmem:[#allocation6] ss:$64 sm:$0x1] }
 0x89a   :  { %v6963_v46 = vpop.f32.mrf.mxu3  ;;  %v7038_v55 = vmax.f32 %v6940_v49, 0.0  ;;  %v7135_v49 = vld [vmem:[#allocation6 + $0x1] ss:$64 sm:$0x1] }
 0x89b   :  { %v6964_v48 = vadd.f32 %v13242_v34, %v6963_v46  ;;  %v5253_v50 = vpop.permute.xlu1 %5252  ;;  %v6571_v54 = vld [vmem:[#allocation5 + $0x198] sm:$0xff] }
 0x89c   :  { %v6388_v53 = vpop.permute.xlu0 %6387  ;;  %5381 = vst.msk [vmem:[#allocation5 + $0x1e8] sm:$0xff] %vm5319_vm9, %v5253_v50  ;;  %9096 = vmatmul.msk.f32.gmra.mxu2 %vm6593_vm13, %v6571_v54  ;;  %v7158_v46 = vld [vmem:[#allocation6 + $0x2] ss:$64 sm:$0x8] }
 0x89d   :  { %v7046_v29 = vmax.f32 %v6964_v48, 0.0  ;;  %5760 = vst.msk [vmem:[#allocation5 + $0x1e8] sm:$0xff] %vm5698_vm10, %v5632_v39  ;;  %v6392_v63 = vpop.permute.xlu2 %6391  ;;  %v7172_v39 = vld [vmem:[#allocation6 + $0x3] ss:$64 sm:$0x4] }
 0x89e   :  { %7101 = vst.msk [vmem:[#allocation6 + $0x168] sm:$0xff] %vm6587_vm14, %v7038_v55  ;;  %v7122_v48 = vld [vmem:[#allocation6] ss:$64 sm:$0x4]  ;;  %v7155_v55 = vor.u32 %v7154_v35, %v7153_v0 }
 0x89f   :  { %7109 = vst.msk [vmem:[#allocation6 + $0x1a8] sm:$0xff] %vm6587_vm14, %v7046_v29  ;;  %v7138_v50 = vld [vmem:[#allocation6 + $0x1] ss:$64 sm:$0x4] }
 0x8a0   :  { %6517 = vst.msk [vmem:[#allocation5 + $0x1e0] sm:$0xff] %vm6456_vm12, %v6388_v53  ;;  %v7235_v53 = vor.u32 %v7234_v19, %v7233_v31  ;;  %v7238_v54 = vld [vmem:[#allocation6 + $0x6] ss:$64 sm:$0x10] }
 0x8a1   :  { %v7254_v29 = vld [vmem:[#allocation6 + $0x7] ss:$64 sm:$0x10] }
 0x8a3   :  { %v6390_v56 = vpop.permute.xlu1 %6389 }
 0x8a4   :  { %v6011_v59 = vpop.permute.xlu0 %6010 }
 0x8a5   :  { %6139 = vst.msk [vmem:[#allocation5 + $0x1e8] sm:$0xff] %vm6077_vm11, %v6011_v59  ;;  %v7198_v59 = vor.u32 %v7197_v21, %v7196_v40 }
 0x8a6   :  { %6518 = vst.msk [vmem:[#allocation5 + $0x1e8] sm:$0xff] %vm6456_vm12, %v6390_v56  ;;  %v7174_v56 = vld [vmem:[#allocation6 + $0x3] ss:$64 sm:$0x8] }
 0x8a7   :  { %v6580_v28 = vld [vmem:[#allocation5 + $0x1e0] sm:$0xff]  ;;  %v7200_v7 = vor.u32 %v7199_v37, %v7198_v59 }
 0x8a8   :  { %9105 = vmatmul.msk.f32.gmra.mxu3 %vm6593_vm13, %v6580_v28  ;;  %v7201_v28 = vld [vmem:[#allocation6 + $0x4] ss:$64 sm:$0x20] }
 0x8a9   :  { %v7202_v19 = vor.u32 %v7201_v28, %v7200_v7 }
 0x8ab   :  { %v6013_v60 = vpop.permute.xlu1 %6012 }
 0x8ac   :  { %v5634_v61 = vpop.permute.xlu0 %5633 }
 0x8ad   :  { %5761 = vst.msk [vmem:[#allocation5 + $0x1f0] sm:$0xff] %vm5698_vm10, %v5634_v61  ;;  %v6581_v1 = vld [vmem:[#allocation5 + $0x1e8] sm:$0xff]  ;;  %v7251_v61 = vor.u32 %v7250_v41, %v7249_v45  ;;  %v7128_v41 = vld [vmem:[#allocation6] ss:$64 sm:$0x20] }
 0x8ae   :  { %6140 = vst.msk [vmem:[#allocation5 + $0x1f0] sm:$0xff] %vm6077_vm11, %v6013_v60  ;;  %v7214_v60 = vor.u32 %v7213_v22, %v7212_v42 }
 0x8af   :  { %6519 = vst.msk [vmem:[#allocation5 + $0x1f0] sm:$0xff] %vm6456_vm12, %v6392_v63  ;;  %v6966_v2 = vpop.f32.mrf.mxu3  ;;  %v7160_v63 = vld [vmem:[#allocation6 + $0x2] ss:$64 sm:$0x10]  ;;  %v7253_v62 = vor.u32 %v7252_v38, %v7251_v61 }
 0x8b0   :  { %9106 = vmatmul.msk.f32.gmra.mxu3 %vm6593_vm13, %v6581_v1  ;;  %v6942_v44 = vpop.f32.mrf.mxu2  ;;  %v6967_v52 = vadd.f32 %v13242_v34, %v6966_v2  ;;  %v7171_v1 = vor.u32 %v7170_v27, %v7169_v23  ;;  %v7124_v2 = vld [vmem:[#allocation6] ss:$64 sm:$0x8] }
 0x8b1   :  { %v6943_v24 = vadd.f32 %v13242_v34, %v6942_v44  ;;  %v7140_v44 = vld [vmem:[#allocation6 + $0x1] ss:$64 sm:$0x8]  ;;  %v7255_v22 = vor.u32 %v7254_v29, %v7253_v62 }
 0x8b2   :  { %v7047_v25 = vmax.f32 %v6967_v52, 0.0  ;;  %v7217_v52 = vld [vmem:[#allocation6 + $0x5] ss:$64 sm:$0x20] }
 0x8b3   :  { %v7039_v4 = vmax.f32 %v6943_v24, 0.0  ;;  %v7237_v24 = vor.u32 %v7236_v3, %v7235_v53  ;;  %v7257_v38 = vor.u32 %v7256_v30, %v7255_v22  ;;  %v7310_v30 = vld [vmem:[#allocation6 + $0xa] ss:$64 sm:$0x2] }
 0x8b4   :  { %7110 = vst.msk [vmem:[#allocation6 + $0x1b0] sm:$0xff] %vm6587_vm14, %v7047_v25  ;;  %v7240_v25 = vld [vmem:[#allocation6 + $0x6] ss:$64 sm:$0x20] }
 0x8b5   :  { %7102 = vst.msk [vmem:[#allocation6 + $0x170] sm:$0xff] %vm6587_vm14, %v7039_v4  ;;  %v7157_v4 = vor.u32 %v7156_v57, %v7155_v55  ;;  %v7239_v12 = vor.u32 %v7238_v54, %v7237_v24  ;;  %v7144_v57 = vld [vmem:[#allocation6 + $0x1] ss:$64 sm:$0x20] }
 0x8b6   :  { %v6582_v14 = vld [vmem:[#allocation5 + $0x1f0] sm:$0xff] }
 0x8b7   :  { %v7159_v16 = vor.u32 %v7158_v46, %v7157_v4  ;;  %v7241_v32 = vor.u32 %v7240_v25, %v7239_v12  ;;  %v13342_v12 = vld [vmem:[#allocation6 + $0xd] ss:$64 sm:$0x2] }
 0x8b8   :  { %9107 = vmatmul.msk.f32.gmra.mxu3 %vm6593_vm13, %v6582_v14  ;;  %v7176_v14 = vld [vmem:[#allocation6 + $0x3] ss:$64 sm:$0x10] }
 0x8b9   :  { %v7161_v33 = vor.u32 %v7160_v63, %v7159_v16  ;;  %v13344_v16 = vld [vmem:[#allocation6 + $0x8] ss:$64 sm:$0x2] }
 0x8c2   :  { %v6945_v5 = vpop.f32.mrf.mxu2 }
 0x8c3   :  { %v7121_v5 = vor.u32 %v7120_v36, %v7119_v47 }
 0x8c5   :  { %v7123_v51 = vor.u32 %v7122_v48, %v7121_v5 }
 0x8c7   :  { %v7125_v3 = vor.u32 %v7124_v2, %v7123_v51  ;;  %v7309_v51 = vld [vmem:[#allocation6 + $0xa] ss:$64 sm:$0x1] }
 0x8c8   :  { %v6969_v6 = vpop.f32.mrf.mxu3 }
 0x8c9   :  { %v7137_v6 = vor.u32 %v7136_v15, %v7135_v49  ;;  %v7127_v45 = vor.u32 %v7126_v11, %v7125_v3  ;;  %v7326_v11 = vld [vmem:[#allocation6 + $0xb] ss:$64 sm:$0x2]  ;;  %v7270_v3 = vld [vmem:[#allocation6 + $0x8] ss:$64 sm:$0x1] }
 0x8cb   :  { %v7139_v18 = vor.u32 %v7138_v50, %v7137_v6  ;;  %v7129_v28 = vor.u32 %v7128_v41, %v7127_v45  ;;  %v7325_v41 = vld [vmem:[#allocation6 + $0xb] ss:$64 sm:$0x1]  ;;  %v7273_v45 = vld [vmem:[#allocation6 + $0x8] ss:$64 sm:$0x4] }
 0x8cd   :  { %v7141_v0 = vor.u32 %v7140_v44, %v7139_v18  ;;  %v7312_v18 = vld [vmem:[#allocation6 + $0xa] ss:$64 sm:$0x4] }
 0x8cf   :  { %v7143_v46 = vor.u32 %v7142_v13, %v7141_v0  ;;  %v7349_v13 = vld [vmem:[#allocation6 + $0xc] ss:$64 sm:$0x2]  ;;  %v13354_v0 = vld [vmem:[#allocation6 + $0x16] ss:$64 sm:$0x2] }
 0x8d1   :  { %v7145_v44 = vor.u32 %v7144_v57, %v7143_v46  ;;  %v13356_v57 = vld [vmem:[#allocation6 + $0x17] ss:$64 sm:$0x2]  ;;  %v13368_v46 = vld [vmem:[#allocation6 + $0x16] ss:$64 sm:$0x1] }
 0x8d7   :  { %v6948_v9 = vpop.f32.mrf.mxu2 }
 0x8d8   :  { %v6949_v17 = vadd.f32 %v13242_v34, %v6948_v9  ;;  %v7162_v9 = vld [vmem:[#allocation6 + $0x2] ss:$64 sm:$0x20] }
 0x8d9   :  { %v6972_v8 = vpop.f32.mrf.mxu3 }
 0x8da   :  { %v6973_v10 = vadd.f32 %v13242_v34, %v6972_v8  ;;  %v7041_v58 = vmax.f32 %v6949_v17, 0.0  ;;  %v7216_v8 = vor.u32 %v7215_v43, %v7214_v60  ;;  %v7178_v17 = vld [vmem:[#allocation6 + $0x3] ss:$64 sm:$0x20]  ;;  %v7163_v43 = vor.u32 %v7162_v9, %v7161_v33 }
 0x8db   :  { %v7364_v33 = vld [vmem:[#allocation6 + $0xd] ss:$64 sm:$0x1] }
 0x8dc   :  { %v7049_v20 = vmax.f32 %v6973_v10, 0.0  ;;  %7104 = vst.msk [vmem:[#allocation6 + $0x180] sm:$0xff] %vm6587_vm14, %v7041_v58  ;;  %v7173_v10 = vor.u32 %v7172_v39, %v7171_v1 }
 0x8de   :  { %7112 = vst.msk [vmem:[#allocation6 + $0x1c0] sm:$0xff] %vm6587_vm14, %v7049_v20  ;;  %v7218_v20 = vor.u32 %v7217_v52, %v7216_v8  ;;  %v7175_v26 = vor.u32 %v7174_v56, %v7173_v10 }
 0x8e0   :  { %v7177_v23 = vor.u32 %v7176_v14, %v7175_v26 }
 0x8e2   :  { %v7179_v54 = vor.u32 %v7178_v17, %v7177_v23  ;;  %v13362_v23 = vld [vmem:[#allocation6 + $0x14] ss:$64 sm:$0x2] }
 0x8e3   :  { %v7203_v27 = vld [vmem:[#allocation6 + $0x4] ss:$64 sm:$0x40]  ;;  %v7219_v58 = vld [vmem:[#allocation6 + $0x5] ss:$64 sm:$0x40] }
 0x8e4   :  { %v7204_v36 = vor.u32 %v7203_v27, %v7202_v19  ;;  %v7220_v15 = vor.u32 %v7219_v58, %v7218_v20  ;;  %v7242_v37 = vld [vmem:[#allocation6 + $0x6] ss:$64 sm:$0x40]  ;;  %v7258_v40 = vld [vmem:[#allocation6 + $0x7] ss:$64 sm:$0x40] }
 0x8e5   :  { %v7205_v35 = vld [vmem:[#allocation6 + $0x4] ss:$64 sm:$0x80]  ;;  %v7221_v21 = vld [vmem:[#allocation6 + $0x5] ss:$64 sm:$0x80]  ;;  %v7243_v39 = vor.u32 %v7242_v37, %v7241_v32  ;;  %v7259_v49 = vor.u32 %v7258_v40, %v7257_v38 }
 0x8e6   :  { %v7244_v31 = vld [vmem:[#allocation6 + $0x6] ss:$64 sm:$0x80]  ;;  %v7260_v42 = vld [vmem:[#allocation6 + $0x7] ss:$64 sm:$0x80]  ;;  %v7206_v47 = vor.u32 %v7205_v35, %v7204_v36  ;;  %v7222_v48 = vor.u32 %v7221_v21, %v7220_v15 }
 0x8e7   :  { %v7164_v50 = vld [vmem:[#allocation6 + $0x2] ss:$64 sm:$0x40]  ;;  %v7245_v29 = vor.u32 %v7244_v31, %v7243_v39  ;;  %v7180_v56 = vld [vmem:[#allocation6 + $0x3] ss:$64 sm:$0x40]  ;;  %v7261_v61 = vor.u32 %v7260_v42, %v7259_v49  ;;  %v7311_v42 = vor.u32 %v7310_v30, %v7309_v51  ;;  %v7327_v49 = vor.u32 %v7326_v11, %v7325_v41 }
 0x8e8   :  { %v7166_v53 = vld [vmem:[#allocation6 + $0x2] ss:$64 sm:$0x80]  ;;  %v7165_v55 = vor.u32 %v7164_v50, %v7163_v43  ;;  %v7182_v59 = vld [vmem:[#allocation6 + $0x3] ss:$64 sm:$0x80]  ;;  %v7223_v60 = vmax.f32 %v7206_v47, %v7222_v48  ;;  %v7181_v63 = vor.u32 %v7180_v56, %v7179_v54  ;;  %v7366_v54 = vor.u32 %v13342_v12, %v7364_v33 }
 0x8e9   :  { %v7130_v1 = vld [vmem:[#allocation6] ss:$64 sm:$0x40]  ;;  %v7146_v25 = vld [vmem:[#allocation6 + $0x1] ss:$64 sm:$0x40]  ;;  %v7262_v14 = vmax.f32 %v7245_v29, %v7261_v61  ;;  %v7313_v61 = vor.u32 %v7312_v18, %v7311_v42 }
 0x8ea   :  { %v7132_v2 = vld [vmem:[#allocation6] ss:$64 sm:$0x80]  ;;  %v7167_v52 = vor.u32 %v7166_v53, %v7165_v55  ;;  %v7131_v24 = vor.u32 %v7130_v1, %v7129_v28  ;;  %v7148_v4 = vld [vmem:[#allocation6 + $0x1] ss:$64 sm:$0x80]  ;;  %7225 = vrot.lane.b32.xlu1 %v7223_v60, %s9154_s12  ;;  %v7183_v5 = vor.u32 %v7182_v59, %v7181_v63  ;;  %v7147_v6 = vor.u32 %v7146_v25, %v7145_v44 }
 0x8eb   :  { %7264 = vrot.lane.b32.xlu2 %v7262_v14, %s9155_s14  ;;  %v13347_v19 = vld [vmem:[#allocation6 + $0x9] ss:$64 sm:$0x2]  ;;  %v13349_v35 = vld [vmem:[#allocation6 + $0xe] ss:$64 sm:$0x2]  ;;  %v7272_v55 = vor.u32 %v13344_v16, %v7270_v3 }
 0x8ec   :  { %v7133_v7 = vor.u32 %v7132_v2, %v7131_v24  ;;  %v7184_v8 = vmax.f32 %v7167_v52, %v7183_v5  ;;  %v7149_v9 = vor.u32 %v7148_v4, %v7147_v6  ;;  %v13351_v20 = vld [vmem:[#allocation6 + $0xf] ss:$64 sm:$0x2]  ;;  %v7328_v27 = vld [vmem:[#allocation6 + $0xb] ss:$64 sm:$0x4] }
 0x8ed   :  { %v7348_v58 = vld [vmem:[#allocation6 + $0xc] ss:$64 sm:$0x1]  ;;  %v7314_v36 = vld [vmem:[#allocation6 + $0xa] ss:$64 sm:$0x8]  ;;  %v7329_v25 = vor.u32 %v7328_v27, %v7327_v49  ;;  %v7274_v18 = vor.u32 %v7273_v45, %v7272_v55 }
 0x8ee   :  { %7186 = vrot.lane.b32.xlu0 %v7184_v8, %s9149_s17  ;;  %v7150_v21 = vmax.f32 %v7133_v7, %v7149_v9  ;;  %v7351_v32 = vld [vmem:[#allocation6 + $0xc] ss:$64 sm:$0x4]  ;;  %v7367_v15 = vld [vmem:[#allocation6 + $0xd] ss:$64 sm:$0x4]  ;;  %v7350_v50 = vor.u32 %v7349_v13, %v7348_v58  ;;  %v7315_v30 = vor.u32 %v7314_v36, %v7313_v61 }
 0x8ef   :  { %v6975_v62 = vpop.f32.mrf.mxu3  ;;  %v7286_v37 = vld [vmem:[#allocation6 + $0x9] ss:$64 sm:$0x1]  ;;  %v13358_v31 = vld [vmem:[#allocation6 + $0xe] ss:$64 sm:$0x1] }
 0x8f0   :  { %v6976_v10 = vadd.f32 %v13242_v34, %v6975_v62  ;;  %v6951_v17 = vpop.f32.mrf.mxu2  ;;  %v13360_v38 = vld [vmem:[#allocation6 + $0xf] ss:$64 sm:$0x1]  ;;  %v13364_v39 = vld [vmem:[#allocation6 + $0x15] ss:$64 sm:$0x2]  ;;  %v7288_v1 = vor.u32 %v13347_v19, %v7286_v37  ;;  %v7389_v2 = vor.u32 %v13349_v35, %v13358_v31  ;;  %v7352_v14 = vor.u32 %v7351_v32, %v7350_v50 }
 0x8f1   :  { %v6952_v22 = vadd.f32 %v13242_v34, %v6951_v17  ;;  %7151 = vst.msk [vmem:[#allocation7] sm:$0xff] %vm6587_vm14, %v7150_v21  ;;  %v7330_v43 = vld [vmem:[#allocation6 + $0xb] ss:$64 sm:$0x8]  ;;  %v7405_v44 = vor.u32 %v13351_v20, %v13360_v38 }
 0x8f2   :  { %v7050_v26 = vmax.f32 %v6976_v10, 0.0  ;;  %v13370_v47 = vld [vmem:[#allocation6 + $0x17] ss:$64 sm:$0x1]  ;;  %v7368_v10 = vor.u32 %v7367_v15, %v7366_v54  ;;  %v7331_v17 = vor.u32 %v7330_v43, %v7329_v25 }
 0x8f3   :  { %v7042_v40 = vmax.f32 %v6952_v22, 0.0  ;;  %v13372_v48 = vld [vmem:[#allocation6 + $0x12] ss:$64 sm:$0x2] }
 0x8f4   :  { %7113 = vst.msk [vmem:[#allocation6 + $0x1c8] sm:$0xff] %vm6587_vm14, %v7050_v26  ;;  %v7353_v53 = vld [vmem:[#allocation6 + $0xc] ss:$64 sm:$0x8] }
 0x8f5   :  { %v7369_v29 = vld [vmem:[#allocation6 + $0xd] ss:$64 sm:$0x8]  ;;  %v7289_v56 = vld [vmem:[#allocation6 + $0x9] ss:$64 sm:$0x4]  ;;  %v7354_v51 = vor.u32 %v7353_v53, %v7352_v14 }
 0x8f6   :  { %v13376_v59 = vld [vmem:[#allocation6 + $0x14] ss:$64 sm:$0x1]  ;;  %v13378_v28 = vld [vmem:[#allocation6 + $0x15] ss:$64 sm:$0x1]  ;;  %v7370_v27 = vor.u32 %v7369_v29, %v7368_v10  ;;  %v7290_v58 = vor.u32 %v7289_v56, %v7288_v1 }
 0x8f7   :  { %v13380_v60 = vld [vmem:[#allocation6 + $0x13] ss:$64 sm:$0x2]  ;;  %7105 = vst.msk [vmem:[#allocation6 + $0x188] sm:$0xff] %vm6587_vm14, %v7042_v40 }
 0x8f8   :  { %v7275_v63 = vld [vmem:[#allocation6 + $0x8] ss:$64 sm:$0x8]  ;;  %v13388_v52 = vld [vmem:[#allocation6 + $0x12] ss:$64 sm:$0x1] }
 0x8f9   :  { %v7316_v24 = vld [vmem:[#allocation6 + $0xa] ss:$64 sm:$0x10]  ;;  %v7332_v4 = vld [vmem:[#allocation6 + $0xb] ss:$64 sm:$0x10]  ;;  %v7276_v31 = vor.u32 %v7275_v63, %v7274_v18 }
 0x8fa   :  { %v7291_v5 = vld [vmem:[#allocation6 + $0x9] ss:$64 sm:$0x8]  ;;  %v7390_v6 = vld [vmem:[#allocation6 + $0xe] ss:$64 sm:$0x4]  ;;  %v7317_v22 = vor.u32 %v7316_v24, %v7315_v30  ;;  %v7333_v36 = vor.u32 %v7332_v4, %v7331_v17 }
 0x8fb   :  { %v13394_v62 = vld [vmem:[#allocation6 + $0x13] ss:$64 sm:$0x1]  ;;  %v7355_v9 = vld [vmem:[#allocation6 + $0xc] ss:$64 sm:$0x10]  ;;  %v6978_v21 = vpop.f32.mrf.mxu3  ;;  %v7292_v49 = vor.u32 %v7291_v5, %v7290_v58  ;;  %v7391_v53 = vor.u32 %v7390_v6, %v7389_v2 }
 0x8fc   :  { %v7371_v11 = vld [vmem:[#allocation6 + $0xd] ss:$64 sm:$0x10]  ;;  %v7318_v16 = vld [vmem:[#allocation6 + $0xa] ss:$64 sm:$0x20]  ;;  %v6979_v3 = vadd.f32 %v13242_v34, %v6978_v21  ;;  %v7356_v15 = vor.u32 %v7355_v9, %v7354_v51 }
 0x8fd   :  { %v7277_v19 = vld [vmem:[#allocation6 + $0x8] ss:$64 sm:$0x10]  ;;  %v7406_v35 = vld [vmem:[#allocation6 + $0xf] ss:$64 sm:$0x4]  ;;  %v7319_v42 = vor.u32 %v7318_v16, %v7317_v22  ;;  %v7372_v43 = vor.u32 %v7371_v11, %v7370_v27 }
 0x8fe   :  { %v7334_v26 = vld [vmem:[#allocation6 + $0xb] ss:$64 sm:$0x20]  ;;  %v7357_v41 = vld [vmem:[#allocation6 + $0xc] ss:$64 sm:$0x20]  ;;  %v7278_v34 = vor.u32 %v7277_v19, %v7276_v31  ;;  %v7407_v11 = vor.u32 %v7406_v35, %v7405_v44 }
 0x8ff   :  { %v13402_v32 = vld [vmem:[#allocation6 + $0xe] ss:$64 sm:$0x8]  ;;  %v7373_v37 = vld [vmem:[#allocation6 + $0xd] ss:$64 sm:$0x20]  ;;  %v7335_v61 = vor.u32 %v7334_v26, %v7333_v36  ;;  %v7358_v1 = vor.u32 %v7357_v41, %v7356_v15 }
 0x900   :  { %v7293_v38 = vld [vmem:[#allocation6 + $0x9] ss:$64 sm:$0x10]  ;;  %v7408_v40 = vld [vmem:[#allocation6 + $0xf] ss:$64 sm:$0x8]  ;;  %v7374_v9 = vor.u32 %v7373_v37, %v7372_v43  ;;  %v7393_v19 = vor.u32 %v13402_v32, %v7391_v53 }
 0x901   :  { %v7279_v45 = vld [vmem:[#allocation6 + $0x8] ss:$64 sm:$0x20]  ;;  %v7295_v50 = vld [vmem:[#allocation6 + $0x9] ss:$64 sm:$0x20]  ;;  %v7294_v10 = vor.u32 %v7293_v38, %v7292_v49  ;;  %v7409_v58 = vor.u32 %v7408_v40, %v7407_v11 }
 0x902   :  { %v13407_v54 = vld [vmem:[#allocation6 + $0x10] ss:$64 sm:$0x2]  ;;  %v7051_v29 = vmax.f32 %v6979_v3, 0.0  ;;  %v7280_v18 = vor.u32 %v7279_v45, %v7278_v34 }
 0x903   :  { %v7320_v55 = vld [vmem:[#allocation6 + $0xa] ss:$64 sm:$0x40]  ;;  %v7394_v24 = vld [vmem:[#allocation6 + $0xe] ss:$64 sm:$0x10]  ;;  %v7296_v27 = vor.u32 %v7295_v50, %v7294_v10 }
 0x904   :  { %v7322_v56 = vld [vmem:[#allocation6 + $0xa] ss:$64 sm:$0x80]  ;;  %v7410_v25 = vld [vmem:[#allocation6 + $0xf] ss:$64 sm:$0x10]  ;;  %v7321_v4 = vor.u32 %v7320_v55, %v7319_v42 }
 0x905   :  { %v7336_v63 = vld [vmem:[#allocation6 + $0xb] ss:$64 sm:$0x40]  ;;  %v7359_v30 = vld [vmem:[#allocation6 + $0xc] ss:$64 sm:$0x40] }
 0x906   :  { %v7338_v14 = vld [vmem:[#allocation6 + $0xb] ss:$64 sm:$0x80]  ;;  %v13409_v5 = vld [vmem:[#allocation6 + $0x1c] ss:$64 sm:$0x2]  ;;  %v7337_v16 = vor.u32 %v7336_v63, %v7335_v61  ;;  %v7360_v17 = vor.u32 %v7359_v30, %v7358_v1  ;;  %v7323_v26 = vor.u32 %v7322_v56, %v7321_v4  ;;  %v7395_v61 = vor.u32 %v7394_v24, %v7393_v19 }
 0x907   :  { %v13411_v2 = vld [vmem:[#allocation6 + $0x10] ss:$64 sm:$0x1]  ;;  %v13413_v6 = vld [vmem:[#allocation6 + $0x11] ss:$64 sm:$0x2]  ;;  %v7411_v1 = vor.u32 %v7410_v25, %v7409_v58 }
 0x908   :  { %7114 = vst.msk [vmem:[#allocation6 + $0x1d0] sm:$0xff] %vm6587_vm14, %v7051_v29  ;;  %v7375_v51 = vld [vmem:[#allocation6 + $0xd] ss:$64 sm:$0x40]  ;;  %v7339_v38 = vor.u32 %v7338_v14, %v7337_v16 }
 0x909   :  { %v13417_v21 = vld [vmem:[#allocation6 + $0xe] ss:$64 sm:$0x20]  ;;  %v13419_v22 = vld [vmem:[#allocation6 + $0xf] ss:$64 sm:$0x20]  ;;  %v7376_v35 = vor.u32 %v7375_v51, %v7374_v9 }
 0x90a   :  { %v7361_v44 = vld [vmem:[#allocation6 + $0xc] ss:$64 sm:$0x80]  ;;  %v7281_v41 = vld [vmem:[#allocation6 + $0x8] ss:$64 sm:$0x40]  ;;  %v7340_v16 = vmax.f32 %v7323_v26, %v7339_v38  ;;  %v7397_v38 = vor.u32 %v13417_v21, %v7395_v61 }
 0x90b   :  { %v13421_v3 = vld [vmem:[#allocation6 + $0x1c] ss:$64 sm:$0x1]  ;;  %v13423_v36 = vld [vmem:[#allocation6 + $0x1d] ss:$64 sm:$0x2]  ;;  %v7362_v42 = vor.u32 %v7361_v44, %v7360_v17  ;;  %v7282_v45 = vor.u32 %v7281_v41, %v7280_v18 }
 0x90c   :  { %v13425_v15 = vld [vmem:[#allocation6 + $0x1a] ss:$64 sm:$0x2]  ;;  %v13427_v37 = vld [vmem:[#allocation6 + $0x1b] ss:$64 sm:$0x2]  ;;  %7342 = vrot.lane.b32.xlu1 %v7340_v16, %s9156_s15 }
 0x90d   :  { %14332 = vst [vmem:[#allocation8_spill] sm:$0xff] %v13427_v37  ;;  %v13429_v31 = vld [vmem:[#allocation6 + $0x18] ss:$64 sm:$0x2] }
 0x90e   :  { %14333 = vst [vmem:[#allocation9_spill] sm:$0xff] %v13429_v31  ;;  %v13431_v32 = vld [vmem:[#allocation6 + $0x11] ss:$64 sm:$0x1] }
 0x90f   :  { %14334 = vst [vmem:[#allocation10_spill] sm:$0xff] %v13431_v32  ;;  %v7377_v43 = vld [vmem:[#allocation6 + $0xd] ss:$64 sm:$0x80] }
 0x910   :  { %v7297_v49 = vld [vmem:[#allocation6 + $0x9] ss:$64 sm:$0x40]  ;;  %v13433_v53 = vld [vmem:[#allocation6 + $0x19] ss:$64 sm:$0x2]  ;;  %v7378_v50 = vor.u32 %v7377_v43, %v7376_v35  ;;  %v7413_v43 = vor.u32 %v13419_v22, %v7411_v1 }
 0x911   :  { %14335 = vst [vmem:[#allocation11_spill] sm:$0xff] %v13433_v53  ;;  %v7283_v29 = vld [vmem:[#allocation6 + $0x8] ss:$64 sm:$0x80]  ;;  %v7298_v55 = vor.u32 %v7297_v49, %v7296_v27 }
 0x912   :  { %v7299_v56 = vld [vmem:[#allocation6 + $0x9] ss:$64 sm:$0x80]  ;;  %v13437_v34 = vld [vmem:[#allocation6 + $0x1d] ss:$64 sm:$0x1]  ;;  %v7284_v17 = vor.u32 %v7283_v29, %v7282_v45  ;;  %v7379_v26 = vmax.f32 %v7362_v42, %v7378_v50 }
 0x913   :  { %v13439_v4 = vld [vmem:[#allocation6 + $0x1a] ss:$64 sm:$0x1]  ;;  %v13441_v63 = vld [vmem:[#allocation6 + $0x1b] ss:$64 sm:$0x1]  ;;  %v7300_v58 = vor.u32 %v7299_v56, %v7298_v55 }
 0x914   :  { %14336 = vst [vmem:[#allocation12_spill] sm:$0xff] %v13441_v63  ;;  %v13443_v14 = vld [vmem:[#allocation6 + $0x18] ss:$64 sm:$0x1]  ;;  %7381 = vrot.lane.b32.xlu2 %v7379_v26, %s9157_s20 }
 0x915   :  { %14337 = vst [vmem:[#allocation13_spill] sm:$0xff] %v13443_v14  ;;  %v13445_v30 = vld [vmem:[#allocation6 + $0x24] ss:$64 sm:$0x2]  ;;  %v7301_v22 = vmax.f32 %v7284_v17, %v7300_v58 }
 0x916   :  { %14338 = vst [vmem:[#allocation14_spill] sm:$0xff] %v13445_v30  ;;  %v13447_v9 = vld [vmem:[#allocation6 + $0x25] ss:$64 sm:$0x2]  ;;  %v13577_v30 = vld [vmem:[%s14277_s4] ss:$0 sm:$0xff] }
 0x917   :  { %14339 = vst [vmem:[#allocation15_spill] sm:$0xff] %v13447_v9  ;;  %v13449_v10 = vld [vmem:[#allocation6 + $0x1e] ss:$64 sm:$0x2]  ;;  %7303 = vrot.lane.b32.xlu0 %v7301_v22, %s9158_s25  ;;  %s9159_s4 = smov 112  }
 0x918   :  { %14340 = vst [vmem:[#allocation16_spill] sm:$0xff] %v13449_v10  ;;  %v13451_v11 = vld [vmem:[#allocation6 + $0x1f] ss:$64 sm:$0x2] }
 0x919   :  { %14341 = vst [vmem:[#allocation17_spill] sm:$0xff] %v13451_v11  ;;  %v7398_v24 = vld [vmem:[#allocation6 + $0xe] ss:$64 sm:$0x40] }
 0x91a   :  { %v7414_v25 = vld [vmem:[#allocation6 + $0xf] ss:$64 sm:$0x40]  ;;  %v13455_v18 = vld [vmem:[#allocation6 + $0x19] ss:$64 sm:$0x1]  ;;  %v13505_v21 = vor.u32 %v7398_v24, %v7397_v38 }
 0x91b   :  { %14342 = vst [vmem:[#allocation18_spill] sm:$0xff] %v13455_v18  ;;  %v13457_v19 = vld [vmem:[#allocation6 + $0x22] ss:$64 sm:$0x2]  ;;  %v13507_v50 = vor.u32 %v7414_v25, %v7413_v43 }
 0x91c   :  { %14343 = vst [vmem:[#allocation19_spill] sm:$0xff] %v13457_v19  ;;  %v13459_v44 = vld [vmem:[#allocation6 + $0x23] ss:$64 sm:$0x2] }
 0x91d   :  { %14344 = vst [vmem:[#allocation20_spill] sm:$0xff] %v13459_v44  ;;  %v13461_v35 = vld [vmem:[#allocation6 + $0x26] ss:$64 sm:$0x2] }
 0x91e   :  { %14345 = vst [vmem:[#allocation21_spill] sm:$0xff] %v13461_v35  ;;  %v13463_v41 = vld [vmem:[#allocation6 + $0x27] ss:$64 sm:$0x2] }
 0x91f   :  { %14346 = vst [vmem:[#allocation22_spill] sm:$0xff] %v13463_v41  ;;  %v13469_v45 = vld [vmem:[#allocation6 + $0x24] ss:$64 sm:$0x1] }
 0x920   :  { %14347 = vst [vmem:[#allocation23_spill] sm:$0xff] %v13469_v45  ;;  %v13471_v49 = vld [vmem:[#allocation6 + $0x25] ss:$64 sm:$0x1] }
 0x921   :  { %14348 = vst [vmem:[#allocation24_spill] sm:$0xff] %v13471_v49  ;;  %v13473_v29 = vld [vmem:[#allocation6 + $0x1e] ss:$64 sm:$0x1] }
 0x922   :  { %14349 = vst [vmem:[#allocation25_spill] sm:$0xff] %v13473_v29  ;;  %v13475_v51 = vld [vmem:[#allocation6 + $0x1f] ss:$64 sm:$0x1] }
 0x923   :  { %14350 = vst [vmem:[#allocation26_spill] sm:$0xff] %v13475_v51  ;;  %v13477_v40 = vld [vmem:[#allocation6 + $0x2a] ss:$64 sm:$0x2] }
 0x924   :  { %14351 = vst [vmem:[#allocation27_spill] sm:$0xff] %v13477_v40  ;;  %v13479_v33 = vld [vmem:[#allocation6 + $0x2b] ss:$64 sm:$0x2] }
 0x925   :  { %14352 = vst [vmem:[#allocation28_spill] sm:$0xff] %v13479_v33  ;;  %v13481_v20 = vld [vmem:[#allocation6 + $0x20] ss:$64 sm:$0x2] }
 0x926   :  { %14353 = vst [vmem:[#allocation29_spill] sm:$0xff] %v13481_v20  ;;  %v13483_v42 = vld [vmem:[#allocation6 + $0x21] ss:$64 sm:$0x2] }
 0x927   :  { %14354 = vst [vmem:[#allocation30_spill] sm:$0xff] %v13483_v42  ;;  %v13494_v56 = vld [vmem:[#allocation6 + $0x22] ss:$64 sm:$0x1] }
 0x928   :  { %14355 = vst [vmem:[#allocation31_spill] sm:$0xff] %v13494_v56  ;;  %v13496_v61 = vld [vmem:[#allocation6 + $0x23] ss:$64 sm:$0x1]  ;;  %v6954_v56 = vpop.f32.mrf.mxu2 }
 0x929   :  { %14356 = vst [vmem:[#allocation32_spill] sm:$0xff] %v13496_v61  ;;  %v13498_v1 = vld [vmem:[#allocation6 + $0x28] ss:$64 sm:$0x2]  ;;  %v6955_v29 = vadd.f32 %v13577_v30, %v6954_v56 }
 0x92a   :  { %14357 = vst [vmem:[#allocation33_spill] sm:$0xff] %v13498_v1  ;;  %v13500_v27 = vld [vmem:[#allocation6 + $0x26] ss:$64 sm:$0x1] }
 0x92b   :  { %14358 = vst [vmem:[#allocation34_spill] sm:$0xff] %v13500_v27  ;;  %v13502_v16 = vld [vmem:[#allocation6 + $0x27] ss:$64 sm:$0x1]  ;;  %v7043_v27 = vmax.f32 %v6955_v29, 0.0  ;;  %v14373_v29 = vor.u32 %v13362_v23, %v13376_v59  ;;  %v14377_v23 = vor.u32 %v13407_v54, %v13411_v2  ;;  %v14381_v54 = vld [vmem:[#allocation10_spill] sm:$0xff] }
 0x92c   :  { %14359 = vst [vmem:[#allocation35_spill] sm:$0xff] %v13502_v16  ;;  %v13511_v12 = vld [vmem:[#allocation6 + $0x2a] ss:$64 sm:$0x1]  ;;  %v14382_v2 = vor.u32 %v13413_v6, %v14381_v54 }
 0x92d   :  { %14360 = vst [vmem:[#allocation36_spill] sm:$0xff] %v13511_v12  ;;  %v13513_v13 = vld [vmem:[#allocation6 + $0x2b] ss:$64 sm:$0x1] }
 0x92e   :  { %14361 = vst [vmem:[#allocation37_spill] sm:$0xff] %v13513_v13  ;;  %v13515_v8 = vld [vmem:[#allocation6 + $0x29] ss:$64 sm:$0x2] }
 0x92f   :  { %v13517_v7 = vld [vmem:[#allocation6 + $0x2e] ss:$64 sm:$0x2]  ;;  %v13519_v14 = vld [vmem:[#allocation6 + $0x2f] ss:$64 sm:$0x2] }
 0x930   :  { %14362 = vst [vmem:[#allocation38_spill] sm:$0xff] %v13519_v14  ;;  %v13521_v31 = vld [vmem:[#allocation6 + $0x2c] ss:$64 sm:$0x2] }
 0x931   :  { %v13523_v17 = vld [vmem:[#allocation6 + $0x20] ss:$64 sm:$0x1]  ;;  %v13525_v24 = vld [vmem:[#allocation6 + $0x21] ss:$64 sm:$0x1] }
 0x932   :  { %14363 = vst [vmem:[#allocation39_spill] sm:$0xff] %v13523_v17  ;;  %v13527_v25 = vld [vmem:[#allocation6 + $0x30] ss:$64 sm:$0x2] }
 0x933   :  { %14364 = vst [vmem:[#allocation40_spill] sm:$0xff] %v13525_v24  ;;  %v13529_v26 = vld [vmem:[#allocation6 + $0x31] ss:$64 sm:$0x2] }
 0x934   :  { %14365 = vst [vmem:[#allocation41_spill] sm:$0xff] %v13527_v25  ;;  %v13539_v18 = vld [vmem:[#allocation6 + $0x28] ss:$64 sm:$0x1] }
 0x935   :  { %14366 = vst [vmem:[#allocation42_spill] sm:$0xff] %v13529_v26  ;;  %v13541_v53 = vld [vmem:[#allocation6 + $0x2d] ss:$64 sm:$0x2] }
 0x936   :  { %14367 = vst [vmem:[#allocation43_spill] sm:$0xff] %v13539_v18  ;;  %v7539_v63 = vld [vmem:[#allocation6 + $0x16] ss:$64 sm:$0x4] }
 0x937   :  { %v7555_v37 = vld [vmem:[#allocation6 + $0x17] ss:$64 sm:$0x4]  ;;  %v7501_v32 = vld [vmem:[#allocation6 + $0x14] ss:$64 sm:$0x4] }
 0x938   :  { %v7517_v58 = vld [vmem:[#allocation6 + $0x15] ss:$64 sm:$0x4]  ;;  %v13548_v49 = vld [vmem:[#allocation6 + $0x29] ss:$64 sm:$0x1] }
 0x939   :  { %v13554_v51 = vld [vmem:[#allocation6 + $0x2e] ss:$64 sm:$0x1]  ;;  %v13556_v22 = vld [vmem:[#allocation6 + $0x2f] ss:$64 sm:$0x1] }
 0x93a   :  { %14368 = vst [vmem:[#allocation44_spill] sm:$0xff] %v13556_v22  ;;  %v13558_v11 = vld [vmem:[#allocation6 + $0x2c] ss:$64 sm:$0x1] }
 0x93b   :  { %v13560_v45 = vld [vmem:[#allocation6 + $0x30] ss:$64 sm:$0x1]  ;;  %v13562_v38 = vld [vmem:[#allocation6 + $0x31] ss:$64 sm:$0x1] }
 0x93c   :  { %14369 = vst [vmem:[#allocation45_spill] sm:$0xff] %v13560_v45  ;;  %v7400_v43 = vld [vmem:[#allocation6 + $0xe] ss:$64 sm:$0x80] }
 0x93d   :  { %14370 = vst [vmem:[#allocation46_spill] sm:$0xff] %v13562_v38  ;;  %v7416_v61 = vld [vmem:[#allocation6 + $0xf] ss:$64 sm:$0x80]  ;;  %v7401_v55 = vor.u32 %v7400_v43, %v13505_v21  ;;  %v14371_v21 = vor.u32 %v13354_v0, %v13368_v46  ;;  %v7502_v43 = vor.u32 %v7501_v32, %v14373_v29  ;;  %v14374_v38 = vor.u32 %v13364_v39, %v13378_v28 }
 0x93e   :  { %v7463_v44 = vld [vmem:[#allocation6 + $0x12] ss:$64 sm:$0x4]  ;;  %v7479_v19 = vld [vmem:[#allocation6 + $0x13] ss:$64 sm:$0x4]  ;;  %v7417_v9 = vor.u32 %v7416_v61, %v13507_v50  ;;  %v14372_v50 = vor.u32 %v13356_v57, %v13370_v47  ;;  %v14375_v46 = vor.u32 %v13372_v48, %v13388_v52  ;;  %v14376_v57 = vor.u32 %v13380_v60, %v13394_v62 }
 0x93f   :  { %v13568_v16 = vld [vmem:[#allocation6 + $0x2d] ss:$64 sm:$0x1]  ;;  %v7429_v41 = vld [vmem:[#allocation6 + $0x10] ss:$64 sm:$0x4]  ;;  %v7540_v22 = vor.u32 %v7539_v63, %v14371_v21  ;;  %v7518_v26 = vor.u32 %v7517_v58, %v14374_v38  ;;  %v14379_v48 = vor.u32 %v13423_v36, %v13437_v34  ;;  %v14380_v60 = vor.u32 %v13425_v15, %v13439_v4 }
 0x940   :  { %v7653_v13 = vld [vmem:[#allocation6 + $0x1c] ss:$64 sm:$0x4]  ;;  %v7669_v33 = vld [vmem:[#allocation6 + $0x1d] ss:$64 sm:$0x4]  ;;  %v7556_v61 = vor.u32 %v7555_v37, %v14372_v50  ;;  %v7418_v56 = vmax.f32 %v7401_v55, %v7417_v9  ;;  %v7464_v63 = vor.u32 %v7463_v44, %v14375_v46  ;;  %v7480_v47 = vor.u32 %v7479_v19, %v14376_v57 }
 0x941   :  { %v7615_v12 = vld [vmem:[#allocation6 + $0x1a] ss:$64 sm:$0x4]  ;;  %v7445_v17 = vld [vmem:[#allocation6 + $0x11] ss:$64 sm:$0x4]  ;;  %v7430_v59 = vor.u32 %v7429_v41, %v14377_v23  ;;  %v14378_v9 = vor.u32 %v13409_v5, %v13421_v3  ;;  %v13628_v52 = vor.u32 %v7669_v33, %v14379_v48 }
 0x942   :  { %v7541_v20 = vld [vmem:[#allocation6 + $0x16] ss:$64 sm:$0x8]  ;;  %v7557_v35 = vld [vmem:[#allocation6 + $0x17] ss:$64 sm:$0x8]  ;;  %v13633_v62 = vor.u32 %v7615_v12, %v14380_v60  ;;  %v7446_v19 = vor.u32 %v7445_v17, %v14382_v2  ;;  %7420 = vrot.lane.b32.xlu0 %v7418_v56, %s9159_s4  ;;  %v6981_v17 = vpop.f32.mrf.mxu3 }
 0x943   :  { %v7631_v24 = vld [vmem:[#allocation6 + $0x1b] ss:$64 sm:$0x4]  ;;  %v7577_v42 = vld [vmem:[#allocation6 + $0x18] ss:$64 sm:$0x4]  ;;  %v7542_v5 = vor.u32 %v7541_v20, %v7540_v22  ;;  %v7558_v3 = vor.u32 %v7557_v35, %v7556_v61 }
 0x944   :  { %v7503_v18 = vld [vmem:[#allocation6 + $0x14] ss:$64 sm:$0x8]  ;;  %v7519_v1 = vld [vmem:[#allocation6 + $0x15] ss:$64 sm:$0x8] }
 0x945   :  { %v7465_v10 = vld [vmem:[#allocation6 + $0x12] ss:$64 sm:$0x8]  ;;  %v7593_v40 = vld [vmem:[#allocation6 + $0x19] ss:$64 sm:$0x4]  ;;  %v7504_v21 = vor.u32 %v7503_v18, %v7502_v43  ;;  %v7520_v20 = vor.u32 %v7519_v1, %v7518_v26 }
 0x946   :  { %v7543_v14 = vld [vmem:[#allocation6 + $0x16] ss:$64 sm:$0x10]  ;;  %v7559_v45 = vld [vmem:[#allocation6 + $0x17] ss:$64 sm:$0x10]  ;;  %v7466_v22 = vor.u32 %v7465_v10, %v7464_v63 }
 0x947   :  { %v7481_v25 = vld [vmem:[#allocation6 + $0x13] ss:$64 sm:$0x8]  ;;  %7106 = vst.msk [vmem:[#allocation6 + $0x190] sm:$0xff] %vm6587_vm14, %v7043_v27  ;;  %v13623_v27 = vor.u32 %v7653_v13, %v14378_v9  ;;  %v14383_v41 = vld [vmem:[#allocation8_spill] sm:$0xff]  ;;  %v14386_v55 = vld [vmem:[#allocation9_spill] sm:$0xff]  ;;  %v7544_v46 = vor.u32 %v7543_v14, %v7542_v5  ;;  %v7560_v57 = vor.u32 %v7559_v45, %v7558_v3 }
 0x948   :  { %v7505_v0 = vld [vmem:[#allocation6 + $0x14] ss:$64 sm:$0x10]  ;;  %v7431_v37 = vld [vmem:[#allocation6 + $0x10] ss:$64 sm:$0x8]  ;;  %v7482_v9 = vor.u32 %v7481_v25, %v7480_v47 }
 0x949   :  { %v7447_v39 = vld [vmem:[#allocation6 + $0x11] ss:$64 sm:$0x8]  ;;  %v7521_v28 = vld [vmem:[#allocation6 + $0x15] ss:$64 sm:$0x10]  ;;  %v7506_v48 = vor.u32 %v7505_v0, %v7504_v21  ;;  %v7432_v2 = vor.u32 %v7431_v37, %v7430_v59 }
 0x94a   :  { %v7467_v32 = vld [vmem:[#allocation6 + $0x12] ss:$64 sm:$0x10]  ;;  %v7545_v13 = vld [vmem:[#allocation6 + $0x16] ss:$64 sm:$0x20]  ;;  %v7522_v60 = vor.u32 %v7521_v28, %v7520_v20  ;;  %v7448_v43 = vor.u32 %v7447_v39, %v7446_v19 }
 0x94b   :  { %v7483_v44 = vld [vmem:[#allocation6 + $0x13] ss:$64 sm:$0x10]  ;;  %v14384_v36 = vld [vmem:[#allocation12_spill] sm:$0xff]  ;;  %v14387_v15 = vld [vmem:[#allocation13_spill] sm:$0xff]  ;;  %v7546_v10 = vor.u32 %v7545_v13, %v7544_v46  ;;  %v7468_v63 = vor.u32 %v7467_v32, %v7466_v22 }
 0x94c   :  { %v14385_v33 = vor.u32 %v14383_v41, %v14384_v36  ;;  %v14388_v12 = vor.u32 %v14386_v55, %v14387_v15  ;;  %v7433_v58 = vld [vmem:[#allocation6 + $0x10] ss:$64 sm:$0x10]  ;;  %v7449_v6 = vld [vmem:[#allocation6 + $0x11] ss:$64 sm:$0x10]  ;;  %v7484_v5 = vor.u32 %v7483_v44, %v7482_v9 }
 0x94d   :  { %v7561_v38 = vld [vmem:[#allocation6 + $0x17] ss:$64 sm:$0x20]  ;;  %v7507_v56 = vld [vmem:[#allocation6 + $0x14] ss:$64 sm:$0x20]  ;;  %v7434_v3 = vor.u32 %v7433_v58, %v7432_v2  ;;  %v7450_v25 = vor.u32 %v7449_v6, %v7448_v43 }
 0x94e   :  { %v13642_v34 = vor.u32 %v7631_v24, %v14385_v33  ;;  %v13647_v4 = vor.u32 %v7577_v42, %v14388_v12  ;;  %v14389_v35 = vld [vmem:[#allocation11_spill] sm:$0xff]  ;;  %v14390_v50 = vld [vmem:[#allocation18_spill] sm:$0xff]  ;;  %v6982_v24 = vadd.f32 %v13577_v30, %v6981_v17  ;;  %v7562_v26 = vor.u32 %v7561_v38, %v7560_v57  ;;  %v7801_v19 = vld [vmem:[#allocation6 + $0x24] ss:$64 sm:$0x4] }
 0x94f   :  { %v14391_v61 = vor.u32 %v14389_v35, %v14390_v50  ;;  %v7523_v23 = vld [vmem:[#allocation6 + $0x15] ss:$64 sm:$0x20]  ;;  %v7469_v42 = vld [vmem:[#allocation6 + $0x12] ss:$64 sm:$0x20]  ;;  %v7508_v45 = vor.u32 %v7507_v56, %v7506_v48 }
 0x950   :  { %v7485_v54 = vld [vmem:[#allocation6 + $0x13] ss:$64 sm:$0x20]  ;;  %v7435_v18 = vld [vmem:[#allocation6 + $0x10] ss:$64 sm:$0x20]  ;;  %v7524_v39 = vor.u32 %v7523_v23, %v7522_v60  ;;  %v7470_v28 = vor.u32 %v7469_v42, %v7468_v63 }
 0x951   :  { %v13652_v29 = vor.u32 %v7593_v40, %v14391_v61  ;;  %v7052_v1 = vmax.f32 %v6982_v24, 0.0  ;;  %v7691_v41 = vld [vmem:[#allocation6 + $0x1e] ss:$64 sm:$0x4]  ;;  %v7486_v38 = vor.u32 %v7485_v54, %v7484_v5  ;;  %v7436_v44 = vor.u32 %v7435_v18, %v7434_v3  ;;  %v14392_v48 = vld [vmem:[#allocation16_spill] sm:$0xff]  ;;  %v14393_v60 = vld [vmem:[#allocation25_spill] sm:$0xff] }
 0x952   :  { %v7451_v40 = vld [vmem:[#allocation6 + $0x11] ss:$64 sm:$0x20]  ;;  %v7547_v36 = vld [vmem:[#allocation6 + $0x16] ss:$64 sm:$0x40]  ;;  %v14394_v2 = vor.u32 %v14392_v48, %v14393_v60 }
 0x953   :  { %v7549_v33 = vld [vmem:[#allocation6 + $0x16] ss:$64 sm:$0x80]  ;;  %v7563_v55 = vld [vmem:[#allocation6 + $0x17] ss:$64 sm:$0x40]  ;;  %v7548_v0 = vor.u32 %v7547_v36, %v7546_v10  ;;  %v7452_v58 = vor.u32 %v7451_v40, %v7450_v25 }
 0x954   :  { %v7565_v14 = vld [vmem:[#allocation6 + $0x17] ss:$64 sm:$0x80]  ;;  %7115 = vst.msk [vmem:[#allocation6 + $0x1d8] sm:$0xff] %vm6587_vm14, %v7052_v1  ;;  %v7564_v47 = vor.u32 %v7563_v55, %v7562_v26  ;;  %v13659_v54 = vor.u32 %v7691_v41, %v14394_v2  ;;  %v14405_v48 = vld [vmem:[#allocation31_spill] sm:$0xff] }
 0x955   :  { %v7509_v59 = vld [vmem:[#allocation6 + $0x14] ss:$64 sm:$0x40]  ;;  %v7707_v32 = vld [vmem:[#allocation6 + $0x1f] ss:$64 sm:$0x4]  ;;  %v7550_v6 = vor.u32 %v7549_v33, %v7548_v0 }
 0x956   :  { %v7511_v37 = vld [vmem:[#allocation6 + $0x14] ss:$64 sm:$0x80]  ;;  %v7510_v13 = vor.u32 %v7509_v59, %v7508_v45  ;;  %v7525_v15 = vld [vmem:[#allocation6 + $0x15] ss:$64 sm:$0x40]  ;;  %v7566_v20 = vor.u32 %v7565_v14, %v7564_v47 }
 0x957   :  { %v7527_v12 = vld [vmem:[#allocation6 + $0x15] ss:$64 sm:$0x80]  ;;  %v7471_v17 = vld [vmem:[#allocation6 + $0x12] ss:$64 sm:$0x40]  ;;  %v7526_v22 = vor.u32 %v7525_v15, %v7524_v39 }
 0x958   :  { %v7817_v21 = vld [vmem:[#allocation6 + $0x25] ss:$64 sm:$0x4]  ;;  %v7763_v56 = vld [vmem:[#allocation6 + $0x22] ss:$64 sm:$0x4]  ;;  %v7472_v35 = vor.u32 %v7471_v17, %v7470_v28  ;;  %v7512_v23 = vor.u32 %v7511_v37, %v7510_v13  ;;  %v7567_v63 = vmax.f32 %v7550_v6, %v7566_v20 }
 0x959   :  { %v7487_v50 = vld [vmem:[#allocation6 + $0x13] ss:$64 sm:$0x40]  ;;  %v7779_v61 = vld [vmem:[#allocation6 + $0x23] ss:$64 sm:$0x4]  ;;  %v7528_v40 = vor.u32 %v7527_v12, %v7526_v22 }
 0x95a   :  { %v7839_v24 = vld [vmem:[#allocation6 + $0x26] ss:$64 sm:$0x4]  ;;  %v7855_v46 = vld [vmem:[#allocation6 + $0x27] ss:$64 sm:$0x4]  ;;  %v7488_v9 = vor.u32 %v7487_v50, %v7486_v38  ;;  %7569 = vrot.lane.b32.xlu0 %v7567_v63, %s9155_s14 }
 0x95b   :  { %v7437_v57 = vld [vmem:[#allocation6 + $0x10] ss:$64 sm:$0x40]  ;;  %v7473_v42 = vld [vmem:[#allocation6 + $0x12] ss:$64 sm:$0x80] }
 0x95c   :  { %v7915_v43 = vld [vmem:[#allocation6 + $0x2a] ss:$64 sm:$0x4]  ;;  %v7438_v18 = vor.u32 %v7437_v57, %v7436_v44  ;;  %v7453_v1 = vld [vmem:[#allocation6 + $0x11] ss:$64 sm:$0x40]  ;;  %v7474_v36 = vor.u32 %v7473_v42, %v7472_v35 }
 0x95d   :  { %v7729_v10 = vld [vmem:[#allocation6 + $0x20] ss:$64 sm:$0x4]  ;;  %v7745_v26 = vld [vmem:[#allocation6 + $0x21] ss:$64 sm:$0x4]  ;;  %v7454_v25 = vor.u32 %v7453_v1, %v7452_v58  ;;  %v7529_v58 = vmax.f32 %v7512_v23, %v7528_v40 }
 0x95e   :  { %v7489_v33 = vld [vmem:[#allocation6 + $0x13] ss:$64 sm:$0x80]  ;;  %v7931_v55 = vld [vmem:[#allocation6 + $0x2b] ss:$64 sm:$0x4] }
 0x95f   :  { %v7877_v14 = vld [vmem:[#allocation6 + $0x28] ss:$64 sm:$0x4]  ;;  %v7893_v45 = vld [vmem:[#allocation6 + $0x29] ss:$64 sm:$0x4]  ;;  %v7490_v0 = vor.u32 %v7489_v33, %v7488_v9  ;;  %7531 = vrot.lane.b32.xlu2 %v7529_v58, %s9154_s12 }
 0x960   :  { %v7991_v5 = vld [vmem:[#allocation6 + $0x2e] ss:$64 sm:$0x4]  ;;  %v7439_v3 = vld [vmem:[#allocation6 + $0x10] ss:$64 sm:$0x80] }
 0x961   :  { %v14395_v47 = vld [vmem:[#allocation14_spill] sm:$0xff]  ;;  %v14396_v59 = vld [vmem:[#allocation23_spill] sm:$0xff]  ;;  %v14398_v39 = vld [vmem:[#allocation17_spill] sm:$0xff]  ;;  %v7440_v6 = vor.u32 %v7439_v3, %v7438_v18  ;;  %v7491_v1 = vmax.f32 %v7474_v36, %v7490_v0 }
 0x962   :  { %v14397_v41 = vor.u32 %v14395_v47, %v14396_v59  ;;  %v14399_v28 = vld [vmem:[#allocation26_spill] sm:$0xff]  ;;  %v8007_v12 = vld [vmem:[#allocation6 + $0x2f] ss:$64 sm:$0x4]  ;;  %v14402_v57 = vld [vmem:[#allocation24_spill] sm:$0xff] }
 0x963   :  { %v14400_v13 = vor.u32 %v14398_v39, %v14399_v28  ;;  %v7953_v17 = vld [vmem:[#allocation6 + $0x2c] ss:$64 sm:$0x4]  ;;  %v7969_v38 = vld [vmem:[#allocation6 + $0x2d] ss:$64 sm:$0x4]  ;;  %7493 = vrot.lane.b32.xlu1 %v7491_v1, %s9149_s17 }
 0x964   :  { %v13664_v37 = vor.u32 %v7801_v19, %v14397_v41  ;;  %v7455_v44 = vld [vmem:[#allocation6 + $0x11] ss:$64 sm:$0x80]  ;;  %v8029_v20 = vld [vmem:[#allocation6 + $0x30] ss:$64 sm:$0x4] }
 0x965   :  { %v13669_v15 = vor.u32 %v7707_v32, %v14400_v13  ;;  %v8045_v22 = vld [vmem:[#allocation6 + $0x31] ss:$64 sm:$0x4]  ;;  %v13672_v35 = vld [vmem:[#allocation6 + $0x1c] ss:$64 sm:$0x8]  ;;  %v7456_v18 = vor.u32 %v7455_v44, %v7454_v25 }
 0x966   :  { %v13674_v50 = vld [vmem:[#allocation6 + $0x1d] ss:$64 sm:$0x8]  ;;  %v13686_v33 = vld [vmem:[#allocation6 + $0x1a] ss:$64 sm:$0x8] }
 0x967   :  { %v14401_v19 = vld [vmem:[#allocation15_spill] sm:$0xff]  ;;  %v14407_v40 = vld [vmem:[#allocation20_spill] sm:$0xff]  ;;  %v14411_v41 = vld [vmem:[#allocation34_spill] sm:$0xff] }
 0x968   :  { %v14403_v42 = vor.u32 %v14401_v19, %v14402_v57  ;;  %v14404_v32 = vld [vmem:[#allocation19_spill] sm:$0xff]  ;;  %v14408_v3 = vld [vmem:[#allocation32_spill] sm:$0xff]  ;;  %v14422_v58 = vld [vmem:[#allocation30_spill] sm:$0xff] }
 0x969   :  { %v14406_v60 = vor.u32 %v14404_v32, %v14405_v48  ;;  %v13688_v63 = vld [vmem:[#allocation6 + $0x1b] ss:$64 sm:$0x8]  ;;  %v13690_v23 = vld [vmem:[#allocation6 + $0x18] ss:$64 sm:$0x8]  ;;  %v14409_v47 = vor.u32 %v14407_v40, %v14408_v3  ;;  %v7457_v48 = vmax.f32 %v7440_v6, %v7456_v18 }
 0x96a   :  { %v13679_v9 = vor.u32 %v7817_v21, %v14403_v42  ;;  %v14410_v21 = vld [vmem:[#allocation21_spill] sm:$0xff]  ;;  %v14414_v13 = vld [vmem:[#allocation35_spill] sm:$0xff]  ;;  %v13710_v44 = vld [vmem:[#allocation6 + $0x24] ss:$64 sm:$0x8] }
 0x96b   :  { %v13684_v2 = vor.u32 %v7763_v56, %v14406_v60  ;;  %v13695_v59 = vor.u32 %v7779_v61, %v14409_v47  ;;  %v14412_v39 = vor.u32 %v14410_v21, %v14411_v41  ;;  %v14413_v56 = vld [vmem:[#allocation22_spill] sm:$0xff]  ;;  %v13708_v0 = vld [vmem:[#allocation6 + $0x19] ss:$64 sm:$0x8]  ;;  %v14417_v42 = vld [vmem:[#allocation36_spill] sm:$0xff]  ;;  %7458 = vst.msk [vmem:[#allocation7 + $0x8] sm:$0xff] %vm6587_vm14, %v7457_v48 }
 0x96c   :  { %v14415_v25 = vor.u32 %v14413_v56, %v14414_v13  ;;  %v13712_v19 = vld [vmem:[#allocation6 + $0x1e] ss:$64 sm:$0x8]  ;;  %v13714_v61 = vld [vmem:[#allocation6 + $0x1f] ss:$64 sm:$0x8] }
 0x96d   :  { %v13700_v28 = vor.u32 %v7839_v24, %v14412_v39  ;;  %v14416_v57 = vld [vmem:[#allocation27_spill] sm:$0xff]  ;;  %v14419_v60 = vld [vmem:[#allocation29_spill] sm:$0xff]  ;;  %v14423_v47 = vld [vmem:[#allocation40_spill] sm:$0xff]  ;;  %v6957_v39 = vpop.f32.mrf.mxu2 }
 0x96e   :  { %v13705_v36 = vor.u32 %v7855_v46, %v14415_v25  ;;  %v14418_v32 = vor.u32 %v14416_v57, %v14417_v42  ;;  %v14420_v40 = vld [vmem:[#allocation39_spill] sm:$0xff]  ;;  %v14424_v21 = vor.u32 %v14422_v58, %v14423_v47  ;;  %v13732_v56 = vld [vmem:[#allocation6 + $0x25] ss:$64 sm:$0x8]  ;;  %v14426_v18 = vld [vmem:[#allocation37_spill] sm:$0xff] }
 0x96f   :  { %v14421_v46 = vor.u32 %v14419_v60, %v14420_v40  ;;  %v13734_v13 = vld [vmem:[#allocation6 + $0x22] ss:$64 sm:$0x8]  ;;  %v14429_v42 = vld [vmem:[#allocation43_spill] sm:$0xff] }
 0x970   :  { %v13719_v24 = vor.u32 %v7915_v43, %v14418_v32  ;;  %v13729_v41 = vor.u32 %v7745_v26, %v14424_v21  ;;  %v13736_v43 = vld [vmem:[#allocation6 + $0x23] ss:$64 sm:$0x8]  ;;  %v14431_v26 = vor.u32 %v13515_v8, %v13548_v49  ;;  %v13753_v40 = vld [vmem:[#allocation6 + $0x26] ss:$64 sm:$0x8]  ;;  %v14439_v8 = vor.u32 %v13521_v31, %v13558_v11 }
 0x971   :  { %v13724_v3 = vor.u32 %v7729_v10, %v14421_v46  ;;  %v14425_v6 = vld [vmem:[#allocation28_spill] sm:$0xff]  ;;  %v14428_v10 = vld [vmem:[#allocation33_spill] sm:$0xff]  ;;  %v14433_v46 = vor.u32 %v13517_v7, %v13554_v51  ;;  %v14441_v7 = vor.u32 %v13541_v53, %v13568_v16  ;;  %v7656_v11 = vor.u32 %v13672_v35, %v13623_v27  ;;  %v7657_v48 = vld [vmem:[#allocation6 + $0x1c] ss:$64 sm:$0x10] }
 0x972   :  { %v14427_v25 = vor.u32 %v14425_v6, %v14426_v18  ;;  %v14430_v32 = vor.u32 %v14428_v10, %v14429_v42  ;;  %v13751_v1 = vor.u32 %v7893_v45, %v14431_v26  ;;  %v13761_v47 = vld [vmem:[#allocation6 + $0x2a] ss:$64 sm:$0x8]  ;;  %v13763_v21 = vld [vmem:[#allocation6 + $0x27] ss:$64 sm:$0x8]  ;;  %v13773_v49 = vor.u32 %v7953_v17, %v14439_v8 }
 0x973   :  { %v13758_v58 = vor.u32 %v7991_v5, %v14433_v46  ;;  %v14436_v6 = vld [vmem:[#allocation44_spill] sm:$0xff]  ;;  %v13778_v51 = vor.u32 %v7969_v38, %v14441_v7  ;;  %v14443_v10 = vld [vmem:[#allocation45_spill] sm:$0xff]  ;;  %v14447_v26 = vld [vmem:[#allocation46_spill] sm:$0xff]  ;;  %v7672_v53 = vor.u32 %v13674_v50, %v13628_v52  ;;  %v7634_v27 = vor.u32 %v13688_v63, %v13642_v34 }
 0x974   :  { %v13741_v57 = vor.u32 %v7931_v55, %v14427_v25  ;;  %v13746_v60 = vor.u32 %v7877_v14, %v14430_v32  ;;  %14432 = vst [vmem:[#allocation10_spill] sm:$0xff] %v13751_v1  ;;  %v6958_v55 = vadd.f32 %v13577_v30, %v6957_v39  ;;  %v14435_v14 = vld [vmem:[#allocation38_spill] sm:$0xff]  ;;  %v13780_v45 = vld [vmem:[#allocation6 + $0x20] ss:$64 sm:$0x8]  ;;  %v14442_v39 = vld [vmem:[#allocation41_spill] sm:$0xff]  ;;  %v7580_v52 = vor.u32 %v13690_v23, %v13647_v4 }
 0x975   :  { %14434 = vst [vmem:[#allocation8_spill] sm:$0xff] %v13758_v58  ;;  %v14437_v18 = vor.u32 %v14435_v14, %v14436_v6  ;;  %v13782_v5 = vld [vmem:[#allocation6 + $0x21] ss:$64 sm:$0x8]  ;;  %v14444_v42 = vor.u32 %v14442_v39, %v14443_v10  ;;  %v7618_v6 = vor.u32 %v13686_v33, %v13633_v62  ;;  %v7596_v62 = vor.u32 %v13708_v0, %v13652_v29 }
 0x976   :  { %14440 = vst [vmem:[#allocation9_spill] sm:$0xff] %v13773_v49  ;;  %v13798_v16 = vld [vmem:[#allocation6 + $0x2b] ss:$64 sm:$0x8]  ;;  %v7804_v34 = vor.u32 %v13710_v44, %v13664_v37  ;;  %v7694_v4 = vor.u32 %v13712_v19, %v13659_v54  ;;  %v7710_v33 = vor.u32 %v13714_v61, %v13669_v15  ;;  %v7820_v10 = vor.u32 %v13732_v56, %v13679_v9 }
 0x977   :  { %v13768_v25 = vor.u32 %v8007_v12, %v14437_v18  ;;  %v13787_v32 = vor.u32 %v8029_v20, %v14444_v42  ;;  %v14446_v12 = vld [vmem:[#allocation42_spill] sm:$0xff]  ;;  %v13800_v17 = vld [vmem:[#allocation6 + $0x28] ss:$64 sm:$0x8]  ;;  %v7766_v29 = vor.u32 %v13734_v13, %v13684_v2  ;;  %v7658_v61 = vor.u32 %v7657_v48, %v7656_v11  ;;  %v6984_v11 = vpop.f32.mrf.mxu3 }
 0x978   :  { %v14448_v46 = vor.u32 %v14446_v12, %v14447_v26  ;;  %v13802_v38 = vld [vmem:[#allocation6 + $0x29] ss:$64 sm:$0x8]  ;;  %v13804_v14 = vld [vmem:[#allocation6 + $0x2e] ss:$64 sm:$0x8] }
 0x979   :  { %14438 = vst [vmem:[#allocation12_spill] sm:$0xff] %v13768_v25  ;;  %v13807_v20 = vld [vmem:[#allocation6 + $0x30] ss:$64 sm:$0x8] }
 0x97a   :  { %14445 = vst [vmem:[#allocation13_spill] sm:$0xff] %v13787_v32  ;;  %v13792_v31 = vor.u32 %v8045_v22, %v14448_v46  ;;  %v7044_v22 = vmax.f32 %v6958_v55, 0.0  ;;  %v13815_v35 = vld [vmem:[#allocation6 + $0x2f] ss:$64 sm:$0x8] }
 0x97b   :  { %14449 = vst [vmem:[#allocation11_spill] sm:$0xff] %v13804_v14  ;;  %v13817_v50 = vld [vmem:[#allocation6 + $0x2c] ss:$64 sm:$0x8] }
 0x97c   :  { %14450 = vst [vmem:[#allocation18_spill] sm:$0xff] %v13807_v20  ;;  %v13819_v18 = vld [vmem:[#allocation6 + $0x2d] ss:$64 sm:$0x8] }
 0x97d   :  { %14451 = vst [vmem:[#allocation16_spill] sm:$0xff] %v13817_v50  ;;  %v13821_v8 = vld [vmem:[#allocation6 + $0x31] ss:$64 sm:$0x8] }
 0x97e   :  { %v7673_v7 = vld [vmem:[#allocation6 + $0x1d] ss:$64 sm:$0x10]  ;;  %v7619_v55 = vld [vmem:[#allocation6 + $0x1a] ss:$64 sm:$0x10] }
 0x97f   :  { %7107 = vst.msk [vmem:[#allocation6 + $0x198] sm:$0xff] %vm6587_vm14, %v7044_v22  ;;  %v7635_v63 = vld [vmem:[#allocation6 + $0x1b] ss:$64 sm:$0x10]  ;;  %v7674_v54 = vor.u32 %v7673_v7, %v7672_v53  ;;  %v7620_v46 = vor.u32 %v7619_v55, %v7618_v6 }
 0x980   :  { %v7581_v23 = vld [vmem:[#allocation6 + $0x18] ss:$64 sm:$0x10]  ;;  %v7597_v39 = vld [vmem:[#allocation6 + $0x19] ss:$64 sm:$0x10]  ;;  %v7636_v22 = vor.u32 %v7635_v63, %v7634_v27 }
 0x981   :  { %v7695_v0 = vld [vmem:[#allocation6 + $0x1e] ss:$64 sm:$0x10]  ;;  %v7805_v44 = vld [vmem:[#allocation6 + $0x24] ss:$64 sm:$0x10]  ;;  %v7582_v32 = vor.u32 %v7581_v23, %v7580_v52  ;;  %v7598_v14 = vor.u32 %v7597_v39, %v7596_v62  ;;  %v6985_v23 = vadd.f32 %v13577_v30, %v6984_v11 }
 0x982   :  { %v7711_v15 = vld [vmem:[#allocation6 + $0x1f] ss:$64 sm:$0x10]  ;;  %v7821_v56 = vld [vmem:[#allocation6 + $0x25] ss:$64 sm:$0x10]  ;;  %v13866_v2 = vor.u32 %v7695_v0, %v7694_v4  ;;  %v13868_v50 = vor.u32 %v7805_v44, %v7804_v34 }
 0x983   :  { %v7767_v13 = vld [vmem:[#allocation6 + $0x22] ss:$64 sm:$0x10]  ;;  %v7659_v19 = vld [vmem:[#allocation6 + $0x1c] ss:$64 sm:$0x20]  ;;  %v13870_v12 = vor.u32 %v7711_v15, %v7710_v33  ;;  %v13872_v55 = vor.u32 %v7821_v56, %v7820_v10 }
 0x984   :  { %v7675_v9 = vld [vmem:[#allocation6 + $0x1d] ss:$64 sm:$0x20]  ;;  %v7621_v37 = vld [vmem:[#allocation6 + $0x1a] ss:$64 sm:$0x20]  ;;  %v7660_v25 = vor.u32 %v7659_v19, %v7658_v61  ;;  %v13874_v62 = vor.u32 %v7767_v13, %v7766_v29  ;;  %v14452_v29 = vor.u32 %v13736_v43, %v13695_v59 }
 0x985   :  { %v7637_v58 = vld [vmem:[#allocation6 + $0x1b] ss:$64 sm:$0x20]  ;;  %v7583_v20 = vld [vmem:[#allocation6 + $0x18] ss:$64 sm:$0x20]  ;;  %v7676_v42 = vor.u32 %v7675_v9, %v7674_v54  ;;  %v7622_v27 = vor.u32 %v7621_v37, %v7620_v46 }
 0x986   :  { %v7783_v1 = vld [vmem:[#allocation6 + $0x23] ss:$64 sm:$0x10]  ;;  %v7599_v49 = vld [vmem:[#allocation6 + $0x19] ss:$64 sm:$0x20]  ;;  %v7638_v52 = vor.u32 %v7637_v58, %v7636_v22  ;;  %v7584_v15 = vor.u32 %v7583_v20, %v7582_v32 }
 0x987   :  { %v7843_v26 = vld [vmem:[#allocation6 + $0x26] ss:$64 sm:$0x10]  ;;  %v7661_v53 = vld [vmem:[#allocation6 + $0x1c] ss:$64 sm:$0x40]  ;;  %v7600_v10 = vor.u32 %v7599_v49, %v7598_v14  ;;  %v13880_v13 = vor.u32 %v7783_v1, %v14452_v29 }
 0x988   :  { %v7663_v6 = vld [vmem:[#allocation6 + $0x1c] ss:$64 sm:$0x80]  ;;  %v7677_v48 = vld [vmem:[#allocation6 + $0x1d] ss:$64 sm:$0x40]  ;;  %v7662_v34 = vor.u32 %v7661_v53, %v7660_v25 }
 0x989   :  { %v7679_v7 = vld [vmem:[#allocation6 + $0x1d] ss:$64 sm:$0x80]  ;;  %v7859_v4 = vld [vmem:[#allocation6 + $0x27] ss:$64 sm:$0x10]  ;;  %v7678_v39 = vor.u32 %v7677_v48, %v7676_v42 }
 0x98a   :  { %v7733_v63 = vld [vmem:[#allocation6 + $0x20] ss:$64 sm:$0x10]  ;;  %v7623_v33 = vld [vmem:[#allocation6 + $0x1a] ss:$64 sm:$0x40]  ;;  %v7664_v53 = vor.u32 %v7663_v6, %v7662_v34  ;;  %v14453_v6 = vor.u32 %v13753_v40, %v13700_v28  ;;  %v14455_v40 = vor.u32 %v13780_v45, %v13724_v3  ;;  %v14457_v45 = vor.u32 %v13798_v16, %v13741_v57 }
 0x98b   :  { %v7625_v0 = vld [vmem:[#allocation6 + $0x1a] ss:$64 sm:$0x80]  ;;  %v7639_v54 = vld [vmem:[#allocation6 + $0x1b] ss:$64 sm:$0x40]  ;;  %v7624_v9 = vor.u32 %v7623_v33, %v7622_v27  ;;  %v7680_v48 = vor.u32 %v7679_v7, %v7678_v39 }
 0x98c   :  { %v7641_v44 = vld [vmem:[#allocation6 + $0x1b] ss:$64 sm:$0x80]  ;;  %v7697_v19 = vld [vmem:[#allocation6 + $0x1e] ss:$64 sm:$0x20]  ;;  %v7640_v37 = vor.u32 %v7639_v54, %v7638_v52  ;;  %v13891_v7 = vor.u32 %v7843_v26, %v14453_v6  ;;  %v13905_v26 = vor.u32 %v7733_v63, %v14455_v40 }
 0x98d   :  { %v7713_v61 = vld [vmem:[#allocation6 + $0x1f] ss:$64 sm:$0x20]  ;;  %v7585_v58 = vld [vmem:[#allocation6 + $0x18] ss:$64 sm:$0x40]  ;;  %v7626_v59 = vor.u32 %v7625_v0, %v7624_v9  ;;  %v7681_v34 = vmax.f32 %v7664_v53, %v7680_v48  ;;  %v14454_v0 = vor.u32 %v13763_v21, %v13705_v36  ;;  %v14456_v48 = vor.u32 %v13761_v47, %v13719_v24 }
 0x98e   :  { %v7601_v56 = vld [vmem:[#allocation6 + $0x19] ss:$64 sm:$0x40]  ;;  %v7919_v46 = vld [vmem:[#allocation6 + $0x2a] ss:$64 sm:$0x10]  ;;  %v7586_v32 = vor.u32 %v7585_v58, %v7584_v15  ;;  %v7642_v43 = vor.u32 %v7641_v44, %v7640_v37  ;;  %v7714_v36 = vor.u32 %v7713_v61, %v13870_v12 }
 0x98f   :  { %v7935_v25 = vld [vmem:[#allocation6 + $0x2b] ss:$64 sm:$0x10]  ;;  %v7881_v42 = vld [vmem:[#allocation6 + $0x28] ss:$64 sm:$0x10]  ;;  %v7602_v1 = vor.u32 %v7601_v56, %v7600_v10  ;;  %v13897_v44 = vor.u32 %v7859_v4, %v14454_v0  ;;  %7683 = vrot.lane.b32.xlu0 %v7681_v34, %s9157_s20  ;;  %v13915_v3 = vor.u32 %v7919_v46, %v14456_v48 }
 0x990   :  { %v7749_v22 = vld [vmem:[#allocation6 + $0x21] ss:$64 sm:$0x10]  ;;  %v7053_v11 = vmax.f32 %v6985_v23, 0.0  ;;  %v8078_v27 = vld [vmem:[%s14278_s5 + $0x78] sm:$0xff]  ;;  %v8077_v49 = vld [vmem:[%s14278_s5 + $0x70] sm:$0xff]  ;;  %v7643_v10 = vmax.f32 %v7626_v59, %v7642_v43  ;;  %v13920_v63 = vor.u32 %v7935_v25, %v14457_v45 }
 0x991   :  { %v7587_v20 = vld [vmem:[#allocation6 + $0x18] ss:$64 sm:$0x80]  ;;  %v7603_v14 = vld [vmem:[#allocation6 + $0x19] ss:$64 sm:$0x80]  ;;  %8120 = vmatpush.msrb.mxu3 %v8078_v27 }
 0x992   :  { %v7807_v52 = vld [vmem:[#allocation6 + $0x24] ss:$64 sm:$0x20]  ;;  %v7823_v33 = vld [vmem:[#allocation6 + $0x25] ss:$64 sm:$0x20]  ;;  %v7588_v39 = vor.u32 %v7587_v20, %v7586_v32  ;;  %v7604_v56 = vor.u32 %v7603_v14, %v7602_v1  ;;  %v6987_v20 = vpop.f32.mrf.mxu3  ;;  %7645 = vrot.lane.b32.xlu2 %v7643_v10, %s9156_s15 }
 0x993   :  { %v7699_v54 = vld [vmem:[#allocation6 + $0x1e] ss:$64 sm:$0x40]  ;;  %v7897_v23 = vld [vmem:[#allocation6 + $0x29] ss:$64 sm:$0x10]  ;;  %8121 = vmatpush.msrb.mxu3 %v8077_v49  ;;  %v6988_v25 = vadd.f32 %v13577_v30, %v6987_v20 }
 0x994   :  { %7116 = vst.msk [vmem:[#allocation6 + $0x1e0] sm:$0xff] %vm6587_vm14, %v7053_v11  ;;  %v7769_v15 = vld [vmem:[#allocation6 + $0x22] ss:$64 sm:$0x20]  ;;  %v7698_v11 = vor.u32 %v7697_v19, %v13866_v2  ;;  %v14458_v2 = vor.u32 %v13800_v17, %v13746_v60  ;;  %v14459_v19 = vor.u32 %v13782_v5, %v13729_v41  ;;  %v7605_v24 = vmax.f32 %v7588_v39, %v7604_v56  ;;  %v14460_v41 = vld [vmem:[#allocation10_spill] sm:$0xff] }
 0x995   :  { %v7715_v58 = vld [vmem:[#allocation6 + $0x1f] ss:$64 sm:$0x40]  ;;  %v7995_v9 = vld [vmem:[#allocation6 + $0x2e] ss:$64 sm:$0x10]  ;;  %v7808_v60 = vor.u32 %v7807_v52, %v13868_v50  ;;  %v7824_v17 = vor.u32 %v7823_v33, %v13872_v55  ;;  %v14461_v5 = vor.u32 %v13802_v38, %v14460_v41  ;;  %v7770_v43 = vor.u32 %v7769_v15, %v13874_v62 }
 0x996   :  { %v8011_v37 = vld [vmem:[#allocation6 + $0x2f] ss:$64 sm:$0x10]  ;;  %v8076_v28 = vld [vmem:[%s14278_s5 + $0x68] sm:$0xff]  ;;  %v13925_v12 = vor.u32 %v7881_v42, %v14458_v2  ;;  %v7750_v61 = vor.u32 %v7749_v22, %v14459_v19  ;;  %v7700_v27 = vor.u32 %v7699_v54, %v7698_v11  ;;  %v7716_v57 = vor.u32 %v7715_v58, %v7714_v36  ;;  %7607 = vrot.lane.b32.xlu1 %v7605_v24, %s9158_s25  ;;  %v14462_v55 = vld [vmem:[#allocation11_spill] sm:$0xff] }
 0x997   :  { %v7785_v29 = vld [vmem:[#allocation6 + $0x23] ss:$64 sm:$0x20]  ;;  %v13909_v21 = vld [vmem:[#allocation6 + $0x20] ss:$64 sm:$0x20]  ;;  %8122 = vmatpush.msrb.mxu3 %v8076_v28  ;;  %v13937_v42 = vor.u32 %v7897_v23, %v14461_v5 }
 0x998   :  { %v7809_v4 = vld [vmem:[#allocation6 + $0x24] ss:$64 sm:$0x40]  ;;  %v7825_v53 = vld [vmem:[#allocation6 + $0x25] ss:$64 sm:$0x40]  ;;  %v7786_v1 = vor.u32 %v7785_v29, %v13880_v13  ;;  %v7736_v28 = vor.u32 %v13909_v21, %v13905_v26 }
 0x999   :  { %v7751_v32 = vld [vmem:[#allocation6 + $0x21] ss:$64 sm:$0x20]  ;;  %v7771_v47 = vld [vmem:[#allocation6 + $0x22] ss:$64 sm:$0x40]  ;;  %v7810_v58 = vor.u32 %v7809_v4, %v7808_v60  ;;  %v7826_v62 = vor.u32 %v7825_v53, %v7824_v17 }
 0x99a   :  { %v7787_v46 = vld [vmem:[#allocation6 + $0x23] ss:$64 sm:$0x40]  ;;  %v7957_v16 = vld [vmem:[#allocation6 + $0x2c] ss:$64 sm:$0x10]  ;;  %v7772_v56 = vor.u32 %v7771_v47, %v7770_v43  ;;  %v7752_v11 = vor.u32 %v7751_v32, %v7750_v61 }
 0x99b   :  { %v13939_v22 = vld [vmem:[#allocation6 + $0x26] ss:$64 sm:$0x20]  ;;  %v7737_v49 = vld [vmem:[#allocation6 + $0x20] ss:$64 sm:$0x40]  ;;  %v7788_v53 = vor.u32 %v7787_v46, %v7786_v1 }
 0x99c   :  { %v7753_v59 = vld [vmem:[#allocation6 + $0x21] ss:$64 sm:$0x40]  ;;  %v7701_v14 = vld [vmem:[#allocation6 + $0x1e] ss:$64 sm:$0x80]  ;;  %v7738_v60 = vor.u32 %v7737_v49, %v7736_v28 }
 0x99d   :  { %v13944_v54 = vld [vmem:[#allocation6 + $0x2a] ss:$64 sm:$0x20]  ;;  %v13946_v50 = vld [vmem:[#allocation6 + $0x2b] ss:$64 sm:$0x20]  ;;  %v7754_v17 = vor.u32 %v7753_v59, %v7752_v11 }
 0x99e   :  { %v14463_v52 = vld [vmem:[#allocation8_spill] sm:$0xff]  ;;  %v7054_v39 = vmax.f32 %v6988_v25, 0.0  ;;  %v7717_v15 = vld [vmem:[#allocation6 + $0x1f] ss:$64 sm:$0x80]  ;;  %v14468_v19 = vld [vmem:[#allocation9_spill] sm:$0xff]  ;;  %v7846_v25 = vor.u32 %v13939_v22, %v13891_v7  ;;  %v7922_v5 = vor.u32 %v13944_v54, %v13915_v3 }
 0x99f   :  { %v14464_v38 = vor.u32 %v14462_v55, %v14463_v52  ;;  %v14465_v23 = vld [vmem:[#allocation12_spill] sm:$0xff]  ;;  %v13958_v13 = vld [vmem:[#allocation6 + $0x28] ss:$64 sm:$0x20]  ;;  %v7718_v29 = vor.u32 %v7717_v15, %v7716_v57 }
 0x9a0   :  { %v14466_v6 = vor.u32 %v13815_v35, %v14465_v23  ;;  %v7861_v0 = vld [vmem:[#allocation6 + $0x27] ss:$64 sm:$0x20]  ;;  %v7811_v40 = vld [vmem:[#allocation6 + $0x24] ss:$64 sm:$0x80]  ;;  %v7884_v52 = vor.u32 %v13958_v13, %v13925_v12 }
 0x9a1   :  { %v13951_v33 = vor.u32 %v7995_v9, %v14464_v38  ;;  %v7827_v10 = vld [vmem:[#allocation6 + $0x25] ss:$64 sm:$0x80]  ;;  %v7702_v9 = vor.u32 %v7701_v14, %v7700_v27  ;;  %v8033_v36 = vld [vmem:[#allocation6 + $0x30] ss:$64 sm:$0x10]  ;;  %v7812_v35 = vor.u32 %v7811_v40, %v7810_v58  ;;  %v6990_v14 = vpop.f32.mrf.mxu3  ;;  %v7862_v7 = vor.u32 %v7861_v0, %v13897_v44 }
 0x9a2   :  { %v13956_v34 = vor.u32 %v8011_v37, %v14466_v6  ;;  %7117 = vst.msk [vmem:[#allocation6 + $0x1e8] sm:$0xff] %vm6587_vm14, %v7054_v39  ;;  %v7828_v37 = vor.u32 %v7827_v10, %v7826_v62  ;;  %v7773_v4 = vld [vmem:[#allocation6 + $0x22] ss:$64 sm:$0x80]  ;;  %v6991_v23 = vadd.f32 %v13577_v30, %v6990_v14  ;;  %v14470_v62 = vld [vmem:[#allocation18_spill] sm:$0xff]  ;;  %v14471_v12 = vld [vmem:[#allocation13_spill] sm:$0xff]  ;;  %v14473_v30 = vor.u32 %v13819_v18, %v13778_v51 }
 0x9a3   :  { %v7847_v48 = vld [vmem:[#allocation6 + $0x26] ss:$64 sm:$0x40]  ;;  %v7863_v45 = vld [vmem:[#allocation6 + $0x27] ss:$64 sm:$0x40]  ;;  %v7774_v47 = vor.u32 %v7773_v4, %v7772_v56  ;;  %v7719_v55 = vmax.f32 %v7702_v9, %v7718_v29  ;;  %v14472_v15 = vor.u32 %v14470_v62, %v14471_v12 }
 0x9a4   :  { %v14467_v2 = vld [vmem:[#allocation16_spill] sm:$0xff]  ;;  %v7973_v26 = vld [vmem:[#allocation6 + $0x2d] ss:$64 sm:$0x10]  ;;  %v7829_v46 = vmax.f32 %v7812_v35, %v7828_v37  ;;  %v7848_v0 = vor.u32 %v7847_v48, %v7846_v25  ;;  %v7864_v28 = vor.u32 %v7863_v45, %v7862_v7  ;;  %v7055_v29 = vmax.f32 %v6991_v23, 0.0  ;;  %v8074_v7 = vld [vmem:[%s14278_s5 + $0x58] sm:$0xff] }
 0x9a5   :  { %v14469_v20 = vor.u32 %v14467_v2, %v14468_v19  ;;  %v8049_v21 = vld [vmem:[#allocation6 + $0x31] ss:$64 sm:$0x10]  ;;  %v7789_v27 = vld [vmem:[#allocation6 + $0x23] ss:$64 sm:$0x80]  ;;  %v8034_v13 = vor.u32 %v8033_v36, %v14472_v15  ;;  %7721 = vrot.lane.b32.xlu1 %v7719_v55, %s9159_s4  ;;  %v7974_v40 = vor.u32 %v7973_v26, %v14473_v30 }
 0x9a6   :  { %v7923_v57 = vld [vmem:[#allocation6 + $0x2a] ss:$64 sm:$0x40]  ;;  %v7939_v61 = vld [vmem:[#allocation6 + $0x2b] ss:$64 sm:$0x40]  ;;  %v7790_v41 = vor.u32 %v7789_v27, %v7788_v53  ;;  %7831 = vrot.lane.b32.xlu0 %v7829_v46, %s9154_s12 }
 0x9a7   :  { %v13966_v24 = vor.u32 %v7957_v16, %v14469_v20  ;;  %v7899_v32 = vld [vmem:[#allocation6 + $0x29] ss:$64 sm:$0x20]  ;;  %v7938_v16 = vor.u32 %v13946_v50, %v13920_v63  ;;  %v7885_v43 = vld [vmem:[#allocation6 + $0x28] ss:$64 sm:$0x40]  ;;  %v7924_v11 = vor.u32 %v7923_v57, %v7922_v5 }
 0x9a8   :  { %v7739_v1 = vld [vmem:[#allocation6 + $0x20] ss:$64 sm:$0x80]  ;;  %v7901_v38 = vld [vmem:[#allocation6 + $0x29] ss:$64 sm:$0x40]  ;;  %v7791_v3 = vmax.f32 %v7774_v47, %v7790_v41  ;;  %v7900_v63 = vor.u32 %v7899_v32, %v13937_v42  ;;  %v14474_v42 = vor.u32 %v13821_v8, %v13792_v31  ;;  %v7886_v4 = vor.u32 %v7885_v43, %v7884_v52 }
 0x9a9   :  { %v7997_v22 = vld [vmem:[#allocation6 + $0x2e] ss:$64 sm:$0x20]  ;;  %v7740_v49 = vor.u32 %v7739_v1, %v7738_v60  ;;  %v7755_v59 = vld [vmem:[#allocation6 + $0x21] ss:$64 sm:$0x80]  ;;  %v7940_v36 = vor.u32 %v7939_v61, %v7938_v16 }
 0x9aa   :  { %v7849_v54 = vld [vmem:[#allocation6 + $0x26] ss:$64 sm:$0x80]  ;;  %v7865_v50 = vld [vmem:[#allocation6 + $0x27] ss:$64 sm:$0x80]  ;;  %v7756_v58 = vor.u32 %v7755_v59, %v7754_v17  ;;  %v8050_v56 = vor.u32 %v8049_v21, %v14474_v42  ;;  %7793 = vrot.lane.b32.xlu2 %v7791_v3, %s9149_s17  ;;  %v7902_v19 = vor.u32 %v7901_v38, %v7900_v63  ;;  %v7998_v31 = vor.u32 %v7997_v22, %v13951_v33  ;;  %v7226_v42 = vpop.permute.xlu1 %7225 }
 0x9ab   :  { %v8013_v6 = vld [vmem:[#allocation6 + $0x2f] ss:$64 sm:$0x20]  ;;  %v7959_v39 = vld [vmem:[#allocation6 + $0x2c] ss:$64 sm:$0x20]  ;;  %v7850_v53 = vor.u32 %v7849_v54, %v7848_v0  ;;  %v7866_v48 = vor.u32 %v7865_v50, %v7864_v28 }
 0x9ac   :  { %v8035_v44 = vld [vmem:[#allocation6 + $0x30] ss:$64 sm:$0x20]  ;;  %v7975_v10 = vld [vmem:[#allocation6 + $0x2d] ss:$64 sm:$0x20]  ;;  %v7757_v45 = vmax.f32 %v7740_v49, %v7756_v58  ;;  %v8014_v21 = vor.u32 %v8013_v6, %v13956_v34  ;;  %v7960_v27 = vor.u32 %v7959_v39, %v13966_v24 }
 0x9ad   :  { %v8051_v9 = vld [vmem:[#allocation6 + $0x31] ss:$64 sm:$0x20]  ;;  %v7925_v35 = vld [vmem:[#allocation6 + $0x2a] ss:$64 sm:$0x80]  ;;  %v7976_v57 = vor.u32 %v7975_v10, %v7974_v40  ;;  %v8036_v61 = vor.u32 %v8035_v44, %v8034_v13  ;;  %v7867_v16 = vmax.f32 %v7850_v53, %v7866_v48 }
 0x9ae   :  { %v7941_v37 = vld [vmem:[#allocation6 + $0x2b] ss:$64 sm:$0x80]  ;;  %7118 = vst.msk [vmem:[#allocation6 + $0x1f0] sm:$0xff] %vm6587_vm14, %v7055_v29  ;;  %v7926_v51 = vor.u32 %v7925_v35, %v7924_v11  ;;  %v8052_v32 = vor.u32 %v8051_v9, %v8050_v56  ;;  %v8075_v38 = vld [vmem:[%s14278_s5 + $0x60] sm:$0xff]  ;;  %v8072_v12 = vld [vmem:[%s14278_s5 + $0x48] sm:$0xff]  ;;  %v7187_v56 = vpop.permute.xlu0 %7186  ;;  %v7265_v11 = vpop.permute.xlu2 %7264 }
 0x9af   :  { %v7942_v18 = vor.u32 %v7941_v37, %v7940_v36  ;;  %v7887_v2 = vld [vmem:[#allocation6 + $0x28] ss:$64 sm:$0x80]  ;;  %v7999_v8 = vld [vmem:[#allocation6 + $0x2e] ss:$64 sm:$0x40]  ;;  %7869 = vrot.lane.b32.xlu1 %v7867_v16, %s9155_s14  ;;  %8123 = vmatpush.msrb.mxu3 %v8075_v38 }
 0x9b0   :  { %v7888_v20 = vor.u32 %v7887_v2, %v7886_v4  ;;  %v7903_v26 = vld [vmem:[#allocation6 + $0x29] ss:$64 sm:$0x80]  ;;  %v8015_v47 = vld [vmem:[#allocation6 + $0x2f] ss:$64 sm:$0x40]  ;;  %v8000_v24 = vor.u32 %v7999_v8, %v7998_v31 }
 0x9b1   :  { %v7943_v25 = vmax.f32 %v7926_v51, %v7942_v18  ;;  %v7904_v60 = vor.u32 %v7903_v26, %v7902_v19  ;;  %v7961_v17 = vld [vmem:[#allocation6 + $0x2c] ss:$64 sm:$0x40]  ;;  %v7977_v46 = vld [vmem:[#allocation6 + $0x2d] ss:$64 sm:$0x40]  ;;  %v8016_v59 = vor.u32 %v8015_v47, %v8014_v21  ;;  %8124 = vmatpush.msrb.mxu3 %v8074_v7 }
 0x9b2   :  { %v8037_v41 = vld [vmem:[#allocation6 + $0x30] ss:$64 sm:$0x40]  ;;  %v8053_v5 = vld [vmem:[#allocation6 + $0x31] ss:$64 sm:$0x40]  ;;  %v7962_v55 = vor.u32 %v7961_v17, %v7960_v27  ;;  %v7978_v52 = vor.u32 %v7977_v46, %v7976_v57  ;;  %v7343_v2 = vpop.permute.xlu1 %7342 }
 0x9b3   :  { %v8001_v43 = vld [vmem:[#allocation6 + $0x2e] ss:$64 sm:$0x80]  ;;  %7758 = vst.msk [vmem:[#allocation7 + $0x10] sm:$0xff] %vm6587_vm14, %v7757_v45  ;;  %7945 = vrot.lane.b32.xlu0 %v7943_v25, %s9156_s15  ;;  %v7905_v33 = vmax.f32 %v7888_v20, %v7904_v60  ;;  %v8038_v22 = vor.u32 %v8037_v41, %v8036_v61  ;;  %v8054_v49 = vor.u32 %v8053_v5, %v8052_v32  ;;  %v8071_v44 = vld [vmem:[%s14278_s5 + $0x40] sm:$0xff]  ;;  %v8070_v28 = vld [vmem:[%s14278_s5 + $0x38] sm:$0xff] }
 0x9b4   :  { %v7963_v34 = vld [vmem:[#allocation6 + $0x2c] ss:$64 sm:$0x80]  ;;  %v7979_v1 = vld [vmem:[#allocation6 + $0x2d] ss:$64 sm:$0x80]  ;;  %v8002_v58 = vor.u32 %v8001_v43, %v8000_v24 }
 0x9b5   :  { %v8017_v14 = vld [vmem:[#allocation6 + $0x2f] ss:$64 sm:$0x80]  ;;  %7907 = vrot.lane.b32.xlu2 %v7905_v33, %s9158_s25  ;;  %v8039_v3 = vld [vmem:[#allocation6 + $0x30] ss:$64 sm:$0x80]  ;;  %v7964_v54 = vor.u32 %v7963_v34, %v7962_v55  ;;  %v7980_v50 = vor.u32 %v7979_v1, %v7978_v52 }
 0x9b6   :  { %v8073_v23 = vld [vmem:[%s14278_s5 + $0x50] sm:$0xff]  ;;  %v8055_v63 = vld [vmem:[#allocation6 + $0x31] ss:$64 sm:$0x80]  ;;  %v8040_v6 = vor.u32 %v8039_v3, %v8038_v22  ;;  %v8018_v62 = vor.u32 %v8017_v14, %v8016_v59  ;;  %v8068_v40 = vld [vmem:[%s14278_s5 + $0x28] sm:$0xff]  ;;  %7190 = vst.msk [vmem:[#allocation7] sm:$0xff] %vm7189_vm15, %v7187_v56  ;;  %v7304_v19 = vpop.permute.xlu0 %7303  ;;  %v7382_v8 = vpop.permute.xlu2 %7381 }
 0x9b7   :  { %v8056_v39 = vor.u32 %v8055_v63, %v8054_v49  ;;  %8125 = vmatpush.msrb.mxu3 %v8073_v23  ;;  %v7981_v13 = vmax.f32 %v7964_v54, %v7980_v50  ;;  %v8069_v30 = vld [vmem:[%s14278_s5 + $0x30] sm:$0xff]  ;;  %v8067_v10 = vld [vmem:[%s14278_s5 + $0x20] sm:$0xff]  ;;  %v8066_v9 = vld [vmem:[%s14278_s5 + $0x18] sm:$0xff]  ;;  %7229 = vst.msk [vmem:[#allocation7] sm:$0xff] %vm7228_vm0, %v7226_v42 }
 0x9b8   :  { %v8019_v0 = vmax.f32 %v8002_v58, %v8018_v62  ;;  %v8065_v29 = vld [vmem:[%s14278_s5 + $0x10] sm:$0xff]  ;;  %7268 = vst.msk [vmem:[#allocation7] sm:$0xff] %vm7267_vm1, %v7265_v11  ;;  %v8064_v36 = vld [vmem:[%s14278_s5 + $0x8] sm:$0xff]  ;;  %v8063_v35 = vld [vmem:[%s14278_s5] sm:$0xff] }
 0x9b9   :  { %v8057_v15 = vmax.f32 %v8040_v6, %v8056_v39  ;;  %8126 = vmatpush.msrb.mxu3 %v8072_v12  ;;  %7983 = vrot.lane.b32.xlu1 %v7981_v13, %s9157_s20  ;;  %v8094_v37 = vld [vmem:[%s14278_s5 + $0xf8] sm:$0xff]  ;;  %v8093_v4 = vld [vmem:[%s14278_s5 + $0xf0] sm:$0xff]  ;;  %v8092_v53 = vld [vmem:[%s14278_s5 + $0xe8] sm:$0xff]  ;;  %7307 = vst.msk [vmem:[#allocation7] sm:$0xff] %vm7306_vm2, %v7304_v19 }
 0x9ba   :  { %v8091_v48 = vld [vmem:[%s14278_s5 + $0xe0] sm:$0xff]  ;;  %v8090_v45 = vld [vmem:[%s14278_s5 + $0xd8] sm:$0xff]  ;;  %v8089_v51 = vld [vmem:[%s14278_s5 + $0xd0] sm:$0xff]  ;;  %7346 = vst.msk [vmem:[#allocation7] sm:$0xff] %vm7345_vm3, %v7343_v2 }
 0x9bb   :  { %8058 = vst.msk [vmem:[#allocation7 + $0x18] sm:$0xff] %vm6587_vm14, %v8057_v15  ;;  %8127 = vmatpush.msrb.mxu3 %v8071_v44  ;;  %v8088_v18 = vld [vmem:[%s14278_s5 + $0xc8] sm:$0xff]  ;;  %v8087_v31 = vld [vmem:[%s14278_s5 + $0xc0] sm:$0xff]  ;;  %v8086_v20 = vld [vmem:[%s14278_s5 + $0xb8] sm:$0xff] }
 0x9bc   :  { %7385 = vst.msk [vmem:[#allocation7] sm:$0xff] %vm7384_vm4, %v7382_v8  ;;  %v8085_v26 = vld [vmem:[%s14278_s5 + $0xb0] sm:$0xff]  ;;  %v8084_v21 = vld [vmem:[%s14278_s5 + $0xa8] sm:$0xff]  ;;  %v8083_v27 = vld [vmem:[%s14278_s5 + $0xa0] sm:$0xff] }
 0x9bd   :  { %8021 = vrot.lane.b32.xlu2 %v8019_v0, %s9159_s4  ;;  %8128 = vmatpush.msrb.mxu3 %v8070_v28  ;;  %v8082_v57 = vld [vmem:[%s14278_s5 + $0x98] sm:$0xff]  ;;  %v8081_v32 = vld [vmem:[%s14278_s5 + $0x90] sm:$0xff]  ;;  %v8080_v25 = vld [vmem:[%s14278_s5 + $0x88] sm:$0xff] }
 0x9be   :  { %v7421_v47 = vpop.permute.xlu0 %7420  ;;  %v7532_v61 = vpop.permute.xlu2 %7531  ;;  %v8079_v17 = vld [vmem:[%s14278_s5 + $0x80] sm:$0xff]  ;;  %v8110_v46 = vld [vmem:[%s14278_s5 + $0x178] sm:$0xff]  ;;  %v8109_v5 = vld [vmem:[%s14278_s5 + $0x170] sm:$0xff] }
 0x9bf   :  { %8129 = vmatpush.msrb.mxu3 %v8069_v30  ;;  %7424 = vst.msk [vmem:[#allocation7] sm:$0xff] %vm7423_vm5, %v7421_v47  ;;  %v8108_v16 = vld [vmem:[%s14278_s5 + $0x168] sm:$0xff]  ;;  %v8107_v33 = vld [vmem:[%s14278_s5 + $0x160] sm:$0xff]  ;;  %v8106_v1 = vld [vmem:[%s14278_s5 + $0x158] sm:$0xff] }
 0x9c0   :  { %v8105_v24 = vld [vmem:[%s14278_s5 + $0x150] sm:$0xff]  ;;  %v8104_v55 = vld [vmem:[%s14278_s5 + $0x148] sm:$0xff]  ;;  %v8103_v52 = vld [vmem:[%s14278_s5 + $0x140] sm:$0xff] }
 0x9c1   :  { %8130 = vmatpush.msrb.mxu3 %v8068_v40  ;;  %v8102_v38 = vld [vmem:[%s14278_s5 + $0x138] sm:$0xff]  ;;  %v8101_v7 = vld [vmem:[%s14278_s5 + $0x130] sm:$0xff]  ;;  %v8100_v22 = vld [vmem:[%s14278_s5 + $0x128] sm:$0xff] }
 0x9c2   :  { %v8099_v49 = vld [vmem:[%s14278_s5 + $0x120] sm:$0xff]  ;;  %v8098_v23 = vld [vmem:[%s14278_s5 + $0x118] sm:$0xff]  ;;  %v8097_v3 = vld [vmem:[%s14278_s5 + $0x110] sm:$0xff] }
 0x9c3   :  { %8131 = vmatpush.msrb.mxu3 %v8067_v10  ;;  %v8096_v54 = vld [vmem:[%s14278_s5 + $0x108] sm:$0xff]  ;;  %v8095_v50 = vld [vmem:[%s14278_s5 + $0x100] sm:$0xff]  ;;  %v8216_v10 = vld [vmem:[%s14281_s7 + $0x78] sm:$0xff] }
 0x9c4   :  { %v8112_v62 = vld [vmem:[%s14278_s5 + $0x188] sm:$0xff]  ;;  %v8111_v13 = vld [vmem:[%s14278_s5 + $0x180] sm:$0xff]  ;;  %v8215_v42 = vld [vmem:[%s14281_s7 + $0x70] sm:$0xff] }
 0x9c5   :  { %8132 = vmatpush.msrb.mxu3 %v8066_v9  ;;  %v8062_v40 = vld [vmem:[#allocation7 + $0x18] sm:$0xff]  ;;  %v8214_v56 = vld [vmem:[%s14281_s7 + $0x68] sm:$0xff]  ;;  %v8211_v11 = vld [vmem:[%s14281_s7 + $0x50] sm:$0xff] }
 0x9c6   :  { %v8059_v60 = vld [vmem:[#allocation7] sm:$0xff]  ;;  %v8213_v9 = vld [vmem:[%s14281_s7 + $0x60] sm:$0xff]  ;;  %v8257_v19 = vld [vmem:[%s14282_s9 + $0x78] sm:$0xff] }
 0x9c7   :  { %8133 = vmatpush.msrb.mxu3 %v8065_v29  ;;  %v8212_v29 = vld [vmem:[%s14281_s7 + $0x58] sm:$0xff]  ;;  %v8201_v2 = vld [vmem:[%s14281_s7] sm:$0xff]  ;;  %v8256_v8 = vld [vmem:[%s14282_s9 + $0x70] sm:$0xff] }
 0x9c9   :  { %8134 = vmatpush.msrb.mxu3 %v8064_v36  ;;  %v8210_v36 = vld [vmem:[%s14281_s7 + $0x48] sm:$0xff] }
 0x9cb   :  { %8135 = vmatpush.msrb.mxu3 %v8063_v35  ;;  %v8209_v35 = vld [vmem:[%s14281_s7 + $0x40] sm:$0xff] }
 0x9cc   :  { %8136 = vmatmul.f32.vlgmr.msrb.gmra.mxu3 %v8059_v60  ;;  %v7570_v34 = vpop.permute.xlu0 %7569 }
 0x9cd   :  { %8140 = vmatpush.msra.mxu3 %v8094_v37  ;;  %v8208_v37 = vld [vmem:[%s14281_s7 + $0x38] sm:$0xff] }
 0x9cf   :  { %8141 = vmatpush.msra.mxu3 %v8093_v4  ;;  %v8207_v4 = vld [vmem:[%s14281_s7 + $0x30] sm:$0xff] }
 0x9d1   :  { %8142 = vmatpush.msra.mxu3 %v8092_v53  ;;  %v8206_v53 = vld [vmem:[%s14281_s7 + $0x28] sm:$0xff] }
 0x9d3   :  { %8143 = vmatpush.msra.mxu3 %v8091_v48  ;;  %v8205_v48 = vld [vmem:[%s14281_s7 + $0x20] sm:$0xff] }
 0x9d5   :  { %8144 = vmatpush.msra.mxu3 %v8090_v45  ;;  %v7494_v43 = vpop.permute.xlu1 %7493  ;;  %v8204_v45 = vld [vmem:[%s14281_s7 + $0x18] sm:$0xff] }
 0x9d6   :  { %7496 = vst.msk [vmem:[#allocation7 + $0x8] sm:$0xff] %vm7189_vm15, %v7494_v43  ;;  %v8245_v43 = vld [vmem:[%s14282_s9 + $0x18] sm:$0xff] }
 0x9d7   :  { %8145 = vmatpush.msra.mxu3 %v8089_v51  ;;  %7534 = vst.msk [vmem:[#allocation7 + $0x8] sm:$0xff] %vm7228_vm0, %v7532_v61  ;;  %v8203_v51 = vld [vmem:[%s14281_s7 + $0x10] sm:$0xff]  ;;  %v8250_v61 = vld [vmem:[%s14282_s9 + $0x40] sm:$0xff] }
 0x9d8   :  { %7572 = vst.msk [vmem:[#allocation7 + $0x8] sm:$0xff] %vm7267_vm1, %v7570_v34 }
 0x9d9   :  { %8146 = vmatpush.msra.mxu3 %v8088_v18  ;;  %v8202_v18 = vld [vmem:[%s14281_s7 + $0x8] sm:$0xff] }
 0x9db   :  { %8147 = vmatpush.msra.mxu3 %v8087_v31 }
 0x9dd   :  { %8148 = vmatpush.msra.mxu3 %v8086_v20  ;;  %v8255_v20 = vld [vmem:[%s14282_s9 + $0x68] sm:$0xff] }
 0x9df   :  { %8149 = vmatpush.msra.mxu3 %v8085_v26  ;;  %v8254_v26 = vld [vmem:[%s14282_s9 + $0x60] sm:$0xff] }
 0x9e1   :  { %8150 = vmatpush.msra.mxu3 %v8084_v21  ;;  %v8253_v21 = vld [vmem:[%s14282_s9 + $0x58] sm:$0xff] }
 0x9e3   :  { %8151 = vmatpush.msra.mxu3 %v8083_v27  ;;  %v8252_v27 = vld [vmem:[%s14282_s9 + $0x50] sm:$0xff] }
 0x9e5   :  { %8152 = vmatpush.msra.mxu3 %v8082_v57  ;;  %v8251_v57 = vld [vmem:[%s14282_s9 + $0x48] sm:$0xff] }
 0x9e7   :  { %8153 = vmatpush.msra.mxu3 %v8081_v32  ;;  %v8249_v32 = vld [vmem:[%s14282_s9 + $0x38] sm:$0xff] }
 0x9e9   :  { %8154 = vmatpush.msra.mxu3 %v8080_v25  ;;  %v9135_v25 = vld [vmem:[%s14279_s6] ss:$0 sm:$0xff] }
 0x9eb   :  { %8155 = vmatpush.msra.mxu3 %v8079_v17  ;;  %v8248_v17 = vld [vmem:[%s14282_s9 + $0x30] sm:$0xff] }
 0x9ec   :  { %v7646_v41 = vpop.permute.xlu2 %7645 }
 0x9ed   :  { %8160 = vmatpush.msrb.mxu3 %v8110_v46  ;;  %v8247_v46 = vld [vmem:[%s14282_s9 + $0x28] sm:$0xff] }
 0x9ef   :  { %8161 = vmatpush.msrb.mxu3 %v8109_v5  ;;  %v8246_v5 = vld [vmem:[%s14282_s9 + $0x20] sm:$0xff] }
 0x9f1   :  { %8162 = vmatpush.msrb.mxu3 %v8108_v16 }
 0x9f3   :  { %8163 = vmatpush.msrb.mxu3 %v8107_v33 }
 0x9f5   :  { %8164 = vmatpush.msrb.mxu3 %v8106_v1 }
 0x9f7   :  { %8165 = vmatpush.msrb.mxu3 %v8105_v24 }
 0x9f9   :  { %8166 = vmatpush.msrb.mxu3 %v8104_v55  ;;  %v8243_v55 = vld [vmem:[%s14282_s9 + $0x8] sm:$0xff] }
 0x9fb   :  { %8167 = vmatpush.msrb.mxu3 %v8103_v52  ;;  %v8242_v52 = vld [vmem:[%s14282_s9] sm:$0xff] }
 0x9fd   :  { %8168 = vmatpush.msrb.mxu3 %v8102_v38  ;;  %v9136_v38 = vld [vmem:[%s14280_s8] ss:$0 sm:$0xff] }
 0x9ff   :  { %8169 = vmatpush.msrb.mxu3 %v8101_v7 }
 0xa01   :  { %8170 = vmatpush.msrb.mxu3 %v8100_v22  ;;  %v7684_v59 = vpop.permute.xlu0 %7683 }
 0xa03   :  { %8171 = vmatpush.msrb.mxu3 %v8099_v49 }
 0xa04   :  { %v7794_v14 = vpop.permute.xlu2 %7793 }
 0xa05   :  { %7796 = vst.msk [vmem:[#allocation7 + $0x10] sm:$0xff] %vm7189_vm15, %v7794_v14  ;;  %8172 = vmatpush.msrb.mxu3 %v8098_v23  ;;  %v8244_v14 = vld [vmem:[%s14282_s9 + $0x10] sm:$0xff] }
 0xa07   :  { %8173 = vmatpush.msrb.mxu3 %v8097_v3 }
 0xa08   :  { %v7608_v63 = vpop.permute.xlu1 %7607 }
 0xa09   :  { %7610 = vst.msk [vmem:[#allocation7 + $0x8] sm:$0xff] %vm7306_vm2, %v7608_v63  ;;  %8174 = vmatpush.msrb.mxu3 %v8096_v54 }
 0xa0a   :  { %7648 = vst.msk [vmem:[#allocation7 + $0x8] sm:$0xff] %vm7345_vm3, %v7646_v41 }
 0xa0b   :  { %7686 = vst.msk [vmem:[#allocation7 + $0x8] sm:$0xff] %vm7384_vm4, %v7684_v59  ;;  %8175 = vmatpush.msrb.mxu3 %v8095_v50  ;;  %v9137_v59 = vld [vmem:[%s14283_s10] ss:$0 sm:$0xff] }
 0xa0f   :  { %v7908_v58 = vpop.permute.xlu2 %7907 }
 0xa17   :  { %v7722_v39 = vpop.permute.xlu1 %7721  ;;  %v8022_v28 = vpop.permute.xlu2 %8021 }
 0xa18   :  { %v7832_v6 = vpop.permute.xlu0 %7831  ;;  %7724 = vst.msk [vmem:[#allocation7 + $0x8] sm:$0xff] %vm7423_vm5, %v7722_v39 }
 0xa19   :  { %7834 = vst.msk [vmem:[#allocation7 + $0x10] sm:$0xff] %vm7228_vm0, %v7832_v6 }
 0xa1f   :  { %v8060_v15 = vld [vmem:[#allocation7 + $0x8] sm:$0xff] }
 0xa20   :  { %8156 = vmatmul.f32.vlgmr.msra.gmra.mxu3 %v8060_v15 }
 0xa21   :  { %v7870_v12 = vpop.permute.xlu1 %7869  ;;  %8194 = vmatpush.msra.mxu3 %v8112_v62 }
 0xa22   :  { %7872 = vst.msk [vmem:[#allocation7 + $0x10] sm:$0xff] %vm7267_vm1, %v7870_v12 }
 0xa23   :  { %7910 = vst.msk [vmem:[#allocation7 + $0x10] sm:$0xff] %vm7306_vm2, %v7908_v58  ;;  %8195 = vmatpush.msra.mxu3 %v8111_v13 }
 0xa25   :  { %v7946_v44 = vpop.permute.xlu0 %7945 }
 0xa26   :  { %7948 = vst.msk [vmem:[#allocation7 + $0x10] sm:$0xff] %vm7345_vm3, %v7946_v44 }
 0xa2b   :  { %v7984_v0 = vpop.permute.xlu1 %7983 }
 0xa2c   :  { %7986 = vst.msk [vmem:[#allocation7 + $0x10] sm:$0xff] %vm7384_vm4, %v7984_v0 }
 0xa2d   :  { %8024 = vst.msk [vmem:[#allocation7 + $0x10] sm:$0xff] %vm7423_vm5, %v8022_v28 }
 0xa34   :  { %v8061_v30 = vld [vmem:[#allocation7 + $0x10] sm:$0xff] }
 0xa35   :  { %8176 = vmatmul.f32.vlgmr.msrb.gmra.mxu3 %v8061_v30 }
 0xa36   :  { %8221 = vmatpush.msrb.mxu3 %v8216_v10 }
 0xa38   :  { %8222 = vmatpush.msrb.mxu3 %v8215_v42 }
 0xa3a   :  { %8223 = vmatpush.msrb.mxu3 %v8214_v56 }
 0xa3c   :  { %8224 = vmatpush.msrb.mxu3 %v8213_v9 }
 0xa3d   :  { %9108 = vmatmul.msk.f32.vlgmr.msra.gmra.mxu3 %vm6587_vm14, %v8062_v40 }
 0xa3e   :  { %8225 = vmatpush.msrb.mxu3 %v8212_v29 }
 0xa40   :  { %8226 = vmatpush.msrb.mxu3 %v8211_v11 }
 0xa42   :  { %8227 = vmatpush.msrb.mxu3 %v8210_v36 }
 0xa44   :  { %8228 = vmatpush.msrb.mxu3 %v8209_v35 }
 0xa46   :  { %8229 = vmatpush.msrb.mxu3 %v8208_v37 }
 0xa48   :  { %8230 = vmatpush.msrb.mxu3 %v8207_v4 }
 0xa4a   :  { %8231 = vmatpush.msrb.mxu3 %v8206_v53 }
 0xa4c   :  { %8232 = vmatpush.msrb.mxu3 %v8205_v48 }
 0xa4e   :  { %8233 = vmatpush.msrb.mxu3 %v8204_v45 }
 0xa4f   :  { %v8137_v31 = vpop.f32.mrf.mxu3 }
 0xa50   :  { %8234 = vmatpush.msrb.mxu3 %v8203_v51  ;;  %v8138_v41 = vadd.f32 %v9135_v25, %v8137_v31 }
 0xa52   :  { %8235 = vmatpush.msrb.mxu3 %v8202_v18 }
 0xa54   :  { %8236 = vmatpush.msrb.mxu3 %v8201_v2 }
 0xa56   :  { %8262 = vmatpush.msra.mxu3 %v8257_v19 }
 0xa58   :  { %8263 = vmatpush.msra.mxu3 %v8256_v8 }
 0xa5a   :  { %8264 = vmatpush.msra.mxu3 %v8255_v20 }
 0xa5c   :  { %8265 = vmatpush.msra.mxu3 %v8254_v26 }
 0xa5e   :  { %8266 = vmatpush.msra.mxu3 %v8253_v21 }
 0xa60   :  { %8267 = vmatpush.msra.mxu3 %v8252_v27 }
 0xa62   :  { %8268 = vmatpush.msra.mxu3 %v8251_v57 }
 0xa64   :  { %8269 = vmatpush.msra.mxu3 %v8250_v61 }
 0xa66   :  { %8270 = vmatpush.msra.mxu3 %v8249_v32 }
 0xa68   :  { %8271 = vmatpush.msra.mxu3 %v8248_v17 }
 0xa6a   :  { %8272 = vmatpush.msra.mxu3 %v8247_v46 }
 0xa6c   :  { %8273 = vmatpush.msra.mxu3 %v8246_v5 }
 0xa6e   :  { %8274 = vmatpush.msra.mxu3 %v8245_v43 }
 0xa70   :  { %8275 = vmatpush.msra.mxu3 %v8244_v14 }
 0xa72   :  { %8276 = vmatpush.msra.mxu3 %v8243_v55 }
 0xa74   :  { %8277 = vmatpush.msra.mxu3 %v8242_v52 }
 0xaa3   :  { %v8157_v47 = vpop.f32.mrf.mxu3 }
 0xaa4   :  { %v8158_v16 = vadd.f32 %v8157_v47, %v8138_v41 }
 0xab8   :  { %v8177_v60 = vpop.f32.mrf.mxu3 }
 0xab9   :  { %v8178_v33 = vadd.f32 %v8177_v60, %v8158_v16 }
 0xac0   :  { %v8197_v34 = vpop.f32.mrf.mxu3 }
 0xac1   :  { %v8198_v1 = vadd.f32 %v8197_v34, %v8178_v33 }
 0xac3   :  { %v8200_v24 = vmax.f32 %v8198_v1, 0.0 }
 0xac5   :  { %8237 = vmatmul.f32.vlgmr.msrb.gmra.mxu3 %v8200_v24 }
 0xb48   :  { %v8238_v7 = vpop.f32.mrf.mxu3 }
 0xb49   :  { %v8239_v22 = vadd.f32 %v9136_v38, %v8238_v7 }
 0xb4b   :  { %v8241_v49 = vmax.f32 %v8239_v22, 0.0 }
 0xb4d   :  { %8278 = vmatmul.f32.vlgmr.msra.gmra.mxu3 %v8241_v49 }
 0xbd0   :  { %v8279_v23 = vpop.f32.mrf.mxu3 }
 0xbd1   :  { %v8280_v3 = vadd.f32 %v9137_v59, %v8279_v23 }
 0xbd3   :  { %8282 = vst [vmem:[%s14284_s11] sm:$0xff] %v8280_v3 }

</bundles_post_ra>
